<compile_context>
chip_gen: v5e
topology: v5e:2x2
jax: 0.10.0
libtpu: 0.0.40
codegen_flags: <defaults>
</compile_context>

<pallas_src>
import functools

import jax
import jax.numpy as jnp
import numpy as np
from jax.experimental import pallas as pl
from jax.experimental.pallas import tpu as pltpu


def _dblock_kernel(x_ref, w_ref, b_ref, o_ref, pad_ref, *, H, W):
    HW = H * W
    Cp = x_ref.shape[-1]

    # Zero the two row-padding bands (2 pad rows top + 2 bottom).  Cheap, and
    # done every grid step so it is megacore-safe (each core owns its scratch).
    pad_ref[pl.ds(0, 2 * W), :] = jnp.zeros((2 * W, Cp), jnp.float32)
    pad_ref[pl.ds(2 * W + HW, 2 * W), :] = jnp.zeros((2 * W, Cp), jnp.float32)

    # Column-boundary masks: built once as (HW, 1), reused by all taps/stages.
    col = jax.lax.broadcasted_iota(jnp.int32, (HW, 1), 0) % W
    left_ok = col > 0           # reading column c-1 is valid (dw = -1)
    right_ok = col < (W - 1)    # reading column c+1 is valid (dw = +1)

    b = b_ref[...]              # (1, Cp), loaded once

    def conv3x3_relu(inp):
        # Stage the input into the row-padded scratch: every dh tap becomes a
        # static slice (row boundaries handled entirely by the zero pad bands).
        pad_ref[pl.ds(2 * W, HW), :] = inp

        # Center tap (dh = dw = 0): no shift, no mask; initializes the acc.
        acc = jnp.dot(inp, w_ref[4], preferred_element_type=jnp.float32)

        for dh in (-1, 0, 1):
            for dw in (-1, 0, 1):
                if dh == 0 and dw == 0:
                    continue
                k = (dh + 1) * 3 + (dw + 1)
                start = 2 * W + dh * W + dw             # static offset
                shifted = pad_ref[pl.ds(start, HW), :]  # (HW, Cp)
                if dw == -1:
                    patch = jnp.where(left_ok, shifted, 0.0)
                elif dw == 1:
                    patch = jnp.where(right_ok, shifted, 0.0)
                else:
                    patch = shifted                     # rows handled by padding
                acc = acc + jnp.dot(patch, w_ref[k],
                                    preferred_element_type=jnp.float32)
        return jnp.maximum(acc + b, 0.0)

    # Dblock.forward: dilate1 applied three times, residual summed.
    x = x_ref[0]                # (HW, Cp)
    d1 = conv3x3_relu(x)
    d2 = conv3x3_relu(d1)
    d3 = conv3x3_relu(d2)
    # Single lane-dense store of the output block.
    o_ref[0] = x + d1 + d2 + d3


def dblock_forward(x_nchw, w_oihw, bias):
    """x_nchw: (N, C, H, W); w_oihw: (C, C, 3, 3); bias: (C,)."""
    N, C, H, W = x_nchw.shape
    HW = H * W
    # Lane-dense channel padding (only when needed).
    Cp = ((C + 127) // 128) * 128

    x = jnp.transpose(x_nchw, (0, 2, 3, 1)).reshape(N, HW, C).astype(jnp.float32)
    w = jnp.transpose(w_oihw, (2, 3, 1, 0)).astype(jnp.float32)   # (3,3,Cin,Cout)
    b = bias.astype(jnp.float32)
    if Cp != C:
        x = jnp.pad(x, ((0, 0), (0, 0), (0, Cp - C)))
        w = jnp.pad(w, ((0, 0), (0, 0), (0, Cp - C), (0, Cp - C)))
        b = jnp.pad(b, (0, Cp - C))
    w = w.reshape(9, Cp, Cp)    # tap index k = (dh+1)*3 + (dw+1)
    b = b.reshape(1, Cp)

    kernel = functools.partial(_dblock_kernel, H=H, W=W)

    out = pl.pallas_call(
        kernel,
        out_shape=jax.ShapeDtypeStruct((N, HW, Cp), jnp.float32),
        grid_spec=pltpu.PrefetchScalarGridSpec(
            num_scalar_prefetch=0,
            grid=(N,),
            in_specs=[
                pl.BlockSpec((1, HW, Cp), lambda n: (n, 0, 0)),
                pl.BlockSpec((9, Cp, Cp), lambda n: (0, 0, 0)),   # weights resident
                pl.BlockSpec((1, Cp), lambda n: (0, 0)),          # bias resident
            ],
            out_specs=pl.BlockSpec((1, HW, Cp), lambda n: (n, 0, 0)),
            scratch_shapes=[pltpu.VMEM(((H + 4) * W, Cp), jnp.float32)],
        ),
        compiler_params=pltpu.CompilerParams(
            dimension_semantics=("parallel",)),
    )(x, w, b)

    out = out[:, :, :C].reshape(N, H, W, C)
    return jnp.transpose(out, (0, 3, 1, 2))


def dblock_reference(x_nchw, w_oihw, bias):
    """Pure-JAX reference (mirrors the PyTorch forward)."""
    def conv_relu(z):
        y = jax.lax.conv_general_dilated(
            z, w_oihw, window_strides=(1, 1), padding=((1, 1), (1, 1)),
            dimension_numbers=('NCHW', 'OIHW', 'NCHW'))
        y = y + bias.reshape(1, -1, 1, 1)
        return jnp.maximum(y, 0.0)
    d1 = conv_relu(x_nchw)
    d2 = conv_relu(d1)
    d3 = conv_relu(d2)
    return x_nchw + d1 + d2 + d3


if __name__ == "__main__":
    key = jax.random.PRNGKey(0)
    k_x, k_w, k_b = jax.random.split(key, 3)

    # Small shapes: N=2, channel=4, spatial 16x16 (i.e. H/32 of a 512 image).
    N, C, H, W = 2, 4, 16, 16
    x = jax.random.normal(k_x, (N, C, H, W), dtype=jnp.float32)

    # Deterministic parameters for dilate1's conv (the only one used by forward).
    w = jax.random.normal(k_w, (C, C, 3, 3), dtype=jnp.float32) * 0.1
    b = jax.random.normal(k_b, (C,), dtype=jnp.float32) * 0.1

    out = dblock_forward(x, w, b)
    out = jax.block_until_ready(out)

    ref = dblock_reference(x, w, b)
    assert out.shape == (N, C, H, W)
    if not np.allclose(np.asarray(out), np.asarray(ref), atol=1e-4, rtol=1e-4):
        raise AssertionError("Pallas Dblock output mismatches JAX reference")

    print("KERNEL_OK")
</pallas_src>

<mosaic_0001>
module attributes {stable_mosaic.version = 11 : i64} {
  func.func @_dblock_kernel(%arg0: i32, %arg1: memref<1x256x128xf32, #tpu.memory_space<vmem>>, %arg2: memref<9x128x128xf32, #tpu.memory_space<vmem>>, %arg3: memref<1x128xf32, #tpu.memory_space<vmem>>, %arg4: memref<1x256x128xf32, #tpu.memory_space<vmem>>, %arg5: memref<320x128xf32, #tpu.memory_space<vmem>>) attributes {dimension_semantics = [#tpu.dimension_semantics<parallel>], iteration_bounds = array<i64: 2>, scalar_prefetch = 0 : i64, scratch_operands = 1 : i64, tpu.core_type = #tpu.core_type<tc>, window_params = [{transform_indices = @transform_0, window_bounds = array<i64: 1, 256, 128>}, {pipeline_mode = #tpu.pipeline_mode<synchronous>, transform_indices = @transform_1, window_bounds = array<i64: 9, 128, 128>}, {pipeline_mode = #tpu.pipeline_mode<synchronous>, transform_indices = @transform_2, window_bounds = array<i64: 1, 128>}, {transform_indices = @transform_3, window_bounds = array<i64: 1, 256, 128>}]} {
    %cst = arith.constant 0.000000e+00 : f32
    %0 = vector.broadcast %cst : f32 to vector<32x128xf32>
    %c0 = arith.constant 0 : index
    %c0_0 = arith.constant 0 : index
    %1 = vector.load %arg5[%c0, %c0_0] : memref<320x128xf32, #tpu.memory_space<vmem>>, vector<32x128xf32>
    tpu.vector_store %arg5[%c0, %c0_0], %0 {strides = array<i32>} : memref<320x128xf32, #tpu.memory_space<vmem>>, vector<32x128xf32>,
    %cst_1 = arith.constant 0.000000e+00 : f32
    %2 = vector.broadcast %cst_1 : f32 to vector<32x128xf32>
    %c288 = arith.constant 288 : index
    %c0_2 = arith.constant 0 : index
    %3 = vector.load %arg5[%c288, %c0_2] : memref<320x128xf32, #tpu.memory_space<vmem>>, vector<32x128xf32>
    tpu.vector_store %arg5[%c288, %c0_2], %2 {strides = array<i32>} : memref<320x128xf32, #tpu.memory_space<vmem>>, vector<32x128xf32>,
    %4 = tpu.iota {dimensions = array<i32: 0>} : vector<256x1xi32>
    %c16_i32 = arith.constant 16 : i32
    %c0_i32 = arith.constant 0 : i32
    %5 = arith.cmpi eq, %c16_i32, %c0_i32 : i32
    %c1_i32 = arith.constant 1 : i32
    %6 = arith.select %5, %c1_i32, %c16_i32 : i32
    %7 = vector.broadcast %6 : i32 to vector<256x1xi32>
    %8 = arith.remsi %4, %7 : vector<256x1xi32>
    %c0_i32_3 = arith.constant 0 : i32
    %9 = vector.broadcast %c0_i32_3 : i32 to vector<256x1xi32>
    %10 = arith.cmpi ne, %8, %9 : vector<256x1xi32>
    %c0_i32_4 = arith.constant 0 : i32
    %11 = vector.broadcast %c0_i32_4 : i32 to vector<256x1xi32>
    %12 = arith.cmpi slt, %8, %11 : vector<256x1xi32>
    %c0_i32_5 = arith.constant 0 : i32
    %13 = arith.cmpi slt, %6, %c0_i32_5 : i32
    %14 = vector.broadcast %13 : i1 to vector<256x1xi1>
    %15 = vector.broadcast %14 : vector<256x1xi1> to vector<256x1xi1>
    %16 = arith.xori %12, %15 : vector<256x1xi1>
    %17 = arith.andi %16, %10 : vector<256x1xi1>
    %18 = vector.broadcast %6 : i32 to vector<256x1xi32>
    %19 = arith.addi %8, %18 : vector<256x1xi32>
    %20 = arith.select %17, %19, %8 : vector<256x1xi1>, vector<256x1xi32>
    %c0_i32_6 = arith.constant 0 : i32
    %21 = vector.broadcast %c0_i32_6 : i32 to vector<256x1xi32>
    %22 = arith.cmpi sgt, %20, %21 : vector<256x1xi32>
    %c15_i32 = arith.constant 15 : i32
    %23 = vector.broadcast %c15_i32 : i32 to vector<256x1xi32>
    %24 = arith.cmpi slt, %20, %23 : vector<256x1xi32>
    %c0_7 = arith.constant 0 : index
    %c0_8 = arith.constant 0 : index
    %25 = vector.load %arg3[%c0_7, %c0_8] : memref<1x128xf32, #tpu.memory_space<vmem>>, vector<1x128xf32>
    %c0_9 = arith.constant 0 : index
    %c0_10 = arith.constant 0 : index
    %c0_11 = arith.constant 0 : index
    %26 = vector.load %arg1[%c0_9, %c0_10, %c0_11] : memref<1x256x128xf32, #tpu.memory_space<vmem>>, vector<1x256x128xf32>
    %27 = vector.shape_cast %26 : vector<1x256x128xf32> to vector<256x128xf32>
    %c32 = arith.constant 32 : index
    %c0_12 = arith.constant 0 : index
    %28 = vector.load %arg5[%c32, %c0_12] : memref<320x128xf32, #tpu.memory_space<vmem>>, vector<256x128xf32>
    tpu.vector_store %arg5[%c32, %c0_12], %27 {strides = array<i32>} : memref<320x128xf32, #tpu.memory_space<vmem>>, vector<256x128xf32>,
    %c4 = arith.constant 4 : index
    %c0_13 = arith.constant 0 : index
    %c0_14 = arith.constant 0 : index
    %29 = vector.load %arg2[%c4, %c0_13, %c0_14] : memref<9x128x128xf32, #tpu.memory_space<vmem>>, vector<1x128x128xf32>
    %30 = vector.shape_cast %29 : vector<1x128x128xf32> to vector<128x128xf32>
    %cst_15 = arith.constant dense<0.000000e+00> : vector<256x128xf32>
    %31 = tpu.matmul %27, %30, %cst_15 {dimension_numbers = #tpu.dot_dimension_numbers<[1], [0], [0], [1], [0, 0, 1, 1], [], []>} : vector<256x128xf32>, vector<128x128xf32>, vector<256x128xf32> -> vector<256x128xf32>
    %c15 = arith.constant 15 : index
    %c0_16 = arith.constant 0 : index
    %32 = vector.load %arg5[%c15, %c0_16] : memref<320x128xf32, #tpu.memory_space<vmem>>, vector<256x128xf32>
    %cst_17 = arith.constant 0.000000e+00 : f32
    %33 = vector.shape_cast %22 : vector<256x1xi1> to vector<256x1xi1>
    %34 = vector.broadcast %33 : vector<256x1xi1> to vector<256x128xi1>
    %35 = vector.broadcast %cst_17 : f32 to vector<256x128xf32>
    %36 = arith.select %34, %32, %35 : vector<256x128xi1>, vector<256x128xf32>
    %c0_18 = arith.constant 0 : index
    %c0_19 = arith.constant 0 : index
    %c0_20 = arith.constant 0 : index
    %37 = vector.load %arg2[%c0_18, %c0_19, %c0_20] : memref<9x128x128xf32, #tpu.memory_space<vmem>>, vector<1x128x128xf32>
    %38 = vector.shape_cast %37 : vector<1x128x128xf32> to vector<128x128xf32>
    %cst_21 = arith.constant dense<0.000000e+00> : vector<256x128xf32>
    %39 = tpu.matmul %36, %38, %cst_21 {dimension_numbers = #tpu.dot_dimension_numbers<[1], [0], [0], [1], [0, 0, 1, 1], [], []>} : vector<256x128xf32>, vector<128x128xf32>, vector<256x128xf32> -> vector<256x128xf32>
    %40 = arith.addf %31, %39 : vector<256x128xf32>
    %c16 = arith.constant 16 : index
    %c0_22 = arith.constant 0 : index
    %41 = vector.load %arg5[%c16, %c0_22] : memref<320x128xf32, #tpu.memory_space<vmem>>, vector<256x128xf32>
    %c1 = arith.constant 1 : index
    %c0_23 = arith.constant 0 : index
    %c0_24 = arith.constant 0 : index
    %42 = vector.load %arg2[%c1, %c0_23, %c0_24] : memref<9x128x128xf32, #tpu.memory_space<vmem>>, vector<1x128x128xf32>
    %43 = vector.shape_cast %42 : vector<1x128x128xf32> to vector<128x128xf32>
    %cst_25 = arith.constant dense<0.000000e+00> : vector<256x128xf32>
    %44 = tpu.matmul %41, %43, %cst_25 {dimension_numbers = #tpu.dot_dimension_numbers<[1], [0], [0], [1], [0, 0, 1, 1], [], []>} : vector<256x128xf32>, vector<128x128xf32>, vector<256x128xf32> -> vector<256x128xf32>
    %45 = arith.addf %40, %44 : vector<256x128xf32>
    %c17 = arith.constant 17 : index
    %c0_26 = arith.constant 0 : index
    %46 = vector.load %arg5[%c17, %c0_26] : memref<320x128xf32, #tpu.memory_space<vmem>>, vector<256x128xf32>
    %cst_27 = arith.constant 0.000000e+00 : f32
    %47 = vector.shape_cast %24 : vector<256x1xi1> to vector<256x1xi1>
    %48 = vector.broadcast %47 : vector<256x1xi1> to vector<256x128xi1>
    %49 = vector.broadcast %cst_27 : f32 to vector<256x128xf32>
    %50 = arith.select %48, %46, %49 : vector<256x128xi1>, vector<256x128xf32>
    %c2 = arith.constant 2 : index
    %c0_28 = arith.constant 0 : index
    %c0_29 = arith.constant 0 : index
    %51 = vector.load %arg2[%c2, %c0_28, %c0_29] : memref<9x128x128xf32, #tpu.memory_space<vmem>>, vector<1x128x128xf32>
    %52 = vector.shape_cast %51 : vector<1x128x128xf32> to vector<128x128xf32>
    %cst_30 = arith.constant dense<0.000000e+00> : vector<256x128xf32>
    %53 = tpu.matmul %50, %52, %cst_30 {dimension_numbers = #tpu.dot_dimension_numbers<[1], [0], [0], [1], [0, 0, 1, 1], [], []>} : vector<256x128xf32>, vector<128x128xf32>, vector<256x128xf32> -> vector<256x128xf32>
    %54 = arith.addf %45, %53 : vector<256x128xf32>
    %c31 = arith.constant 31 : index
    %c0_31 = arith.constant 0 : index
    %55 = vector.load %arg5[%c31, %c0_31] : memref<320x128xf32, #tpu.memory_space<vmem>>, vector<256x128xf32>
    %cst_32 = arith.constant 0.000000e+00 : f32
    %56 = vector.shape_cast %22 : vector<256x1xi1> to vector<256x1xi1>
    %57 = vector.broadcast %56 : vector<256x1xi1> to vector<256x128xi1>
    %58 = vector.broadcast %cst_32 : f32 to vector<256x128xf32>
    %59 = arith.select %57, %55, %58 : vector<256x128xi1>, vector<256x128xf32>
    %c3 = arith.constant 3 : index
    %c0_33 = arith.constant 0 : index
    %c0_34 = arith.constant 0 : index
    %60 = vector.load %arg2[%c3, %c0_33, %c0_34] : memref<9x128x128xf32, #tpu.memory_space<vmem>>, vector<1x128x128xf32>
    %61 = vector.shape_cast %60 : vector<1x128x128xf32> to vector<128x128xf32>
    %cst_35 = arith.constant dense<0.000000e+00> : vector<256x128xf32>
    %62 = tpu.matmul %59, %61, %cst_35 {dimension_numbers = #tpu.dot_dimension_numbers<[1], [0], [0], [1], [0, 0, 1, 1], [], []>} : vector<256x128xf32>, vector<128x128xf32>, vector<256x128xf32> -> vector<256x128xf32>
    %63 = arith.addf %54, %62 : vector<256x128xf32>
    %c33 = arith.constant 33 : index
    %c0_36 = arith.constant 0 : index
    %64 = vector.load %arg5[%c33, %c0_36] : memref<320x128xf32, #tpu.memory_space<vmem>>, vector<256x128xf32>
    %cst_37 = arith.constant 0.000000e+00 : f32
    %65 = vector.shape_cast %24 : vector<256x1xi1> to vector<256x1xi1>
    %66 = vector.broadcast %65 : vector<256x1xi1> to vector<256x128xi1>
    %67 = vector.broadcast %cst_37 : f32 to vector<256x128xf32>
    %68 = arith.select %66, %64, %67 : vector<256x128xi1>, vector<256x128xf32>
    %c5 = arith.constant 5 : index
    %c0_38 = arith.constant 0 : index
    %c0_39 = arith.constant 0 : index
    %69 = vector.load %arg2[%c5, %c0_38, %c0_39] : memref<9x128x128xf32, #tpu.memory_space<vmem>>, vector<1x128x128xf32>
    %70 = vector.shape_cast %69 : vector<1x128x128xf32> to vector<128x128xf32>
    %cst_40 = arith.constant dense<0.000000e+00> : vector<256x128xf32>
    %71 = tpu.matmul %68, %70, %cst_40 {dimension_numbers = #tpu.dot_dimension_numbers<[1], [0], [0], [1], [0, 0, 1, 1], [], []>} : vector<256x128xf32>, vector<128x128xf32>, vector<256x128xf32> -> vector<256x128xf32>
    %72 = arith.addf %63, %71 : vector<256x128xf32>
    %c47 = arith.constant 47 : index
    %c0_41 = arith.constant 0 : index
    %73 = vector.load %arg5[%c47, %c0_41] : memref<320x128xf32, #tpu.memory_space<vmem>>, vector<256x128xf32>
    %cst_42 = arith.constant 0.000000e+00 : f32
    %74 = vector.shape_cast %22 : vector<256x1xi1> to vector<256x1xi1>
    %75 = vector.broadcast %74 : vector<256x1xi1> to vector<256x128xi1>
    %76 = vector.broadcast %cst_42 : f32 to vector<256x128xf32>
    %77 = arith.select %75, %73, %76 : vector<256x128xi1>, vector<256x128xf32>
    %c6 = arith.constant 6 : index
    %c0_43 = arith.constant 0 : index
    %c0_44 = arith.constant 0 : index
    %78 = vector.load %arg2[%c6, %c0_43, %c0_44] : memref<9x128x128xf32, #tpu.memory_space<vmem>>, vector<1x128x128xf32>
    %79 = vector.shape_cast %78 : vector<1x128x128xf32> to vector<128x128xf32>
    %cst_45 = arith.constant dense<0.000000e+00> : vector<256x128xf32>
    %80 = tpu.matmul %77, %79, %cst_45 {dimension_numbers = #tpu.dot_dimension_numbers<[1], [0], [0], [1], [0, 0, 1, 1], [], []>} : vector<256x128xf32>, vector<128x128xf32>, vector<256x128xf32> -> vector<256x128xf32>
    %81 = arith.addf %72, %80 : vector<256x128xf32>
    %c48 = arith.constant 48 : index
    %c0_46 = arith.constant 0 : index
    %82 = vector.load %arg5[%c48, %c0_46] : memref<320x128xf32, #tpu.memory_space<vmem>>, vector<256x128xf32>
    %c7 = arith.constant 7 : index
    %c0_47 = arith.constant 0 : index
    %c0_48 = arith.constant 0 : index
    %83 = vector.load %arg2[%c7, %c0_47, %c0_48] : memref<9x128x128xf32, #tpu.memory_space<vmem>>, vector<1x128x128xf32>
    %84 = vector.shape_cast %83 : vector<1x128x128xf32> to vector<128x128xf32>
    %cst_49 = arith.constant dense<0.000000e+00> : vector<256x128xf32>
    %85 = tpu.matmul %82, %84, %cst_49 {dimension_numbers = #tpu.dot_dimension_numbers<[1], [0], [0], [1], [0, 0, 1, 1], [], []>} : vector<256x128xf32>, vector<128x128xf32>, vector<256x128xf32> -> vector<256x128xf32>
    %86 = arith.addf %81, %85 : vector<256x128xf32>
    %c49 = arith.constant 49 : index
    %c0_50 = arith.constant 0 : index
    %87 = vector.load %arg5[%c49, %c0_50] : memref<320x128xf32, #tpu.memory_space<vmem>>, vector<256x128xf32>
    %cst_51 = arith.constant 0.000000e+00 : f32
    %88 = vector.shape_cast %24 : vector<256x1xi1> to vector<256x1xi1>
    %89 = vector.broadcast %88 : vector<256x1xi1> to vector<256x128xi1>
    %90 = vector.broadcast %cst_51 : f32 to vector<256x128xf32>
    %91 = arith.select %89, %87, %90 : vector<256x128xi1>, vector<256x128xf32>
    %c8 = arith.constant 8 : index
    %c0_52 = arith.constant 0 : index
    %c0_53 = arith.constant 0 : index
    %92 = vector.load %arg2[%c8, %c0_52, %c0_53] : memref<9x128x128xf32, #tpu.memory_space<vmem>>, vector<1x128x128xf32>
    %93 = vector.shape_cast %92 : vector<1x128x128xf32> to vector<128x128xf32>
    %cst_54 = arith.constant dense<0.000000e+00> : vector<256x128xf32>
    %94 = tpu.matmul %91, %93, %cst_54 {dimension_numbers = #tpu.dot_dimension_numbers<[1], [0], [0], [1], [0, 0, 1, 1], [], []>} : vector<256x128xf32>, vector<128x128xf32>, vector<256x128xf32> -> vector<256x128xf32>
    %95 = arith.addf %86, %94 : vector<256x128xf32>
    %96 = vector.broadcast %25 : vector<1x128xf32> to vector<256x128xf32>
    %97 = arith.addf %95, %96 : vector<256x128xf32>
    %cst_55 = arith.constant 0.000000e+00 : f32
    %98 = vector.broadcast %cst_55 : f32 to vector<256x128xf32>
    %99 = arith.maximumf %97, %98 : vector<256x128xf32>
    %c32_56 = arith.constant 32 : index
    %c0_57 = arith.constant 0 : index
    %100 = vector.load %arg5[%c32_56, %c0_57] : memref<320x128xf32, #tpu.memory_space<vmem>>, vector<256x128xf32>
    tpu.vector_store %arg5[%c32_56, %c0_57], %99 {strides = array<i32>} : memref<320x128xf32, #tpu.memory_space<vmem>>, vector<256x128xf32>,
    %c4_58 = arith.constant 4 : index
    %c0_59 = arith.constant 0 : index
    %c0_60 = arith.constant 0 : index
    %101 = vector.load %arg2[%c4_58, %c0_59, %c0_60] : memref<9x128x128xf32, #tpu.memory_space<vmem>>, vector<1x128x128xf32>
    %102 = vector.shape_cast %101 : vector<1x128x128xf32> to vector<128x128xf32>
    %cst_61 = arith.constant dense<0.000000e+00> : vector<256x128xf32>
    %103 = tpu.matmul %99, %102, %cst_61 {dimension_numbers = #tpu.dot_dimension_numbers<[1], [0], [0], [1], [0, 0, 1, 1], [], []>} : vector<256x128xf32>, vector<128x128xf32>, vector<256x128xf32> -> vector<256x128xf32>
    %c15_62 = arith.constant 15 : index
    %c0_63 = arith.constant 0 : index
    %104 = vector.load %arg5[%c15_62, %c0_63] : memref<320x128xf32, #tpu.memory_space<vmem>>, vector<256x128xf32>
    %cst_64 = arith.constant 0.000000e+00 : f32
    %105 = vector.shape_cast %22 : vector<256x1xi1> to vector<256x1xi1>
    %106 = vector.broadcast %105 : vector<256x1xi1> to vector<256x128xi1>
    %107 = vector.broadcast %cst_64 : f32 to vector<256x128xf32>
    %108 = arith.select %106, %104, %107 : vector<256x128xi1>, vector<256x128xf32>
    %c0_65 = arith.constant 0 : index
    %c0_66 = arith.constant 0 : index
    %c0_67 = arith.constant 0 : index
    %109 = vector.load %arg2[%c0_65, %c0_66, %c0_67] : memref<9x128x128xf32, #tpu.memory_space<vmem>>, vector<1x128x128xf32>
    %110 = vector.shape_cast %109 : vector<1x128x128xf32> to vector<128x128xf32>
    %cst_68 = arith.constant dense<0.000000e+00> : vector<256x128xf32>
    %111 = tpu.matmul %108, %110, %cst_68 {dimension_numbers = #tpu.dot_dimension_numbers<[1], [0], [0], [1], [0, 0, 1, 1], [], []>} : vector<256x128xf32>, vector<128x128xf32>, vector<256x128xf32> -> vector<256x128xf32>
    %112 = arith.addf %103, %111 : vector<256x128xf32>
    %c16_69 = arith.constant 16 : index
    %c0_70 = arith.constant 0 : index
    %113 = vector.load %arg5[%c16_69, %c0_70] : memref<320x128xf32, #tpu.memory_space<vmem>>, vector<256x128xf32>
    %c1_71 = arith.constant 1 : index
    %c0_72 = arith.constant 0 : index
    %c0_73 = arith.constant 0 : index
    %114 = vector.load %arg2[%c1_71, %c0_72, %c0_73] : memref<9x128x128xf32, #tpu.memory_space<vmem>>, vector<1x128x128xf32>
    %115 = vector.shape_cast %114 : vector<1x128x128xf32> to vector<128x128xf32>
    %cst_74 = arith.constant dense<0.000000e+00> : vector<256x128xf32>
    %116 = tpu.matmul %113, %115, %cst_74 {dimension_numbers = #tpu.dot_dimension_numbers<[1], [0], [0], [1], [0, 0, 1, 1], [], []>} : vector<256x128xf32>, vector<128x128xf32>, vector<256x128xf32> -> vector<256x128xf32>
    %117 = arith.addf %112, %116 : vector<256x128xf32>
    %c17_75 = arith.constant 17 : index
    %c0_76 = arith.constant 0 : index
    %118 = vector.load %arg5[%c17_75, %c0_76] : memref<320x128xf32, #tpu.memory_space<vmem>>, vector<256x128xf32>
    %cst_77 = arith.constant 0.000000e+00 : f32
    %119 = vector.shape_cast %24 : vector<256x1xi1> to vector<256x1xi1>
    %120 = vector.broadcast %119 : vector<256x1xi1> to vector<256x128xi1>
    %121 = vector.broadcast %cst_77 : f32 to vector<256x128xf32>
    %122 = arith.select %120, %118, %121 : vector<256x128xi1>, vector<256x128xf32>
    %c2_78 = arith.constant 2 : index
    %c0_79 = arith.constant 0 : index
    %c0_80 = arith.constant 0 : index
    %123 = vector.load %arg2[%c2_78, %c0_79, %c0_80] : memref<9x128x128xf32, #tpu.memory_space<vmem>>, vector<1x128x128xf32>
    %124 = vector.shape_cast %123 : vector<1x128x128xf32> to vector<128x128xf32>
    %cst_81 = arith.constant dense<0.000000e+00> : vector<256x128xf32>
    %125 = tpu.matmul %122, %124, %cst_81 {dimension_numbers = #tpu.dot_dimension_numbers<[1], [0], [0], [1], [0, 0, 1, 1], [], []>} : vector<256x128xf32>, vector<128x128xf32>, vector<256x128xf32> -> vector<256x128xf32>
    %126 = arith.addf %117, %125 : vector<256x128xf32>
    %c31_82 = arith.constant 31 : index
    %c0_83 = arith.constant 0 : index
    %127 = vector.load %arg5[%c31_82, %c0_83] : memref<320x128xf32, #tpu.memory_space<vmem>>, vector<256x128xf32>
    %cst_84 = arith.constant 0.000000e+00 : f32
    %128 = vector.shape_cast %22 : vector<256x1xi1> to vector<256x1xi1>
    %129 = vector.broadcast %128 : vector<256x1xi1> to vector<256x128xi1>
    %130 = vector.broadcast %cst_84 : f32 to vector<256x128xf32>
    %131 = arith.select %129, %127, %130 : vector<256x128xi1>, vector<256x128xf32>
    %c3_85 = arith.constant 3 : index
    %c0_86 = arith.constant 0 : index
    %c0_87 = arith.constant 0 : index
    %132 = vector.load %arg2[%c3_85, %c0_86, %c0_87] : memref<9x128x128xf32, #tpu.memory_space<vmem>>, vector<1x128x128xf32>
    %133 = vector.shape_cast %132 : vector<1x128x128xf32> to vector<128x128xf32>
    %cst_88 = arith.constant dense<0.000000e+00> : vector<256x128xf32>
    %134 = tpu.matmul %131, %133, %cst_88 {dimension_numbers = #tpu.dot_dimension_numbers<[1], [0], [0], [1], [0, 0, 1, 1], [], []>} : vector<256x128xf32>, vector<128x128xf32>, vector<256x128xf32> -> vector<256x128xf32>
    %135 = arith.addf %126, %134 : vector<256x128xf32>
    %c33_89 = arith.constant 33 : index
    %c0_90 = arith.constant 0 : index
    %136 = vector.load %arg5[%c33_89, %c0_90] : memref<320x128xf32, #tpu.memory_space<vmem>>, vector<256x128xf32>
    %cst_91 = arith.constant 0.000000e+00 : f32
    %137 = vector.shape_cast %24 : vector<256x1xi1> to vector<256x1xi1>
    %138 = vector.broadcast %137 : vector<256x1xi1> to vector<256x128xi1>
    %139 = vector.broadcast %cst_91 : f32 to vector<256x128xf32>
    %140 = arith.select %138, %136, %139 : vector<256x128xi1>, vector<256x128xf32>
    %c5_92 = arith.constant 5 : index
    %c0_93 = arith.constant 0 : index
    %c0_94 = arith.constant 0 : index
    %141 = vector.load %arg2[%c5_92, %c0_93, %c0_94] : memref<9x128x128xf32, #tpu.memory_space<vmem>>, vector<1x128x128xf32>
    %142 = vector.shape_cast %141 : vector<1x128x128xf32> to vector<128x128xf32>
    %cst_95 = arith.constant dense<0.000000e+00> : vector<256x128xf32>
    %143 = tpu.matmul %140, %142, %cst_95 {dimension_numbers = #tpu.dot_dimension_numbers<[1], [0], [0], [1], [0, 0, 1, 1], [], []>} : vector<256x128xf32>, vector<128x128xf32>, vector<256x128xf32> -> vector<256x128xf32>
    %144 = arith.addf %135, %143 : vector<256x128xf32>
    %c47_96 = arith.constant 47 : index
    %c0_97 = arith.constant 0 : index
    %145 = vector.load %arg5[%c47_96, %c0_97] : memref<320x128xf32, #tpu.memory_space<vmem>>, vector<256x128xf32>
    %cst_98 = arith.constant 0.000000e+00 : f32
    %146 = vector.shape_cast %22 : vector<256x1xi1> to vector<256x1xi1>
    %147 = vector.broadcast %146 : vector<256x1xi1> to vector<256x128xi1>
    %148 = vector.broadcast %cst_98 : f32 to vector<256x128xf32>
    %149 = arith.select %147, %145, %148 : vector<256x128xi1>, vector<256x128xf32>
    %c6_99 = arith.constant 6 : index
    %c0_100 = arith.constant 0 : index
    %c0_101 = arith.constant 0 : index
    %150 = vector.load %arg2[%c6_99, %c0_100, %c0_101] : memref<9x128x128xf32, #tpu.memory_space<vmem>>, vector<1x128x128xf32>
    %151 = vector.shape_cast %150 : vector<1x128x128xf32> to vector<128x128xf32>
    %cst_102 = arith.constant dense<0.000000e+00> : vector<256x128xf32>
    %152 = tpu.matmul %149, %151, %cst_102 {dimension_numbers = #tpu.dot_dimension_numbers<[1], [0], [0], [1], [0, 0, 1, 1], [], []>} : vector<256x128xf32>, vector<128x128xf32>, vector<256x128xf32> -> vector<256x128xf32>
    %153 = arith.addf %144, %152 : vector<256x128xf32>
    %c48_103 = arith.constant 48 : index
    %c0_104 = arith.constant 0 : index
    %154 = vector.load %arg5[%c48_103, %c0_104] : memref<320x128xf32, #tpu.memory_space<vmem>>, vector<256x128xf32>
    %c7_105 = arith.constant 7 : index
    %c0_106 = arith.constant 0 : index
    %c0_107 = arith.constant 0 : index
    %155 = vector.load %arg2[%c7_105, %c0_106, %c0_107] : memref<9x128x128xf32, #tpu.memory_space<vmem>>, vector<1x128x128xf32>
    %156 = vector.shape_cast %155 : vector<1x128x128xf32> to vector<128x128xf32>
    %cst_108 = arith.constant dense<0.000000e+00> : vector<256x128xf32>
    %157 = tpu.matmul %154, %156, %cst_108 {dimension_numbers = #tpu.dot_dimension_numbers<[1], [0], [0], [1], [0, 0, 1, 1], [], []>} : vector<256x128xf32>, vector<128x128xf32>, vector<256x128xf32> -> vector<256x128xf32>
    %158 = arith.addf %153, %157 : vector<256x128xf32>
    %c49_109 = arith.constant 49 : index
    %c0_110 = arith.constant 0 : index
    %159 = vector.load %arg5[%c49_109, %c0_110] : memref<320x128xf32, #tpu.memory_space<vmem>>, vector<256x128xf32>
    %cst_111 = arith.constant 0.000000e+00 : f32
    %160 = vector.shape_cast %24 : vector<256x1xi1> to vector<256x1xi1>
    %161 = vector.broadcast %160 : vector<256x1xi1> to vector<256x128xi1>
    %162 = vector.broadcast %cst_111 : f32 to vector<256x128xf32>
    %163 = arith.select %161, %159, %162 : vector<256x128xi1>, vector<256x128xf32>
    %c8_112 = arith.constant 8 : index
    %c0_113 = arith.constant 0 : index
    %c0_114 = arith.constant 0 : index
    %164 = vector.load %arg2[%c8_112, %c0_113, %c0_114] : memref<9x128x128xf32, #tpu.memory_space<vmem>>, vector<1x128x128xf32>
    %165 = vector.shape_cast %164 : vector<1x128x128xf32> to vector<128x128xf32>
    %cst_115 = arith.constant dense<0.000000e+00> : vector<256x128xf32>
    %166 = tpu.matmul %163, %165, %cst_115 {dimension_numbers = #tpu.dot_dimension_numbers<[1], [0], [0], [1], [0, 0, 1, 1], [], []>} : vector<256x128xf32>, vector<128x128xf32>, vector<256x128xf32> -> vector<256x128xf32>
    %167 = arith.addf %158, %166 : vector<256x128xf32>
    %168 = vector.broadcast %25 : vector<1x128xf32> to vector<256x128xf32>
    %169 = arith.addf %167, %168 : vector<256x128xf32>
    %cst_116 = arith.constant 0.000000e+00 : f32
    %170 = vector.broadcast %cst_116 : f32 to vector<256x128xf32>
    %171 = arith.maximumf %169, %170 : vector<256x128xf32>
    %c32_117 = arith.constant 32 : index
    %c0_118 = arith.constant 0 : index
    %172 = vector.load %arg5[%c32_117, %c0_118] : memref<320x128xf32, #tpu.memory_space<vmem>>, vector<256x128xf32>
    tpu.vector_store %arg5[%c32_117, %c0_118], %171 {strides = array<i32>} : memref<320x128xf32, #tpu.memory_space<vmem>>, vector<256x128xf32>,
    %c4_119 = arith.constant 4 : index
    %c0_120 = arith.constant 0 : index
    %c0_121 = arith.constant 0 : index
    %173 = vector.load %arg2[%c4_119, %c0_120, %c0_121] : memref<9x128x128xf32, #tpu.memory_space<vmem>>, vector<1x128x128xf32>
    %174 = vector.shape_cast %173 : vector<1x128x128xf32> to vector<128x128xf32>
    %cst_122 = arith.constant dense<0.000000e+00> : vector<256x128xf32>
    %175 = tpu.matmul %171, %174, %cst_122 {dimension_numbers = #tpu.dot_dimension_numbers<[1], [0], [0], [1], [0, 0, 1, 1], [], []>} : vector<256x128xf32>, vector<128x128xf32>, vector<256x128xf32> -> vector<256x128xf32>
    %c15_123 = arith.constant 15 : index
    %c0_124 = arith.constant 0 : index
    %176 = vector.load %arg5[%c15_123, %c0_124] : memref<320x128xf32, #tpu.memory_space<vmem>>, vector<256x128xf32>
    %cst_125 = arith.constant 0.000000e+00 : f32
    %177 = vector.shape_cast %22 : vector<256x1xi1> to vector<256x1xi1>
    %178 = vector.broadcast %177 : vector<256x1xi1> to vector<256x128xi1>
    %179 = vector.broadcast %cst_125 : f32 to vector<256x128xf32>
    %180 = arith.select %178, %176, %179 : vector<256x128xi1>, vector<256x128xf32>
    %c0_126 = arith.constant 0 : index
    %c0_127 = arith.constant 0 : index
    %c0_128 = arith.constant 0 : index
    %181 = vector.load %arg2[%c0_126, %c0_127, %c0_128] : memref<9x128x128xf32, #tpu.memory_space<vmem>>, vector<1x128x128xf32>
    %182 = vector.shape_cast %181 : vector<1x128x128xf32> to vector<128x128xf32>
    %cst_129 = arith.constant dense<0.000000e+00> : vector<256x128xf32>
    %183 = tpu.matmul %180, %182, %cst_129 {dimension_numbers = #tpu.dot_dimension_numbers<[1], [0], [0], [1], [0, 0, 1, 1], [], []>} : vector<256x128xf32>, vector<128x128xf32>, vector<256x128xf32> -> vector<256x128xf32>
    %184 = arith.addf %175, %183 : vector<256x128xf32>
    %c16_130 = arith.constant 16 : index
    %c0_131 = arith.constant 0 : index
    %185 = vector.load %arg5[%c16_130, %c0_131] : memref<320x128xf32, #tpu.memory_space<vmem>>, vector<256x128xf32>
    %c1_132 = arith.constant 1 : index
    %c0_133 = arith.constant 0 : index
    %c0_134 = arith.constant 0 : index
    %186 = vector.load %arg2[%c1_132, %c0_133, %c0_134] : memref<9x128x128xf32, #tpu.memory_space<vmem>>, vector<1x128x128xf32>
    %187 = vector.shape_cast %186 : vector<1x128x128xf32> to vector<128x128xf32>
    %cst_135 = arith.constant dense<0.000000e+00> : vector<256x128xf32>
    %188 = tpu.matmul %185, %187, %cst_135 {dimension_numbers = #tpu.dot_dimension_numbers<[1], [0], [0], [1], [0, 0, 1, 1], [], []>} : vector<256x128xf32>, vector<128x128xf32>, vector<256x128xf32> -> vector<256x128xf32>
    %189 = arith.addf %184, %188 : vector<256x128xf32>
    %c17_136 = arith.constant 17 : index
    %c0_137 = arith.constant 0 : index
    %190 = vector.load %arg5[%c17_136, %c0_137] : memref<320x128xf32, #tpu.memory_space<vmem>>, vector<256x128xf32>
    %cst_138 = arith.constant 0.000000e+00 : f32
    %191 = vector.shape_cast %24 : vector<256x1xi1> to vector<256x1xi1>
    %192 = vector.broadcast %191 : vector<256x1xi1> to vector<256x128xi1>
    %193 = vector.broadcast %cst_138 : f32 to vector<256x128xf32>
    %194 = arith.select %192, %190, %193 : vector<256x128xi1>, vector<256x128xf32>
    %c2_139 = arith.constant 2 : index
    %c0_140 = arith.constant 0 : index
    %c0_141 = arith.constant 0 : index
    %195 = vector.load %arg2[%c2_139, %c0_140, %c0_141] : memref<9x128x128xf32, #tpu.memory_space<vmem>>, vector<1x128x128xf32>
    %196 = vector.shape_cast %195 : vector<1x128x128xf32> to vector<128x128xf32>
    %cst_142 = arith.constant dense<0.000000e+00> : vector<256x128xf32>
    %197 = tpu.matmul %194, %196, %cst_142 {dimension_numbers = #tpu.dot_dimension_numbers<[1], [0], [0], [1], [0, 0, 1, 1], [], []>} : vector<256x128xf32>, vector<128x128xf32>, vector<256x128xf32> -> vector<256x128xf32>
    %198 = arith.addf %189, %197 : vector<256x128xf32>
    %c31_143 = arith.constant 31 : index
    %c0_144 = arith.constant 0 : index
    %199 = vector.load %arg5[%c31_143, %c0_144] : memref<320x128xf32, #tpu.memory_space<vmem>>, vector<256x128xf32>
    %cst_145 = arith.constant 0.000000e+00 : f32
    %200 = vector.shape_cast %22 : vector<256x1xi1> to vector<256x1xi1>
    %201 = vector.broadcast %200 : vector<256x1xi1> to vector<256x128xi1>
    %202 = vector.broadcast %cst_145 : f32 to vector<256x128xf32>
    %203 = arith.select %201, %199, %202 : vector<256x128xi1>, vector<256x128xf32>
    %c3_146 = arith.constant 3 : index
    %c0_147 = arith.constant 0 : index
    %c0_148 = arith.constant 0 : index
    %204 = vector.load %arg2[%c3_146, %c0_147, %c0_148] : memref<9x128x128xf32, #tpu.memory_space<vmem>>, vector<1x128x128xf32>
    %205 = vector.shape_cast %204 : vector<1x128x128xf32> to vector<128x128xf32>
    %cst_149 = arith.constant dense<0.000000e+00> : vector<256x128xf32>
    %206 = tpu.matmul %203, %205, %cst_149 {dimension_numbers = #tpu.dot_dimension_numbers<[1], [0], [0], [1], [0, 0, 1, 1], [], []>} : vector<256x128xf32>, vector<128x128xf32>, vector<256x128xf32> -> vector<256x128xf32>
    %207 = arith.addf %198, %206 : vector<256x128xf32>
    %c33_150 = arith.constant 33 : index
    %c0_151 = arith.constant 0 : index
    %208 = vector.load %arg5[%c33_150, %c0_151] : memref<320x128xf32, #tpu.memory_space<vmem>>, vector<256x128xf32>
    %cst_152 = arith.constant 0.000000e+00 : f32
    %209 = vector.shape_cast %24 : vector<256x1xi1> to vector<256x1xi1>
    %210 = vector.broadcast %209 : vector<256x1xi1> to vector<256x128xi1>
    %211 = vector.broadcast %cst_152 : f32 to vector<256x128xf32>
    %212 = arith.select %210, %208, %211 : vector<256x128xi1>, vector<256x128xf32>
    %c5_153 = arith.constant 5 : index
    %c0_154 = arith.constant 0 : index
    %c0_155 = arith.constant 0 : index
    %213 = vector.load %arg2[%c5_153, %c0_154, %c0_155] : memref<9x128x128xf32, #tpu.memory_space<vmem>>, vector<1x128x128xf32>
    %214 = vector.shape_cast %213 : vector<1x128x128xf32> to vector<128x128xf32>
    %cst_156 = arith.constant dense<0.000000e+00> : vector<256x128xf32>
    %215 = tpu.matmul %212, %214, %cst_156 {dimension_numbers = #tpu.dot_dimension_numbers<[1], [0], [0], [1], [0, 0, 1, 1], [], []>} : vector<256x128xf32>, vector<128x128xf32>, vector<256x128xf32> -> vector<256x128xf32>
    %216 = arith.addf %207, %215 : vector<256x128xf32>
    %c47_157 = arith.constant 47 : index
    %c0_158 = arith.constant 0 : index
    %217 = vector.load %arg5[%c47_157, %c0_158] : memref<320x128xf32, #tpu.memory_space<vmem>>, vector<256x128xf32>
    %cst_159 = arith.constant 0.000000e+00 : f32
    %218 = vector.shape_cast %22 : vector<256x1xi1> to vector<256x1xi1>
    %219 = vector.broadcast %218 : vector<256x1xi1> to vector<256x128xi1>
    %220 = vector.broadcast %cst_159 : f32 to vector<256x128xf32>
    %221 = arith.select %219, %217, %220 : vector<256x128xi1>, vector<256x128xf32>
    %c6_160 = arith.constant 6 : index
    %c0_161 = arith.constant 0 : index
    %c0_162 = arith.constant 0 : index
    %222 = vector.load %arg2[%c6_160, %c0_161, %c0_162] : memref<9x128x128xf32, #tpu.memory_space<vmem>>, vector<1x128x128xf32>
    %223 = vector.shape_cast %222 : vector<1x128x128xf32> to vector<128x128xf32>
    %cst_163 = arith.constant dense<0.000000e+00> : vector<256x128xf32>
    %224 = tpu.matmul %221, %223, %cst_163 {dimension_numbers = #tpu.dot_dimension_numbers<[1], [0], [0], [1], [0, 0, 1, 1], [], []>} : vector<256x128xf32>, vector<128x128xf32>, vector<256x128xf32> -> vector<256x128xf32>
    %225 = arith.addf %216, %224 : vector<256x128xf32>
    %c48_164 = arith.constant 48 : index
    %c0_165 = arith.constant 0 : index
    %226 = vector.load %arg5[%c48_164, %c0_165] : memref<320x128xf32, #tpu.memory_space<vmem>>, vector<256x128xf32>
    %c7_166 = arith.constant 7 : index
    %c0_167 = arith.constant 0 : index
    %c0_168 = arith.constant 0 : index
    %227 = vector.load %arg2[%c7_166, %c0_167, %c0_168] : memref<9x128x128xf32, #tpu.memory_space<vmem>>, vector<1x128x128xf32>
    %228 = vector.shape_cast %227 : vector<1x128x128xf32> to vector<128x128xf32>
    %cst_169 = arith.constant dense<0.000000e+00> : vector<256x128xf32>
    %229 = tpu.matmul %226, %228, %cst_169 {dimension_numbers = #tpu.dot_dimension_numbers<[1], [0], [0], [1], [0, 0, 1, 1], [], []>} : vector<256x128xf32>, vector<128x128xf32>, vector<256x128xf32> -> vector<256x128xf32>
    %230 = arith.addf %225, %229 : vector<256x128xf32>
    %c49_170 = arith.constant 49 : index
    %c0_171 = arith.constant 0 : index
    %231 = vector.load %arg5[%c49_170, %c0_171] : memref<320x128xf32, #tpu.memory_space<vmem>>, vector<256x128xf32>
    %cst_172 = arith.constant 0.000000e+00 : f32
    %232 = vector.shape_cast %24 : vector<256x1xi1> to vector<256x1xi1>
    %233 = vector.broadcast %232 : vector<256x1xi1> to vector<256x128xi1>
    %234 = vector.broadcast %cst_172 : f32 to vector<256x128xf32>
    %235 = arith.select %233, %231, %234 : vector<256x128xi1>, vector<256x128xf32>
    %c8_173 = arith.constant 8 : index
    %c0_174 = arith.constant 0 : index
    %c0_175 = arith.constant 0 : index
    %236 = vector.load %arg2[%c8_173, %c0_174, %c0_175] : memref<9x128x128xf32, #tpu.memory_space<vmem>>, vector<1x128x128xf32>
    %237 = vector.shape_cast %236 : vector<1x128x128xf32> to vector<128x128xf32>
    %cst_176 = arith.constant dense<0.000000e+00> : vector<256x128xf32>
    %238 = tpu.matmul %235, %237, %cst_176 {dimension_numbers = #tpu.dot_dimension_numbers<[1], [0], [0], [1], [0, 0, 1, 1], [], []>} : vector<256x128xf32>, vector<128x128xf32>, vector<256x128xf32> -> vector<256x128xf32>
    %239 = arith.addf %230, %238 : vector<256x128xf32>
    %240 = vector.broadcast %25 : vector<1x128xf32> to vector<256x128xf32>
    %241 = arith.addf %239, %240 : vector<256x128xf32>
    %cst_177 = arith.constant 0.000000e+00 : f32
    %242 = vector.broadcast %cst_177 : f32 to vector<256x128xf32>
    %243 = arith.maximumf %241, %242 : vector<256x128xf32>
    %244 = arith.addf %27, %99 : vector<256x128xf32>
    %245 = arith.addf %244, %171 : vector<256x128xf32>
    %246 = arith.addf %245, %243 : vector<256x128xf32>
    %c0_178 = arith.constant 0 : index
    %c0_179 = arith.constant 0 : index
    %c0_180 = arith.constant 0 : index
    %247 = vector.load %arg4[%c0_178, %c0_179, %c0_180] : memref<1x256x128xf32, #tpu.memory_space<vmem>>, vector<1x256x128xf32>
    %248 = vector.shape_cast %247 : vector<1x256x128xf32> to vector<256x128xf32>
    %249 = vector.shape_cast %246 : vector<256x128xf32> to vector<1x256x128xf32>
    tpu.vector_store %arg4[%c0_178, %c0_179, %c0_180], %249 {strides = array<i32>} : memref<1x256x128xf32, #tpu.memory_space<vmem>>, vector<1x256x128xf32>,
    return
  }
  func.func @transform_0(%arg0: i32) -> (i32, i32, i32) {
    %c0_i32 = arith.constant 0 : i32
    %c0_i32_0 = arith.constant 0 : i32
    %c0_i32_1 = arith.constant 0 : i32
    return %arg0, %c0_i32, %c0_i32_0 : i32, i32, i32
  }
  func.func @transform_1(%arg0: i32) -> (i32, i32, i32) {
    %c0_i32 = arith.constant 0 : i32
    %c0_i32_0 = arith.constant 0 : i32
    %c0_i32_1 = arith.constant 0 : i32
    %c0_i32_2 = arith.constant 0 : i32
    return %c0_i32, %c0_i32_0, %c0_i32_1 : i32, i32, i32
  }
  func.func @transform_2(%arg0: i32) -> (i32, i32) {
    %c0_i32 = arith.constant 0 : i32
    %c0_i32_0 = arith.constant 0 : i32
    %c0_i32_1 = arith.constant 0 : i32
    return %c0_i32, %c0_i32_0 : i32, i32
  }
  func.func @transform_3(%arg0: i32) -> (i32, i32, i32) {
    %c0_i32 = arith.constant 0 : i32
    %c0_i32_0 = arith.constant 0 : i32
    %c0_i32_1 = arith.constant 0 : i32
    return %arg0, %c0_i32, %c0_i32_0 : i32, i32, i32
  }
}

</mosaic_0001>

<bundles_post_ra>
// kernel: tpu_custom_call.1
= control target key start
LH: loop header
LB: loop body
LE: loop exit
PB: predicated region body
PF: predicated region fallthrough
CT: control target
= control target key end

     0   :  { %8 = vsyncpa [#allocation4], 0  ;;  %s10994_s0 = inlined_call_operand.hbm [shape: f32[2,256,128], index: 0, kind: input, shape index: {}]   ;;  %s10995_s1 = inlined_call_operand.hbm [shape: f32[9,128,128], index: 1, kind: input, shape index: {}]   ;;  %s10996_s2 = inlined_call_operand.vmem [shape: f32[1,128], index: 2, kind: input, shape index: {}]   ;;  %s10997_s3 = inlined_call_operand.hbm [shape: f32[2,256,128], index: 3, kind: output, shape index: {}]  }
   0x1   :  { %10 = vsyncpa [#allocation4 + $0x1], 0 }
   0x2   :  { %11 = vsyncpa [#allocation7], 0 }
   0x3   :  { %12 = vsyncpa [#allocation5], 0 }
   0x4   :  { %14 = vsyncpa [#allocation5 + $0x1], 0  ;;  %s7497_s12 = smov 0   ;;  %s7499_s13 = smov 0  }
   0x5   :  { %s7501_s14 = smov 0   ;;  %s7503_s15 = smov 0  }
   0x6 LB: > { %s7518_s16 = sadd.s32 4294967295, %s7469_s15   ;;  %s6883_s17 = sadd.s32 4294967294, %s7469_s15   ;;  %s7469_s15 = sphi %s7503_s15, %s11933_s15   ;;  %s7465_s14 = sphi %s7501_s14, %s11932_s14   ;;  %s7461_s13 = sphi %s7499_s13, %s11931_s13   ;;  %s7457_s12 = sphi %s7497_s12, %s11930_s12  }
   0x7   : > { %p40_p0 = scmp.ne.s32.totalorder %s7461_s13, %s7457_s12  ;;  %p41_p1 = scmp.eq.s32.totalorder %s7518_s16, 0 }
   0x8   : > { %p106_p2 = scmp.eq.s32.totalorder %s7518_s16, 1  ;;  %p112_p3 = scmp.eq.s32.totalorder %s6883_s17, 1 }
   0x9   : > { %p7527_p4 = por %p41_p1, %p40_p0  ;;  %p6884_p5 = scmp.ge.s32.totalorder %s7469_s15, 1 }
   0xa   : > { %p7532_p6 = por %p112_p3, %p40_p0  ;;  %p119_p7 = scmp.lt.s32.totalorder %s7469_s15, 3 }
   0xb   : > { %s130_s22 = sshll.u32 %s10995_s1, 4  ;;  %s7471_s24 = smov [#allocation6]   ;;  %s131_s22 = int_to_ptr.hbm [resolvable:$true] %s130_s22 }
   0xc   : > { %p7540_p8 = pnand %p6884_p5, %p119_p7  ;;  %s132_s25 = sshll.u32 %s7471_s24, 4  ;;  %s133_s25 = int_to_ptr.vmem [resolvable:$true] %s132_s25 }
   0xd   : > { %s7550_s26 = sadd.s32 1, %s7469_s15   ;;  %s7472_s27 = smov 128  }
   0xe   : > { %p7245_p9 = pneg %p7540_p8  ;;  %s7473_s28 = smov 8  }
   0xf   : > { %s24_s29 = ssub.s32 %s7469_s15, %s7550_s26  ;;  %s27_s30 = sadd.s32 1, %s7465_s14 }
  0x10   : > { %p7246_p10 = pnand %p7245_p9, %p41_p1  ;;  %p25_p12 = scmp.eq.s32.totalorder %s24_s29, 0 }
  0x11   : > { %p34_p13 = scmp.ne.s32.totalorder %s7465_s14, %s7461_s13  ;;  %p35_p0 = scmp.eq.s32.totalorder %s7469_s15, 0 }
  0x12   : > { %7248 = dma.hbm_to_vmem [thread:$0]  (!%p7246_p10), %s131_s22, 18432, %s133_s25, [#allocation7], %s7472_s27, %s7472_s27, %s7473_s28  }
  0x13   : > { %s7562_s4 = scalar_select %p25_p12, %s7465_s14, %s27_s30  }
  0x14   : > { %p7566_p3 = por %p106_p2, %p34_p13  ;;  %p7258_p5 = scmp.lt.s32.totalorder %s7469_s15, 2 }
  0x15   : > { %s149_s6 = sand.u32 1, %s7465_s14   ;;  %s7187_s7 = sshll.u32 %s7469_s15, 8 }
  0x16   : > { %p36_p7 = por %p35_p0, %p34_p13  ;;  %s6887_s8 = sshll.u32 %s149_s6, 8 }
  0x17   : > { %s158_s11 = scalar_lea.hbm %s10994_s0, %s7187_s7  ;;  %s153_s20 = scalar_lea.vmem [#allocation3], %s6887_s8 }
  0x18   : > { %s159_s17 = sshll.u32 %s158_s11, 4  ;;  %s161_s21 = sshll.u32 %s153_s20, 4  ;;  %s160_s17 = int_to_ptr.hbm [resolvable:$true] %s159_s17  ;;  %s162_s21 = int_to_ptr.vmem [resolvable:$true] %s161_s21 }
  0x19   : > { %p7576_p9 = pnand %p7258_p5, %p36_p7  ;;  %s150_s24 = scalar_lea.sflag [#allocation4], %s149_s6 }
  0x1a   : > { %s7369_s25 = sshra.s32 %s160_s17, 4  ;;  %s7376_s8 = scalar_lea.hbm %s10994_s0, 512  ;;  %s7370_s25 = int_to_ptr.hbm [resolvable:$true] %s7369_s25 }
  0x1b   : > { %s7371_s29 = scalar_lea.hbm %s7370_s25, 256  ;;  %p7373_p10 = pneg %p7576_p9 }
  0x1c   : > { %p7372_p2 = scmp.ne.s32.totalorder %s7370_s25, %s7371_s29  ;;  %p7377_p0 = scmp.lt.s32.totalorder %s7370_s25, %s10994_s0 }
  0x1d   : > { %p7378_p5 = scmp.lt.s32.totalorder %s7376_s8, %s7371_s29 }
  0x1e   : > { %p7374_p12 = pnand %p7373_p10, %p7372_p2 }
  0x1f   : > { %p7379_p7 = por %p7378_p5, %p7377_p0 }
  0x20   : > { %p7375_p13 = pneg %p7374_p12 }
  0x22   : > { %p7380_p11 = pnand %p7379_p7, %p7375_p13 }
  0x24   : > { %7383 = shalt.err (!%p7380_p11)
}
  0x25   : > { %7252 = dma.hbm_to_vmem [thread:$0]  (!%p7576_p9), %s160_s17, 4096, %s162_s21, %s150_s24, %s7472_s27, %s7472_s27, %s7473_s28  }
  0x26   : > { %173 = sbr.rel (%p7540_p8) target bundleno = 2203 (0x89b), region = 32 }
  0x2b   : > { %s7596_s6 = sand.u32 1, %s7461_s13  }
  0x2c   : > { %s6891_s11 = sshll.u32 %s7596_s6, 8  ;;  %s176_s20 = scalar_lea.sflag [#allocation4], %s7596_s6 }
  0x2d   : > { %s7602_s25 = scalar_lea.vmem [#allocation3], %s6891_s11 }
  0x2e   : > { %7444 = dma.done.wait (%p7527_p4), %s176_s20, 4096  }
  0x2f   : > { %7446 = vsyncadd (%p7527_p4), %s176_s20, 4294963200 }
  0x30   : > { %7448 = dma.done.wait (%p41_p1), [#allocation7], 18432  }
  0x31   : > { %7450 = vsyncadd (%p41_p1), [#allocation7], 4294948864  ;;  %v7474_v0 = vmov 0.0   ;;  %v922_v1 = vld [vmem:[#allocation6 + $0x78] sm:$0xff]  ;;  %v921_v2 = vld [vmem:[#allocation6 + $0x70] sm:$0xff]  ;;  %v216_v24 = vlaneseq  ;;  %v11265_v60 = vmov 0 }
  0x32   : > { %208 = vst [vmem:[#allocation2] sm:$0xff] %v7474_v0  ;;  %923 = vmatpush.msra.mxu0 %v922_v1  ;;  %7189 = vmatpush.msra.mxu3 %v922_v1  ;;  %v7618_v3 = vld [vmem:[#allocation6 + $0xf8] sm:$0xff]  ;;  %v7620_v4 = vld [vmem:[#allocation6 + $0xf0] sm:$0xff]  ;;  %v920_v5 = vld [vmem:[#allocation6 + $0x68] sm:$0xff]  ;;  %v11268_v62 = vmov 0  ;;  %s10704_s7 = scalar_lea.vmem [#allocation8], %s6891_s11 }
  0x33   : > { %209 = vst [vmem:[#allocation2 + $0x8] sm:$0xff] %v7474_v0  ;;  %1198 = vmatpush.msra.mxu2 %v7618_v3  ;;  %v7624_v6 = vld [vmem:[#allocation6 + $0x278] sm:$0xff]  ;;  %v7626_v7 = vld [vmem:[#allocation6 + $0xe8] sm:$0xff]  ;;  %v7628_v8 = vld [vmem:[#allocation6 + $0x270] sm:$0xff]  ;;  %v7680_v34 = vshrl.u32 %v216_v24, 7  ;;  %s7188_s8 = sshll.u32 %s7518_s16, 8 }
  0x34   : > { %210 = vst [vmem:[#allocation2 + $0x10] sm:$0xff] %v7474_v0  ;;  %924 = vmatpush.msra.mxu0 %v921_v2  ;;  %7190 = vmatpush.msra.mxu3 %v921_v2  ;;  %v919_v9 = vld [vmem:[#allocation6 + $0x60] sm:$0xff]  ;;  %v7634_v11 = vld [vmem:[#allocation6 + $0x268] sm:$0xff]  ;;  %v918_v12 = vld [vmem:[#allocation6 + $0x58] sm:$0xff]  ;;  %s6796_s11 = scalar_lea.hbm %s10997_s3, %s7188_s8  ;;  %s6797_s20 = sshll.u32 %s10704_s7, 4  ;;  %s6798_s20 = int_to_ptr.vmem [resolvable:$true] %s6797_s20 }
  0x35   : > { %211 = vst [vmem:[#allocation2 + $0x18] sm:$0xff] %v7474_v0  ;;  %1199 = vmatpush.msra.mxu2 %v7620_v4  ;;  %1036 = vmatpush.msra.mxu1 %v7624_v6  ;;  %v7632_v10 = vld [vmem:[#allocation6 + $0xe0] sm:$0xff]  ;;  %v7638_v13 = vld [vmem:[#allocation6 + $0xd8] sm:$0xff]  ;;  %v917_v15 = vld [vmem:[#allocation6 + $0x50] sm:$0xff]  ;;  %v241_v45 = vadd.s32 192, %v7680_v34  ;;  %v253_v53 = vand.u32 15, %v7680_v34 }
  0x36   : > { %212 = vst [vmem:[#allocation2 + $0x120] sm:$0xff] %v7474_v0  ;;  %925 = vmatpush.msra.mxu0 %v920_v5  ;;  %7191 = vmatpush.msra.mxu3 %v920_v5  ;;  %v7640_v14 = vld [vmem:[#allocation6 + $0x260] sm:$0xff]  ;;  %v7644_v16 = vld [vmem:[#allocation6 + $0xd0] sm:$0xff]  ;;  %v7646_v17 = vld [vmem:[#allocation6 + $0x258] sm:$0xff]  ;;  %v219_v24 = vadd.s32 16, %v7680_v34  ;;  %s6785_s16 = scalar_lea.sflag [#allocation5], %s7596_s6 }
  0x37   : > { %213 = vst [vmem:[#allocation2 + $0x128] sm:$0xff] %v7474_v0  ;;  %1200 = vmatpush.msra.mxu2 %v7626_v7  ;;  %1037 = vmatpush.msra.mxu1 %v7628_v8  ;;  %v916_v18 = vld [vmem:[#allocation6 + $0x48] sm:$0xff]  ;;  %v7652_v20 = vld [vmem:[#allocation6 + $0x250] sm:$0xff]  ;;  %v915_v21 = vld [vmem:[#allocation6 + $0x40] sm:$0xff]  ;;  %v421_v54 = vand.u32 15, %v241_v45  ;;  %vm7744_vm0 = vcmp.gt.s32.totalorder %v253_v53, 0 }
  0x38   : > { %214 = vst [vmem:[#allocation2 + $0x130] sm:$0xff] %v7474_v0  ;;  %926 = vmatpush.msra.mxu0 %v919_v9  ;;  %7192 = vmatpush.msra.mxu3 %v919_v9  ;;  %v7650_v19 = vld [vmem:[#allocation6 + $0xc8] sm:$0xff]  ;;  %v7656_v22 = vld [vmem:[#allocation6 + $0xc0] sm:$0xff]  ;;  %v914_v25 = vld [vmem:[#allocation6 + $0x38] sm:$0xff]  ;;  %v11266_v60 = vsel %vm7744_vm0, 4294967295, %v11265_v60  ;;  %v11275_v45 = vmov 0 }
  0x39   : > { %1201 = vmatpush.msra.mxu2 %v7632_v10  ;;  %1038 = vmatpush.msra.mxu1 %v7634_v11  ;;  %v7658_v23 = vld [vmem:[#allocation6 + $0x248] sm:$0xff]  ;;  %v7666_v27 = vld [vmem:[%s7602_s25 + $0xb0] sm:$0xff]  ;;  %v7668_v28 = vld [vmem:[#allocation6 + $0xb8] sm:$0xff]  ;;  %11267 = vst [vmem:[#allocation21_spill] sm:$0xff] %v11266_v60  ;;  %vm7748_vm1 = vcmp.gt.s32.totalorder %v421_v54, 0  ;;  %v221_v53 = vadd.s32 32, %v7680_v34 }
  0x3a   : > { %927 = vmatpush.msra.mxu0 %v918_v12  ;;  %7193 = vmatpush.msra.mxu3 %v918_v12  ;;  %v7663_v26 = vld [vmem:[%s7602_s25 + $0xa8] sm:$0xff]  ;;  %11257 = vst [vmem:[#allocation13_spill] sm:$0xff] %v7666_v27  ;;  %v7670_v29 = vld [vmem:[#allocation6 + $0x240] sm:$0xff]  ;;  %v913_v30 = vld [vmem:[#allocation6 + $0x30] sm:$0xff]  ;;  %v11269_v62 = vsel %vm7748_vm1, 4294967295, %v11268_v62  ;;  %v245_v54 = vadd.s32 224, %v7680_v34 }
  0x3b   : > { %1202 = vmatpush.msra.mxu2 %v7638_v13  ;;  %1039 = vmatpush.msra.mxu1 %v7640_v14  ;;  %11256 = vst [vmem:[#allocation12_spill] sm:$0xff] %v7663_v26  ;;  %v912_v31 = vld [vmem:[#allocation6 + $0x28] sm:$0xff]  ;;  %v7675_v32 = vld [vmem:[#allocation6 + $0xb0] sm:$0xff]  ;;  %v7678_v33 = vld [vmem:[#allocation6 + $0x238] sm:$0xff]  ;;  %s7419_s17 = scalar_lea.hbm %s10997_s3, 512 }
  0x3c   : > { %928 = vmatpush.msra.mxu0 %v917_v15  ;;  %7194 = vmatpush.msra.mxu3 %v917_v15  ;;  %751 = vst [vmem:[#allocation2 + $0xc8] sm:$0xff] %v7663_v26  ;;  %v7683_v35 = vld [vmem:[%s7602_s25 + $0xb8] sm:$0xff]  ;;  %v7686_v36 = vld [vmem:[%s7602_s25] sm:$0xff]  ;;  %v7690_v37 = vld [vmem:[#allocation6 + $0xa8] sm:$0xff] }
  0x3d   : > { %1203 = vmatpush.msra.mxu2 %v7644_v16  ;;  %1040 = vmatpush.msra.mxu1 %v7646_v17  ;;  %752 = vst [vmem:[#allocation2 + $0xd0] sm:$0xff] %v7666_v27  ;;  %v7694_v38 = vld [vmem:[%s7602_s25 + $0xc0] sm:$0xff]  ;;  %v7697_v39 = vld [vmem:[%s7602_s25 + $0x8] sm:$0xff]  ;;  %v7699_v40 = vld [vmem:[#allocation6 + $0x230] sm:$0xff] }
  0x3e   : > { %929 = vmatpush.msra.mxu0 %v916_v18  ;;  %7195 = vmatpush.msra.mxu3 %v916_v18  ;;  %11258 = vst [vmem:[#allocation14_spill] sm:$0xff] %v7683_v35  ;;  %v7703_v41 = vld [vmem:[%s7602_s25 + $0xc8] sm:$0xff]  ;;  %v911_v42 = vld [vmem:[#allocation6 + $0x20] sm:$0xff]  ;;  %v910_v46 = vld [vmem:[#allocation6 + $0x18] sm:$0xff] }
  0x3f   : > { %1204 = vmatpush.msra.mxu2 %v7650_v19  ;;  %1041 = vmatpush.msra.mxu1 %v7652_v20  ;;  %11259 = vst [vmem:[#allocation15_spill] sm:$0xff] %v7686_v36  ;;  %v7708_v43 = vld [vmem:[#allocation6 + $0xa0] sm:$0xff]  ;;  %v7710_v44 = vld [vmem:[#allocation6 + $0x228] sm:$0xff]  ;;  %v7716_v47 = vld [vmem:[#allocation6 + $0x98] sm:$0xff] }
  0x40   : > { %930 = vmatpush.msra.mxu0 %v915_v21  ;;  %7196 = vmatpush.msra.mxu3 %v915_v21  ;;  %753 = vst [vmem:[#allocation2 + $0xd8] sm:$0xff] %v7683_v35  ;;  %v7719_v48 = vld [vmem:[#allocation6 + $0x220] sm:$0xff]  ;;  %v7722_v49 = vld [vmem:[%s7602_s25 + $0x10] sm:$0xff]  ;;  %v7733_v55 = vld [vmem:[#allocation6 + $0x218] sm:$0xff] }
  0x41   : > { %1205 = vmatpush.msra.mxu2 %v7656_v22  ;;  %1042 = vmatpush.msra.mxu1 %v7658_v23  ;;  %11260 = vst [vmem:[#allocation16_spill] sm:$0xff] %v7694_v38  ;;  %v7725_v50 = vld [vmem:[%s7602_s25 + $0xd0] sm:$0xff]  ;;  %v908_v56 = vld [vmem:[#allocation6 + $0x8] sm:$0xff]  ;;  %v907_v59 = vld [vmem:[#allocation6] sm:$0xff] }
  0x42   : > { %931 = vmatpush.msra.mxu0 %v914_v25  ;;  %7197 = vmatpush.msra.mxu3 %v914_v25  ;;  %11261 = vst [vmem:[#allocation17_spill] sm:$0xff] %v7697_v39  ;;  %v909_v51 = vld [vmem:[#allocation6 + $0x10] sm:$0xff]  ;;  %v7738_v57 = vld [vmem:[#allocation6 + $0x88] sm:$0xff]  ;;  %v7754_v1 = vld [vmem:[#allocation6 + $0x80] sm:$0xff]  ;;  %v243_v25 = vadd.s32 208, %v7680_v34 }
  0x43   : > { %1206 = vmatpush.msra.mxu2 %v7668_v28  ;;  %1043 = vmatpush.msra.mxu1 %v7670_v29  ;;  %730 = vst [vmem:[#allocation2 + $0x20] sm:$0xff] %v7686_v36  ;;  %v7730_v52 = vld [vmem:[#allocation6 + $0x90] sm:$0xff]  ;;  %v7756_v2 = vld [vmem:[#allocation6 + $0x208] sm:$0xff]  ;;  %v7759_v5 = vld [vmem:[%s7602_s25 + $0x18] sm:$0xff] }
  0x44   : > { %932 = vmatpush.msra.mxu0 %v913_v30  ;;  %7198 = vmatpush.msra.mxu3 %v913_v30  ;;  %11262 = vst [vmem:[#allocation18_spill] sm:$0xff] %v7703_v41  ;;  %v7740_v58 = vld [vmem:[#allocation6 + $0x210] sm:$0xff]  ;;  %v7762_v9 = vld [vmem:[%s7602_s25 + $0xd8] sm:$0xff]  ;;  %v7771_v15 = vld [vmem:[#allocation6 + $0x200] sm:$0xff] }
  0x45   : > { %1207 = vmatpush.msra.mxu2 %v7675_v32  ;;  %1044 = vmatpush.msra.mxu1 %v7678_v33  ;;  %754 = vst [vmem:[#allocation2 + $0xe0] sm:$0xff] %v7694_v38  ;;  %v779_v61 = vld [vmem:[#allocation2 + $0xf] sm:$0xff]  ;;  %v1713_v12 = vld [vmem:[#allocation6 + $0x1f8] sm:$0xff] }
  0x46   : > { %933 = vmatpush.msra.mxu0 %v912_v31  ;;  %7199 = vmatpush.msra.mxu3 %v912_v31  ;;  %731 = vst [vmem:[#allocation2 + $0x28] sm:$0xff] %v7697_v39  ;;  %v803_v63 = vld [vmem:[#allocation2 + $0xcf] sm:$0xff]  ;;  %v780_v21 = vld [vmem:[#allocation2 + $0x17] sm:$0xff]  ;;  %v7784_v31 = vld [vmem:[%s7602_s25 + $0x20] sm:$0xff] }
  0x47   : > { %1208 = vmatpush.msra.mxu2 %v7690_v37  ;;  %1045 = vmatpush.msra.mxu1 %v7699_v40  ;;  %755 = vst [vmem:[#allocation2 + $0xe8] sm:$0xff] %v7703_v41  ;;  %v1712_v18 = vld [vmem:[#allocation6 + $0x1f0] sm:$0xff]  ;;  %v1711_v30 = vld [vmem:[#allocation6 + $0x1e8] sm:$0xff] }
  0x48   : > { %934 = vmatpush.msra.mxu0 %v911_v42  ;;  %7200 = vmatpush.msra.mxu3 %v911_v42  ;;  %11263 = vst [vmem:[#allocation19_spill] sm:$0xff] %v7722_v49  ;;  %v267_v42 = vand.u32 15, %v219_v24 }
  0x49   : > { %11264 = vst [vmem:[#allocation20_spill] sm:$0xff] %v7725_v50  ;;  %1209 = vmatpush.msra.mxu2 %v7708_v43  ;;  %1046 = vmatpush.msra.mxu1 %v7710_v44 }
  0x4a   : > { %732 = vst [vmem:[#allocation2 + $0x30] sm:$0xff] %v7722_v49  ;;  %935 = vmatpush.msra.mxu0 %v910_v46  ;;  %7201 = vmatpush.msra.mxu3 %v910_v46  ;;  %vm7794_vm2 = vcmp.gt.s32.totalorder %v267_v42, 0  ;;  %v7798_v46 = vld [vmem:[#allocation2 + $0x1f] sm:$0xff] }
  0x4b   : > { %756 = vst [vmem:[#allocation2 + $0xf0] sm:$0xff] %v7725_v50  ;;  %1210 = vmatpush.msra.mxu2 %v7716_v47  ;;  %1047 = vmatpush.msra.mxu1 %v7719_v48  ;;  %v11276_v45 = vsel %vm7794_vm2, 4294967295, %v11275_v45  ;;  %v7926_v42 = vld [vmem:[%s7602_s25 + $0x58] sm:$0xff] }
  0x4c   : > { %936 = vmatpush.msra.mxu0 %v909_v51  ;;  %7202 = vmatpush.msra.mxu3 %v909_v51  ;;  %11270 = vst [vmem:[#allocation22_spill] sm:$0xff] %v11269_v62  ;;  %v11278_v51 = vmov 0 }
  0x4d   : > { %1211 = vmatpush.msra.mxu2 %v7730_v52  ;;  %1048 = vmatpush.msra.mxu1 %v7733_v55  ;;  %11271 = vst [vmem:[#allocation23_spill] sm:$0xff] %v7759_v5 }
  0x4e   : > { %937 = vmatpush.msra.mxu0 %v908_v56  ;;  %7203 = vmatpush.msra.mxu3 %v908_v56  ;;  %11272 = vst [vmem:[#allocation24_spill] sm:$0xff] %v7762_v9  ;;  %v281_v56 = vand.u32 15, %v221_v53  ;;  %v7962_v53 = vld [vmem:[%s7602_s25 + $0xf0] sm:$0xff] }
  0x4f   : > { %1212 = vmatpush.msra.mxu2 %v7738_v57  ;;  %1049 = vmatpush.msra.mxu1 %v7740_v58  ;;  %733 = vst [vmem:[#allocation2 + $0x38] sm:$0xff] %v7759_v5 }
  0x50   : > { %938 = vmatpush.msra.mxu0 %v907_v59  ;;  %7204 = vmatpush.msra.mxu3 %v907_v59  ;;  %757 = vst [vmem:[#allocation2 + $0xf8] sm:$0xff] %v7762_v9  ;;  %v449_v59 = vand.u32 15, %v245_v54  ;;  %vm7838_vm4 = vcmp.gt.s32.totalorder %v281_v56, 0  ;;  %v1704_v54 = vld [vmem:[#allocation6 + $0x1b0] sm:$0xff]  ;;  %v229_v56 = vadd.s32 96, %v7680_v34 }
  0x51   : > { %6894 = vmatmul.msk.f32.vlgmr.msra.gmra.mxu0 %vm7744_vm0, %v779_v61  ;;  %6906 = vmatmul.msk.f32.vlgmr.msra.gmra.mxu3 %vm7748_vm1, %v803_v63  ;;  %11273 = vst [vmem:[#allocation25_spill] sm:$0xff] %v7784_v31  ;;  %v11287_v61 = vmov 0 }
  0x52   : > { %7205 = vmatpush.msrb.mxu3 %v7624_v6  ;;  %1213 = vmatpush.msra.mxu2 %v7754_v1  ;;  %v804_v6 = vld [vmem:[#allocation2 + $0xd7] sm:$0xff]  ;;  %734 = vst [vmem:[#allocation2 + $0x40] sm:$0xff] %v7784_v31  ;;  %vm7844_vm5 = vcmp.gt.s32.totalorder %v449_v59, 0  ;;  %v807_v63 = vld [vmem:[#allocation2 + $0xef] sm:$0xff] }
  0x53   : > { %1214 = vmatmul.f32.vlgmr.msra.gmra.mxu2 %v7474_v0  ;;  %1050 = vmatpush.msra.mxu1 %v7756_v2  ;;  %11277 = vst [vmem:[#allocation27_spill] sm:$0xff] %v11276_v45  ;;  %v11288_v61 = vsel %vm7844_vm5, 4294967295, %v11287_v61  ;;  %v7971_v59 = vld [vmem:[%s7602_s25 + $0x70] sm:$0xff] }
  0x54   : > { %7206 = vmatpush.msrb.mxu3 %v7628_v8  ;;  %1714 = vmatpush.msrb.mxu0 %v1713_v12  ;;  %v7787_v8 = vld [vmem:[%s7602_s25 + $0xe0] sm:$0xff]  ;;  %11289 = vst [vmem:[#allocation33_spill] sm:$0xff] %v11288_v61 }
  0x55   : > { %1051 = vmatpush.msra.mxu1 %v7771_v15  ;;  %11274 = vst [vmem:[#allocation26_spill] sm:$0xff] %v7787_v8  ;;  %v1698_v61 = vld [vmem:[#allocation6 + $0x180] sm:$0xff] }
  0x56   : > { %7207 = vmatpush.msrb.mxu3 %v7634_v11  ;;  %1052 = vmatmul.f32.vlgmr.msra.gmra.mxu1 %v7686_v36  ;;  %v435_v11 = vand.u32 15, %v243_v25  ;;  %758 = vst [vmem:[#allocation2 + $0x100] sm:$0xff] %v7787_v8  ;;  %v225_v25 = vadd.s32 64, %v7680_v34 }
  0x57   : > { %1715 = vmatpush.msrb.mxu0 %v1712_v18  ;;  %v808_v12 = vld [vmem:[#allocation2 + $0xf7] sm:$0xff]  ;;  %v247_v18 = vadd.s32 240, %v7680_v34  ;;  %11303 = vst [vmem:[#allocation41_spill] sm:$0xff] %v7926_v42 }
  0x58   : > { %7208 = vmatpush.msrb.mxu3 %v7640_v14  ;;  %v1710_v14 = vld [vmem:[#allocation6 + $0x1e0] sm:$0xff]  ;;  %vm7800_vm3 = vcmp.gt.s32.totalorder %v435_v11, 0  ;;  %741 = vst [vmem:[#allocation2 + $0x78] sm:$0xff] %v7926_v42 }
  0x59   : > { %942 = vmatmul.f32.gmra.mxu0 %v780_v21  ;;  %1014 = vmatmul.f32.gmra.mxu3 %v804_v6  ;;  %v11279_v51 = vsel %vm7800_vm3, 4294967295, %v11278_v51  ;;  %v7870_v21 = vld [vmem:[%s7602_s25 + $0x40] sm:$0xff]  ;;  %11309 = vst [vmem:[#allocation45_spill] sm:$0xff] %v7962_v53 }
  0x5a   : > { %7209 = vmatpush.msrb.mxu3 %v7646_v17  ;;  %1716 = vmatpush.msrb.mxu0 %v1711_v30  ;;  %11280 = vst [vmem:[#allocation28_spill] sm:$0xff] %v11279_v51  ;;  %v805_v17 = vld [vmem:[#allocation2 + $0xdf] sm:$0xff]  ;;  %v7909_v30 = vld [vmem:[%s7602_s25 + $0x50] sm:$0xff] }
  0x5b   : > { %1217 = vmatmul.f32.gmra.mxu2 %v7474_v0  ;;  %v7808_v0 = vld [vmem:[%s7602_s25 + $0x28] sm:$0xff]  ;;  %11291 = vst [vmem:[#allocation35_spill] sm:$0xff] %v7870_v21  ;;  %v7882_v6 = vld [vmem:[#allocation2 + $0x3f] sm:$0xff] }
  0x5c   : > { %7210 = vmatpush.msrb.mxu3 %v7652_v20  ;;  %1717 = vmatpush.msrb.mxu0 %v1710_v14  ;;  %11281 = vst [vmem:[#allocation29_spill] sm:$0xff] %v7808_v0  ;;  %v7811_v20 = vld [vmem:[%s7602_s25 + $0xe8] sm:$0xff]  ;;  %v11305_v14 = vmov 0 }
  0x5d   : > { %11282 = vst [vmem:[#allocation30_spill] sm:$0xff] %v7811_v20  ;;  %v809_v24 = vld [vmem:[#allocation2 + $0xff] sm:$0xff] }
  0x5e   : > { %1055 = vmatmul.f32.gmra.mxu1 %v7697_v39  ;;  %7211 = vmatpush.msrb.mxu3 %v7658_v23  ;;  %735 = vst [vmem:[#allocation2 + $0x48] sm:$0xff] %v7808_v0  ;;  %v7823_v23 = vld [vmem:[#allocation2 + $0x27] sm:$0xff] }
  0x5f   : > { %759 = vst [vmem:[#allocation2 + $0x108] sm:$0xff] %v7811_v20 }
  0x60   : > { %7212 = vmatpush.msrb.mxu3 %v7670_v29  ;;  %v806_v29 = vld [vmem:[#allocation2 + $0xe7] sm:$0xff]  ;;  %738 = vst [vmem:[#allocation2 + $0x60] sm:$0xff] %v7870_v21 }
  0x61   : > { %6895 = vmatmul.msk.f32.gmra.mxu0 %vm7794_vm2, %v7798_v46  ;;  %6907 = vmatmul.msk.f32.gmra.mxu3 %vm7800_vm3, %v805_v17  ;;  %11299 = vst [vmem:[#allocation39_spill] sm:$0xff] %v7909_v30 }
  0x62   : > { %7213 = vmatpush.msrb.mxu3 %v7678_v33  ;;  %v7831_v33 = vld [vmem:[%s7602_s25 + $0x30] sm:$0xff]  ;;  %740 = vst [vmem:[#allocation2 + $0x70] sm:$0xff] %v7909_v30 }
  0x63   : > { %1220 = vmatmul.f32.gmra.mxu2 %v7686_v36  ;;  %11283 = vst [vmem:[#allocation31_spill] sm:$0xff] %v7831_v33  ;;  %v11327_v36 = vmov 0 }
  0x64   : > { %7214 = vmatpush.msrb.mxu3 %v7699_v40  ;;  %736 = vst [vmem:[#allocation2 + $0x50] sm:$0xff] %v7831_v33  ;;  %v1709_v40 = vld [vmem:[#allocation6 + $0x1d8] sm:$0xff] }
  0x65   : > { %1718 = vmatpush.msrb.mxu0 %v1709_v40  ;;  %760 = vst [vmem:[#allocation2 + $0x110] sm:$0xff] %v7962_v53 }
  0x66   : > { %1058 = vmatmul.f32.gmra.mxu1 %v7722_v49  ;;  %7215 = vmatpush.msrb.mxu3 %v7710_v44  ;;  %v11284_v44 = vmov 0  ;;  %11310 = vst [vmem:[#allocation46_spill] sm:$0xff] %v7971_v59 }
  0x67   : > { %v11285_v44 = vsel %vm7838_vm4, 4294967295, %v11284_v44  ;;  %744 = vst [vmem:[#allocation2 + $0x90] sm:$0xff] %v7971_v59 }
  0x68   : > { %7216 = vmatpush.msrb.mxu3 %v7719_v48  ;;  %11286 = vst [vmem:[#allocation32_spill] sm:$0xff] %v11285_v44  ;;  %v7842_v48 = vld [vmem:[#allocation2 + $0x2f] sm:$0xff] }
  0x69   : > { %948 = vmatmul.f32.gmra.mxu0 %v7823_v23  ;;  %1020 = vmatmul.f32.gmra.mxu3 %v806_v29  ;;  %v7954_v29 = vld [vmem:[%s7602_s25 + $0x68] sm:$0xff] }
  0x6a   : > { %7217 = vmatpush.msrb.mxu3 %v7733_v55  ;;  %v7852_v55 = vld [vmem:[%s7602_s25 + $0x38] sm:$0xff]  ;;  %11308 = vst [vmem:[#allocation44_spill] sm:$0xff] %v7954_v29 }
  0x6b   : > { %1223 = vmatmul.f32.gmra.mxu2 %v7697_v39  ;;  %11290 = vst [vmem:[#allocation34_spill] sm:$0xff] %v7852_v55 }
  0x6c   : > { %7218 = vmatpush.msrb.mxu3 %v7740_v58  ;;  %737 = vst [vmem:[#allocation2 + $0x58] sm:$0xff] %v7852_v55  ;;  %v1708_v58 = vld [vmem:[#allocation6 + $0x1d0] sm:$0xff] }
  0x6d   : > { %1719 = vmatpush.msrb.mxu0 %v1708_v58  ;;  %743 = vst [vmem:[#allocation2 + $0x88] sm:$0xff] %v7954_v29  ;;  %v337_v58 = vand.u32 15, %v229_v56 }
  0x6e   : > { %1061 = vmatmul.f32.gmra.mxu1 %v7759_v5  ;;  %7219 = vmatpush.msrb.mxu3 %v7756_v2  ;;  %v7863_v2 = vld [vmem:[#allocation2 + $0x37] sm:$0xff] }
  0x6f   : > { %vm7981_vm10 = vcmp.gt.s32.totalorder %v337_v58, 0  ;;  %v8016_v58 = vld [vmem:[%s7602_s25 + $0x88] sm:$0xff] }
  0x70   : > { %7220 = vmatpush.msrb.mxu3 %v7771_v15  ;;  %v223_v15 = vadd.s32 48, %v7680_v34  ;;  %11320 = vst [vmem:[#allocation52_spill] sm:$0xff] %v8016_v58 }
  0x71   : > { %6896 = vmatmul.msk.f32.gmra.mxu0 %vm7838_vm4, %v7842_v48  ;;  %6908 = vmatmul.msk.f32.gmra.mxu3 %vm7844_vm5, %v807_v63  ;;  %v7977_v63 = vld [vmem:[%s7602_s25 + $0xf8] sm:$0xff]  ;;  %747 = vst [vmem:[#allocation2 + $0xa8] sm:$0xff] %v8016_v58 }
  0x72   : > { %7221 = vmatpush.msra.mxu3 %v7618_v3  ;;  %v295_v3 = vand.u32 15, %v223_v15  ;;  %11311 = vst [vmem:[#allocation47_spill] sm:$0xff] %v7977_v63 }
  0x73   : > { %1226 = vmatmul.f32.gmra.mxu2 %v7722_v49  ;;  %v7950_v17 = vld [vmem:[#allocation2 + $0x5f] sm:$0xff]  ;;  %761 = vst [vmem:[#allocation2 + $0x118] sm:$0xff] %v7977_v63 }
  0x74   : > { %7222 = vmatpush.msra.mxu3 %v7620_v4  ;;  %v463_v4 = vand.u32 15, %v247_v18  ;;  %vm7878_vm6 = vcmp.gt.s32.totalorder %v295_v3, 0  ;;  %v7989_v18 = vld [vmem:[%s7602_s25 + $0x78] sm:$0xff] }
  0x75   : > { %11315 = vst [vmem:[#allocation49_spill] sm:$0xff] %v7989_v18  ;;  %v1487_v3 = vld [vmem:[#allocation6 + $0x178] sm:$0xff] }
  0x76   : > { %1064 = vmatmul.f32.gmra.mxu1 %v7784_v31  ;;  %7223 = vmatpush.msra.mxu3 %v7626_v7  ;;  %v11292_v7 = vmov 0  ;;  %vm7884_vm7 = vcmp.gt.s32.totalorder %v463_v4, 0  ;;  %745 = vst [vmem:[#allocation2 + $0x98] sm:$0xff] %v7989_v18  ;;  %v1703_v4 = vld [vmem:[#allocation6 + $0x1a8] sm:$0xff] }
  0x77   : > { %v11293_v7 = vsel %vm7878_vm6, 4294967295, %v11292_v7 }
  0x78   : > { %7224 = vmatpush.msra.mxu3 %v7632_v10  ;;  %11294 = vst [vmem:[#allocation36_spill] sm:$0xff] %v11293_v7  ;;  %v11295_v10 = vmov 0 }
  0x79   : > { %954 = vmatmul.f32.gmra.mxu0 %v7863_v2  ;;  %1026 = vmatmul.f32.gmra.mxu3 %v808_v12  ;;  %v11296_v10 = vsel %vm7884_vm7, 4294967295, %v11295_v10  ;;  %v11312_v12 = vmov 0 }
  0x7a   : > { %7225 = vmatpush.msra.mxu3 %v7638_v13  ;;  %11297 = vst [vmem:[#allocation37_spill] sm:$0xff] %v11296_v10  ;;  %v7891_v13 = vld [vmem:[%s7602_s25 + $0x48] sm:$0xff]  ;;  %v11313_v12 = vsel %vm7981_vm10, 4294967295, %v11312_v12 }
  0x7b   : > { %1229 = vmatmul.f32.gmra.mxu2 %v7759_v5  ;;  %11298 = vst [vmem:[#allocation38_spill] sm:$0xff] %v7891_v13  ;;  %v2162_v5 = vld [vmem:[#allocation6 + $0x360] sm:$0xff] }
  0x7c   : > { %7226 = vmatpush.msra.mxu3 %v7644_v16  ;;  %739 = vst [vmem:[#allocation2 + $0x68] sm:$0xff] %v7891_v13  ;;  %v1707_v16 = vld [vmem:[#allocation6 + $0x1c8] sm:$0xff] }
  0x7d   : > { %1720 = vmatpush.msrb.mxu0 %v1707_v16  ;;  %11314 = vst [vmem:[#allocation48_spill] sm:$0xff] %v11313_v12  ;;  %v1939_v16 = vld [vmem:[#allocation6 + $0x2f8] sm:$0xff] }
  0x7e   : > { %1067 = vmatmul.f32.gmra.mxu1 %v7808_v0  ;;  %7227 = vmatpush.msra.mxu3 %v7650_v19  ;;  %v7903_v19 = vld [vmem:[#allocation2 + $0x47] sm:$0xff] }
  0x7f   : > { %1940 = vmatpush.msrb.mxu1 %v1939_v16 }
  0x80   : > { %7228 = vmatpush.msra.mxu3 %v7656_v22  ;;  %v810_v22 = vld [vmem:[#allocation2 + $0x107] sm:$0xff] }
  0x81   : > { %6897 = vmatmul.msk.f32.gmra.mxu0 %vm7878_vm6, %v7882_v6  ;;  %6909 = vmatmul.msk.f32.gmra.mxu3 %vm7884_vm7, %v809_v24  ;;  %v1486_v24 = vld [vmem:[#allocation6 + $0x170] sm:$0xff] }
  0x82   : > { %7229 = vmatpush.msra.mxu3 %v7668_v28  ;;  %v309_v28 = vand.u32 15, %v225_v25  ;;  %v231_v25 = vadd.s32 112, %v7680_v34 }
  0x83   : > { %1232 = vmatmul.f32.gmra.mxu2 %v7784_v31  ;;  %v7966_v40 = vld [vmem:[#allocation2 + $0x67] sm:$0xff]  ;;  %v7985_v15 = vld [vmem:[#allocation2 + $0x6f] sm:$0xff] }
  0x84   : > { %7230 = vmatpush.msra.mxu3 %v7675_v32  ;;  %v1706_v32 = vld [vmem:[#allocation6 + $0x1c0] sm:$0xff]  ;;  %vm7917_vm8 = vcmp.gt.s32.totalorder %v309_v28, 0 }
  0x85   : > { %1721 = vmatpush.msrb.mxu0 %v1706_v32  ;;  %v8002_v28 = vld [vmem:[%s7602_s25 + $0x80] sm:$0xff]  ;;  %v1485_v32 = vld [vmem:[#allocation6 + $0x168] sm:$0xff] }
  0x86   : > { %1070 = vmatmul.f32.gmra.mxu1 %v7831_v33  ;;  %7231 = vmatpush.msra.mxu3 %v7690_v37  ;;  %v11300_v37 = vmov 0  ;;  %11316 = vst [vmem:[#allocation50_spill] sm:$0xff] %v8002_v28  ;;  %v1476_v31 = vld [vmem:[#allocation6 + $0x120] sm:$0xff] }
  0x87   : > { %v11301_v37 = vsel %vm7917_vm8, 4294967295, %v11300_v37  ;;  %746 = vst [vmem:[#allocation2 + $0xa0] sm:$0xff] %v8002_v28 }
  0x88   : > { %7232 = vmatpush.msra.mxu3 %v7708_v43  ;;  %11302 = vst [vmem:[#allocation40_spill] sm:$0xff] %v11301_v37  ;;  %v7921_v43 = vld [vmem:[#allocation2 + $0x4f] sm:$0xff] }
  0x89   : > { %960 = vmatmul.f32.gmra.mxu0 %v7903_v19  ;;  %1032 = vmatmul.f32.gmra.mxu3 %v810_v22  ;;  %v7997_v22 = vld [vmem:[#allocation2 + $0x77] sm:$0xff] }
  0x8a   : > { %7233 = vmatpush.msra.mxu3 %v7716_v47  ;;  %v7935_v47 = vld [vmem:[#allocation2 + $0x57] sm:$0xff] }
  0x8b   : > { %1235 = vmatmul.f32.gmra.mxu2 %v7808_v0 }
  0x8c   : > { %7234 = vmatpush.msra.mxu3 %v7730_v52  ;;  %v227_v52 = vadd.s32 80, %v7680_v34 }
  0x8e   : > { %1073 = vmatmul.f32.gmra.mxu1 %v7852_v55  ;;  %7235 = vmatpush.msra.mxu3 %v7738_v57  ;;  %v7940_v57 = vld [vmem:[%s7602_s25 + $0x60] sm:$0xff]  ;;  %v323_v11 = vand.u32 15, %v227_v52  ;;  %v351_v52 = vand.u32 15, %v231_v25  ;;  %v233_v25 = vadd.s32 128, %v7680_v34 }
  0x8f   : > { %11304 = vst [vmem:[#allocation42_spill] sm:$0xff] %v7940_v57  ;;  %v8084_v10 = vld [vmem:[#allocation2 + $0xa7] sm:$0xff] }
  0x90   : > { %7236 = vmatpush.msra.mxu3 %v7754_v1  ;;  %742 = vst [vmem:[#allocation2 + $0x80] sm:$0xff] %v7940_v57  ;;  %v1705_v1 = vld [vmem:[#allocation6 + $0x1b8] sm:$0xff]  ;;  %vm7946_vm9 = vcmp.gt.s32.totalorder %v323_v11, 0  ;;  %v1702_v11 = vld [vmem:[#allocation6 + $0x1a0] sm:$0xff]  ;;  %vm8008_vm11 = vcmp.gt.s32.totalorder %v351_v52, 0  ;;  %v1481_v52 = vld [vmem:[#allocation6 + $0x148] sm:$0xff] }
  0x91   : > { %6898 = vmatmul.msk.f32.gmra.mxu0 %vm7917_vm8, %v7921_v43  ;;  %1124 = vmatmul.f32.vlgmr.msrb.gmra.mxu3 %v7694_v38  ;;  %v11306_v14 = vsel %vm7946_vm9, 4294967295, %v11305_v14 }
  0x92   : > { %1722 = vmatpush.msrb.mxu0 %v1705_v1  ;;  %11307 = vst [vmem:[#allocation43_spill] sm:$0xff] %v11306_v14  ;;  %1488 = vmatpush.msrb.mxu3 %v1487_v3  ;;  %v1484_v1 = vld [vmem:[#allocation6 + $0x160] sm:$0xff]  ;;  %v1483_v3 = vld [vmem:[#allocation6 + $0x158] sm:$0xff] }
  0x93   : > { %1238 = vmatmul.f32.gmra.mxu2 %v7831_v33  ;;  %v8060_v33 = vld [vmem:[%s7602_s25 + $0xa0] sm:$0xff] }
  0x94   : > { %1723 = vmatpush.msrb.mxu0 %v1704_v54  ;;  %1489 = vmatpush.msrb.mxu3 %v1486_v24  ;;  %v11317_v54 = vmov 0  ;;  %v1482_v24 = vld [vmem:[#allocation6 + $0x150] sm:$0xff]  ;;  %11326 = vst [vmem:[#allocation56_spill] sm:$0xff] %v8060_v33 }
  0x95   : > { %v11318_v54 = vsel %vm8008_vm11, 4294967295, %v11317_v54  ;;  %750 = vst [vmem:[#allocation2 + $0xc0] sm:$0xff] %v8060_v33 }
  0x96   : > { %1076 = vmatmul.f32.gmra.mxu1 %v7870_v21  ;;  %1724 = vmatpush.msrb.mxu0 %v1703_v4  ;;  %11319 = vst [vmem:[#allocation51_spill] sm:$0xff] %v11318_v54  ;;  %v1938_v4 = vld [vmem:[#allocation6 + $0x2f0] sm:$0xff]  ;;  %v11361_v54 = vmov 0 }
  0x97   : > { %1490 = vmatpush.msrb.mxu3 %v1485_v32  ;;  %v8012_v56 = vld [vmem:[#allocation2 + $0x7f] sm:$0xff]  ;;  %1941 = vmatpush.msrb.mxu1 %v1938_v4  ;;  %v8024_v16 = vld [vmem:[#allocation2 + $0x87] sm:$0xff]  ;;  %v8029_v32 = vld [vmem:[%s7602_s25 + $0x90] sm:$0xff] }
  0x98   : > { %1725 = vmatpush.msrb.mxu0 %v1702_v11  ;;  %11321 = vst [vmem:[#allocation53_spill] sm:$0xff] %v8029_v32  ;;  %v365_v11 = vand.u32 15, %v233_v25  ;;  %v1937_v4 = vld [vmem:[#allocation6 + $0x2e8] sm:$0xff]  ;;  %v1479_v25 = vld [vmem:[#allocation6 + $0x138] sm:$0xff] }
  0x99   : > { %966 = vmatmul.f32.gmra.mxu0 %v7935_v47  ;;  %1127 = vmatmul.f32.gmra.mxu3 %v7703_v41  ;;  %748 = vst [vmem:[#allocation2 + $0xb0] sm:$0xff] %v8029_v32 }
  0x9a   : > { %1491 = vmatpush.msrb.mxu3 %v1484_v1  ;;  %v1701_v1 = vld [vmem:[#allocation6 + $0x198] sm:$0xff]  ;;  %1942 = vmatpush.msrb.mxu1 %v1937_v4  ;;  %vm8035_vm12 = vcmp.gt.s32.totalorder %v365_v11, 0  ;;  %v1700_v4 = vld [vmem:[#allocation6 + $0x190] sm:$0xff] }
  0x9b   : > { %1241 = vmatmul.f32.gmra.mxu2 %v7852_v55  ;;  %1726 = vmatpush.msrb.mxu0 %v1701_v1  ;;  %v235_v55 = vadd.s32 144, %v7680_v34 }
  0x9c   : > { %1492 = vmatpush.msrb.mxu3 %v1483_v3  ;;  %v1480_v3 = vld [vmem:[#allocation6 + $0x140] sm:$0xff] }
  0x9d   : > { %1727 = vmatpush.msrb.mxu0 %v1700_v4  ;;  %v379_v4 = vand.u32 15, %v235_v55  ;;  %v8072_v55 = vld [vmem:[#allocation2 + $0x9f] sm:$0xff] }
  0x9e   : > { %1079 = vmatmul.f32.gmra.mxu1 %v7891_v13  ;;  %1493 = vmatpush.msrb.mxu3 %v1482_v24 }
  0x9f   : > { %vm8068_vm13 = vcmp.gt.s32.totalorder %v379_v4, 0 }
  0xa0   : > { %1494 = vmatpush.msrb.mxu3 %v1481_v52  ;;  %v11328_v36 = vsel %vm8068_vm13, 4294967295, %v11327_v36 }
  0xa1   : > { %6899 = vmatmul.msk.f32.gmra.mxu0 %vm7946_vm9, %v7950_v17  ;;  %1130 = vmatmul.f32.gmra.mxu3 %v7725_v50  ;;  %11329 = vst [vmem:[#allocation57_spill] sm:$0xff] %v11328_v36  ;;  %v8442_v36 = vld [vmem:[#allocation2 + $0xc1] sm:$0xff] }
  0xa2   : > { %1495 = vmatpush.msrb.mxu3 %v1480_v3  ;;  %v1478_v3 = vld [vmem:[#allocation6 + $0x130] sm:$0xff] }
  0xa3   : > { %1244 = vmatmul.f32.gmra.mxu2 %v7870_v21  ;;  %v8053_v21 = vld [vmem:[#allocation2 + $0x97] sm:$0xff] }
  0xa4   : > { %1496 = vmatpush.msrb.mxu3 %v1479_v25 }
  0xa6   : > { %1082 = vmatmul.f32.gmra.mxu1 %v7909_v30  ;;  %1497 = vmatpush.msrb.mxu3 %v1478_v3  ;;  %v2164_v3 = vld [vmem:[#allocation6 + $0x370] sm:$0xff] }
  0xa9   : > { %972 = vmatmul.f32.gmra.mxu0 %v7966_v40  ;;  %1133 = vmatmul.f32.gmra.mxu3 %v7762_v9 }
  0xab   : > { %1247 = vmatmul.f32.gmra.mxu2 %v7891_v13 }
  0xae   : > { %1085 = vmatmul.f32.gmra.mxu1 %v7926_v42 }
  0xb1   : > { %6900 = vmatmul.msk.f32.gmra.mxu0 %vm7981_vm10, %v7985_v15  ;;  %1136 = vmatmul.f32.gmra.mxu3 %v7787_v8 }
  0xb3   : > { %1250 = vmatmul.f32.gmra.mxu2 %v7909_v30  ;;  %v8043_v30 = vld [vmem:[%s7602_s25 + $0x98] sm:$0xff]  ;;  %s6799_s25 = sshll.u32 %s6796_s11, 4  ;;  %s6800_s25 = int_to_ptr.hbm [resolvable:$true] %s6799_s25 }
  0xb4   : > { %11325 = vst [vmem:[#allocation55_spill] sm:$0xff] %v8043_v30  ;;  %s7413_s18 = sshra.s32 %s6800_s25, 4  ;;  %s7414_s18 = int_to_ptr.hbm [resolvable:$true] %s7413_s18 }
  0xb5   : > { %749 = vst [vmem:[#allocation2 + $0xb8] sm:$0xff] %v8043_v30  ;;  %s7415_s23 = scalar_lea.hbm %s7414_s18, 256  ;;  %p7420_p11 = scmp.lt.s32.totalorder %s7414_s18, %s10997_s3 }
  0xb6   : > { %1088 = vmatmul.f32.gmra.mxu1 %v7940_v57  ;;  %p7416_p1 = scmp.ne.s32.totalorder %s7414_s18, %s7415_s23  ;;  %p7421_p9 = scmp.lt.s32.totalorder %s7419_s17, %s7415_s23 }
  0xb8   : > { %p7417_p4 = pnand %p7416_p1, %p7566_p3  ;;  %p7422_p2 = por %p7421_p9, %p7420_p11 }
  0xb9   : > { %978 = vmatmul.f32.gmra.mxu0 %v7997_v22  ;;  %1139 = vmatmul.f32.gmra.mxu3 %v7811_v20 }
  0xba   : > { %p7418_p8 = pneg %p7417_p4 }
  0xbb   : > { %1253 = vmatmul.f32.gmra.mxu2 %v7926_v42  ;;  %v8039_v42 = vld [vmem:[#allocation2 + $0x8f] sm:$0xff] }
  0xbc   : > { %p7423_p10 = pnand %p7422_p2, %p7418_p8 }
  0xbe   : > { %1091 = vmatmul.f32.gmra.mxu1 %v7954_v29 }
  0xc1   : > { %6901 = vmatmul.msk.f32.gmra.mxu0 %vm8008_vm11, %v8012_v56  ;;  %1142 = vmatmul.f32.gmra.mxu3 %v7962_v53 }
  0xc3   : > { %1256 = vmatmul.f32.gmra.mxu2 %v7940_v57  ;;  %v11322_v57 = vmov 0 }
  0xc4   : > { %v11323_v57 = vsel %vm8035_vm12, 4294967295, %v11322_v57 }
  0xc5   : > { %11324 = vst [vmem:[#allocation54_spill] sm:$0xff] %v11323_v57  ;;  %v2575_v57 = vld [vmem:[#allocation6 + $0x428] sm:$0xff] }
  0xc6   : > { %1094 = vmatmul.f32.gmra.mxu1 %v7971_v59 }
  0xc9   : > { %984 = vmatmul.f32.gmra.mxu0 %v8024_v16  ;;  %1145 = vmatmul.f32.gmra.mxu3 %v7977_v63 }
  0xcb   : > { %1259 = vmatmul.f32.gmra.mxu2 %v7954_v29 }
  0xce   : > { %v940_v24 = vpop.f32.mrf.mxu0  ;;  %1097 = vmatmul.f32.gmra.mxu1 %v7989_v18 }
  0xd1   : > { %6902 = vmatmul.msk.f32.gmra.mxu0 %vm8035_vm12, %v8039_v42  ;;  %1286 = vmatmul.f32.vlgmr.msra.gmra.mxu3 %v7666_v27 }
  0xd3   : > { %1262 = vmatmul.f32.gmra.mxu2 %v7971_v59  ;;  %v1053_v52 = vpop.f32.mrf.mxu1  ;;  %v2165_v59 = vld [vmem:[#allocation6 + $0x378] sm:$0xff] }
  0xd4   : > { %v8051_v1 = vpop.f32.mrf.mxu3  ;;  %v1054_v11 = vadd.f32 %v1053_v52, %v940_v24  ;;  %2166 = vmatpush.msrb.mxu2 %v2165_v59  ;;  %v1477_v24 = vld [vmem:[#allocation6 + $0x128] sm:$0xff]  ;;  %v1936_v52 = vld [vmem:[#allocation6 + $0x2e0] sm:$0xff] }
  0xd5   : > { %1498 = vmatpush.msrb.mxu3 %v1477_v24  ;;  %1943 = vmatpush.msrb.mxu1 %v1936_v52  ;;  %v2161_v52 = vld [vmem:[#allocation6 + $0x358] sm:$0xff] }
  0xd6   : > { %v943_v29 = vpop.f32.mrf.mxu0  ;;  %v1215_v13 = vpop.f32.mrf.mxu2  ;;  %1100 = vmatmul.f32.gmra.mxu1 %v8002_v28  ;;  %2167 = vmatpush.msrb.mxu2 %v2164_v3  ;;  %v2160_v3 = vld [vmem:[#allocation6 + $0x350] sm:$0xff] }
  0xd7   : > { %v8057_v25 = vadd.f32 %v1215_v13, %v1054_v11  ;;  %v2163_v11 = vld [vmem:[#allocation6 + $0x368] sm:$0xff]  ;;  %1499 = vmatpush.msrb.mxu3 %v1476_v31  ;;  %v1475_v31 = vld [vmem:[#allocation6 + $0x118] sm:$0xff] }
  0xd8   : > { %2168 = vmatpush.msrb.mxu2 %v2163_v11 }
  0xd9   : > { %990 = vmatmul.f32.gmra.mxu0 %v8053_v21  ;;  %1289 = vmatmul.f32.gmra.mxu3 %v7683_v35 }
  0xda   : > { %2169 = vmatpush.msrb.mxu2 %v2162_v5  ;;  %1500 = vmatpush.msrb.mxu3 %v1475_v31 }
  0xdb   : > { %1265 = vmatmul.f32.gmra.mxu2 %v7989_v18  ;;  %v1056_v13 = vpop.f32.mrf.mxu1  ;;  %v1934_v18 = vld [vmem:[#allocation6 + $0x2d0] sm:$0xff] }
  0xdc   : > { %v8066_v0 = vpop.f32.mrf.mxu3  ;;  %v1057_v59 = vadd.f32 %v1056_v13, %v943_v29  ;;  %v1699_v29 = vld [vmem:[#allocation6 + $0x188] sm:$0xff]  ;;  %2170 = vmatpush.msrb.mxu2 %v2161_v52  ;;  %v1935_v13 = vld [vmem:[#allocation6 + $0x2d8] sm:$0xff]  ;;  %v237_v52 = vadd.s32 160, %v7680_v34 }
  0xdd   : > { %1728 = vmatpush.msrb.mxu0 %v1699_v29  ;;  %1944 = vmatpush.msrb.mxu1 %v1935_v13  ;;  %v1933_v29 = vld [vmem:[#allocation6 + $0x2c8] sm:$0xff]  ;;  %v2156_v13 = vld [vmem:[#allocation6 + $0x330] sm:$0xff] }
  0xde   : > { %v946_v49 = vpop.f32.mrf.mxu0  ;;  %v1218_v39 = vpop.f32.mrf.mxu2  ;;  %1103 = vmatmul.f32.gmra.mxu1 %v8016_v58  ;;  %2171 = vmatpush.msrb.mxu2 %v2160_v3  ;;  %v1473_v3 = vld [vmem:[#allocation6 + $0x108] sm:$0xff] }
  0xdf   : > { %v8075_v24 = vadd.f32 %v1218_v39, %v1057_v59  ;;  %v2159_v39 = vld [vmem:[#allocation6 + $0x348] sm:$0xff]  ;;  %v1474_v59 = vld [vmem:[#allocation6 + $0x110] sm:$0xff]  ;;  %1945 = vmatpush.msrb.mxu1 %v1934_v18  ;;  %1729 = vmatpush.msrb.mxu0 %v1698_v61 }
  0xe0   : > { %1501 = vmatpush.msrb.mxu3 %v1474_v59  ;;  %2172 = vmatpush.msrb.mxu2 %v2159_v39  ;;  %v393_v59 = vand.u32 15, %v237_v52  ;;  %v1929_v61 = vld [vmem:[#allocation6 + $0x2a8] sm:$0xff] }
  0xe1   : > { %6903 = vmatmul.msk.f32.gmra.mxu0 %vm8068_vm13, %v8072_v55  ;;  %1292 = vmatmul.f32.gmra.mxu3 %v7694_v38  ;;  %v2158_v38 = vld [vmem:[#allocation6 + $0x340] sm:$0xff] }
  0xe2   : > { %2173 = vmatpush.msrb.mxu2 %v2158_v38  ;;  %1946 = vmatpush.msrb.mxu1 %v1933_v29  ;;  %v1931_v38 = vld [vmem:[#allocation6 + $0x2b8] sm:$0xff]  ;;  %vm8095_vm14 = vcmp.gt.s32.totalorder %v393_v59, 0  ;;  %v11330_v29 = vmov 0 }
  0xe3   : > { %1268 = vmatmul.f32.gmra.mxu2 %v8002_v28  ;;  %v1059_v4 = vpop.f32.mrf.mxu1  ;;  %1502 = vmatpush.msrb.mxu3 %v1473_v3  ;;  %v11331_v29 = vsel %vm8095_vm14, 4294967295, %v11330_v29  ;;  %v2153_v3 = vld [vmem:[#allocation6 + $0x318] sm:$0xff] }
  0xe4   : > { %v8082_v11 = vpop.f32.mrf.mxu3  ;;  %v1060_v5 = vadd.f32 %v1059_v4, %v946_v49  ;;  %v2157_v49 = vld [vmem:[#allocation6 + $0x338] sm:$0xff]  ;;  %v1932_v4 = vld [vmem:[#allocation6 + $0x2c0] sm:$0xff]  ;;  %11332 = vst [vmem:[#allocation58_spill] sm:$0xff] %v11331_v29 }
  0xe5   : > { %2174 = vmatpush.msrb.mxu2 %v2157_v49  ;;  %1947 = vmatpush.msrb.mxu1 %v1932_v4  ;;  %v8099_v49 = vld [vmem:[#allocation2 + $0xaf] sm:$0xff]  ;;  %v2359_v4 = vld [vmem:[#allocation6 + $0x3f8] sm:$0xff] }
  0xe6   : > { %v949_v63 = vpop.f32.mrf.mxu0  ;;  %v1221_v53 = vpop.f32.mrf.mxu2  ;;  %1106 = vmatmul.f32.gmra.mxu1 %v8029_v32 }
  0xe7   : > { %v8088_v31 = vadd.f32 %v1221_v53, %v1060_v5  ;;  %v2155_v53 = vld [vmem:[#allocation6 + $0x328] sm:$0xff]  ;;  %2175 = vmatpush.msrb.mxu2 %v2156_v13  ;;  %v1472_v5 = vld [vmem:[#allocation6 + $0x100] sm:$0xff]  ;;  %1948 = vmatpush.msrb.mxu1 %v1931_v38  ;;  %v2152_v13 = vld [vmem:[#allocation6 + $0x310] sm:$0xff] }
  0xe8   : > { %1503 = vmatpush.msrb.mxu3 %v1472_v5  ;;  %v2150_v5 = vld [vmem:[#allocation6 + $0x300] sm:$0xff] }
  0xe9   : > { %996 = vmatmul.f32.gmra.mxu0 %v8084_v10  ;;  %1295 = vmatmul.f32.gmra.mxu3 %v7703_v41  ;;  %v2154_v41 = vld [vmem:[#allocation6 + $0x320] sm:$0xff] }
  0xea   : > { %2176 = vmatpush.msrb.mxu2 %v2155_v53  ;;  %2360 = vmatpush.msra.mxu3 %v2359_v4  ;;  %v2151_v53 = vld [vmem:[#allocation6 + $0x308] sm:$0xff]  ;;  %v1927_v4 = vld [vmem:[#allocation6 + $0x298] sm:$0xff] }
  0xeb   : > { %1271 = vmatmul.f32.gmra.mxu2 %v8016_v58  ;;  %v1062_v28 = vpop.f32.mrf.mxu1 }
  0xec   : > { %v8093_v39 = vpop.f32.mrf.mxu3  ;;  %v1063_v18 = vadd.f32 %v1062_v28, %v949_v63  ;;  %v1930_v28 = vld [vmem:[#allocation6 + $0x2b0] sm:$0xff]  ;;  %2177 = vmatpush.msrb.mxu2 %v2154_v41  ;;  %v1928_v41 = vld [vmem:[#allocation6 + $0x2a0] sm:$0xff] }
  0xed   : > { %1949 = vmatpush.msrb.mxu1 %v1930_v28  ;;  %v239_v28 = vadd.s32 176, %v7680_v34 }
  0xee   : > { %v952_v51 = vpop.f32.mrf.mxu0  ;;  %v1224_v52 = vpop.f32.mrf.mxu2  ;;  %1109 = vmatmul.f32.gmra.mxu1 %v8043_v30  ;;  %2178 = vmatpush.msrb.mxu2 %v2153_v3 }
  0xef   : > { %v8102_v63 = vadd.f32 %v1224_v52, %v1063_v18  ;;  %1950 = vmatpush.msrb.mxu1 %v1929_v61  ;;  %v2585_v61 = vld [vmem:[#allocation6 + $0x478] sm:$0xff] }
  0xf0   : > { %2179 = vmatpush.msrb.mxu2 %v2152_v13  ;;  %v407_v13 = vand.u32 15, %v239_v28  ;;  %2586 = vmatpush.msra.mxu0 %v2585_v61 }
  0xf1   : > { %6904 = vmatmul.msk.f32.gmra.mxu0 %vm8095_vm14, %v8099_v49  ;;  %1298 = vmatmul.f32.gmra.mxu3 %v7725_v50  ;;  %v8111_v50 = vld [vmem:[#allocation2 + $0xb7] sm:$0xff] }
  0xf2   : > { %2180 = vmatpush.msrb.mxu2 %v2151_v53  ;;  %1951 = vmatpush.msrb.mxu1 %v1928_v41  ;;  %vm8122_vm15 = vcmp.gt.s32.totalorder %v407_v13, 0 }
  0xf3   : > { %1274 = vmatmul.f32.gmra.mxu2 %v8029_v32  ;;  %v1065_v59 = vpop.f32.mrf.mxu1 }
  0xf4   : > { %v8109_v18 = vpop.f32.mrf.mxu3  ;;  %v1066_v38 = vadd.f32 %v1065_v59, %v952_v51  ;;  %2181 = vmatpush.msrb.mxu2 %v2150_v5  ;;  %v1926_v51 = vld [vmem:[#allocation6 + $0x290] sm:$0xff]  ;;  %1952 = vmatpush.msrb.mxu1 %v1927_v4  ;;  %v11333_v5 = vmov 0  ;;  %v1924_v4 = vld [vmem:[#allocation6 + $0x280] sm:$0xff] }
  0xf5   : > { %v11334_v5 = vsel %vm8122_vm15, 4294967295, %v11333_v5 }
  0xf6   : > { %v955_v52 = vpop.f32.mrf.mxu0  ;;  %v1227_v58 = vpop.f32.mrf.mxu2  ;;  %1112 = vmatmul.f32.gmra.mxu1 %v8060_v33  ;;  %11335 = vst [vmem:[#allocation59_spill] sm:$0xff] %v11334_v5 }
  0xf7   : > { %v8115_v3 = vadd.f32 %v1227_v58, %v1066_v38  ;;  %1953 = vmatpush.msrb.mxu1 %v1926_v51  ;;  %v1925_v58 = vld [vmem:[#allocation6 + $0x288] sm:$0xff] }
  0xf9   : > { %1002 = vmatmul.f32.gmra.mxu0 %v8111_v50  ;;  %1301 = vmatmul.f32.gmra.mxu3 %v7762_v9  ;;  %v8126_v9 = vld [vmem:[#allocation2 + $0xbf] sm:$0xff] }
  0xfa   : > { %1954 = vmatpush.msrb.mxu1 %v1925_v58 }
  0xfb   : > { %1277 = vmatmul.f32.gmra.mxu2 %v8043_v30  ;;  %v1068_v59 = vpop.f32.mrf.mxu1  ;;  %v1343_v30 = vld [vmem:[#allocation2 + $0x11] sm:$0xff] }
  0xfc   : > { %v8120_v32 = vpop.f32.mrf.mxu3  ;;  %v1069_v53 = vadd.f32 %v1068_v59, %v955_v52  ;;  %v2358_v52 = vld [vmem:[#allocation6 + $0x3f0] sm:$0xff]  ;;  %1955 = vmatpush.msrb.mxu1 %v1924_v4 }
  0xfd   : > { %2361 = vmatpush.msra.mxu3 %v2358_v52  ;;  %v2584_v4 = vld [vmem:[#allocation6 + $0x470] sm:$0xff] }
  0xfe   : > { %v958_v38 = vpop.f32.mrf.mxu0  ;;  %v1230_v41 = vpop.f32.mrf.mxu2  ;;  %1115 = vmatmul.f32.gmra.mxu1 %v7663_v26  ;;  %2587 = vmatpush.msra.mxu0 %v2584_v4  ;;  %v2357_v4 = vld [vmem:[#allocation6 + $0x3e8] sm:$0xff] }
  0xff   : > { %v8129_v28 = vadd.f32 %v1230_v41, %v1069_v53  ;;  %v8138_v41 = vld [vmem:[#allocation2 + $0xc7] sm:$0xff]  ;;  %2362 = vmatpush.msra.mxu3 %v2357_v4 }
 0x100   : > { %v2583_v4 = vld [vmem:[#allocation6 + $0x468] sm:$0xff] }
 0x101   : > { %6905 = vmatmul.msk.f32.gmra.mxu0 %vm8122_vm15, %v8126_v9  ;;  %1304 = vmatmul.f32.gmra.mxu3 %v7787_v8 }
 0x102   : > { %2588 = vmatpush.msra.mxu0 %v2583_v4 }
 0x103   : > { %1280 = vmatmul.f32.gmra.mxu2 %v8060_v33  ;;  %v1071_v51 = vpop.f32.mrf.mxu1 }
 0x104   : > { %v8136_v61 = vpop.f32.mrf.mxu3  ;;  %v1072_v13 = vadd.f32 %v1071_v51, %v958_v38 }
 0x106   : > { %v961_v59 = vpop.f32.mrf.mxu0  ;;  %v1233_v53 = vpop.f32.mrf.mxu2  ;;  %1118 = vmatmul.f32.gmra.mxu1 %v7666_v27 }
 0x107   : > { %v8141_v58 = vadd.f32 %v1233_v53, %v1072_v13  ;;  %v218_v13 = vadd.s32 8, %v7680_v34 }
 0x109   : > { %1008 = vmatmul.f32.gmra.mxu0 %v8138_v41  ;;  %1307 = vmatmul.f32.gmra.mxu3 %v7811_v20  ;;  %v260_v20 = vand.u32 15, %v218_v13 }
 0x10b   : > { %1283 = vmatmul.f32.gmra.mxu2 %v7663_v26  ;;  %v1074_v52 = vpop.f32.mrf.mxu1  ;;  %vm8161_vm7 = vcmp.lt.s32.totalorder %v260_v20, 15 }
 0x10c   : > { %v8146_v8 = vpop.f32.mrf.mxu3  ;;  %v1075_v38 = vadd.f32 %v1074_v52, %v961_v59  ;;  %v1859_v59 = vld [vmem:[#allocation2 + $0x21] sm:$0xff] }
 0x10e   : > { %v964_v51 = vpop.f32.mrf.mxu0  ;;  %v1236_v33 = vpop.f32.mrf.mxu2  ;;  %1121 = vmatmul.f32.gmra.mxu1 %v7683_v35 }
 0x10f   : > { %v8150_v53 = vadd.f32 %v1236_v33, %v1075_v38  ;;  %v11336_v38 = vmov 0 }
 0x110   : > { %v11337_v38 = vsel %vm8161_vm7, 4294967295, %v11336_v38 }
 0x111   : > { %1504 = vmatmul.f32.vlgmr.msrb.gmra.mxu3 %v1343_v30  ;;  %6926 = vmatmul.msk.f32.vlgmr.msrb.gmra.mxu0 %vm7744_vm0, %v7798_v46  ;;  %11338 = vst [vmem:[#allocation60_spill] sm:$0xff] %v11337_v38  ;;  %v1344_v46 = vld [vmem:[#allocation2 + $0x19] sm:$0xff]  ;;  %v2508_v38 = vld [vmem:[#allocation2 + $0x49] sm:$0xff] }
 0x113   : > { %v1077_v27 = vpop.f32.mrf.mxu1  ;;  %6958 = vmatmul.msk.f32.vlgmr.msrb.gmra.mxu2 %vm7744_vm0, %v7842_v48 }
 0x114   : > { %v1125_v52 = vpop.f32.mrf.mxu3  ;;  %v1078_v35 = vadd.f32 %v1077_v27, %v964_v51 }
 0x115   : > { %v8159_v26 = vadd.f32 %v1125_v52, %v8051_v1  ;;  %v1860_v1 = vld [vmem:[#allocation2 + $0x29] sm:$0xff] }
 0x116   : > { %v967_v33 = vpop.f32.mrf.mxu0  ;;  %v1239_v30 = vpop.f32.mrf.mxu2  ;;  %1956 = vmatmul.f32.vlgmr.msrb.gmra.mxu1 %v1859_v59 }
 0x117   : > { %v8165_v13 = vadd.f32 %v1239_v30, %v1078_v35  ;;  %v220_v35 = vadd.s32 24, %v7680_v34 }
 0x119   : > { %6910 = vmatmul.msk.f32.gmra.mxu3 %vm8161_vm7, %v1344_v46  ;;  %1733 = vmatmul.f32.gmra.mxu0 %v7823_v23  ;;  %v2356_v23 = vld [vmem:[#allocation6 + $0x3e0] sm:$0xff]  ;;  %v274_v46 = vand.u32 15, %v220_v35 }
 0x11a   : > { %2363 = vmatpush.msra.mxu3 %v2356_v23  ;;  %v2582_v35 = vld [vmem:[#allocation6 + $0x460] sm:$0xff] }
 0x11b   : > { %v1080_v27 = vpop.f32.mrf.mxu1  ;;  %2185 = vmatmul.f32.gmra.mxu2 %v7863_v2  ;;  %vm8188_vm0 = vcmp.lt.s32.totalorder %v274_v46, 15  ;;  %2589 = vmatpush.msra.mxu0 %v2582_v35 }
 0x11c   : > { %v1128_v51 = vpop.f32.mrf.mxu3  ;;  %v1081_v20 = vadd.f32 %v1080_v27, %v967_v33 }
 0x11d   : > { %v8172_v52 = vadd.f32 %v1128_v51, %v8066_v0  ;;  %v1861_v0 = vld [vmem:[#allocation2 + $0x31] sm:$0xff] }
 0x11e   : > { %v970_v60 = vpop.f32.mrf.mxu0  ;;  %v1242_v62 = vpop.f32.mrf.mxu2  ;;  %6942 = vmatmul.msk.f32.gmra.mxu1 %vm8161_vm7, %v1860_v1 }
 0x11f   : > { %v8177_v30 = vadd.f32 %v1242_v62, %v1081_v20  ;;  %v11339_v20 = vmov 0 }
 0x120   : > { %v11340_v20 = vsel %vm8188_vm0, 4294967295, %v11339_v20 }
 0x121   : > { %1510 = vmatmul.f32.gmra.mxu3 %v1859_v59  ;;  %6927 = vmatmul.msk.f32.gmra.mxu0 %vm7794_vm2, %v7842_v48  ;;  %11341 = vst [vmem:[#allocation61_spill] sm:$0xff] %v11340_v20 }
 0x123   : > { %v1083_v33 = vpop.f32.mrf.mxu1  ;;  %6959 = vmatmul.msk.f32.gmra.mxu2 %vm7794_vm2, %v7882_v6 }
 0x124   : > { %v1131_v4 = vpop.f32.mrf.mxu3  ;;  %v1084_v27 = vadd.f32 %v1083_v33, %v970_v60 }
 0x125   : > { %v8186_v51 = vadd.f32 %v1131_v4, %v8082_v11  ;;  %v1862_v11 = vld [vmem:[#allocation2 + $0x39] sm:$0xff] }
 0x126   : > { %v973_v62 = vpop.f32.mrf.mxu0  ;;  %v1245_v59 = vpop.f32.mrf.mxu2  ;;  %1962 = vmatmul.f32.gmra.mxu1 %v1861_v0 }
 0x127   : > { %v8192_v48 = vadd.f32 %v1245_v59, %v1084_v27 }
 0x129   : > { %6911 = vmatmul.msk.f32.gmra.mxu3 %vm8188_vm0, %v1860_v1  ;;  %1739 = vmatmul.f32.gmra.mxu0 %v7863_v2  ;;  %v222_v1 = vadd.s32 40, %v7680_v34  ;;  %v2355_v2 = vld [vmem:[#allocation6 + $0x3d8] sm:$0xff] }
 0x12a   : > { %2364 = vmatpush.msra.mxu3 %v2355_v2 }
 0x12b   : > { %v1086_v60 = vpop.f32.mrf.mxu1  ;;  %2191 = vmatmul.f32.gmra.mxu2 %v7903_v19  ;;  %v288_v59 = vand.u32 15, %v222_v1  ;;  %v2581_v1 = vld [vmem:[#allocation6 + $0x458] sm:$0xff] }
 0x12c   : > { %v1134_v23 = vpop.f32.mrf.mxu3  ;;  %v1087_v33 = vadd.f32 %v1086_v60, %v973_v62  ;;  %2590 = vmatpush.msra.mxu0 %v2581_v1 }
 0x12d   : > { %v8199_v46 = vadd.f32 %v1134_v23, %v8093_v39  ;;  %v1863_v39 = vld [vmem:[#allocation2 + $0x41] sm:$0xff]  ;;  %vm8215_vm2 = vcmp.lt.s32.totalorder %v288_v59, 15 }
 0x12e   : > { %v976_v4 = vpop.f32.mrf.mxu0  ;;  %v1248_v45 = vpop.f32.mrf.mxu2  ;;  %6943 = vmatmul.msk.f32.gmra.mxu1 %vm8188_vm0, %v1862_v11 }
 0x12f   : > { %v8204_v27 = vadd.f32 %v1248_v45, %v1087_v33  ;;  %v11342_v33 = vmov 0 }
 0x130   : > { %v11343_v33 = vsel %vm8215_vm2, 4294967295, %v11342_v33 }
 0x131   : > { %1516 = vmatmul.f32.gmra.mxu3 %v1861_v0  ;;  %6928 = vmatmul.msk.f32.gmra.mxu0 %vm7838_vm4, %v7882_v6  ;;  %11344 = vst [vmem:[#allocation62_spill] sm:$0xff] %v11343_v33 }
 0x133   : > { %v1089_v62 = vpop.f32.mrf.mxu1  ;;  %6960 = vmatmul.msk.f32.gmra.mxu2 %vm7838_vm4, %v7921_v43 }
 0x134   : > { %v1137_v35 = vpop.f32.mrf.mxu3  ;;  %v1090_v60 = vadd.f32 %v1089_v62, %v976_v4 }
 0x135   : > { %v8213_v23 = vadd.f32 %v1137_v35, %v8109_v18  ;;  %v1864_v18 = vld [vmem:[#allocation2 + $0x49] sm:$0xff] }
 0x136   : > { %v979_v45 = vpop.f32.mrf.mxu0  ;;  %v1251_v0 = vpop.f32.mrf.mxu2  ;;  %1968 = vmatmul.f32.gmra.mxu1 %v1863_v39 }
 0x137   : > { %v8219_v6 = vadd.f32 %v1251_v0, %v1090_v60 }
 0x139   : > { %6912 = vmatmul.msk.f32.gmra.mxu3 %vm8215_vm2, %v1862_v11  ;;  %1745 = vmatmul.f32.gmra.mxu0 %v7903_v19  ;;  %v224_v11 = vadd.s32 56, %v7680_v34  ;;  %v2354_v19 = vld [vmem:[#allocation6 + $0x3d0] sm:$0xff] }
 0x13a   : > { %2365 = vmatpush.msra.mxu3 %v2354_v19 }
 0x13b   : > { %v1092_v4 = vpop.f32.mrf.mxu1  ;;  %2197 = vmatmul.f32.gmra.mxu2 %v7935_v47  ;;  %v302_v0 = vand.u32 15, %v224_v11  ;;  %v2580_v11 = vld [vmem:[#allocation6 + $0x450] sm:$0xff] }
 0x13c   : > { %v1140_v2 = vpop.f32.mrf.mxu3  ;;  %v1093_v62 = vadd.f32 %v1092_v4, %v979_v45  ;;  %2591 = vmatpush.msra.mxu0 %v2580_v11 }
 0x13d   : > { %v8226_v59 = vadd.f32 %v1140_v2, %v8120_v32  ;;  %v1865_v32 = vld [vmem:[#allocation2 + $0x51] sm:$0xff]  ;;  %vm8242_vm4 = vcmp.lt.s32.totalorder %v302_v0, 15 }
 0x13e   : > { %v982_v35 = vpop.f32.mrf.mxu0  ;;  %v1254_v44 = vpop.f32.mrf.mxu2  ;;  %6944 = vmatmul.msk.f32.gmra.mxu1 %vm8215_vm2, %v1864_v18 }
 0x13f   : > { %v8231_v60 = vadd.f32 %v1254_v44, %v1093_v62  ;;  %v11345_v62 = vmov 0 }
 0x140   : > { %v11346_v62 = vsel %vm8242_vm4, 4294967295, %v11345_v62 }
 0x141   : > { %1522 = vmatmul.f32.gmra.mxu3 %v1863_v39  ;;  %6929 = vmatmul.msk.f32.gmra.mxu0 %vm7878_vm6, %v7921_v43  ;;  %11347 = vst [vmem:[#allocation63_spill] sm:$0xff] %v11346_v62 }
 0x143   : > { %v1095_v45 = vpop.f32.mrf.mxu1  ;;  %6961 = vmatmul.msk.f32.gmra.mxu2 %vm7878_vm6, %v7950_v17 }
 0x144   : > { %v1143_v1 = vpop.f32.mrf.mxu3  ;;  %v1096_v4 = vadd.f32 %v1095_v45, %v982_v35 }
 0x145   : > { %v8240_v2 = vadd.f32 %v1143_v1, %v8136_v61  ;;  %v1866_v61 = vld [vmem:[#allocation2 + $0x59] sm:$0xff] }
 0x146   : > { %v985_v44 = vpop.f32.mrf.mxu0  ;;  %v1257_v39 = vpop.f32.mrf.mxu2  ;;  %1974 = vmatmul.f32.gmra.mxu1 %v1865_v32 }
 0x147   : > { %v8246_v43 = vadd.f32 %v1257_v39, %v1096_v4 }
 0x149   : > { %6913 = vmatmul.msk.f32.gmra.mxu3 %vm8242_vm4, %v1864_v18  ;;  %1751 = vmatmul.f32.gmra.mxu0 %v7935_v47  ;;  %v226_v18 = vadd.s32 72, %v7680_v34  ;;  %v2353_v47 = vld [vmem:[#allocation6 + $0x3c8] sm:$0xff] }
 0x14a   : > { %2366 = vmatpush.msra.mxu3 %v2353_v47 }
 0x14b   : > { %v1098_v35 = vpop.f32.mrf.mxu1  ;;  %2203 = vmatmul.f32.gmra.mxu2 %v7966_v40  ;;  %v316_v39 = vand.u32 15, %v226_v18  ;;  %v2579_v18 = vld [vmem:[#allocation6 + $0x448] sm:$0xff] }
 0x14c   : > { %v1146_v19 = vpop.f32.mrf.mxu3  ;;  %v1099_v45 = vadd.f32 %v1098_v35, %v985_v44  ;;  %2592 = vmatpush.msra.mxu0 %v2579_v18 }
 0x14d   : > { %v8253_v0 = vadd.f32 %v1146_v19, %v8146_v8  ;;  %v1867_v8 = vld [vmem:[#allocation2 + $0x61] sm:$0xff]  ;;  %vm8269_vm6 = vcmp.lt.s32.totalorder %v316_v39, 15 }
 0x14e   : > { %v988_v1 = vpop.f32.mrf.mxu0  ;;  %v1260_v7 = vpop.f32.mrf.mxu2  ;;  %6945 = vmatmul.msk.f32.gmra.mxu1 %vm8242_vm4, %v1866_v61 }
 0x14f   : > { %v8258_v4 = vadd.f32 %v1260_v7, %v1099_v45  ;;  %v11348_v45 = vmov 0 }
 0x150   : > { %v11349_v45 = vsel %vm8269_vm6, 4294967295, %v11348_v45 }
 0x151   : > { %1528 = vmatmul.f32.gmra.mxu3 %v1865_v32  ;;  %6930 = vmatmul.msk.f32.gmra.mxu0 %vm7917_vm8, %v7950_v17  ;;  %11350 = vst [vmem:[#allocation64_spill] sm:$0xff] %v11349_v45 }
 0x153   : > { %v1101_v44 = vpop.f32.mrf.mxu1  ;;  %6962 = vmatmul.msk.f32.gmra.mxu2 %vm7917_vm8, %v7985_v15 }
 0x154   : > { %v1287_v11 = vpop.f32.mrf.mxu3  ;;  %v1102_v35 = vadd.f32 %v1101_v44, %v988_v1 }
 0x155   : > { %v8267_v19 = vadd.f32 %v1287_v11, %v8159_v26  ;;  %v1868_v26 = vld [vmem:[#allocation2 + $0x69] sm:$0xff] }
 0x156   : > { %v991_v7 = vpop.f32.mrf.mxu0  ;;  %v1263_v32 = vpop.f32.mrf.mxu2  ;;  %1980 = vmatmul.f32.gmra.mxu1 %v1867_v8 }
 0x157   : > { %v8273_v17 = vadd.f32 %v1263_v32, %v1102_v35 }
 0x159   : > { %6914 = vmatmul.msk.f32.gmra.mxu3 %vm8269_vm6, %v1866_v61  ;;  %1757 = vmatmul.f32.gmra.mxu0 %v7966_v40  ;;  %v228_v61 = vadd.s32 88, %v7680_v34  ;;  %v2352_v40 = vld [vmem:[#allocation6 + $0x3c0] sm:$0xff] }
 0x15a   : > { %2367 = vmatpush.msra.mxu3 %v2352_v40 }
 0x15b   : > { %v1104_v1 = vpop.f32.mrf.mxu1  ;;  %2209 = vmatmul.f32.gmra.mxu2 %v7997_v22  ;;  %v330_v32 = vand.u32 15, %v228_v61  ;;  %v2578_v61 = vld [vmem:[#allocation6 + $0x440] sm:$0xff] }
 0x15c   : > { %v1290_v47 = vpop.f32.mrf.mxu3  ;;  %v1105_v44 = vadd.f32 %v1104_v1, %v991_v7  ;;  %2593 = vmatpush.msra.mxu0 %v2578_v61 }
 0x15d   : > { %v8280_v39 = vadd.f32 %v1290_v47, %v8172_v52  ;;  %v1869_v52 = vld [vmem:[#allocation2 + $0x71] sm:$0xff]  ;;  %vm8296_vm8 = vcmp.lt.s32.totalorder %v330_v32, 15 }
 0x15e   : > { %v994_v11 = vpop.f32.mrf.mxu0  ;;  %v1266_v37 = vpop.f32.mrf.mxu2  ;;  %6946 = vmatmul.msk.f32.gmra.mxu1 %vm8269_vm6, %v1868_v26 }
 0x15f   : > { %v8285_v35 = vadd.f32 %v1266_v37, %v1105_v44  ;;  %v11351_v44 = vmov 0 }
 0x160   : > { %v11352_v44 = vsel %vm8296_vm8, 4294967295, %v11351_v44 }
 0x161   : > { %1534 = vmatmul.f32.gmra.mxu3 %v1867_v8  ;;  %6931 = vmatmul.msk.f32.gmra.mxu0 %vm7946_vm9, %v7985_v15  ;;  %11353 = vst [vmem:[#allocation65_spill] sm:$0xff] %v11352_v44  ;;  %v2324_v44 = vld [vmem:[#allocation2 + $0x98] sm:$0xff] }
 0x163   : > { %v1107_v7 = vpop.f32.mrf.mxu1  ;;  %6963 = vmatmul.msk.f32.gmra.mxu2 %vm7946_vm9, %v8012_v56 }
 0x164   : > { %v1293_v18 = vpop.f32.mrf.mxu3  ;;  %v1108_v1 = vadd.f32 %v1107_v7, %v994_v11 }
 0x165   : > { %v8294_v47 = vadd.f32 %v1293_v18, %v8186_v51  ;;  %v1870_v51 = vld [vmem:[#allocation2 + $0x79] sm:$0xff] }
 0x166   : > { %v997_v37 = vpop.f32.mrf.mxu0  ;;  %v1269_v8 = vpop.f32.mrf.mxu2  ;;  %1986 = vmatmul.f32.gmra.mxu1 %v1869_v52 }
 0x167   : > { %v8300_v15 = vadd.f32 %v1269_v8, %v1108_v1 }
 0x169   : > { %6915 = vmatmul.msk.f32.gmra.mxu3 %vm8296_vm8, %v1868_v26  ;;  %1763 = vmatmul.f32.gmra.mxu0 %v7997_v22  ;;  %v230_v26 = vadd.s32 104, %v7680_v34  ;;  %v2351_v22 = vld [vmem:[#allocation6 + $0x3b8] sm:$0xff] }
 0x16a   : > { %2368 = vmatpush.msra.mxu3 %v2351_v22 }
 0x16b   : > { %v1110_v11 = vpop.f32.mrf.mxu1  ;;  %2215 = vmatmul.f32.gmra.mxu2 %v8024_v16  ;;  %v344_v8 = vand.u32 15, %v230_v26  ;;  %v1872_v26 = vld [vmem:[#allocation2 + $0x89] sm:$0xff] }
 0x16c   : > { %v1296_v40 = vpop.f32.mrf.mxu3  ;;  %v1111_v7 = vadd.f32 %v1110_v11, %v997_v37 }
 0x16d   : > { %v8307_v32 = vadd.f32 %v1296_v40, %v8199_v46  ;;  %v1871_v46 = vld [vmem:[#allocation2 + $0x81] sm:$0xff]  ;;  %vm8323_vm9 = vcmp.lt.s32.totalorder %v344_v8, 15 }
 0x16e   : > { %v1000_v18 = vpop.f32.mrf.mxu0  ;;  %v1272_v14 = vpop.f32.mrf.mxu2  ;;  %6947 = vmatmul.msk.f32.gmra.mxu1 %vm8296_vm8, %v1870_v51 }
 0x16f   : > { %11354 = vst [vmem:[#allocation66_spill] sm:$0xff] %v8307_v32  ;;  %v8312_v1 = vadd.f32 %v1272_v14, %v1111_v7  ;;  %v2925_v14 = vld [vmem:[#allocation6 + $0x78] sm:$0xff]  ;;  %v11355_v32 = vmov 0 }
 0x170   : > { %v11356_v32 = vsel %vm8323_vm9, 4294967295, %v11355_v32  ;;  %2926 = vmatpush.msra.mxu1 %v2925_v14 }
 0x171   : > { %1540 = vmatmul.f32.gmra.mxu3 %v1869_v52  ;;  %6932 = vmatmul.msk.f32.gmra.mxu0 %vm7981_vm10, %v8012_v56  ;;  %11357 = vst [vmem:[#allocation67_spill] sm:$0xff] %v11356_v32 }
 0x173   : > { %v1113_v37 = vpop.f32.mrf.mxu1  ;;  %6964 = vmatmul.msk.f32.gmra.mxu2 %vm7981_vm10, %v8039_v42 }
 0x174   : > { %v1299_v61 = vpop.f32.mrf.mxu3  ;;  %v1114_v11 = vadd.f32 %v1113_v37, %v1000_v18  ;;  %v2577_v18 = vld [vmem:[#allocation6 + $0x438] sm:$0xff] }
 0x175   : > { %v8321_v40 = vadd.f32 %v1299_v61, %v8213_v23  ;;  %2594 = vmatpush.msra.mxu0 %v2577_v18 }
 0x176   : > { %v1003_v52 = vpop.f32.mrf.mxu0  ;;  %v1275_v7 = vpop.f32.mrf.mxu2  ;;  %1992 = vmatmul.f32.gmra.mxu1 %v1871_v46 }
 0x177   : > { %v8327_v56 = vadd.f32 %v1275_v7, %v1114_v11 }
 0x179   : > { %6916 = vmatmul.msk.f32.gmra.mxu3 %vm8323_vm9, %v1870_v51  ;;  %1769 = vmatmul.f32.gmra.mxu0 %v8024_v16  ;;  %v232_v51 = vadd.s32 120, %v7680_v34  ;;  %v2350_v16 = vld [vmem:[#allocation6 + $0x3b0] sm:$0xff] }
 0x17a   : > { %2369 = vmatpush.msra.mxu3 %v2350_v16  ;;  %v8363_v16 = vld [vmem:[#allocation2 + $0x99] sm:$0xff] }
 0x17b   : > { %v1116_v23 = vpop.f32.mrf.mxu1  ;;  %2221 = vmatmul.f32.gmra.mxu2 %v8053_v21  ;;  %v358_v7 = vand.u32 15, %v232_v51 }
 0x17c   : > { %v1302_v22 = vpop.f32.mrf.mxu3  ;;  %v1117_v8 = vadd.f32 %v1116_v23, %v1003_v52 }
 0x17d   : > { %v8334_v37 = vadd.f32 %v1302_v22, %v8226_v59  ;;  %v8347_v59 = vld [vmem:[#allocation2 + $0x91] sm:$0xff]  ;;  %vm8352_vm10 = vcmp.lt.s32.totalorder %v358_v7, 15 }
 0x17e   : > { %v1006_v61 = vpop.f32.mrf.mxu0  ;;  %v1278_v11 = vpop.f32.mrf.mxu2  ;;  %6948 = vmatmul.msk.f32.gmra.mxu1 %vm8323_vm9, %v1872_v26 }
 0x17f   : > { %v8339_v14 = vadd.f32 %v1278_v11, %v1117_v8 }
 0x181   : > { %1546 = vmatmul.f32.gmra.mxu3 %v1871_v46  ;;  %6933 = vmatmul.msk.f32.gmra.mxu0 %vm8008_vm11, %v8039_v42  ;;  %v2924_v46 = vld [vmem:[#allocation6 + $0x70] sm:$0xff]  ;;  %v11358_v42 = vmov 0 }
 0x182   : > { %v11359_v42 = vsel %vm8352_vm10, 4294967295, %v11358_v42  ;;  %2927 = vmatpush.msra.mxu1 %v2924_v46  ;;  %v2349_v46 = vld [vmem:[#allocation6 + $0x3a8] sm:$0xff] }
 0x183   : > { %v1119_v52 = vpop.f32.mrf.mxu1  ;;  %6965 = vmatmul.msk.f32.gmra.mxu2 %vm8008_vm11, %v8072_v55  ;;  %11360 = vst [vmem:[#allocation68_spill] sm:$0xff] %v11359_v42  ;;  %2370 = vmatpush.msra.mxu3 %v2349_v46 }
 0x184   : > { %v1305_v18 = vpop.f32.mrf.mxu3  ;;  %v1120_v23 = vadd.f32 %v1119_v52, %v1006_v61  ;;  %v2576_v61 = vld [vmem:[#allocation6 + $0x430] sm:$0xff] }
 0x185   : > { %v8350_v22 = vadd.f32 %v1305_v18, %v8240_v2  ;;  %2595 = vmatpush.msra.mxu0 %v2576_v61  ;;  %v8381_v61 = vld [vmem:[#allocation2 + $0xa1] sm:$0xff] }
 0x186   : > { %v1009_v8 = vpop.f32.mrf.mxu0  ;;  %v1281_v11 = vpop.f32.mrf.mxu2  ;;  %1998 = vmatmul.f32.gmra.mxu1 %v8347_v59 }
 0x187   : > { %v8357_v51 = vadd.f32 %v1281_v11, %v1120_v23  ;;  %2596 = vmatpush.msra.mxu0 %v2575_v57 }
 0x189   : > { %6917 = vmatmul.msk.f32.gmra.mxu3 %vm8352_vm10, %v1872_v26  ;;  %1775 = vmatmul.f32.gmra.mxu0 %v8053_v21  ;;  %v234_v21 = vadd.s32 136, %v7680_v34 }
 0x18b   : > { %v1122_v2 = vpop.f32.mrf.mxu1  ;;  %2227 = vmatmul.f32.gmra.mxu2 %v8084_v10 }
 0x18c   : > { %v1308_v7 = vpop.f32.mrf.mxu3  ;;  %v1123_v52 = vadd.f32 %v1122_v2, %v1009_v8  ;;  %v372_v8 = vand.u32 15, %v234_v21 }
 0x18d   : > { %v8366_v18 = vadd.f32 %v1308_v7, %v8253_v0 }
 0x18e   : > { %v1731_v23 = vpop.f32.mrf.mxu0  ;;  %v1284_v11 = vpop.f32.mrf.mxu2  ;;  %6949 = vmatmul.msk.f32.gmra.mxu1 %vm8352_vm10, %v8363_v16  ;;  %vm8384_vm11 = vcmp.lt.s32.totalorder %v372_v8, 15 }
 0x18f   : > { %v8372_v26 = vadd.f32 %v1284_v11, %v1123_v52  ;;  %v2923_v52 = vld [vmem:[#allocation6 + $0x68] sm:$0xff]  ;;  %v11362_v54 = vsel %vm8384_vm11, 4294967295, %v11361_v54 }
 0x190   : > { %11363 = vst [vmem:[#allocation69_spill] sm:$0xff] %v11362_v54  ;;  %2928 = vmatpush.msra.mxu1 %v2923_v52  ;;  %v11364_v54 = vmov 0 }
 0x191   : > { %1552 = vmatmul.f32.gmra.mxu3 %v8347_v59  ;;  %6934 = vmatmul.msk.f32.gmra.mxu0 %vm8035_vm12, %v8072_v55 }
 0x193   : > { %6966 = vmatmul.msk.f32.gmra.mxu2 %vm8035_vm12, %v8099_v49  ;;  %v1957_v0 = vpop.f32.mrf.mxu1 }
 0x194   : > { %v1505_v2 = vpop.f32.mrf.mxu3 }
 0x195   : > { %v1601_v7 = vadd.f32 %v1505_v2, %v8057_v25  ;;  %v8396_v2 = vld [vmem:[#allocation2 + $0xa9] sm:$0xff] }
 0x196   : > { %v1734_v11 = vpop.f32.mrf.mxu0  ;;  %v2183_v55 = vpop.f32.mrf.mxu2  ;;  %2004 = vmatmul.f32.gmra.mxu1 %v8381_v61 }
 0x197   : > { %v1827_v21 = vadd.f32 %v1731_v23, %v1601_v7 }
 0x199   : > { %v2053_v46 = vadd.f32 %v1957_v0, %v1827_v21  ;;  %6918 = vmatmul.msk.f32.gmra.mxu3 %vm8384_vm11, %v8363_v16  ;;  %1781 = vmatmul.f32.gmra.mxu0 %v8084_v10  ;;  %v236_v10 = vadd.s32 152, %v7680_v34 }
 0x19b   : > { %v8393_v25 = vadd.f32 %v2183_v55, %v2053_v46  ;;  %2233 = vmatmul.f32.gmra.mxu2 %v8111_v50  ;;  %v1960_v8 = vpop.f32.mrf.mxu1  ;;  %v2348_v55 = vld [vmem:[#allocation6 + $0x3a0] sm:$0xff]  ;;  %v386_v21 = vand.u32 15, %v236_v10  ;;  %v8412_v46 = vld [vmem:[#allocation2 + $0xb1] sm:$0xff] }
 0x19c   : > { %v1508_v12 = vpop.f32.mrf.mxu3  ;;  %2371 = vmatpush.msra.mxu3 %v2348_v55 }
 0x19d   : > { %v1602_v23 = vadd.f32 %v1508_v12, %v8075_v24  ;;  %vm8415_vm12 = vcmp.lt.s32.totalorder %v386_v21, 15  ;;  %v8427_v21 = vld [vmem:[#allocation2 + $0xb9] sm:$0xff] }
 0x19e   : > { %v1737_v7 = vpop.f32.mrf.mxu0  ;;  %v2186_v0 = vpop.f32.mrf.mxu2  ;;  %6950 = vmatmul.msk.f32.gmra.mxu1 %vm8384_vm11, %v8396_v2  ;;  %v11365_v54 = vsel %vm8415_vm12, 4294967295, %v11364_v54 }
 0x19f   : > { %v1828_v52 = vadd.f32 %v1734_v11, %v1602_v23  ;;  %v2922_v23 = vld [vmem:[#allocation6 + $0x60] sm:$0xff]  ;;  %11366 = vst [vmem:[#allocation70_spill] sm:$0xff] %v11365_v54  ;;  %v11367_v54 = vmov 0 }
 0x1a0   : > { %2929 = vmatpush.msra.mxu1 %v2922_v23 }
 0x1a1   : > { %v2054_v57 = vadd.f32 %v1960_v8, %v1828_v52  ;;  %1558 = vmatmul.f32.gmra.mxu3 %v8381_v61  ;;  %6935 = vmatmul.msk.f32.gmra.mxu0 %vm8068_vm13, %v8099_v49 }
 0x1a3   : > { %v8407_v12 = vadd.f32 %v2186_v0, %v2054_v57  ;;  %6967 = vmatmul.msk.f32.gmra.mxu2 %vm8068_vm13, %v8126_v9  ;;  %v1963_v24 = vpop.f32.mrf.mxu1  ;;  %v2574_v57 = vld [vmem:[#allocation6 + $0x420] sm:$0xff] }
 0x1a4   : > { %v1511_v11 = vpop.f32.mrf.mxu3  ;;  %2597 = vmatpush.msra.mxu0 %v2574_v57 }
 0x1a5   : > { %v1603_v8 = vadd.f32 %v1511_v11, %v8088_v31 }
 0x1a6   : > { %v1740_v52 = vpop.f32.mrf.mxu0  ;;  %v2189_v49 = vpop.f32.mrf.mxu2  ;;  %2010 = vmatmul.f32.gmra.mxu1 %v8412_v46 }
 0x1a7   : > { %v1829_v0 = vadd.f32 %v1737_v7, %v1603_v8 }
 0x1a9   : > { %v2055_v10 = vadd.f32 %v1963_v24, %v1829_v0  ;;  %6919 = vmatmul.msk.f32.gmra.mxu3 %vm8415_vm12, %v8396_v2  ;;  %1787 = vmatmul.f32.gmra.mxu0 %v8111_v50  ;;  %v238_v50 = vadd.s32 168, %v7680_v34  ;;  %v2105_v0 = vld [vmem:[#allocation2 + $0xcf] sm:$0xff] }
 0x1ab   : > { %v8424_v31 = vadd.f32 %v2189_v49, %v2055_v10  ;;  %2239 = vmatmul.f32.gmra.mxu2 %v8138_v41  ;;  %v1966_v55 = vpop.f32.mrf.mxu1  ;;  %v2347_v10 = vld [vmem:[#allocation6 + $0x398] sm:$0xff]  ;;  %v400_v57 = vand.u32 15, %v238_v50 }
 0x1ac   : > { %v1514_v11 = vpop.f32.mrf.mxu3  ;;  %2372 = vmatpush.msra.mxu3 %v2347_v10  ;;  %v2106_v50 = vld [vmem:[#allocation2 + $0xd7] sm:$0xff] }
 0x1ad   : > { %v1604_v7 = vadd.f32 %v1514_v11, %v8102_v63  ;;  %vm8445_vm13 = vcmp.lt.s32.totalorder %v400_v57, 15 }
 0x1ae   : > { %v1743_v8 = vpop.f32.mrf.mxu0  ;;  %v2192_v24 = vpop.f32.mrf.mxu2  ;;  %6951 = vmatmul.msk.f32.gmra.mxu1 %vm8415_vm12, %v8427_v21  ;;  %v11368_v54 = vsel %vm8445_vm13, 4294967295, %v11367_v54 }
 0x1af   : > { %v1830_v23 = vadd.f32 %v1740_v52, %v1604_v7  ;;  %v2921_v7 = vld [vmem:[#allocation6 + $0x58] sm:$0xff]  ;;  %11369 = vst [vmem:[#allocation71_spill] sm:$0xff] %v11368_v54 }
 0x1b0   : > { %2930 = vmatpush.msra.mxu1 %v2921_v7 }
 0x1b1   : > { %v2056_v49 = vadd.f32 %v1966_v55, %v1830_v23  ;;  %1564 = vmatmul.f32.gmra.mxu3 %v8412_v46  ;;  %6936 = vmatmul.msk.f32.gmra.mxu0 %vm8095_vm14, %v8126_v9 }
 0x1b3   : > { %v8438_v63 = vadd.f32 %v2192_v24, %v2056_v49  ;;  %6968 = vmatmul.msk.f32.gmra.mxu2 %vm8095_vm14, %v2105_v0  ;;  %v1969_v11 = vpop.f32.mrf.mxu1 }
 0x1b4   : > { %v1517_v52 = vpop.f32.mrf.mxu3 }
 0x1b5   : > { %v1605_v55 = vadd.f32 %v1517_v52, %v8115_v3  ;;  %v2573_v3 = vld [vmem:[#allocation6 + $0x418] sm:$0xff]  ;;  %v8456_v52 = vld [vmem:[#allocation2 + $0xc9] sm:$0xff] }
 0x1b6   : > { %v1746_v23 = vpop.f32.mrf.mxu0  ;;  %v2195_v9 = vpop.f32.mrf.mxu2  ;;  %2016 = vmatmul.f32.gmra.mxu1 %v8442_v36  ;;  %2598 = vmatpush.msra.mxu0 %v2573_v3 }
 0x1b7   : > { %v1831_v24 = vadd.f32 %v1743_v8, %v1605_v55 }
 0x1b9   : > { %v2057_v49 = vadd.f32 %v1969_v11, %v1831_v24  ;;  %6920 = vmatmul.msk.f32.gmra.mxu3 %vm8445_vm13, %v8427_v21  ;;  %1793 = vmatmul.f32.gmra.mxu0 %v8138_v41  ;;  %v240_v11 = vadd.s32 184, %v7680_v34  ;;  %v2107_v24 = vld [vmem:[#allocation2 + $0xdf] sm:$0xff] }
 0x1bb   : > { %v8454_v10 = vadd.f32 %v2195_v9, %v2057_v49  ;;  %2245 = vmatmul.f32.gmra.mxu2 %v2106_v50  ;;  %v1972_v57 = vpop.f32.mrf.mxu1  ;;  %v2346_v9 = vld [vmem:[#allocation6 + $0x390] sm:$0xff]  ;;  %v414_v49 = vand.u32 15, %v240_v11  ;;  %v2108_v11 = vld [vmem:[#allocation2 + $0xe7] sm:$0xff] }
 0x1bc   : > { %v1520_v29 = vpop.f32.mrf.mxu3  ;;  %2373 = vmatpush.msra.mxu3 %v2346_v9  ;;  %v2572_v9 = vld [vmem:[#allocation6 + $0x410] sm:$0xff] }
 0x1bd   : > { %11370 = vst [vmem:[#allocation72_spill] sm:$0xff] %v8454_v10  ;;  %v1606_v8 = vadd.f32 %v1520_v29, %v8129_v28  ;;  %v8470_v28 = vld [vmem:[#allocation2 + $0xd1] sm:$0xff]  ;;  %vm8473_vm14 = vcmp.lt.s32.totalorder %v414_v49, 15  ;;  %2599 = vmatpush.msra.mxu0 %v2572_v9 }
 0x1be   : > { %v1749_v55 = vpop.f32.mrf.mxu0  ;;  %v2198_v7 = vpop.f32.mrf.mxu2  ;;  %6952 = vmatmul.msk.f32.gmra.mxu1 %vm8445_vm13, %v8456_v52 }
 0x1bf   : > { %v1832_v41 = vadd.f32 %v1746_v23, %v1606_v8 }
 0x1c1   : > { %v2058_v3 = vadd.f32 %v1972_v57, %v1832_v41  ;;  %1570 = vmatmul.f32.gmra.mxu3 %v8442_v36  ;;  %6937 = vmatmul.msk.f32.gmra.mxu0 %vm8122_vm15, %v2105_v0  ;;  %v2920_v57 = vld [vmem:[#allocation6 + $0x50] sm:$0xff]  ;;  %v11372_v41 = vmov 0 }
 0x1c2   : > { %v11373_v41 = vsel %vm8473_vm14, 4294967295, %v11372_v41  ;;  %2931 = vmatpush.msra.mxu1 %v2920_v57  ;;  %v2109_v57 = vld [vmem:[#allocation2 + $0xef] sm:$0xff] }
 0x1c3   : > { %v8466_v29 = vadd.f32 %v2198_v7, %v2058_v3  ;;  %6969 = vmatmul.msk.f32.gmra.mxu2 %vm8122_vm15, %v2107_v24  ;;  %v1975_v10 = vpop.f32.mrf.mxu1  ;;  %11374 = vst [vmem:[#allocation74_spill] sm:$0xff] %v11373_v41 }
 0x1c4   : > { %v1523_v54 = vpop.f32.mrf.mxu3 }
 0x1c5   : > { %11371 = vst [vmem:[#allocation73_spill] sm:$0xff] %v8466_v29  ;;  %v1607_v23 = vadd.f32 %v1523_v54, %v8141_v58  ;;  %v8483_v58 = vld [vmem:[#allocation2 + $0xd9] sm:$0xff] }
 0x1c6   : > { %v1752_v8 = vpop.f32.mrf.mxu0  ;;  %v2201_v0 = vpop.f32.mrf.mxu2  ;;  %2022 = vmatmul.f32.gmra.mxu1 %v8470_v28 }
 0x1c7   : > { %v1833_v7 = vadd.f32 %v1749_v55, %v1607_v23 }
 0x1c9   : > { %v2059_v3 = vadd.f32 %v1975_v10, %v1833_v7  ;;  %6921 = vmatmul.msk.f32.gmra.mxu3 %vm8473_vm14, %v8456_v52  ;;  %1799 = vmatmul.f32.gmra.mxu0 %v2106_v50  ;;  %v242_v10 = vadd.s32 200, %v7680_v34 }
 0x1cb   : > { %v8481_v54 = vadd.f32 %v2201_v0, %v2059_v3  ;;  %2251 = vmatmul.f32.gmra.mxu2 %v2108_v11  ;;  %v1978_v55 = vpop.f32.mrf.mxu1  ;;  %v2345_v3 = vld [vmem:[#allocation6 + $0x388] sm:$0xff]  ;;  %v428_v9 = vand.u32 15, %v242_v10  ;;  %v2110_v10 = vld [vmem:[#allocation2 + $0xf7] sm:$0xff] }
 0x1cc   : > { %v1526_v49 = vpop.f32.mrf.mxu3  ;;  %2374 = vmatpush.msra.mxu3 %v2345_v3 }
 0x1cd   : > { %v1608_v5 = vadd.f32 %v1526_v49, %v8150_v53  ;;  %v8497_v49 = vld [vmem:[#allocation2 + $0xe1] sm:$0xff]  ;;  %vm8500_vm15 = vcmp.lt.s32.totalorder %v428_v9, 15 }
 0x1ce   : > { %v1755_v29 = vpop.f32.mrf.mxu0  ;;  %6953 = vmatmul.msk.f32.gmra.mxu1 %vm8473_vm14, %v8483_v58  ;;  %v2204_v50 = vpop.f32.mrf.mxu2 }
 0x1cf   : > { %v1834_v23 = vadd.f32 %v1752_v8, %v1608_v5  ;;  %v2919_v8 = vld [vmem:[#allocation6 + $0x48] sm:$0xff] }
 0x1d0   : > { %2932 = vmatpush.msra.mxu1 %v2919_v8  ;;  %v2344_v8 = vld [vmem:[#allocation6 + $0x380] sm:$0xff] }
 0x1d1   : > { %v2060_v7 = vadd.f32 %v1978_v55, %v1834_v23  ;;  %1576 = vmatmul.f32.gmra.mxu3 %v8470_v28  ;;  %6938 = vmatmul.msk.f32.gmra.mxu0 %vm7748_vm1, %v2107_v24  ;;  %v11376_v23 = vmov 0 }
 0x1d2   : > { %v11377_v23 = vsel %vm8500_vm15, 4294967295, %v11376_v23  ;;  %2375 = vmatpush.msra.mxu3 %v2344_v8  ;;  %v2570_v8 = vld [vmem:[#allocation6 + $0x400] sm:$0xff] }
 0x1d3   : > { %v8493_v53 = vadd.f32 %v2204_v50, %v2060_v7  ;;  %6970 = vmatmul.msk.f32.gmra.mxu2 %vm7748_vm1, %v2109_v57  ;;  %11378 = vst [vmem:[#allocation75_spill] sm:$0xff] %v11377_v23  ;;  %v2571_v50 = vld [vmem:[#allocation6 + $0x408] sm:$0xff]  ;;  %v2918_v23 = vld [vmem:[#allocation6 + $0x40] sm:$0xff] }
 0x1d4   : > { %v1529_v41 = vpop.f32.mrf.mxu3  ;;  %2600 = vmatpush.msra.mxu0 %v2571_v50  ;;  %2933 = vmatpush.msra.mxu1 %v2918_v23 }
 0x1d5   : > { %v1609_v5 = vadd.f32 %v1529_v41, %v8165_v13  ;;  %v8510_v13 = vld [vmem:[#allocation2 + $0xe9] sm:$0xff] }
 0x1d6   : > { %v1758_v55 = vpop.f32.mrf.mxu0  ;;  %2028 = vmatmul.f32.gmra.mxu1 %v8497_v49  ;;  %2601 = vmatpush.msra.mxu0 %v2570_v8  ;;  %v2845_v8 = vld [vmem:[#allocation6 + $0x278] sm:$0xff] }
 0x1d7   : > { %v8505_v24 = vadd.f32 %v1755_v29, %v1609_v5  ;;  %v244_v29 = vadd.s32 216, %v7680_v34  ;;  %v2111_v5 = vld [vmem:[#allocation2 + $0xff] sm:$0xff]  ;;  %3039 = vmatpush.msra.mxu2 %v2845_v8  ;;  %v8564_v8 = vld [vmem:[#allocation2 + $0x109] sm:$0xff] }
 0x1d9   : > { %6922 = vmatmul.msk.f32.gmra.mxu3 %vm8500_vm15, %v8483_v58  ;;  %1805 = vmatmul.f32.gmra.mxu0 %v2108_v11  ;;  %v442_v50 = vand.u32 15, %v244_v29  ;;  %v2112_v29 = vld [vmem:[#allocation2 + $0x107] sm:$0xff] }
 0x1db   : > { %2257 = vmatmul.f32.gmra.mxu2 %v2110_v10  ;;  %vm8527_vm1 = vcmp.lt.s32.totalorder %v442_v50, 15 }
 0x1dc   : > { %v1532_v41 = vpop.f32.mrf.mxu3 }
 0x1dd   : > { %v1610_v7 = vadd.f32 %v1532_v41, %v8177_v30  ;;  %v8524_v30 = vld [vmem:[#allocation2 + $0xf1] sm:$0xff] }
 0x1de   : > { %v1761_v3 = vpop.f32.mrf.mxu0  ;;  %6954 = vmatmul.msk.f32.gmra.mxu1 %vm8500_vm15, %v8510_v13 }
 0x1df   : > { %v8517_v9 = vadd.f32 %v1758_v55, %v1610_v7  ;;  %v11381_v7 = vmov 0 }
 0x1e0   : > { %v11382_v7 = vsel %vm8527_vm1, 4294967295, %v11381_v7 }
 0x1e1   : > { %11379 = vst [vmem:[#allocation76_spill] sm:$0xff] %v8517_v9  ;;  %1582 = vmatmul.f32.gmra.mxu3 %v8497_v49  ;;  %6939 = vmatmul.msk.f32.gmra.mxu0 %vm7800_vm3, %v2109_v57  ;;  %v2917_v9 = vld [vmem:[#allocation6 + $0x38] sm:$0xff] }
 0x1e2   : > { %11383 = vst [vmem:[#allocation77_spill] sm:$0xff] %v11382_v7  ;;  %2934 = vmatpush.msra.mxu1 %v2917_v9 }
 0x1e3   : > { %6971 = vmatmul.msk.f32.gmra.mxu2 %vm7800_vm3, %v2111_v5 }
 0x1e4   : > { %v1535_v41 = vpop.f32.mrf.mxu3 }
 0x1e5   : > { %v1611_v0 = vadd.f32 %v1535_v41, %v8192_v48  ;;  %v8537_v48 = vld [vmem:[#allocation2 + $0xf9] sm:$0xff] }
 0x1e6   : > { %v1764_v55 = vpop.f32.mrf.mxu0  ;;  %2034 = vmatmul.f32.gmra.mxu1 %v8524_v30 }
 0x1e7   : > { %v8532_v57 = vadd.f32 %v1761_v3, %v1611_v0  ;;  %v246_v0 = vadd.s32 232, %v7680_v34  ;;  %v2113_v3 = vld [vmem:[#allocation2 + $0x10f] sm:$0xff] }
 0x1e9   : > { %11384 = vst [vmem:[#allocation78_spill] sm:$0xff] %v8532_v57  ;;  %6923 = vmatmul.msk.f32.gmra.mxu3 %vm8527_vm1, %v8510_v13  ;;  %1811 = vmatmul.f32.gmra.mxu0 %v2110_v10  ;;  %v456_v57 = vand.u32 15, %v246_v0  ;;  %v2114_v0 = vld [vmem:[#allocation2 + $0x117] sm:$0xff]  ;;  %v11391_v10 = vld [vmem:[#allocation37_spill] sm:$0xff] }
 0x1eb   : > { %2263 = vmatmul.f32.gmra.mxu2 %v2112_v29  ;;  %vm8554_vm3 = vcmp.lt.s32.totalorder %v456_v57, 15 }
 0x1ec   : > { %v1538_v50 = vpop.f32.mrf.mxu3 }
 0x1ed   : > { %v1612_v41 = vadd.f32 %v1538_v50, %v8204_v27  ;;  %v8551_v27 = vld [vmem:[#allocation2 + $0x101] sm:$0xff] }
 0x1ee   : > { %v1767_v11 = vpop.f32.mrf.mxu0  ;;  %6955 = vmatmul.msk.f32.gmra.mxu1 %vm8527_vm1, %v8537_v48 }
 0x1ef   : > { %v8544_v23 = vadd.f32 %v1764_v55, %v1612_v41  ;;  %v11386_v41 = vmov 0 }
 0x1f0   : > { %v11387_v41 = vsel %vm8554_vm3, 4294967295, %v11386_v41 }
 0x1f1   : > { %1588 = vmatmul.f32.gmra.mxu3 %v8524_v30  ;;  %6940 = vmatmul.msk.f32.gmra.mxu0 %vm7844_vm5, %v2111_v5  ;;  %11388 = vst [vmem:[#allocation79_spill] sm:$0xff] %v11387_v41 }
 0x1f3   : > { %6972 = vmatmul.msk.f32.gmra.mxu2 %vm7844_vm5, %v2113_v3  ;;  %vm11392_vm5 = vnez %v11391_v10  ;;  %v2505_v10 = vld [vmem:[#allocation2 + $0x31] sm:$0xff] }
 0x1f4   : > { %v1541_v50 = vpop.f32.mrf.mxu3 }
 0x1f5   : > { %v1613_v7 = vadd.f32 %v1541_v50, %v8219_v6 }
 0x1f6   : > { %v1770_v55 = vpop.f32.mrf.mxu0  ;;  %2040 = vmatmul.f32.gmra.mxu1 %v8551_v27 }
 0x1f7   : > { %v8559_v5 = vadd.f32 %v1767_v11, %v1613_v7  ;;  %v248_v11 = vadd.s32 248, %v7680_v34  ;;  %v2115_v7 = vld [vmem:[#allocation2 + $0x11f] sm:$0xff]  ;;  %v2916_v34 = vld [vmem:[#allocation6 + $0x30] sm:$0xff] }
 0x1f8   : > { %2935 = vmatpush.msra.mxu1 %v2916_v34 }
 0x1f9   : > { %11389 = vst [vmem:[#allocation80_spill] sm:$0xff] %v8559_v5  ;;  %6924 = vmatmul.msk.f32.gmra.mxu3 %vm8554_vm3, %v8537_v48  ;;  %1817 = vmatmul.f32.gmra.mxu0 %v2112_v29  ;;  %v2844_v29 = vld [vmem:[#allocation6 + $0x270] sm:$0xff]  ;;  %v470_v5 = vand.u32 15, %v248_v11  ;;  %v2116_v11 = vld [vmem:[#allocation2 + $0x127] sm:$0xff] }
 0x1fa   : > { %3040 = vmatpush.msra.mxu2 %v2844_v29 }
 0x1fb   : > { %2269 = vmatmul.f32.gmra.mxu2 %v2114_v0 }
 0x1fc   : > { %v1544_v6 = vpop.f32.mrf.mxu3 }
 0x1fd   : > { %v1614_v57 = vadd.f32 %v1544_v6, %v8231_v60  ;;  %v8578_v60 = vld [vmem:[#allocation2 + $0x111] sm:$0xff] }
 0x1fe   : > { %v1773_v50 = vpop.f32.mrf.mxu0  ;;  %6956 = vmatmul.msk.f32.gmra.mxu1 %vm8554_vm3, %v8564_v8  ;;  %vm8581_vm3 = vcmp.lt.s32.totalorder %v470_v5, 15 }
 0x1ff   : > { %v8571_v9 = vadd.f32 %v1770_v55, %v1614_v57  ;;  %v11393_v57 = vmov 0 }
 0x200   : > { %v11394_v57 = vsel %vm8581_vm3, 4294967295, %v11393_v57 }
 0x201   : > { %11390 = vst [vmem:[#allocation81_spill] sm:$0xff] %v8571_v9  ;;  %1594 = vmatmul.f32.gmra.mxu3 %v8551_v27  ;;  %6941 = vmatmul.msk.f32.gmra.mxu0 %vm11392_vm5, %v2113_v3  ;;  %v2312_v9 = vld [vmem:[#allocation2 + $0x38] sm:$0xff] }
 0x202   : > { %11395 = vst [vmem:[#allocation82_spill] sm:$0xff] %v11394_v57 }
 0x203   : > { %6973 = vmatmul.msk.f32.gmra.mxu2 %vm11392_vm5, %v2115_v7  ;;  %v8591_v7 = vld [vmem:[#allocation2 + $0x119] sm:$0xff] }
 0x204   : > { %v1547_v6 = vpop.f32.mrf.mxu3 }
 0x205   : > { %v1615_v41 = vadd.f32 %v1547_v6, %v8246_v43  ;;  %v2311_v6 = vld [vmem:[#allocation2 + $0x30] sm:$0xff] }
 0x206   : > { %v1776_v55 = vpop.f32.mrf.mxu0  ;;  %2046 = vmatmul.f32.gmra.mxu1 %v8578_v60 }
 0x207   : > { %v8586_v3 = vadd.f32 %v1773_v50, %v1615_v41  ;;  %v2843_v50 = vld [vmem:[#allocation6 + $0x268] sm:$0xff] }
 0x208   : > { %3041 = vmatpush.msra.mxu2 %v2843_v50  ;;  %v2507_v50 = vld [vmem:[#allocation2 + $0x41] sm:$0xff] }
 0x209   : > { %11396 = vst [vmem:[#allocation83_spill] sm:$0xff] %v8586_v3  ;;  %6925 = vmatmul.msk.f32.gmra.mxu3 %vm8581_vm3, %v8564_v8  ;;  %1823 = vmatmul.f32.gmra.mxu0 %v2114_v0 }
 0x20b   : > { %2275 = vmatmul.f32.gmra.mxu2 %v2116_v11  ;;  %v2915_v11 = vld [vmem:[#allocation6 + $0x28] sm:$0xff] }
 0x20c   : > { %v1550_v43 = vpop.f32.mrf.mxu3  ;;  %2936 = vmatpush.msra.mxu1 %v2915_v11 }
 0x20d   : > { %v1616_v5 = vadd.f32 %v1550_v43, %v8258_v4  ;;  %v2506_v4 = vld [vmem:[#allocation2 + $0x39] sm:$0xff] }
 0x20e   : > { %v1779_v29 = vpop.f32.mrf.mxu0  ;;  %6957 = vmatmul.msk.f32.gmra.mxu1 %vm8581_vm3, %v8591_v7 }
 0x20f   : > { %v8597_v41 = vadd.f32 %v1776_v55, %v1616_v5 }
 0x211   : > { %2376 = vmatmul.f32.vlgmr.msra.gmra.mxu3 %v2311_v6  ;;  %2602 = vmatmul.f32.vlgmr.msra.gmra.mxu0 %v2505_v10  ;;  %v2313_v6 = vld [vmem:[#allocation2 + $0x40] sm:$0xff] }
 0x214   : > { %v1553_v0 = vpop.f32.mrf.mxu3 }
 0x215   : > { %v1617_v34 = vadd.f32 %v1553_v0, %v8273_v17  ;;  %v8607_v17 = vpop.f32.mrf.mxu1  ;;  %v2842_v0 = vld [vmem:[#allocation6 + $0x260] sm:$0xff] }
 0x216   : > { %v1782_v3 = vpop.f32.mrf.mxu0  ;;  %3042 = vmatpush.msra.mxu2 %v2842_v0  ;;  %v2509_v0 = vld [vmem:[#allocation2 + $0x51] sm:$0xff] }
 0x217   : > { %v8600_v43 = vadd.f32 %v1779_v29, %v1617_v34  ;;  %v2914_v34 = vld [vmem:[#allocation6 + $0x20] sm:$0xff] }
 0x218   : > { %2937 = vmatpush.msra.mxu1 %v2914_v34 }
 0x219   : > { %11397 = vst [vmem:[#allocation84_spill] sm:$0xff] %v8600_v43  ;;  %2379 = vmatmul.f32.gmra.mxu3 %v2312_v9  ;;  %6974 = vmatmul.msk.f32.gmra.mxu0 %vm8161_vm7, %v2506_v4  ;;  %v2314_v4 = vld [vmem:[#allocation2 + $0x48] sm:$0xff] }
 0x21c   : > { %v1556_v55 = vpop.f32.mrf.mxu3 }
 0x21d   : > { %v1618_v5 = vadd.f32 %v1556_v55, %v8285_v35 }
 0x21e   : > { %v1785_v10 = vpop.f32.mrf.mxu0 }
 0x21f   : > { %v8605_v57 = vadd.f32 %v1782_v3, %v1618_v5  ;;  %v8614_v3 = vpop.f32.mrf.mxu1 }
 0x221   : > { %11398 = vst [vmem:[#allocation85_spill] sm:$0xff] %v8605_v57  ;;  %2382 = vmatmul.f32.gmra.mxu3 %v2313_v6  ;;  %2608 = vmatmul.f32.gmra.mxu0 %v2507_v50  ;;  %v2315_v50 = vld [vmem:[#allocation2 + $0x50] sm:$0xff] }
 0x224   : > { %v1559_v29 = vpop.f32.mrf.mxu3 }
 0x225   : > { %v1619_v9 = vadd.f32 %v1559_v29, %v8300_v15  ;;  %v8619_v29 = vpop.f32.mrf.mxu2 }
 0x226   : > { %v1788_v11 = vpop.f32.mrf.mxu0 }
 0x227   : > { %v8610_v35 = vadd.f32 %v1785_v10, %v1619_v9  ;;  %v2841_v10 = vld [vmem:[#allocation6 + $0x258] sm:$0xff]  ;;  %v8621_v9 = vpop.f32.mrf.mxu1 }
 0x228   : > { %3043 = vmatpush.msra.mxu2 %v2841_v10 }
 0x229   : > { %11399 = vst [vmem:[#allocation86_spill] sm:$0xff] %v8610_v35  ;;  %2385 = vmatmul.f32.gmra.mxu3 %v2314_v4  ;;  %6975 = vmatmul.msk.f32.gmra.mxu0 %vm8188_vm0, %v2508_v38  ;;  %v2913_v4 = vld [vmem:[#allocation6 + $0x18] sm:$0xff] }
 0x22a   : > { %v2316_v35 = vld [vmem:[#allocation2 + $0x58] sm:$0xff]  ;;  %2938 = vmatpush.msra.mxu1 %v2913_v4 }
 0x22c   : > { %v1562_v55 = vpop.f32.mrf.mxu3 }
 0x22d   : > { %v1620_v5 = vadd.f32 %v1562_v55, %v8312_v1  ;;  %v2510_v1 = vld [vmem:[#allocation2 + $0x59] sm:$0xff] }
 0x22e   : > { %v1791_v6 = vpop.f32.mrf.mxu0 }
 0x22f   : > { %v8617_v15 = vadd.f32 %v1788_v11, %v1620_v5  ;;  %v8628_v11 = vpop.f32.mrf.mxu2 }
 0x231   : > { %11400 = vst [vmem:[#allocation87_spill] sm:$0xff] %v8617_v15  ;;  %2388 = vmatmul.f32.gmra.mxu3 %v2315_v50  ;;  %2614 = vmatmul.f32.gmra.mxu0 %v2509_v0  ;;  %v8631_v0 = vpop.f32.mrf.mxu1 }
 0x234   : > { %v1565_v34 = vpop.f32.mrf.mxu3 }
 0x235   : > { %v1621_v38 = vadd.f32 %v1565_v34, %v8327_v56  ;;  %v2317_v56 = vld [vmem:[#allocation2 + $0x60] sm:$0xff] }
 0x236   : > { %v1794_v20 = vpop.f32.mrf.mxu0  ;;  %v2511_v34 = vld [vmem:[#allocation2 + $0x61] sm:$0xff] }
 0x237   : > { %v8624_v55 = vadd.f32 %v1791_v6, %v1621_v38  ;;  %v2840_v6 = vld [vmem:[#allocation6 + $0x250] sm:$0xff]  ;;  %v8635_v38 = vpop.f32.mrf.mxu2 }
 0x238   : > { %3044 = vmatpush.msra.mxu2 %v2840_v6  ;;  %v2513_v6 = vld [vmem:[#allocation2 + $0x71] sm:$0xff] }
 0x239   : > { %11401 = vst [vmem:[#allocation88_spill] sm:$0xff] %v8624_v55  ;;  %2391 = vmatmul.f32.gmra.mxu3 %v2316_v35  ;;  %6976 = vmatmul.msk.f32.gmra.mxu0 %vm8215_vm2, %v2510_v1  ;;  %v2912_v1 = vld [vmem:[#allocation6 + $0x10] sm:$0xff]  ;;  %v2318_v55 = vld [vmem:[#allocation2 + $0x68] sm:$0xff]  ;;  %v8640_v57 = vpop.f32.mrf.mxu1 }
 0x23a   : > { %2939 = vmatpush.msra.mxu1 %v2912_v1 }
 0x23c   : > { %v1568_v5 = vpop.f32.mrf.mxu3 }
 0x23d   : > { %v1622_v50 = vadd.f32 %v1568_v5, %v8339_v14  ;;  %v2512_v14 = vld [vmem:[#allocation2 + $0x69] sm:$0xff] }
 0x23e   : > { %v1797_v10 = vpop.f32.mrf.mxu0 }
 0x23f   : > { %v8633_v15 = vadd.f32 %v1794_v20, %v1622_v50 }
 0x241   : > { %11402 = vst [vmem:[#allocation89_spill] sm:$0xff] %v8633_v15  ;;  %2394 = vmatmul.f32.gmra.mxu3 %v2317_v56  ;;  %2620 = vmatmul.f32.gmra.mxu0 %v2511_v34  ;;  %v2319_v34 = vld [vmem:[#allocation2 + $0x70] sm:$0xff] }
 0x244   : > { %v1571_v35 = vpop.f32.mrf.mxu3 }
 0x245   : > { %v1623_v4 = vadd.f32 %v1571_v35, %v8357_v51  ;;  %v8645_v51 = vpop.f32.mrf.mxu2 }
 0x246   : > { %v1800_v33 = vpop.f32.mrf.mxu0 }
 0x247   : > { %v8638_v5 = vadd.f32 %v1797_v10, %v1623_v4  ;;  %v2839_v10 = vld [vmem:[#allocation6 + $0x248] sm:$0xff]  ;;  %v8649_v4 = vpop.f32.mrf.mxu1 }
 0x248   : > { %3045 = vmatpush.msra.mxu2 %v2839_v10  ;;  %v2515_v10 = vld [vmem:[#allocation2 + $0x81] sm:$0xff] }
 0x249   : > { %11403 = vst [vmem:[#allocation90_spill] sm:$0xff] %v8638_v5  ;;  %2397 = vmatmul.f32.gmra.mxu3 %v2318_v55  ;;  %6977 = vmatmul.msk.f32.gmra.mxu0 %vm8242_vm4, %v2512_v14  ;;  %v2911_v14 = vld [vmem:[#allocation6 + $0x8] sm:$0xff]  ;;  %v2320_v5 = vld [vmem:[#allocation2 + $0x78] sm:$0xff] }
 0x24a   : > { %2940 = vmatpush.msra.mxu1 %v2911_v14 }
 0x24c   : > { %v1574_v20 = vpop.f32.mrf.mxu3 }
 0x24d   : > { %v1624_v50 = vadd.f32 %v1574_v20, %v8372_v26  ;;  %v2514_v26 = vld [vmem:[#allocation2 + $0x79] sm:$0xff]  ;;  %v8654_v15 = vpop.f32.mrf.mxu2 }
 0x24e   : > { %v1803_v56 = vpop.f32.mrf.mxu0 }
 0x24f   : > { %v8647_v35 = vadd.f32 %v1800_v33, %v1624_v50  ;;  %v8658_v33 = vpop.f32.mrf.mxu1 }
 0x251   : > { %11404 = vst [vmem:[#allocation91_spill] sm:$0xff] %v8647_v35  ;;  %2400 = vmatmul.f32.gmra.mxu3 %v2319_v34  ;;  %2626 = vmatmul.f32.gmra.mxu0 %v2513_v6  ;;  %v2322_v35 = vld [vmem:[#allocation2 + $0x88] sm:$0xff] }
 0x254   : > { %v1577_v55 = vpop.f32.mrf.mxu3 }
 0x255   : > { %v1625_v1 = vadd.f32 %v1577_v55, %v8267_v19  ;;  %v2321_v19 = vld [vmem:[#allocation2 + $0x80] sm:$0xff] }
 0x256   : > { %v1806_v62 = vpop.f32.mrf.mxu0 }
 0x257   : > { %v8652_v20 = vadd.f32 %v1803_v56, %v1625_v1  ;;  %v2838_v56 = vld [vmem:[#allocation6 + $0x240] sm:$0xff]  ;;  %v8663_v1 = vpop.f32.mrf.mxu2  ;;  %v8666_v45 = vpop.f32.mrf.mxu1 }
 0x258   : > { %3046 = vmatpush.msra.mxu2 %v2838_v56  ;;  %v2837_v56 = vld [vmem:[#allocation6 + $0x238] sm:$0xff] }
 0x259   : > { %11405 = vst [vmem:[#allocation92_spill] sm:$0xff] %v8652_v20  ;;  %2403 = vmatmul.f32.gmra.mxu3 %v2320_v5  ;;  %6978 = vmatmul.msk.f32.gmra.mxu0 %vm8269_vm6, %v2514_v26  ;;  %v2910_v26 = vld [vmem:[#allocation6] sm:$0xff] }
 0x25a   : > { %2941 = vmatpush.msra.mxu1 %v2910_v26  ;;  %3047 = vmatpush.msra.mxu2 %v2837_v56  ;;  %v2836_v26 = vld [vmem:[#allocation6 + $0x230] sm:$0xff]  ;;  %v11410_v56 = vld [vmem:[#allocation21_spill] sm:$0xff] }
 0x25b   : > { %vm11411_vm5 = vnez %v11410_v56 }
 0x25c   : > { %v1580_v50 = vpop.f32.mrf.mxu3  ;;  %3048 = vmatpush.msra.mxu2 %v2836_v26  ;;  %v2832_v26 = vld [vmem:[#allocation6 + $0x210] sm:$0xff] }
 0x25d   : > { %v1626_v34 = vadd.f32 %v1580_v50, %v8280_v39  ;;  %v2516_v39 = vld [vmem:[#allocation2 + $0x89] sm:$0xff] }
 0x25e   : > { %v1809_v6 = vpop.f32.mrf.mxu0 }
 0x25f   : > { %v8661_v55 = vadd.f32 %v1806_v62, %v1626_v34  ;;  %v3199_v62 = vld [vmem:[#allocation6 + $0xf8] sm:$0xff] }
 0x260   : > { %3200 = vmatpush.msrb.mxu3 %v3199_v62 }
 0x261   : > { %11406 = vst [vmem:[#allocation93_spill] sm:$0xff] %v8661_v55  ;;  %2406 = vmatmul.f32.gmra.mxu3 %v2321_v19  ;;  %2632 = vmatmul.f32.gmra.mxu0 %v2515_v10  ;;  %v8672_v19 = vpop.f32.mrf.mxu2  ;;  %v11408_v10 = vld [vmem:[#allocation66_spill] sm:$0xff] }
 0x262   : > { %v2323_v55 = vld [vmem:[#allocation2 + $0x90] sm:$0xff] }
 0x264   : > { %v1583_v5 = vpop.f32.mrf.mxu3 }
 0x265   : > { %v1627_v14 = vadd.f32 %v1583_v5, %v8294_v47 }
 0x266   : > { %v1812_v20 = vpop.f32.mrf.mxu0 }
 0x267   : > { %v8668_v50 = vadd.f32 %v1809_v6, %v1627_v14  ;;  %v8677_v6 = vpop.f32.mrf.mxu1  ;;  %v3424_v14 = vld [vmem:[#allocation6 + $0x178] sm:$0xff] }
 0x268   : > { %3425 = vmatpush.msrb.mxu0 %v3424_v14  ;;  %v2830_v14 = vld [vmem:[#allocation6 + $0x200] sm:$0xff] }
 0x269   : > { %11407 = vst [vmem:[#allocation94_spill] sm:$0xff] %v8668_v50  ;;  %2409 = vmatmul.f32.gmra.mxu3 %v2322_v35  ;;  %6979 = vmatmul.msk.f32.gmra.mxu0 %vm8296_vm8, %v2516_v39  ;;  %v2835_v35 = vld [vmem:[#allocation6 + $0x228] sm:$0xff]  ;;  %v2834_v39 = vld [vmem:[#allocation6 + $0x220] sm:$0xff] }
 0x26a   : > { %3049 = vmatpush.msra.mxu2 %v2835_v35  ;;  %v2831_v35 = vld [vmem:[#allocation6 + $0x208] sm:$0xff] }
 0x26c   : > { %v1586_v34 = vpop.f32.mrf.mxu3  ;;  %3050 = vmatpush.msra.mxu2 %v2834_v39 }
 0x26d   : > { %v1628_v47 = vadd.f32 %v1586_v34, %v11408_v10  ;;  %v2846_v34 = vld [vmem:[#allocation2 + $0xf] sm:$0xff] }
 0x26e   : > { %v1815_v5 = vpop.f32.mrf.mxu0  ;;  %6990 = vmatmul.msk.f32.vlgmr.msra.gmra.mxu1 %vm11411_vm5, %v2846_v34 }
 0x26f   : > { %v8675_v43 = vadd.f32 %v1812_v20, %v1628_v47  ;;  %v2833_v20 = vld [vmem:[#allocation6 + $0x218] sm:$0xff] }
 0x270   : > { %3051 = vmatpush.msra.mxu2 %v2833_v20  ;;  %v3649_v20 = vld [vmem:[#allocation6 + $0x1f8] sm:$0xff] }
 0x271   : > { %11409 = vst [vmem:[#allocation66_spill] sm:$0xff] %v8675_v43  ;;  %2412 = vmatmul.f32.gmra.mxu3 %v2323_v55  ;;  %2638 = vmatmul.f32.gmra.mxu0 %v8347_v59  ;;  %v8683_v55 = vpop.f32.mrf.mxu2  ;;  %v11429_v43 = vld [vmem:[#allocation73_spill] sm:$0xff] }
 0x272   : > { %3052 = vmatpush.msra.mxu2 %v2832_v26  ;;  %v2325_v26 = vld [vmem:[#allocation2 + $0xa0] sm:$0xff]  ;;  %3650 = vmatpush.msrb.mxu1 %v3649_v20  ;;  %v3648_v20 = vld [vmem:[#allocation6 + $0x1f0] sm:$0xff] }
 0x274   : > { %v1589_v62 = vpop.f32.mrf.mxu3  ;;  %3053 = vmatpush.msra.mxu2 %v2831_v35  ;;  %v3423_v35 = vld [vmem:[#allocation6 + $0x170] sm:$0xff]  ;;  %3651 = vmatpush.msrb.mxu1 %v3648_v20 }
 0x275   : > { %v1629_v10 = vadd.f32 %v1589_v62, %v8321_v40  ;;  %v8690_v40 = vpop.f32.mrf.mxu1  ;;  %v2847_v62 = vld [vmem:[#allocation2 + $0x17] sm:$0xff]  ;;  %3426 = vmatpush.msrb.mxu0 %v3423_v35  ;;  %v3422_v35 = vld [vmem:[#allocation6 + $0x168] sm:$0xff] }
 0x276   : > { %v1818_v47 = vpop.f32.mrf.mxu0  ;;  %3054 = vmatpush.msra.mxu2 %v2830_v14  ;;  %2945 = vmatmul.f32.gmra.mxu1 %v2847_v62  ;;  %v2326_v62 = vld [vmem:[#allocation2 + $0xa8] sm:$0xff] }
 0x277   : > { %v8685_v59 = vadd.f32 %v1815_v5, %v1629_v10  ;;  %v3198_v5 = vld [vmem:[#allocation6 + $0xf0] sm:$0xff]  ;;  %3427 = vmatpush.msrb.mxu0 %v3422_v35 }
 0x278   : > { %3201 = vmatpush.msrb.mxu3 %v3198_v5 }
 0x279   : > { %11412 = vst [vmem:[#allocation95_spill] sm:$0xff] %v8685_v59  ;;  %2415 = vmatmul.f32.gmra.mxu3 %v2324_v44  ;;  %6980 = vmatmul.msk.f32.gmra.mxu0 %vm8323_vm9, %v8363_v16  ;;  %v8695_v16 = vpop.f32.mrf.mxu2 }
 0x27c   : > { %v1592_v39 = vpop.f32.mrf.mxu3 }
 0x27d   : > { %v1630_v34 = vadd.f32 %v1592_v39, %v8334_v37  ;;  %v8698_v14 = vpop.f32.mrf.mxu1 }
 0x27e   : > { %v1821_v10 = vpop.f32.mrf.mxu0 }
 0x27f   : > { %v8693_v44 = vadd.f32 %v1818_v47, %v1630_v34  ;;  %v3197_v47 = vld [vmem:[#allocation6 + $0xe8] sm:$0xff] }
 0x280   : > { %3202 = vmatpush.msrb.mxu3 %v3197_v47  ;;  %v2328_v47 = vld [vmem:[#allocation2 + $0xb8] sm:$0xff] }
 0x281   : > { %11413 = vst [vmem:[#allocation96_spill] sm:$0xff] %v8693_v44  ;;  %2418 = vmatmul.f32.gmra.mxu3 %v2325_v26  ;;  %2644 = vmatmul.f32.gmra.mxu0 %v8381_v61  ;;  %v8706_v61 = vpop.f32.mrf.mxu2  ;;  %v11425_v44 = vld [vmem:[#allocation32_spill] sm:$0xff] }
 0x284   : > { %v1595_v56 = vpop.f32.mrf.mxu3 }
 0x285   : > { %v1631_v37 = vadd.f32 %v1595_v56, %v8350_v22  ;;  %v8709_v26 = vpop.f32.mrf.mxu1  ;;  %v2327_v56 = vld [vmem:[#allocation2 + $0xb0] sm:$0xff] }
 0x286   : > { %v1824_v39 = vpop.f32.mrf.mxu0 }
 0x287   : > { %v8701_v32 = vadd.f32 %v1821_v10, %v1631_v37 }
 0x289   : > { %11414 = vst [vmem:[#allocation97_spill] sm:$0xff] %v8701_v32  ;;  %2421 = vmatmul.f32.gmra.mxu3 %v2326_v62  ;;  %6981 = vmatmul.msk.f32.gmra.mxu0 %vm8352_vm10, %v8396_v2  ;;  %v8714_v2 = vpop.f32.mrf.mxu2 }
 0x28c   : > { %v1598_v34 = vpop.f32.mrf.mxu3 }
 0x28d   : > { %v1632_v5 = vadd.f32 %v1598_v34, %v8366_v18  ;;  %v8720_v18 = vld [vmem:[%s10996_s2] ss:$0 sm:$0xff] }
 0x28e   : > { %v2603_v22 = vpop.f32.mrf.mxu0 }
 0x28f   : > { %v8711_v10 = vadd.f32 %v1824_v39, %v1632_v5  ;;  %v3647_v39 = vld [vmem:[#allocation6 + $0x1e8] sm:$0xff]  ;;  %v8722_v5 = vpop.f32.mrf.mxu1 }
 0x290   : > { %3652 = vmatpush.msrb.mxu1 %v3647_v39  ;;  %v2329_v39 = vld [vmem:[#allocation2 + $0xc0] sm:$0xff] }
 0x291   : > { %11415 = vst [vmem:[#allocation98_spill] sm:$0xff] %v8711_v10  ;;  %2424 = vmatmul.f32.gmra.mxu3 %v2327_v56  ;;  %2650 = vmatmul.f32.gmra.mxu0 %v8412_v46  ;;  %v8733_v42 = vpop.f32.mrf.mxu2  ;;  %v11419_v10 = vld [vmem:[#allocation27_spill] sm:$0xff] }
 0x294   : > { %v2377_v37 = vpop.f32.mrf.mxu3 }
 0x295   : > { %v2473_v62 = vadd.f32 %v2377_v37, %v8393_v25  ;;  %v3196_v25 = vld [vmem:[#allocation6 + $0xe0] sm:$0xff] }
 0x296   : > { %v2606_v20 = vpop.f32.mrf.mxu0  ;;  %3203 = vmatpush.msrb.mxu3 %v3196_v25 }
 0x297   : > { %v2699_v34 = vadd.f32 %v2603_v22, %v2473_v62 }
 0x299   : > { %v2734_v46 = vadd.f32 %v8720_v18, %v2699_v34  ;;  %2427 = vmatmul.f32.gmra.mxu3 %v2328_v47  ;;  %6982 = vmatmul.msk.f32.gmra.mxu0 %vm8384_vm11, %v8427_v21  ;;  %v3421_v34 = vld [vmem:[#allocation6 + $0x160] sm:$0xff]  ;;  %vm11420_vm11 = vnez %v11419_v10 }
 0x29a   : > { %3428 = vmatpush.msrb.mxu0 %v3421_v34 }
 0x29b   : > { %v8728_v35 = vmax.f32 %v2734_v46, 0.0  ;;  %v8737_v46 = vpop.f32.mrf.mxu1 }
 0x29c   : > { %v2380_v37 = vpop.f32.mrf.mxu3 }
 0x29d   : > { %11417 = vst [vmem:[#allocation99_spill] sm:$0xff] %v8728_v35  ;;  %v2474_v22 = vadd.f32 %v2380_v37, %v8407_v12  ;;  %3055 = vmatmul.f32.vlgmr.msra.gmra.mxu2 %v8728_v35 }
 0x29e   : > { %2798 = vst [vmem:[#allocation2 + $0x20] sm:$0xff] %v8728_v35  ;;  %v2609_v62 = vpop.f32.mrf.mxu0 }
 0x29f   : > { %v2700_v47 = vadd.f32 %v2606_v20, %v2474_v22  ;;  %v2330_v20 = vld [vmem:[#allocation2 + $0xc8] sm:$0xff] }
 0x2a1   : > { %2430 = vmatmul.f32.gmra.mxu3 %v2329_v39  ;;  %2656 = vmatmul.f32.gmra.mxu0 %v8442_v36  ;;  %v2735_v21 = vadd.f32 %v8720_v18, %v2700_v47  ;;  %v3646_v39 = vld [vmem:[#allocation6 + $0x1e0] sm:$0xff]  ;;  %v8746_v47 = vpop.f32.mrf.mxu2 }
 0x2a2   : > { %3653 = vmatpush.msrb.mxu1 %v3646_v39  ;;  %v3420_v39 = vld [vmem:[#allocation6 + $0x158] sm:$0xff] }
 0x2a3   : > { %v8739_v25 = vmax.f32 %v2735_v21, 0.0  ;;  %3429 = vmatpush.msrb.mxu0 %v3420_v39 }
 0x2a4   : > { %v2383_v56 = vpop.f32.mrf.mxu3 }
 0x2a5   : > { %11418 = vst [vmem:[#allocation100_spill] sm:$0xff] %v8739_v25  ;;  %v2848_v12 = vld [vmem:[#allocation2 + $0x1f] sm:$0xff]  ;;  %v2475_v37 = vadd.f32 %v2383_v56, %v8424_v31  ;;  %3058 = vmatmul.f32.gmra.mxu2 %v8739_v25 }
 0x2a6   : > { %6991 = vmatmul.msk.f32.gmra.mxu1 %vm11420_vm11, %v2848_v12  ;;  %2799 = vst [vmem:[#allocation2 + $0x28] sm:$0xff] %v8739_v25  ;;  %v2612_v36 = vpop.f32.mrf.mxu0  ;;  %v3195_v56 = vld [vmem:[#allocation6 + $0xd8] sm:$0xff]  ;;  %v8754_v12 = vpop.f32.mrf.mxu1 }
 0x2a7   : > { %v2701_v22 = vadd.f32 %v2609_v62, %v2475_v37  ;;  %3204 = vmatpush.msrb.mxu3 %v3195_v56 }
 0x2a9   : > { %2433 = vmatmul.f32.gmra.mxu3 %v2330_v20  ;;  %6983 = vmatmul.msk.f32.gmra.mxu0 %vm8415_vm12, %v8456_v52  ;;  %v2736_v31 = vadd.f32 %v8720_v18, %v2701_v22  ;;  %v2331_v20 = vld [vmem:[#allocation2 + $0xd0] sm:$0xff]  ;;  %vm11426_vm12 = vnez %v11425_v44 }
 0x2ab   : > { %v8752_v34 = vmax.f32 %v2736_v31, 0.0  ;;  %v8761_v31 = vpop.f32.mrf.mxu2 }
 0x2ac   : > { %v2386_v10 = vpop.f32.mrf.mxu3 }
 0x2ad   : > { %11422 = vst [vmem:[#allocation101_spill] sm:$0xff] %v8752_v34  ;;  %v2849_v32 = vld [vmem:[#allocation2 + $0x27] sm:$0xff]  ;;  %v2476_v62 = vadd.f32 %v2386_v10, %v8438_v63  ;;  %3061 = vmatmul.f32.gmra.mxu2 %v8752_v34 }
 0x2ae   : > { %2951 = vmatmul.f32.gmra.mxu1 %v2849_v32  ;;  %2800 = vst [vmem:[#allocation2 + $0x30] sm:$0xff] %v8752_v34  ;;  %v2615_v37 = vpop.f32.mrf.mxu0  ;;  %v11424_v10 = vld [vmem:[#allocation72_spill] sm:$0xff] }
 0x2af   : > { %v2702_v52 = vadd.f32 %v2612_v36, %v2476_v62  ;;  %v2332_v62 = vld [vmem:[#allocation2 + $0xd8] sm:$0xff] }
 0x2b1   : > { %2436 = vmatmul.f32.gmra.mxu3 %v2331_v20  ;;  %2662 = vmatmul.f32.gmra.mxu0 %v8470_v28  ;;  %v2737_v22 = vadd.f32 %v8720_v18, %v2702_v52  ;;  %v8770_v28 = vpop.f32.mrf.mxu1  ;;  %v3645_v52 = vld [vmem:[#allocation6 + $0x1d8] sm:$0xff] }
 0x2b2   : > { %3654 = vmatpush.msrb.mxu1 %v3645_v52  ;;  %v3419_v52 = vld [vmem:[#allocation6 + $0x150] sm:$0xff] }
 0x2b3   : > { %v8763_v56 = vmax.f32 %v2737_v22, 0.0  ;;  %v8778_v59 = vpop.f32.mrf.mxu2  ;;  %3430 = vmatpush.msrb.mxu0 %v3419_v52  ;;  %v3193_v52 = vld [vmem:[#allocation6 + $0xc8] sm:$0xff] }
 0x2b4   : > { %v2389_v63 = vpop.f32.mrf.mxu3 }
 0x2b5   : > { %11423 = vst [vmem:[#allocation102_spill] sm:$0xff] %v8763_v56  ;;  %v2850_v32 = vld [vmem:[#allocation2 + $0x2f] sm:$0xff]  ;;  %v2477_v21 = vadd.f32 %v2389_v63, %v11424_v10  ;;  %3064 = vmatmul.f32.gmra.mxu2 %v8763_v56 }
 0x2b6   : > { %6992 = vmatmul.msk.f32.gmra.mxu1 %vm11426_vm12, %v2850_v32  ;;  %2801 = vst [vmem:[#allocation2 + $0x38] sm:$0xff] %v8763_v56  ;;  %v2618_v36 = vpop.f32.mrf.mxu0  ;;  %v3194_v63 = vld [vmem:[#allocation6 + $0xd0] sm:$0xff] }
 0x2b7   : > { %v2703_v20 = vadd.f32 %v2615_v37, %v2477_v21  ;;  %3205 = vmatpush.msrb.mxu3 %v3194_v63  ;;  %v2333_v37 = vld [vmem:[#allocation2 + $0xe0] sm:$0xff] }
 0x2b9   : > { %2439 = vmatmul.f32.gmra.mxu3 %v2332_v62  ;;  %6984 = vmatmul.msk.f32.gmra.mxu0 %vm8445_vm13, %v8483_v58  ;;  %v2738_v39 = vadd.f32 %v8720_v18, %v2703_v20  ;;  %v8783_v62 = vpop.f32.mrf.mxu1 }
 0x2ba   : > { %11430 = vst [vmem:[#allocation73_spill] sm:$0xff] %v8783_v62  ;;  %3206 = vmatpush.msrb.mxu3 %v3193_v52 }
 0x2bb   : > { %v8776_v32 = vmax.f32 %v2738_v39, 0.0 }
 0x2bc   : > { %v2392_v10 = vpop.f32.mrf.mxu3 }
 0x2bd   : > { %11428 = vst [vmem:[#allocation72_spill] sm:$0xff] %v8776_v32  ;;  %v2851_v44 = vld [vmem:[#allocation2 + $0x37] sm:$0xff]  ;;  %v2478_v50 = vadd.f32 %v2392_v10, %v11429_v43  ;;  %3067 = vmatmul.f32.gmra.mxu2 %v8776_v32  ;;  %v11432_v10 = vld [vmem:[#allocation36_spill] sm:$0xff] }
 0x2be   : > { %2957 = vmatmul.f32.gmra.mxu1 %v2851_v44  ;;  %2802 = vst [vmem:[#allocation2 + $0x40] sm:$0xff] %v8776_v32  ;;  %v2621_v21 = vpop.f32.mrf.mxu0  ;;  %vm11433_vm13 = vnez %v11432_v10 }
 0x2bf   : > { %v2704_v58 = vadd.f32 %v2618_v36, %v2478_v50  ;;  %v2334_v36 = vld [vmem:[#allocation2 + $0xe8] sm:$0xff] }
 0x2c1   : > { %2442 = vmatmul.f32.gmra.mxu3 %v2333_v37  ;;  %2668 = vmatmul.f32.gmra.mxu0 %v8497_v49  ;;  %v2739_v20 = vadd.f32 %v8720_v18, %v2704_v58  ;;  %v8794_v49 = vpop.f32.mrf.mxu2  ;;  %v3644_v58 = vld [vmem:[#allocation6 + $0x1d0] sm:$0xff] }
 0x2c2   : > { %3655 = vmatpush.msrb.mxu1 %v3644_v58 }
 0x2c3   : > { %v8787_v39 = vmax.f32 %v2739_v20, 0.0 }
 0x2c4   : > { %v2395_v43 = vpop.f32.mrf.mxu3 }
 0x2c5   : > { %11431 = vst [vmem:[#allocation103_spill] sm:$0xff] %v8787_v39  ;;  %v2852_v44 = vld [vmem:[#allocation2 + $0x3f] sm:$0xff]  ;;  %v2479_v63 = vadd.f32 %v2395_v43, %v8481_v54  ;;  %3070 = vmatmul.f32.gmra.mxu2 %v8787_v39  ;;  %v8800_v43 = vpop.f32.mrf.mxu1 }
 0x2c6   : > { %6993 = vmatmul.msk.f32.gmra.mxu1 %vm11433_vm13, %v2852_v44  ;;  %2803 = vst [vmem:[#allocation2 + $0x48] sm:$0xff] %v8787_v39  ;;  %v2624_v50 = vpop.f32.mrf.mxu0 }
 0x2c7   : > { %v2705_v37 = vadd.f32 %v2621_v21, %v2479_v63  ;;  %11435 = vst [vmem:[#allocation104_spill] sm:$0xff] %v8800_v43  ;;  %v2335_v63 = vld [vmem:[#allocation2 + $0xf0] sm:$0xff] }
 0x2c9   : > { %2445 = vmatmul.f32.gmra.mxu3 %v2334_v36  ;;  %6985 = vmatmul.msk.f32.gmra.mxu0 %vm8473_vm14, %v8510_v13  ;;  %v2740_v54 = vadd.f32 %v8720_v18, %v2705_v37  ;;  %v2061_v13 = vadd.f32 %v8607_v17, %v8505_v24  ;;  %v8809_v37 = vpop.f32.mrf.mxu2  ;;  %v11438_v24 = vld [vmem:[#allocation40_spill] sm:$0xff]  ;;  %v2336_v17 = vld [vmem:[#allocation2 + $0xf8] sm:$0xff] }
 0x2ca   : > { %vm11439_vm14 = vnez %v11438_v24 }
 0x2cb   : > { %v8802_v44 = vmax.f32 %v2740_v54, 0.0  ;;  %v3418_v54 = vld [vmem:[#allocation6 + $0x148] sm:$0xff] }
 0x2cc   : > { %v2398_v10 = vpop.f32.mrf.mxu3  ;;  %3431 = vmatpush.msrb.mxu0 %v3418_v54 }
 0x2cd   : > { %11436 = vst [vmem:[#allocation105_spill] sm:$0xff] %v8802_v44  ;;  %v2853_v22 = vld [vmem:[#allocation2 + $0x47] sm:$0xff]  ;;  %v2480_v62 = vadd.f32 %v2398_v10, %v8493_v53  ;;  %3073 = vmatmul.f32.gmra.mxu2 %v8802_v44  ;;  %v2287_v53 = vadd.f32 %v8619_v29, %v2061_v13  ;;  %v8816_v10 = vpop.f32.mrf.mxu1  ;;  %v3415_v13 = vld [vmem:[#allocation6 + $0x130] sm:$0xff] }
 0x2ce   : > { %2963 = vmatmul.f32.gmra.mxu1 %v2853_v22  ;;  %2804 = vst [vmem:[#allocation2 + $0x50] sm:$0xff] %v8802_v44  ;;  %v2627_v21 = vpop.f32.mrf.mxu0 }
 0x2cf   : > { %v2706_v36 = vadd.f32 %v2624_v50, %v2480_v62  ;;  %v11440_v62 = vld [vmem:[#allocation76_spill] sm:$0xff] }
 0x2d0   : > { %v2062_v50 = vadd.f32 %v8614_v3, %v11440_v62  ;;  %v11443_v62 = vld [vmem:[#allocation78_spill] sm:$0xff] }
 0x2d1   : > { %2448 = vmatmul.f32.gmra.mxu3 %v2335_v63  ;;  %2674 = vmatmul.f32.gmra.mxu0 %v8524_v30  ;;  %v2741_v58 = vadd.f32 %v8720_v18, %v2706_v36  ;;  %v3643_v63 = vld [vmem:[#allocation6 + $0x1c8] sm:$0xff]  ;;  %v8829_v54 = vpop.f32.mrf.mxu2 }
 0x2d2   : > { %3656 = vmatpush.msrb.mxu1 %v3643_v63 }
 0x2d3   : > { %v8814_v22 = vmax.f32 %v2741_v58, 0.0  ;;  %v2288_v58 = vadd.f32 %v8628_v11, %v2062_v50  ;;  %v3417_v50 = vld [vmem:[#allocation6 + $0x140] sm:$0xff] }
 0x2d4   : > { %v2401_v52 = vpop.f32.mrf.mxu3  ;;  %3432 = vmatpush.msrb.mxu0 %v3417_v50  ;;  %v3642_v50 = vld [vmem:[#allocation6 + $0x1c0] sm:$0xff] }
 0x2d5   : > { %11437 = vst [vmem:[#allocation106_spill] sm:$0xff] %v8814_v22  ;;  %v2854_v20 = vld [vmem:[#allocation2 + $0x4f] sm:$0xff]  ;;  %v2481_v43 = vadd.f32 %v2401_v52, %v2287_v53  ;;  %3076 = vmatmul.f32.gmra.mxu2 %v8814_v22  ;;  %3657 = vmatpush.msrb.mxu1 %v3642_v50 }
 0x2d6   : > { %6994 = vmatmul.msk.f32.gmra.mxu1 %vm11439_vm14, %v2854_v20  ;;  %2805 = vst [vmem:[#allocation2 + $0x58] sm:$0xff] %v8814_v22  ;;  %v2630_v30 = vpop.f32.mrf.mxu0  ;;  %v3192_v20 = vld [vmem:[#allocation6 + $0xc0] sm:$0xff] }
 0x2d7   : > { %v2707_v29 = vadd.f32 %v2627_v21, %v2481_v43  ;;  %3207 = vmatpush.msrb.mxu3 %v3192_v20  ;;  %v8835_v21 = vpop.f32.mrf.mxu1  ;;  %v3416_v20 = vld [vmem:[#allocation6 + $0x138] sm:$0xff] }
 0x2d8   : > { %3433 = vmatpush.msrb.mxu0 %v3416_v20 }
 0x2d9   : > { %2451 = vmatmul.f32.gmra.mxu3 %v2336_v17  ;;  %6986 = vmatmul.msk.f32.gmra.mxu0 %vm8500_vm15, %v8537_v48  ;;  %v2742_v36 = vadd.f32 %v8720_v18, %v2707_v29  ;;  %v2337_v17 = vld [vmem:[#allocation2 + $0x100] sm:$0xff]  ;;  %v2063_v29 = vadd.f32 %v8621_v9, %v11443_v62 }
 0x2da   : > { %3434 = vmatpush.msrb.mxu0 %v3415_v13 }
 0x2db   : > { %v8831_v53 = vmax.f32 %v2742_v36, 0.0  ;;  %v3191_v36 = vld [vmem:[#allocation6 + $0xb8] sm:$0xff] }
 0x2dc   : > { %v2404_v52 = vpop.f32.mrf.mxu3  ;;  %3208 = vmatpush.msrb.mxu3 %v3191_v36 }
 0x2dd   : > { %11442 = vst [vmem:[#allocation76_spill] sm:$0xff] %v8831_v53  ;;  %v2855_v3 = vld [vmem:[#allocation2 + $0x57] sm:$0xff]  ;;  %v2482_v43 = vadd.f32 %v2404_v52, %v2288_v58  ;;  %3079 = vmatmul.f32.gmra.mxu2 %v8831_v53  ;;  %v2289_v58 = vadd.f32 %v8635_v38, %v2063_v29  ;;  %v3414_v38 = vld [vmem:[#allocation6 + $0x128] sm:$0xff] }
 0x2de   : > { %2969 = vmatmul.f32.gmra.mxu1 %v2855_v3  ;;  %2806 = vst [vmem:[#allocation2 + $0x60] sm:$0xff] %v8831_v53  ;;  %v2633_v48 = vpop.f32.mrf.mxu0  ;;  %v3190_v3 = vld [vmem:[#allocation6 + $0xb0] sm:$0xff]  ;;  %v2338_v29 = vld [vmem:[#allocation2 + $0x108] sm:$0xff]  ;;  %3435 = vmatpush.msrb.mxu0 %v3414_v38 }
 0x2df   : > { %v2708_v11 = vadd.f32 %v2630_v30, %v2482_v43  ;;  %3209 = vmatpush.msrb.mxu3 %v3190_v3  ;;  %v8844_v30 = vpop.f32.mrf.mxu2  ;;  %v8852_v36 = vpop.f32.mrf.mxu1  ;;  %v3187_v3 = vld [vmem:[#allocation6 + $0x98] sm:$0xff] }
 0x2e1   : > { %2454 = vmatmul.f32.gmra.mxu3 %v2337_v17  ;;  %2680 = vmatmul.f32.gmra.mxu0 %v8551_v27  ;;  %v2743_v63 = vadd.f32 %v8720_v18, %v2708_v11  ;;  %v11445_v27 = vld [vmem:[#allocation43_spill] sm:$0xff]  ;;  %v3189_v17 = vld [vmem:[#allocation6 + $0xa8] sm:$0xff]  ;;  %v2064_v11 = vadd.f32 %v8631_v0, %v8544_v23 }
 0x2e2   : > { %vm11446_vm15 = vnez %v11445_v27  ;;  %3210 = vmatpush.msrb.mxu3 %v3189_v17 }
 0x2e3   : > { %v8842_v52 = vmax.f32 %v2743_v63, 0.0  ;;  %v3188_v63 = vld [vmem:[#allocation6 + $0xa0] sm:$0xff]  ;;  %v2290_v23 = vadd.f32 %v8645_v51, %v2064_v11 }
 0x2e4   : > { %v2407_v24 = vpop.f32.mrf.mxu3  ;;  %3211 = vmatpush.msrb.mxu3 %v3188_v63  ;;  %v2339_v63 = vld [vmem:[#allocation2 + $0x110] sm:$0xff]  ;;  %v11449_v51 = vld [vmem:[#allocation80_spill] sm:$0xff] }
 0x2e5   : > { %11444 = vst [vmem:[#allocation78_spill] sm:$0xff] %v8842_v52  ;;  %v2856_v9 = vld [vmem:[#allocation2 + $0x5f] sm:$0xff]  ;;  %v2483_v43 = vadd.f32 %v2407_v24, %v2289_v58  ;;  %3082 = vmatmul.f32.gmra.mxu2 %v8842_v52  ;;  %v2065_v11 = vadd.f32 %v8640_v57, %v11449_v51 }
 0x2e6   : > { %6995 = vmatmul.msk.f32.gmra.mxu1 %vm11446_vm15, %v2856_v9  ;;  %2807 = vst [vmem:[#allocation2 + $0x68] sm:$0xff] %v8842_v52  ;;  %v2636_v62 = vpop.f32.mrf.mxu0  ;;  %v3413_v24 = vld [vmem:[#allocation6 + $0x120] sm:$0xff]  ;;  %v3412_v9 = vld [vmem:[#allocation6 + $0x118] sm:$0xff]  ;;  %3212 = vmatpush.msrb.mxu3 %v3187_v3 }
 0x2e7   : > { %v2709_v13 = vadd.f32 %v2633_v48, %v2483_v43  ;;  %3436 = vmatpush.msrb.mxu0 %v3413_v24  ;;  %v3186_v48 = vld [vmem:[#allocation6 + $0x90] sm:$0xff]  ;;  %v8865_v24 = vpop.f32.mrf.mxu2  ;;  %v3184_v3 = vld [vmem:[#allocation6 + $0x80] sm:$0xff] }
 0x2e8   : > { %v3411_v43 = vld [vmem:[#allocation6 + $0x110] sm:$0xff]  ;;  %3213 = vmatpush.msrb.mxu3 %v3186_v48  ;;  %v3874_v48 = vld [vmem:[#allocation6 + $0x2f8] sm:$0xff] }
 0x2e9   : > { %2457 = vmatmul.f32.gmra.mxu3 %v2338_v29  ;;  %6987 = vmatmul.msk.f32.gmra.mxu0 %vm8527_vm1, %v8564_v8  ;;  %v2744_v58 = vadd.f32 %v8720_v18, %v2709_v13  ;;  %v3185_v8 = vld [vmem:[#allocation6 + $0x88] sm:$0xff] }
 0x2ea   : > { %3437 = vmatpush.msrb.mxu0 %v3412_v9  ;;  %v3410_v13 = vld [vmem:[#allocation6 + $0x108] sm:$0xff]  ;;  %3214 = vmatpush.msrb.mxu3 %v3185_v8  ;;  %v3409_v9 = vld [vmem:[#allocation6 + $0x100] sm:$0xff] }
 0x2eb   : > { %v8859_v0 = vmax.f32 %v2744_v58, 0.0  ;;  %3875 = vmatpush.msrb.mxu2 %v3874_v48  ;;  %v11451_v8 = vld [vmem:[#allocation48_spill] sm:$0xff] }
 0x2ec   : > { %v2410_v17 = vpop.f32.mrf.mxu3  ;;  %3438 = vmatpush.msrb.mxu0 %v3411_v43  ;;  %3215 = vmatpush.msrb.mxu3 %v3184_v3  ;;  %v2291_v43 = vadd.f32 %v8654_v15, %v2065_v11  ;;  %vm11452_vm1 = vnez %v11451_v8  ;;  %v3641_v3 = vld [vmem:[#allocation6 + $0x1b8] sm:$0xff] }
 0x2ed   : > { %11448 = vst [vmem:[#allocation107_spill] sm:$0xff] %v8859_v0  ;;  %v2857_v38 = vld [vmem:[#allocation2 + $0x67] sm:$0xff]  ;;  %v2484_v29 = vadd.f32 %v2410_v17, %v2290_v23  ;;  %3085 = vmatmul.f32.gmra.mxu2 %v8859_v0  ;;  %v8869_v17 = vpop.f32.mrf.mxu1  ;;  %3658 = vmatpush.msrb.mxu1 %v3641_v3  ;;  %v11454_v11 = vld [vmem:[#allocation79_spill] sm:$0xff] }
 0x2ee   : > { %2975 = vmatmul.f32.gmra.mxu1 %v2857_v38  ;;  %2808 = vst [vmem:[#allocation2 + $0x70] sm:$0xff] %v8859_v0  ;;  %v2639_v50 = vpop.f32.mrf.mxu0  ;;  %3439 = vmatpush.msrb.mxu0 %v3410_v13  ;;  %v2340_v13 = vld [vmem:[#allocation2 + $0x118] sm:$0xff]  ;;  %vm11455_vm15 = vnez %v11454_v11 }
 0x2ef   : > { %v2710_v58 = vadd.f32 %v2636_v62, %v2484_v29  ;;  %v8880_v15 = vpop.f32.mrf.mxu2  ;;  %v11459_v8 = vld [vmem:[#allocation51_spill] sm:$0xff] }
 0x2f0   : > { %3440 = vmatpush.msrb.mxu0 %v3409_v9 }
 0x2f1   : > { %2460 = vmatmul.f32.gmra.mxu3 %v2339_v63  ;;  %2686 = vmatmul.f32.gmra.mxu0 %v8578_v60  ;;  %v2745_v23 = vadd.f32 %v8720_v18, %v2710_v58  ;;  %v11453_v63 = vld [vmem:[#allocation81_spill] sm:$0xff] }
 0x2f2   : > { %v2066_v51 = vadd.f32 %v8649_v4, %v11453_v63 }
 0x2f3   : > { %v8872_v57 = vmax.f32 %v2745_v23, 0.0 }
 0x2f4   : > { %v2413_v38 = vpop.f32.mrf.mxu3  ;;  %v2292_v23 = vadd.f32 %v8663_v1, %v2066_v51  ;;  %v3873_v51 = vld [vmem:[#allocation6 + $0x2f0] sm:$0xff] }
 0x2f5   : > { %11450 = vst [vmem:[#allocation80_spill] sm:$0xff] %v8872_v57  ;;  %v2858_v62 = vld [vmem:[#allocation2 + $0x6f] sm:$0xff]  ;;  %v2485_v29 = vadd.f32 %v2413_v38, %v2291_v43  ;;  %3088 = vmatmul.f32.gmra.mxu2 %v8872_v57  ;;  %v8889_v43 = vpop.f32.mrf.mxu1 }
 0x2f6   : > { %6996 = vmatmul.msk.f32.gmra.mxu1 %vm11452_vm1, %v2858_v62  ;;  %2809 = vst [vmem:[#allocation2 + $0x78] sm:$0xff] %v8872_v57  ;;  %v2642_v60 = vpop.f32.mrf.mxu0  ;;  %3876 = vmatpush.msrb.mxu2 %v3873_v51 }
 0x2f7   : > { %v2711_v58 = vadd.f32 %v2639_v50, %v2485_v29  ;;  %v2535_v29 = vld [vmem:[#allocation2 + $0x121] sm:$0xff] }
 0x2f9   : > { %2463 = vmatmul.f32.gmra.mxu3 %v2340_v13  ;;  %6988 = vmatmul.msk.f32.gmra.mxu0 %vm11455_vm15, %v8591_v7  ;;  %v2746_v9 = vadd.f32 %v8720_v18, %v2711_v58  ;;  %v11457_v13 = vld [vmem:[#allocation83_spill] sm:$0xff]  ;;  %v7300_v58 = vld [vmem:[#allocation2] sm:$0xff]  ;;  %vm11460_vm15 = vnez %v11459_v8 }
 0x2fa   : > { %v2067_v7 = vadd.f32 %v8658_v33, %v11457_v13  ;;  %v3640_v13 = vld [vmem:[#allocation6 + $0x1b0] sm:$0xff] }
 0x2fb   : > { %v8887_v48 = vmax.f32 %v2746_v9, 0.0  ;;  %v8897_v9 = vpop.f32.mrf.mxu2  ;;  %3659 = vmatpush.msrb.mxu1 %v3640_v13 }
 0x2fc   : > { %v2416_v38 = vpop.f32.mrf.mxu3  ;;  %v2293_v3 = vadd.f32 %v8672_v19, %v2067_v7  ;;  %v2068_v19 = vadd.f32 %v8666_v45, %v8597_v41  ;;  %v3345_v41 = vld [vmem:[#allocation2 + $0x11] sm:$0xff] }
 0x2fd   : > { %11456 = vst [vmem:[#allocation81_spill] sm:$0xff] %v8887_v48  ;;  %v2859_v4 = vld [vmem:[#allocation2 + $0x77] sm:$0xff]  ;;  %v2486_v50 = vadd.f32 %v2416_v38, %v2292_v23  ;;  %3091 = vmatmul.f32.gmra.mxu2 %v8887_v48  ;;  %v8905_v33 = vpop.f32.mrf.mxu1 }
 0x2fe   : > { %2981 = vmatmul.f32.gmra.mxu1 %v2859_v4  ;;  %2810 = vst [vmem:[#allocation2 + $0x80] sm:$0xff] %v8887_v48  ;;  %v2645_v62 = vpop.f32.mrf.mxu0  ;;  %v11465_v7 = vld [vmem:[#allocation54_spill] sm:$0xff] }
 0x2ff   : > { %v2712_v63 = vadd.f32 %v2642_v60, %v2486_v50  ;;  %v2536_v50 = vld [vmem:[#allocation2 + $0x129] sm:$0xff] }
 0x301   : > { %2466 = vmatmul.f32.gmra.mxu3 %v7300_v58  ;;  %2692 = vmatmul.f32.gmra.mxu0 %v2535_v29  ;;  %v2747_v1 = vadd.f32 %v8720_v18, %v2712_v63 }
 0x303   : > { %v8899_v23 = vmax.f32 %v2747_v1, 0.0  ;;  %v2294_v1 = vadd.f32 %v8683_v55, %v2068_v19 }
 0x304   : > { %v2419_v38 = vpop.f32.mrf.mxu3 }
 0x305   : > { %11458 = vst [vmem:[#allocation83_spill] sm:$0xff] %v8899_v23  ;;  %v2860_v4 = vld [vmem:[#allocation2 + $0x7f] sm:$0xff]  ;;  %v2487_v11 = vadd.f32 %v2419_v38, %v2293_v3  ;;  %3094 = vmatmul.f32.gmra.mxu2 %v8899_v23 }
 0x306   : > { %6997 = vmatmul.msk.f32.gmra.mxu1 %vm11460_vm15, %v2860_v4  ;;  %2811 = vst [vmem:[#allocation2 + $0x88] sm:$0xff] %v8899_v23  ;;  %v2648_v60 = vpop.f32.mrf.mxu0  ;;  %v8915_v4 = vpop.f32.mrf.mxu2 }
 0x307   : > { %v2713_v29 = vadd.f32 %v2645_v62, %v2487_v11  ;;  %v8919_v11 = vpop.f32.mrf.mxu1  ;;  %v11463_v62 = vld [vmem:[#allocation84_spill] sm:$0xff] }
 0x309   : > { %2469 = vmatmul.f32.gmra.mxu3 %v7300_v58  ;;  %6989 = vmatmul.msk.f32.gmra.mxu0 %vm8581_vm3, %v2536_v50  ;;  %v2748_v63 = vadd.f32 %v8720_v18, %v2713_v29  ;;  %v2069_v50 = vadd.f32 %v8677_v6, %v11463_v62  ;;  %v3872_v29 = vld [vmem:[#allocation6 + $0x2e8] sm:$0xff]  ;;  %vm11466_vm3 = vnez %v11465_v7 }
 0x30a   : > { %3877 = vmatpush.msrb.mxu2 %v3872_v29  ;;  %v3639_v62 = vld [vmem:[#allocation6 + $0x1a8] sm:$0xff] }
 0x30b   : > { %v8913_v51 = vmax.f32 %v2748_v63, 0.0  ;;  %v2295_v13 = vadd.f32 %v8695_v16, %v2069_v50  ;;  %v3346_v16 = vld [vmem:[#allocation2 + $0x19] sm:$0xff]  ;;  %3660 = vmatpush.msrb.mxu1 %v3639_v62 }
 0x30c   : > { %v2422_v3 = vpop.f32.mrf.mxu3 }
 0x30d   : > { %11462 = vst [vmem:[#allocation108_spill] sm:$0xff] %v8913_v51  ;;  %v2861_v38 = vld [vmem:[#allocation2 + $0x87] sm:$0xff]  ;;  %v2488_v8 = vadd.f32 %v2422_v3, %v2294_v1  ;;  %3097 = vmatmul.f32.gmra.mxu2 %v8913_v51 }
 0x30e   : > { %2987 = vmatmul.f32.gmra.mxu1 %v2861_v38  ;;  %2812 = vst [vmem:[#allocation2 + $0x90] sm:$0xff] %v8913_v51  ;;  %v2651_v45 = vpop.f32.mrf.mxu0 }
 0x30f   : > { %v2714_v55 = vadd.f32 %v2648_v60, %v2488_v8  ;;  %v11467_v8 = vld [vmem:[#allocation85_spill] sm:$0xff]  ;;  %v2946_v50 = vpop.f32.mrf.mxu1 }
 0x310   : > { %v2070_v60 = vadd.f32 %v8690_v40, %v11467_v8 }
 0x311   : > { %3216 = vmatmul.f32.vlgmr.msrb.gmra.mxu3 %v7300_v58  ;;  %3441 = vmatmul.f32.vlgmr.msrb.gmra.mxu0 %v3345_v41  ;;  %v2749_v19 = vadd.f32 %v8720_v18, %v2714_v55  ;;  %v8933_v55 = vpop.f32.mrf.mxu2 }
 0x313   : > { %v8925_v63 = vmax.f32 %v2749_v19, 0.0 }
 0x314   : > { %v2425_v1 = vpop.f32.mrf.mxu3 }
 0x315   : > { %11464 = vst [vmem:[#allocation84_spill] sm:$0xff] %v8925_v63  ;;  %v2862_v3 = vld [vmem:[#allocation2 + $0x8f] sm:$0xff]  ;;  %v2489_v38 = vadd.f32 %v2425_v1, %v2295_v13  ;;  %3100 = vmatmul.f32.gmra.mxu2 %v8925_v63  ;;  %v2296_v13 = vadd.f32 %v8706_v61, %v2070_v60 }
 0x316   : > { %6998 = vmatmul.msk.f32.gmra.mxu1 %vm11466_vm3, %v2862_v3  ;;  %2813 = vst [vmem:[#allocation2 + $0x98] sm:$0xff] %v8925_v63  ;;  %v2654_v6 = vpop.f32.mrf.mxu0 }
 0x317   : > { %v2715_v41 = vadd.f32 %v2651_v45, %v2489_v38  ;;  %v11470_v38 = vld [vmem:[#allocation86_spill] sm:$0xff] }
 0x319   : > { %3219 = vmatmul.f32.gmra.mxu3 %v7300_v58  ;;  %7006 = vmatmul.msk.f32.gmra.mxu0 %vm8161_vm7, %v3346_v16  ;;  %v2750_v29 = vadd.f32 %v8720_v18, %v2715_v41  ;;  %v2071_v58 = vadd.f32 %v8698_v14, %v11470_v38  ;;  %v8947_v41 = vld [vmem:[#allocation2 + $0x21] sm:$0xff]  ;;  %v11474_v38 = vld [vmem:[#allocation87_spill] sm:$0xff] }
 0x31b   : > { %v8939_v1 = vmax.f32 %v2750_v29, 0.0  ;;  %v2297_v16 = vadd.f32 %v8714_v2, %v2071_v58  ;;  %v8961_v2 = vld [vmem:[#allocation2 + $0x29] sm:$0xff] }
 0x31c   : > { %v2428_v3 = vpop.f32.mrf.mxu3 }
 0x31d   : > { %11469 = vst [vmem:[#allocation85_spill] sm:$0xff] %v8939_v1  ;;  %v2863_v7 = vld [vmem:[#allocation2 + $0x97] sm:$0xff]  ;;  %v2490_v40 = vadd.f32 %v2428_v3, %v2296_v13  ;;  %3103 = vmatmul.f32.gmra.mxu2 %v8939_v1  ;;  %v11472_v3 = vld [vmem:[#allocation57_spill] sm:$0xff] }
 0x31e   : > { %2993 = vmatmul.f32.gmra.mxu1 %v2863_v7  ;;  %2814 = vst [vmem:[#allocation2 + $0xa0] sm:$0xff] %v8939_v1  ;;  %v2657_v45 = vpop.f32.mrf.mxu0  ;;  %v3871_v7 = vld [vmem:[#allocation6 + $0x2e0] sm:$0xff]  ;;  %vm11473_vm3 = vnez %v11472_v3 }
 0x31f   : > { %v2716_v8 = vadd.f32 %v2654_v6, %v2490_v40  ;;  %3878 = vmatpush.msrb.mxu2 %v3871_v7  ;;  %v3638_v7 = vld [vmem:[#allocation6 + $0x1a0] sm:$0xff] }
 0x320   : > { %v8945_v62 = vpop.f32.mrf.mxu2  ;;  %3661 = vmatpush.msrb.mxu1 %v3638_v7 }
 0x321   : > { %3222 = vmatmul.f32.gmra.mxu3 %v8728_v35  ;;  %3447 = vmatmul.f32.gmra.mxu0 %v8947_v41  ;;  %v2751_v61 = vadd.f32 %v8720_v18, %v2716_v8  ;;  %v2072_v8 = vadd.f32 %v8709_v26, %v11474_v38 }
 0x323   : > { %v2949_v60 = vpop.f32.mrf.mxu1  ;;  %v8953_v29 = vmax.f32 %v2751_v61, 0.0  ;;  %v9250_v61 = vld [vmem:[#allocation2 + $0x47] sm:$0xff] }
 0x324   : > { %v2431_v13 = vpop.f32.mrf.mxu3 }
 0x325   : > { %11471 = vst [vmem:[#allocation86_spill] sm:$0xff] %v8953_v29  ;;  %v2864_v14 = vld [vmem:[#allocation2 + $0x9f] sm:$0xff]  ;;  %v2491_v6 = vadd.f32 %v2431_v13, %v2297_v16  ;;  %3106 = vmatmul.f32.gmra.mxu2 %v8953_v29 }
 0x326   : > { %6999 = vmatmul.msk.f32.gmra.mxu1 %vm11473_vm3, %v2864_v14  ;;  %2815 = vst [vmem:[#allocation2 + $0xa8] sm:$0xff] %v8953_v29  ;;  %v2660_v40 = vpop.f32.mrf.mxu0  ;;  %v2298_v14 = vadd.f32 %v8733_v42, %v2072_v8  ;;  %v3870_v8 = vld [vmem:[#allocation6 + $0x2d8] sm:$0xff] }
 0x327   : > { %v2717_v35 = vadd.f32 %v2657_v45, %v2491_v6  ;;  %3879 = vmatpush.msrb.mxu2 %v3870_v8  ;;  %v3637_v8 = vld [vmem:[#allocation6 + $0x198] sm:$0xff] }
 0x328   : > { %v3059_v20 = vpop.f32.mrf.mxu2  ;;  %3662 = vmatpush.msrb.mxu1 %v3637_v8 }
 0x329   : > { %v8963_v58 = vadd.f32 %v3059_v20, %v2946_v50  ;;  %3225 = vmatmul.f32.gmra.mxu3 %v8739_v25  ;;  %7007 = vmatmul.msk.f32.gmra.mxu0 %vm8188_vm0, %v8961_v2  ;;  %v2752_v16 = vadd.f32 %v8720_v18, %v2717_v35  ;;  %v11477_v50 = vld [vmem:[#allocation88_spill] sm:$0xff]  ;;  %v8977_v35 = vld [vmem:[#allocation2 + $0x31] sm:$0xff] }
 0x32a   : > { %v2073_v7 = vadd.f32 %v8722_v5, %v11477_v50 }
 0x32b   : > { %v2952_v13 = vpop.f32.mrf.mxu1  ;;  %v8971_v26 = vmax.f32 %v2752_v16, 0.0 }
 0x32c   : > { %v2434_v45 = vpop.f32.mrf.mxu3 }
 0x32d   : > { %11476 = vst [vmem:[#allocation87_spill] sm:$0xff] %v8971_v26  ;;  %v2865_v6 = vld [vmem:[#allocation2 + $0xa7] sm:$0xff]  ;;  %v2492_v38 = vadd.f32 %v2434_v45, %v2298_v14  ;;  %3109 = vmatmul.f32.gmra.mxu2 %v8971_v26  ;;  %v2299_v14 = vadd.f32 %v8746_v47, %v2073_v7  ;;  %v8993_v47 = vld [vmem:[#allocation2 + $0x39] sm:$0xff] }
 0x32e   : > { %2999 = vmatmul.f32.gmra.mxu1 %v2865_v6  ;;  %2816 = vst [vmem:[#allocation2 + $0xb0] sm:$0xff] %v8971_v26  ;;  %v2663_v20 = vpop.f32.mrf.mxu0 }
 0x32f   : > { %v2718_v25 = vadd.f32 %v2660_v40, %v2492_v38  ;;  %v11479_v38 = vld [vmem:[#allocation58_spill] sm:$0xff] }
 0x330   : > { %v3062_v3 = vpop.f32.mrf.mxu2  ;;  %vm11480_vm3 = vnez %v11479_v38 }
 0x331   : > { %v8979_v27 = vadd.f32 %v3062_v3, %v2949_v60  ;;  %3228 = vmatmul.f32.gmra.mxu3 %v8752_v34  ;;  %3453 = vmatmul.f32.gmra.mxu0 %v8977_v35  ;;  %v2753_v42 = vadd.f32 %v8720_v18, %v2718_v25  ;;  %v11481_v3 = vld [vmem:[#allocation89_spill] sm:$0xff] }
 0x332   : > { %v2074_v25 = vadd.f32 %v8737_v46, %v11481_v3 }
 0x333   : > { %v2955_v16 = vpop.f32.mrf.mxu1  ;;  %v8985_v45 = vmax.f32 %v2753_v42, 0.0 }
 0x334   : > { %v2437_v5 = vpop.f32.mrf.mxu3 }
 0x335   : > { %11478 = vst [vmem:[#allocation88_spill] sm:$0xff] %v8985_v45  ;;  %v2866_v40 = vld [vmem:[#allocation2 + $0xaf] sm:$0xff]  ;;  %v2493_v6 = vadd.f32 %v2437_v5, %v2299_v14  ;;  %3112 = vmatmul.f32.gmra.mxu2 %v8985_v45 }
 0x336   : > { %7000 = vmatmul.msk.f32.gmra.mxu1 %vm11480_vm3, %v2866_v40  ;;  %2817 = vst [vmem:[#allocation2 + $0xb8] sm:$0xff] %v8985_v45  ;;  %v2666_v60 = vpop.f32.mrf.mxu0  ;;  %v2300_v40 = vadd.f32 %v8761_v31, %v2074_v25  ;;  %v3869_v25 = vld [vmem:[#allocation6 + $0x2d0] sm:$0xff] }
 0x337   : > { %v2719_v50 = vadd.f32 %v2663_v20, %v2493_v6  ;;  %3880 = vmatpush.msrb.mxu2 %v3869_v25  ;;  %v3636_v25 = vld [vmem:[#allocation6 + $0x190] sm:$0xff] }
 0x338   : > { %v3065_v34 = vpop.f32.mrf.mxu2  ;;  %3663 = vmatpush.msrb.mxu1 %v3636_v25  ;;  %v11492_v25 = vld [vmem:[#allocation73_spill] sm:$0xff] }
 0x339   : > { %v8995_v7 = vadd.f32 %v3065_v34, %v2952_v13  ;;  %3231 = vmatmul.f32.gmra.mxu3 %v8763_v56  ;;  %7008 = vmatmul.msk.f32.gmra.mxu0 %vm8215_vm2, %v8993_v47  ;;  %v2754_v14 = vadd.f32 %v8720_v18, %v2719_v50  ;;  %v11484_v13 = vld [vmem:[#allocation90_spill] sm:$0xff]  ;;  %v9009_v50 = vld [vmem:[#allocation2 + $0x41] sm:$0xff] }
 0x33a   : > { %v2075_v8 = vadd.f32 %v8754_v12, %v11484_v13 }
 0x33b   : > { %v2958_v5 = vpop.f32.mrf.mxu1  ;;  %v9003_v46 = vmax.f32 %v2754_v14, 0.0 }
 0x33c   : > { %v2440_v20 = vpop.f32.mrf.mxu3 }
 0x33d   : > { %11483 = vst [vmem:[#allocation89_spill] sm:$0xff] %v9003_v46  ;;  %v2867_v6 = vld [vmem:[#allocation2 + $0xb7] sm:$0xff]  ;;  %v2494_v3 = vadd.f32 %v2440_v20, %v2300_v40  ;;  %3115 = vmatmul.f32.gmra.mxu2 %v9003_v46  ;;  %v2301_v40 = vadd.f32 %v8778_v59, %v2075_v8  ;;  %v9025_v59 = vld [vmem:[#allocation2 + $0x49] sm:$0xff] }
 0x33e   : > { %3005 = vmatmul.f32.gmra.mxu1 %v2867_v6  ;;  %2818 = vst [vmem:[#allocation2 + $0xc0] sm:$0xff] %v9003_v46  ;;  %v2669_v34 = vpop.f32.mrf.mxu0 }
 0x33f   : > { %v2720_v56 = vadd.f32 %v2666_v60, %v2494_v3  ;;  %v11486_v3 = vld [vmem:[#allocation59_spill] sm:$0xff] }
 0x340   : > { %v3068_v38 = vpop.f32.mrf.mxu2  ;;  %vm11487_vm3 = vnez %v11486_v3 }
 0x341   : > { %v9011_v42 = vadd.f32 %v3068_v38, %v2955_v16  ;;  %3234 = vmatmul.f32.gmra.mxu3 %v8776_v32  ;;  %3459 = vmatmul.f32.gmra.mxu0 %v9009_v50  ;;  %v2755_v31 = vadd.f32 %v8720_v18, %v2720_v56  ;;  %v11488_v38 = vld [vmem:[#allocation91_spill] sm:$0xff] }
 0x342   : > { %v2076_v56 = vadd.f32 %v8770_v28, %v11488_v38 }
 0x343   : > { %v2961_v14 = vpop.f32.mrf.mxu1  ;;  %v9017_v20 = vmax.f32 %v2755_v31, 0.0 }
 0x344   : > { %v2443_v12 = vpop.f32.mrf.mxu3 }
 0x345   : > { %11485 = vst [vmem:[#allocation90_spill] sm:$0xff] %v9017_v20  ;;  %v2868_v60 = vld [vmem:[#allocation2 + $0xbf] sm:$0xff]  ;;  %v2495_v6 = vadd.f32 %v2443_v12, %v2301_v40  ;;  %3118 = vmatmul.f32.gmra.mxu2 %v9017_v20 }
 0x346   : > { %7001 = vmatmul.msk.f32.gmra.mxu1 %vm11487_vm3, %v2868_v60  ;;  %2819 = vst [vmem:[#allocation2 + $0xc8] sm:$0xff] %v9017_v20  ;;  %v2672_v16 = vpop.f32.mrf.mxu0  ;;  %v2302_v60 = vadd.f32 %v8794_v49, %v2076_v56  ;;  %v3868_v56 = vld [vmem:[#allocation6 + $0x2c8] sm:$0xff] }
 0x347   : > { %v2721_v13 = vadd.f32 %v2669_v34, %v2495_v6  ;;  %3881 = vmatpush.msrb.mxu2 %v3868_v56  ;;  %v3635_v56 = vld [vmem:[#allocation6 + $0x188] sm:$0xff] }
 0x348   : > { %v3071_v32 = vpop.f32.mrf.mxu2  ;;  %3664 = vmatpush.msrb.mxu1 %v3635_v56 }
 0x349   : > { %v9027_v8 = vadd.f32 %v3071_v32, %v2958_v5  ;;  %3237 = vmatmul.f32.gmra.mxu3 %v8787_v39  ;;  %7009 = vmatmul.msk.f32.gmra.mxu0 %vm8242_vm4, %v9025_v59  ;;  %v2756_v40 = vadd.f32 %v8720_v18, %v2721_v13  ;;  %v11491_v5 = vld [vmem:[#allocation92_spill] sm:$0xff]  ;;  %v9041_v13 = vld [vmem:[#allocation2 + $0x51] sm:$0xff] }
 0x34a   : > { %v2077_v39 = vadd.f32 %v11492_v25, %v11491_v5  ;;  %v11494_v5 = vld [vmem:[#allocation22_spill] sm:$0xff] }
 0x34b   : > { %v2964_v12 = vpop.f32.mrf.mxu1  ;;  %v9035_v28 = vmax.f32 %v2756_v40, 0.0  ;;  %vm11495_vm3 = vnez %v11494_v5 }
 0x34c   : > { %v2446_v34 = vpop.f32.mrf.mxu3 }
 0x34d   : > { %11490 = vst [vmem:[#allocation91_spill] sm:$0xff] %v9035_v28  ;;  %v2869_v6 = vld [vmem:[#allocation2 + $0xc7] sm:$0xff]  ;;  %v2496_v38 = vadd.f32 %v2446_v34, %v2302_v60  ;;  %3121 = vmatmul.f32.gmra.mxu2 %v9035_v28  ;;  %v2303_v60 = vadd.f32 %v8809_v37, %v2077_v39  ;;  %v9057_v39 = vld [vmem:[#allocation2 + $0x59] sm:$0xff] }
 0x34e   : > { %3011 = vmatmul.f32.gmra.mxu1 %v2869_v6  ;;  %2820 = vst [vmem:[#allocation2 + $0xd0] sm:$0xff] %v9035_v28  ;;  %v2675_v32 = vpop.f32.mrf.mxu0 }
 0x34f   : > { %v2722_v3 = vadd.f32 %v2672_v16, %v2496_v38 }
 0x350   : > { %v3074_v31 = vpop.f32.mrf.mxu2 }
 0x351   : > { %v9043_v20 = vadd.f32 %v3074_v31, %v2961_v14  ;;  %3240 = vmatmul.f32.gmra.mxu3 %v8802_v44  ;;  %3465 = vmatmul.f32.gmra.mxu0 %v9041_v13  ;;  %v2757_v49 = vadd.f32 %v8720_v18, %v2722_v3  ;;  %v11496_v31 = vld [vmem:[#allocation93_spill] sm:$0xff]  ;;  %v11497_v3 = vld [vmem:[#allocation104_spill] sm:$0xff] }
 0x352   : > { %v2078_v25 = vadd.f32 %v11497_v3, %v11496_v31 }
 0x353   : > { %v2967_v40 = vpop.f32.mrf.mxu1  ;;  %v9049_v34 = vmax.f32 %v2757_v49, 0.0 }
 0x354   : > { %v2449_v6 = vpop.f32.mrf.mxu3 }
 0x355   : > { %11493 = vst [vmem:[#allocation92_spill] sm:$0xff] %v9049_v34  ;;  %v2870_v16 = vld [vmem:[#allocation2 + $0xcf] sm:$0xff]  ;;  %v2497_v38 = vadd.f32 %v2449_v6, %v2303_v60  ;;  %3124 = vmatmul.f32.gmra.mxu2 %v9049_v34 }
 0x356   : > { %7002 = vmatmul.msk.f32.gmra.mxu1 %vm11495_vm3, %v2870_v16  ;;  %2821 = vst [vmem:[#allocation2 + $0xd8] sm:$0xff] %v9049_v34  ;;  %v2678_v14 = vpop.f32.mrf.mxu0  ;;  %v2304_v16 = vadd.f32 %v8829_v54, %v2078_v25  ;;  %v3867_v25 = vld [vmem:[#allocation6 + $0x2c0] sm:$0xff] }
 0x357   : > { %v2723_v44 = vadd.f32 %v2675_v32, %v2497_v38  ;;  %3882 = vmatpush.msrb.mxu2 %v3867_v25 }
 0x358   : > { %v3077_v28 = vpop.f32.mrf.mxu2 }
 0x359   : > { %v9059_v37 = vadd.f32 %v3077_v28, %v2964_v12  ;;  %3243 = vmatmul.f32.gmra.mxu3 %v8814_v22  ;;  %7010 = vmatmul.msk.f32.gmra.mxu0 %vm8269_vm6, %v9057_v39  ;;  %v2758_v60 = vadd.f32 %v8720_v18, %v2723_v44  ;;  %v11500_v28 = vld [vmem:[#allocation94_spill] sm:$0xff]  ;;  %v9073_v44 = vld [vmem:[#allocation2 + $0x61] sm:$0xff] }
 0x35a   : > { %v2079_v56 = vadd.f32 %v8816_v10, %v11500_v28  ;;  %v3634_v28 = vld [vmem:[#allocation6 + $0x180] sm:$0xff] }
 0x35b   : > { %v2970_v6 = vpop.f32.mrf.mxu1  ;;  %v9067_v31 = vmax.f32 %v2758_v60, 0.0  ;;  %3665 = vmatpush.msrb.mxu1 %v3634_v28 }
 0x35c   : > { %v2452_v32 = vpop.f32.mrf.mxu3 }
 0x35d   : > { %11499 = vst [vmem:[#allocation73_spill] sm:$0xff] %v9067_v31  ;;  %v2871_v38 = vld [vmem:[#allocation2 + $0xd7] sm:$0xff]  ;;  %v2498_v3 = vadd.f32 %v2452_v32, %v2304_v16  ;;  %3127 = vmatmul.f32.gmra.mxu2 %v9067_v31  ;;  %v2305_v16 = vadd.f32 %v8844_v30, %v2079_v56  ;;  %v9089_v30 = vld [vmem:[#allocation2 + $0x69] sm:$0xff] }
 0x35e   : > { %3017 = vmatmul.f32.gmra.mxu1 %v2871_v38  ;;  %2822 = vst [vmem:[#allocation2 + $0xe0] sm:$0xff] %v9067_v31  ;;  %v2681_v12 = vpop.f32.mrf.mxu0 }
 0x35f   : > { %v2724_v22 = vadd.f32 %v2678_v14, %v2498_v3  ;;  %v11502_v3 = vld [vmem:[#allocation28_spill] sm:$0xff] }
 0x360   : > { %v3080_v5 = vpop.f32.mrf.mxu2  ;;  %vm11503_vm3 = vnez %v11502_v3 }
 0x361   : > { %v9075_v49 = vadd.f32 %v3080_v5, %v2967_v40  ;;  %3246 = vmatmul.f32.gmra.mxu3 %v8831_v53  ;;  %3471 = vmatmul.f32.gmra.mxu0 %v9073_v44  ;;  %v2759_v54 = vadd.f32 %v8720_v18, %v2724_v22  ;;  %v11504_v5 = vld [vmem:[#allocation66_spill] sm:$0xff]  ;;  %v11507_v53 = vld [vmem:[#allocation95_spill] sm:$0xff] }
 0x362   : > { %v2080_v18 = vadd.f32 %v8835_v21, %v11504_v5 }
 0x363   : > { %v2973_v60 = vpop.f32.mrf.mxu1  ;;  %v9081_v32 = vmax.f32 %v2759_v54, 0.0  ;;  %v3865_v54 = vld [vmem:[#allocation6 + $0x2b0] sm:$0xff] }
 0x364   : > { %v2455_v10 = vpop.f32.mrf.mxu3 }
 0x365   : > { %11501 = vst [vmem:[#allocation93_spill] sm:$0xff] %v9081_v32  ;;  %v2872_v14 = vld [vmem:[#allocation2 + $0xdf] sm:$0xff]  ;;  %v2499_v38 = vadd.f32 %v2455_v10, %v2305_v16  ;;  %3130 = vmatmul.f32.gmra.mxu2 %v9081_v32 }
 0x366   : > { %7003 = vmatmul.msk.f32.gmra.mxu1 %vm11503_vm3, %v2872_v14  ;;  %2823 = vst [vmem:[#allocation2 + $0xe8] sm:$0xff] %v9081_v32  ;;  %v2684_v40 = vpop.f32.mrf.mxu0  ;;  %v9100_v16 = vld [vmem:[%s10996_s2] ss:$0 sm:$0xff]  ;;  %v4099_v10 = vld [vmem:[#allocation6 + $0x378] sm:$0xff]  ;;  %v2306_v14 = vadd.f32 %v8865_v24, %v2080_v18 }
 0x367   : > { %v2725_v22 = vadd.f32 %v2681_v12, %v2499_v38  ;;  %4100 = vmatpush.msra.mxu3 %v4099_v10  ;;  %v9110_v18 = vld [vmem:[#allocation2 + $0x71] sm:$0xff] }
 0x368   : > { %v3083_v25 = vpop.f32.mrf.mxu2 }
 0x369   : > { %v9091_v56 = vadd.f32 %v3083_v25, %v2970_v6  ;;  %3249 = vmatmul.f32.gmra.mxu3 %v8842_v52  ;;  %7011 = vmatmul.msk.f32.gmra.mxu0 %vm8296_vm8, %v9089_v30  ;;  %v2760_v21 = vadd.f32 %v9100_v16, %v2725_v22  ;;  %v3866_v25 = vld [vmem:[#allocation6 + $0x2b8] sm:$0xff]  ;;  %v2081_v22 = vadd.f32 %v8852_v36, %v11507_v53 }
 0x36a   : > { %3883 = vmatpush.msrb.mxu2 %v3866_v25  ;;  %v11509_v25 = vld [vmem:[#allocation33_spill] sm:$0xff] }
 0x36b   : > { %v2976_v12 = vpop.f32.mrf.mxu1  ;;  %v9104_v38 = vmax.f32 %v2760_v21, 0.0  ;;  %v2307_v53 = vadd.f32 %v8880_v15, %v2081_v22  ;;  %vm11510_vm3 = vnez %v11509_v25  ;;  %v11511_v15 = vld [vmem:[#allocation96_spill] sm:$0xff] }
 0x36c   : > { %v2458_v6 = vpop.f32.mrf.mxu3  ;;  %3884 = vmatpush.msrb.mxu2 %v3865_v54  ;;  %v2082_v22 = vadd.f32 %v8869_v17, %v11511_v15  ;;  %v4098_v17 = vld [vmem:[#allocation6 + $0x370] sm:$0xff]  ;;  %v3859_v15 = vld [vmem:[#allocation6 + $0x280] sm:$0xff] }
 0x36d   : > { %11506 = vst [vmem:[#allocation104_spill] sm:$0xff] %v9104_v38  ;;  %v2873_v5 = vld [vmem:[#allocation2 + $0xe7] sm:$0xff]  ;;  %v2500_v28 = vadd.f32 %v2458_v6, %v2306_v14  ;;  %3133 = vmatmul.f32.gmra.mxu2 %v9104_v38  ;;  %4101 = vmatpush.msra.mxu3 %v4098_v17 }
 0x36e   : > { %3023 = vmatmul.f32.gmra.mxu1 %v2873_v5  ;;  %2824 = vst [vmem:[#allocation2 + $0xf0] sm:$0xff] %v9104_v38  ;;  %v2687_v52 = vpop.f32.mrf.mxu0  ;;  %v3864_v14 = vld [vmem:[#allocation6 + $0x2a8] sm:$0xff]  ;;  %v4292_v5 = vld [vmem:[#allocation6 + $0x3f8] sm:$0xff] }
 0x36f   : > { %v2726_v3 = vadd.f32 %v2684_v40, %v2500_v28  ;;  %3885 = vmatpush.msrb.mxu2 %v3864_v14  ;;  %4293 = vmatpush.msra.mxu0 %v4292_v5  ;;  %v3863_v40 = vld [vmem:[#allocation6 + $0x2a0] sm:$0xff]  ;;  %v3861_v5 = vld [vmem:[#allocation6 + $0x290] sm:$0xff] }
 0x370   : > { %v3086_v24 = vpop.f32.mrf.mxu2 }
 0x371   : > { %v9112_v21 = vadd.f32 %v3086_v24, %v2973_v60  ;;  %3252 = vmatmul.f32.gmra.mxu3 %v8859_v0  ;;  %3477 = vmatmul.f32.gmra.mxu0 %v9110_v18  ;;  %v2761_v10 = vadd.f32 %v9100_v16, %v2726_v3  ;;  %v4517_v3 = vld [vmem:[#allocation6 + $0x478] sm:$0xff] }
 0x372   : > { %3886 = vmatpush.msrb.mxu2 %v3863_v40  ;;  %v3862_v24 = vld [vmem:[#allocation6 + $0x298] sm:$0xff]  ;;  %4518 = vmatpush.msra.mxu1 %v4517_v3  ;;  %v3860_v3 = vld [vmem:[#allocation6 + $0x288] sm:$0xff] }
 0x373   : > { %v2979_v6 = vpop.f32.mrf.mxu1  ;;  %v9118_v36 = vmax.f32 %v2761_v10, 0.0  ;;  %v9126_v40 = vld [vmem:[#allocation2 + $0x79] sm:$0xff] }
 0x374   : > { %v2461_v28 = vpop.f32.mrf.mxu3  ;;  %3887 = vmatpush.msrb.mxu2 %v3862_v24 }
 0x375   : > { %11508 = vst [vmem:[#allocation94_spill] sm:$0xff] %v9118_v36  ;;  %v2874_v54 = vld [vmem:[#allocation2 + $0xef] sm:$0xff]  ;;  %v2501_v60 = vadd.f32 %v2461_v28, %v2307_v53  ;;  %3136 = vmatmul.f32.gmra.mxu2 %v9118_v36 }
 0x376   : > { %7004 = vmatmul.msk.f32.gmra.mxu1 %vm11510_vm3, %v2874_v54  ;;  %2825 = vst [vmem:[#allocation2 + $0xf8] sm:$0xff] %v9118_v36  ;;  %v2690_v14 = vpop.f32.mrf.mxu0  ;;  %3888 = vmatpush.msrb.mxu2 %v3861_v5 }
 0x377   : > { %v2727_v10 = vadd.f32 %v2687_v52, %v2501_v60  ;;  %v2308_v52 = vadd.f32 %v8897_v9, %v2082_v22  ;;  %v9142_v9 = vld [vmem:[#allocation2 + $0x81] sm:$0xff] }
 0x378   : > { %v3089_v0 = vpop.f32.mrf.mxu2  ;;  %3889 = vmatpush.msrb.mxu2 %v3860_v3 }
 0x379   : > { %v9128_v53 = vadd.f32 %v3089_v0, %v2976_v12  ;;  %3255 = vmatmul.f32.gmra.mxu3 %v8872_v57  ;;  %7012 = vmatmul.msk.f32.gmra.mxu0 %vm8323_vm9, %v9126_v40  ;;  %v2762_v54 = vadd.f32 %v9100_v16, %v2727_v10  ;;  %v11514_v57 = vld [vmem:[#allocation97_spill] sm:$0xff] }
 0x37a   : > { %3890 = vmatpush.msrb.mxu2 %v3859_v15  ;;  %v2083_v3 = vadd.f32 %v8889_v43, %v11514_v57 }
 0x37b   : > { %v2982_v24 = vpop.f32.mrf.mxu1  ;;  %v9136_v60 = vmax.f32 %v2762_v54, 0.0 }
 0x37c   : > { %v2464_v0 = vpop.f32.mrf.mxu3  ;;  %v2309_v15 = vadd.f32 %v8915_v4, %v2083_v3 }
 0x37d   : > { %11513 = vst [vmem:[#allocation66_spill] sm:$0xff] %v9136_v60  ;;  %v2875_v12 = vld [vmem:[#allocation2 + $0xf7] sm:$0xff]  ;;  %v2502_v5 = vadd.f32 %v2464_v0, %v2308_v52  ;;  %3139 = vmatmul.f32.gmra.mxu2 %v9136_v60 }
 0x37e   : > { %3029 = vmatmul.f32.gmra.mxu1 %v2875_v12  ;;  %2826 = vst [vmem:[#allocation2 + $0x100] sm:$0xff] %v9136_v60  ;;  %v2693_v10 = vpop.f32.mrf.mxu0  ;;  %v4291_v52 = vld [vmem:[#allocation6 + $0x3f0] sm:$0xff]  ;;  %v11516_v12 = vld [vmem:[#allocation37_spill] sm:$0xff] }
 0x37f   : > { %v2728_v25 = vadd.f32 %v2690_v14, %v2502_v5  ;;  %4294 = vmatpush.msra.mxu0 %v4291_v52  ;;  %vm11517_vm3 = vnez %v11516_v12 }
 0x380   : > { %v3092_v28 = vpop.f32.mrf.mxu2 }
 0x381   : > { %v9144_v22 = vadd.f32 %v3092_v28, %v2979_v6  ;;  %3258 = vmatmul.f32.gmra.mxu3 %v8887_v48  ;;  %3483 = vmatmul.f32.gmra.mxu0 %v9142_v9  ;;  %v2763_v54 = vadd.f32 %v9100_v16, %v2728_v25  ;;  %v4516_v6 = vld [vmem:[#allocation6 + $0x470] sm:$0xff]  ;;  %v4097_v48 = vld [vmem:[#allocation6 + $0x368] sm:$0xff] }
 0x382   : > { %4519 = vmatpush.msra.mxu1 %v4516_v6  ;;  %v11518_v25 = vld [vmem:[#allocation98_spill] sm:$0xff]  ;;  %4102 = vmatpush.msra.mxu3 %v4097_v48 }
 0x383   : > { %v2985_v17 = vpop.f32.mrf.mxu1  ;;  %v9150_v0 = vmax.f32 %v2763_v54, 0.0  ;;  %v2084_v5 = vadd.f32 %v8905_v33, %v11518_v25  ;;  %v9158_v54 = vld [vmem:[#allocation2 + $0x89] sm:$0xff] }
 0x384   : > { %v2467_v57 = vpop.f32.mrf.mxu3 }
 0x385   : > { %11515 = vst [vmem:[#allocation95_spill] sm:$0xff] %v9150_v0  ;;  %v2876_v43 = vld [vmem:[#allocation2 + $0xff] sm:$0xff]  ;;  %v2503_v14 = vadd.f32 %v2467_v57, %v2309_v15  ;;  %3142 = vmatmul.f32.gmra.mxu2 %v9150_v0  ;;  %v2310_v6 = vadd.f32 %v8933_v55, %v2084_v5  ;;  %v4290_v5 = vld [vmem:[#allocation6 + $0x3e8] sm:$0xff] }
 0x386   : > { %7005 = vmatmul.msk.f32.gmra.mxu1 %vm11517_vm3, %v2876_v43  ;;  %2827 = vst [vmem:[#allocation2 + $0x108] sm:$0xff] %v9150_v0  ;;  %v2696_v28 = vpop.f32.mrf.mxu0  ;;  %4295 = vmatpush.msra.mxu0 %v4290_v5 }
 0x387   : > { %v2729_v4 = vadd.f32 %v2693_v10, %v2503_v14 }
 0x388   : > { %v3095_v3 = vpop.f32.mrf.mxu2 }
 0x389   : > { %v9160_v52 = vadd.f32 %v3095_v3, %v2982_v24  ;;  %3261 = vmatmul.f32.gmra.mxu3 %v8899_v23  ;;  %7013 = vmatmul.msk.f32.gmra.mxu0 %vm8352_vm10, %v9158_v54  ;;  %v2764_v57 = vadd.f32 %v9100_v16, %v2729_v4  ;;  %v9168_v23 = vld [vmem:[#allocation2 + $0x91] sm:$0xff]  ;;  %v3057_v4 = vadd.f32 %v8945_v62, %v8919_v11  ;;  %v11521_v11 = vld [vmem:[#allocation69_spill] sm:$0xff] }
 0x38a   : > { %vm11522_vm3 = vnez %v11521_v11 }
 0x38b   : > { %v2988_v43 = vpop.f32.mrf.mxu1  ;;  %v2796_v12 = vmax.f32 %v2764_v57, 0.0 }
 0x38c   : > { %v2470_v33 = vpop.f32.mrf.mxu3 }
 0x38d   : > { %v2877_v10 = vld [vmem:[#allocation2 + $0x107] sm:$0xff]  ;;  %v2504_v14 = vadd.f32 %v2470_v33, %v2310_v6  ;;  %3145 = vmatmul.f32.gmra.mxu2 %v2796_v12  ;;  %2828 = vst [vmem:[#allocation2 + $0x110] sm:$0xff] %v2796_v12 }
 0x38e   : > { %3035 = vmatmul.f32.gmra.mxu1 %v2877_v10  ;;  %v3442_v24 = vpop.f32.mrf.mxu0  ;;  %v4515_v33 = vld [vmem:[#allocation6 + $0x468] sm:$0xff] }
 0x38f   : > { %v2730_v25 = vadd.f32 %v2696_v28, %v2504_v14  ;;  %v3570_v28 = vld [vmem:[#allocation2 + $0x1f] sm:$0xff]  ;;  %4520 = vmatpush.msra.mxu1 %v4515_v33 }
 0x390   : > { %v3098_v3 = vpop.f32.mrf.mxu2 }
 0x391   : > { %v9170_v15 = vadd.f32 %v3098_v3, %v2985_v17  ;;  %3264 = vmatmul.f32.gmra.mxu3 %v8913_v51  ;;  %3489 = vmatmul.f32.gmra.mxu0 %v9168_v23  ;;  %v2765_v55 = vadd.f32 %v9100_v16, %v2730_v25  ;;  %v9181_v25 = vld [vmem:[#allocation2 + $0x99] sm:$0xff]  ;;  %v9436_v17 = vld [vmem:[#allocation2 + $0xa7] sm:$0xff] }
 0x392   : > { %v4288_v51 = vld [vmem:[#allocation6 + $0x3d8] sm:$0xff] }
 0x393   : > { %v2991_v48 = vpop.f32.mrf.mxu1  ;;  %v2797_v57 = vmax.f32 %v2765_v55, 0.0  ;;  %v4096_v55 = vld [vmem:[#allocation6 + $0x360] sm:$0xff] }
 0x394   : > { %v3217_v12 = vpop.f32.mrf.mxu3  ;;  %4103 = vmatpush.msra.mxu3 %v4096_v55 }
 0x395   : > { %v3313_v6 = vadd.f32 %v3217_v12, %v3057_v4  ;;  %3148 = vmatmul.f32.gmra.mxu2 %v2797_v57  ;;  %2829 = vst [vmem:[#allocation2 + $0x118] sm:$0xff] %v2797_v57  ;;  %v3571_v4 = vld [vmem:[#allocation2 + $0x27] sm:$0xff] }
 0x396   : > { %7022 = vmatmul.msk.f32.vlgmr.msrb.gmra.mxu1 %vm11411_vm5, %v3570_v28  ;;  %v3445_v10 = vpop.f32.mrf.mxu0  ;;  %v9193_v28 = vld [vmem:[#allocation2 + $0xa1] sm:$0xff] }
 0x397   : > { %v9179_v14 = vadd.f32 %v3442_v24, %v3313_v6 }
 0x398   : > { %v3101_v16 = vpop.f32.mrf.mxu2 }
 0x399   : > { %v9183_v3 = vadd.f32 %v3101_v16, %v2988_v43  ;;  %3267 = vmatmul.f32.gmra.mxu3 %v8925_v63  ;;  %7014 = vmatmul.msk.f32.gmra.mxu0 %vm11522_vm3, %v9181_v25  ;;  %v4289_v16 = vld [vmem:[#allocation6 + $0x3e0] sm:$0xff]  ;;  %v9218_v63 = vld [vmem:[#allocation2 + $0x37] sm:$0xff] }
 0x39a   : > { %4296 = vmatpush.msra.mxu0 %v4289_v16 }
 0x39b   : > { %v2994_v62 = vpop.f32.mrf.mxu1 }
 0x39c   : > { %v3220_v5 = vpop.f32.mrf.mxu3  ;;  %4297 = vmatpush.msra.mxu0 %v4288_v51  ;;  %v9242_v51 = vld [vmem:[#allocation2 + $0xb9] sm:$0xff] }
 0x39d   : > { %v3314_v57 = vadd.f32 %v3220_v5, %v8963_v58  ;;  %3891 = vmatmul.f32.vlgmr.msrb.gmra.mxu2 %v8947_v41  ;;  %v9199_v58 = vld [vmem:[#allocation2 + $0x2f] sm:$0xff] }
 0x39e   : > { %3669 = vmatmul.f32.gmra.mxu1 %v3571_v4  ;;  %v3448_v24 = vpop.f32.mrf.mxu0 }
 0x39f   : > { %v9191_v12 = vadd.f32 %v3445_v10, %v3314_v57  ;;  %v11523_v10 = vld [vmem:[#allocation27_spill] sm:$0xff] }
 0x3a0   : > { %v3104_v43 = vpop.f32.mrf.mxu2 }
 0x3a1   : > { %v9195_v6 = vadd.f32 %v3104_v43, %v2991_v48  ;;  %3270 = vmatmul.f32.gmra.mxu3 %v8939_v1  ;;  %3495 = vmatmul.f32.gmra.mxu0 %v9193_v28  ;;  %v4514_v48 = vld [vmem:[#allocation6 + $0x460] sm:$0xff]  ;;  %v9210_v43 = vld [vmem:[#allocation2 + $0xa9] sm:$0xff]  ;;  %v4095_v1 = vld [vmem:[#allocation6 + $0x358] sm:$0xff] }
 0x3a2   : > { %4521 = vmatpush.msra.mxu1 %v4514_v48  ;;  %4104 = vmatpush.msra.mxu3 %v4095_v1 }
 0x3a3   : > { %v2997_v33 = vpop.f32.mrf.mxu1 }
 0x3a4   : > { %v3223_v55 = vpop.f32.mrf.mxu3 }
 0x3a5   : > { %v3315_v41 = vadd.f32 %v3223_v55, %v8979_v27  ;;  %7038 = vmatmul.msk.f32.gmra.mxu2 %vm8161_vm7, %v8961_v2  ;;  %v11524_v27 = vld [vmem:[#allocation70_spill] sm:$0xff] }
 0x3a6   : > { %7023 = vmatmul.msk.f32.gmra.mxu1 %vm11420_vm11, %v9199_v58  ;;  %v3451_v5 = vpop.f32.mrf.mxu0  ;;  %vm11525_vm3 = vnez %v11524_v27 }
 0x3a7   : > { %v9208_v4 = vadd.f32 %v3448_v24, %v3315_v41 }
 0x3a8   : > { %v3107_v57 = vpop.f32.mrf.mxu2 }
 0x3a9   : > { %v9212_v16 = vadd.f32 %v3107_v57, %v2994_v62  ;;  %3273 = vmatmul.f32.gmra.mxu3 %v8953_v29  ;;  %7015 = vmatmul.msk.f32.gmra.mxu0 %vm11525_vm3, %v9210_v43  ;;  %v9225_v57 = vld [vmem:[#allocation2 + $0xb1] sm:$0xff] }
 0x3ab   : > { %v3000_v55 = vpop.f32.mrf.mxu1 }
 0x3ac   : > { %v3226_v2 = vpop.f32.mrf.mxu3 }
 0x3ad   : > { %v3316_v24 = vadd.f32 %v3226_v2, %v8995_v7  ;;  %3897 = vmatmul.f32.gmra.mxu2 %v8977_v35  ;;  %v9231_v2 = vld [vmem:[#allocation2 + $0x3f] sm:$0xff] }
 0x3ae   : > { %3675 = vmatmul.f32.gmra.mxu1 %v9218_v63  ;;  %v3454_v62 = vpop.f32.mrf.mxu0 }
 0x3af   : > { %v9223_v41 = vadd.f32 %v3451_v5, %v3316_v24  ;;  %v11527_v5 = vld [vmem:[#allocation32_spill] sm:$0xff] }
 0x3b0   : > { %v3110_v48 = vpop.f32.mrf.mxu2 }
 0x3b1   : > { %11526 = vst [vmem:[#allocation96_spill] sm:$0xff] %v9223_v41  ;;  %v9227_v29 = vadd.f32 %v3110_v48, %v2997_v33  ;;  %3276 = vmatmul.f32.gmra.mxu3 %v8971_v26  ;;  %3501 = vmatmul.f32.gmra.mxu0 %v9225_v57  ;;  %v4513_v33 = vld [vmem:[#allocation6 + $0x458] sm:$0xff]  ;;  %v4094_v41 = vld [vmem:[#allocation6 + $0x350] sm:$0xff] }
 0x3b2   : > { %4522 = vmatpush.msra.mxu1 %v4513_v33  ;;  %4105 = vmatpush.msra.mxu3 %v4094_v41  ;;  %v9257_v33 = vld [vmem:[#allocation2 + $0xc1] sm:$0xff] }
 0x3b3   : > { %v3003_v1 = vpop.f32.mrf.mxu1  ;;  %11532 = vst [vmem:[#allocation109_spill] sm:$0xff] %v9257_v33 }
 0x3b4   : > { %v3229_v7 = vpop.f32.mrf.mxu3 }
 0x3b5   : > { %v3317_v35 = vadd.f32 %v3229_v7, %v9011_v42  ;;  %7039 = vmatmul.msk.f32.gmra.mxu2 %vm8188_vm0, %v8993_v47  ;;  %v11529_v42 = vld [vmem:[#allocation71_spill] sm:$0xff] }
 0x3b6   : > { %7024 = vmatmul.msk.f32.gmra.mxu1 %vm11426_vm12, %v9231_v2  ;;  %v3457_v24 = vpop.f32.mrf.mxu0  ;;  %vm11530_vm7 = vnez %v11529_v42  ;;  %v4287_v42 = vld [vmem:[#allocation6 + $0x3d0] sm:$0xff] }
 0x3b7   : > { %v9240_v48 = vadd.f32 %v3454_v62, %v3317_v35  ;;  %4298 = vmatpush.msra.mxu0 %v4287_v42  ;;  %v9274_v42 = vld [vmem:[#allocation2 + $0xc9] sm:$0xff] }
 0x3b8   : > { %v3113_v26 = vpop.f32.mrf.mxu2 }
 0x3b9   : > { %11528 = vst [vmem:[#allocation97_spill] sm:$0xff] %v9240_v48  ;;  %v9244_v19 = vadd.f32 %v3113_v26, %v3000_v55  ;;  %3279 = vmatmul.f32.gmra.mxu3 %v8985_v45  ;;  %7016 = vmatmul.msk.f32.gmra.mxu0 %vm11530_vm7, %v9242_v51 }
 0x3bb   : > { %v3006_v7 = vpop.f32.mrf.mxu1 }
 0x3bc   : > { %v3232_v47 = vpop.f32.mrf.mxu3 }
 0x3bd   : > { %v3318_v62 = vadd.f32 %v3232_v47, %v9027_v8  ;;  %3903 = vmatmul.f32.gmra.mxu2 %v9009_v50  ;;  %v9263_v47 = vld [vmem:[#allocation2 + $0x4f] sm:$0xff] }
 0x3be   : > { %3681 = vmatmul.f32.gmra.mxu1 %v9250_v61  ;;  %v3460_v26 = vpop.f32.mrf.mxu0 }
 0x3bf   : > { %v9255_v55 = vadd.f32 %v3457_v24, %v3318_v62  ;;  %v4093_v24 = vld [vmem:[#allocation6 + $0x348] sm:$0xff]  ;;  %v9282_v62 = vld [vmem:[#allocation2 + $0x57] sm:$0xff] }
 0x3c0   : > { %v3116_v35 = vpop.f32.mrf.mxu2  ;;  %4106 = vmatpush.msra.mxu3 %v4093_v24 }
 0x3c1   : > { %11531 = vst [vmem:[#allocation98_spill] sm:$0xff] %v9255_v55  ;;  %v9259_v45 = vadd.f32 %v3116_v35, %v3003_v1  ;;  %3282 = vmatmul.f32.gmra.mxu3 %v9003_v46  ;;  %3507 = vmatmul.f32.gmra.mxu0 %v9257_v33  ;;  %v4512_v1 = vld [vmem:[#allocation6 + $0x450] sm:$0xff] }
 0x3c2   : > { %4523 = vmatpush.msra.mxu1 %v4512_v1  ;;  %v11536_v33 = vld [vmem:[#allocation90_spill] sm:$0xff] }
 0x3c3   : > { %v3009_v41 = vpop.f32.mrf.mxu1  ;;  %v9289_v1 = vld [vmem:[#allocation2 + $0xd1] sm:$0xff] }
 0x3c4   : > { %v3235_v8 = vpop.f32.mrf.mxu3  ;;  %11540 = vst [vmem:[#allocation112_spill] sm:$0xff] %v9289_v1 }
 0x3c5   : > { %v3319_v50 = vadd.f32 %v3235_v8, %v9043_v20  ;;  %7040 = vmatmul.msk.f32.gmra.mxu2 %vm8215_vm2, %v9025_v59  ;;  %v11537_v20 = vld [vmem:[#allocation74_spill] sm:$0xff] }
 0x3c6   : > { %7025 = vmatmul.msk.f32.gmra.mxu1 %vm11433_vm13, %v9263_v47  ;;  %v3463_v35 = vpop.f32.mrf.mxu0  ;;  %vm11538_vm0 = vnez %v11537_v20  ;;  %v11541_v20 = vld [vmem:[#allocation91_spill] sm:$0xff] }
 0x3c7   : > { %v9272_v46 = vadd.f32 %v3460_v26, %v3319_v50 }
 0x3c8   : > { %v3119_v55 = vpop.f32.mrf.mxu2 }
 0x3c9   : > { %11535 = vst [vmem:[#allocation110_spill] sm:$0xff] %v9272_v46  ;;  %v9276_v48 = vadd.f32 %v3119_v55, %v3006_v7  ;;  %3285 = vmatmul.f32.gmra.mxu3 %v11536_v33  ;;  %7017 = vmatmul.msk.f32.gmra.mxu0 %vm11538_vm0, %v9274_v42  ;;  %v4286_v46 = vld [vmem:[#allocation6 + $0x3c8] sm:$0xff] }
 0x3ca   : > { %4299 = vmatpush.msra.mxu0 %v4286_v46  ;;  %v9306_v46 = vld [vmem:[#allocation2 + $0xd9] sm:$0xff] }
 0x3cb   : > { %v3012_v8 = vpop.f32.mrf.mxu1  ;;  %11545 = vst [vmem:[#allocation114_spill] sm:$0xff] %v9306_v46 }
 0x3cc   : > { %v3238_v59 = vpop.f32.mrf.mxu3 }
 0x3cd   : > { %v3320_v26 = vadd.f32 %v3238_v59, %v9059_v37  ;;  %3909 = vmatmul.f32.gmra.mxu2 %v9041_v13  ;;  %v9295_v59 = vld [vmem:[#allocation2 + $0x5f] sm:$0xff] }
 0x3ce   : > { %3687 = vmatmul.f32.gmra.mxu1 %v9282_v62  ;;  %v3466_v7 = vpop.f32.mrf.mxu0 }
 0x3cf   : > { %v9287_v55 = vadd.f32 %v3463_v35, %v3320_v26  ;;  %v4092_v35 = vld [vmem:[#allocation6 + $0x340] sm:$0xff] }
 0x3d0   : > { %v3122_v50 = vpop.f32.mrf.mxu2  ;;  %4107 = vmatpush.msra.mxu3 %v4092_v35  ;;  %v9314_v26 = vld [vmem:[#allocation2 + $0x67] sm:$0xff]  ;;  %v4091_v35 = vld [vmem:[#allocation6 + $0x338] sm:$0xff] }
 0x3d1   : > { %11539 = vst [vmem:[#allocation111_spill] sm:$0xff] %v9287_v55  ;;  %v9291_v33 = vadd.f32 %v3122_v50, %v3009_v41  ;;  %3288 = vmatmul.f32.gmra.mxu3 %v11541_v20  ;;  %3513 = vmatmul.f32.gmra.mxu0 %v9289_v1  ;;  %v4511_v41 = vld [vmem:[#allocation6 + $0x448] sm:$0xff] }
 0x3d2   : > { %4524 = vmatpush.msra.mxu1 %v4511_v41  ;;  %4108 = vmatpush.msra.mxu3 %v4091_v35  ;;  %v4089_v35 = vld [vmem:[#allocation6 + $0x328] sm:$0xff] }
 0x3d3   : > { %v3015_v24 = vpop.f32.mrf.mxu1 }
 0x3d4   : > { %v3241_v37 = vpop.f32.mrf.mxu3 }
 0x3d5   : > { %v3321_v13 = vadd.f32 %v3241_v37, %v9075_v49  ;;  %7041 = vmatmul.msk.f32.gmra.mxu2 %vm8242_vm4, %v9057_v39  ;;  %v11546_v49 = vld [vmem:[#allocation75_spill] sm:$0xff] }
 0x3d6   : > { %7026 = vmatmul.msk.f32.gmra.mxu1 %vm11439_vm14, %v9295_v59  ;;  %v3469_v50 = vpop.f32.mrf.mxu0  ;;  %vm11547_vm2 = vnez %v11546_v49  ;;  %v4283_v49 = vld [vmem:[#allocation6 + $0x3b0] sm:$0xff] }
 0x3d7   : > { %v9304_v20 = vadd.f32 %v3466_v7, %v3321_v13 }
 0x3d8   : > { %v3125_v55 = vpop.f32.mrf.mxu2 }
 0x3d9   : > { %11544 = vst [vmem:[#allocation113_spill] sm:$0xff] %v9304_v20  ;;  %v9308_v1 = vadd.f32 %v3125_v55, %v3012_v8  ;;  %3291 = vmatmul.f32.gmra.mxu3 %v9049_v34  ;;  %7018 = vmatmul.msk.f32.gmra.mxu0 %vm11547_vm2, %v9306_v46  ;;  %v4285_v55 = vld [vmem:[#allocation6 + $0x3c0] sm:$0xff] }
 0x3da   : > { %v9321_v34 = vld [vmem:[#allocation2 + $0xe1] sm:$0xff]  ;;  %4300 = vmatpush.msra.mxu0 %v4285_v55  ;;  %v4087_v55 = vld [vmem:[#allocation6 + $0x318] sm:$0xff] }
 0x3db   : > { %v3018_v37 = vpop.f32.mrf.mxu1  ;;  %11549 = vst [vmem:[#allocation116_spill] sm:$0xff] %v9321_v34 }
 0x3dc   : > { %v3244_v39 = vpop.f32.mrf.mxu3 }
 0x3dd   : > { %v3322_v7 = vadd.f32 %v3244_v39, %v9091_v56  ;;  %3915 = vmatmul.f32.gmra.mxu2 %v9073_v44  ;;  %v4284_v56 = vld [vmem:[#allocation6 + $0x3b8] sm:$0xff]  ;;  %v4090_v44 = vld [vmem:[#allocation6 + $0x330] sm:$0xff] }
 0x3de   : > { %3693 = vmatmul.f32.gmra.mxu1 %v9314_v26  ;;  %v3472_v8 = vpop.f32.mrf.mxu0  ;;  %4301 = vmatpush.msra.mxu0 %v4284_v56  ;;  %v4282_v56 = vld [vmem:[#allocation6 + $0x3a8] sm:$0xff] }
 0x3df   : > { %v9319_v13 = vadd.f32 %v3469_v50, %v3322_v7  ;;  %v9327_v50 = vld [vmem:[#allocation2 + $0x6f] sm:$0xff]  ;;  %4109 = vmatpush.msra.mxu3 %v4090_v44  ;;  %v4281_v44 = vld [vmem:[#allocation6 + $0x3a0] sm:$0xff] }
 0x3e0   : > { %v3128_v41 = vpop.f32.mrf.mxu2  ;;  %4302 = vmatpush.msra.mxu0 %v4283_v49 }
 0x3e1   : > { %11548 = vst [vmem:[#allocation115_spill] sm:$0xff] %v9319_v13  ;;  %v9323_v20 = vadd.f32 %v3128_v41, %v3015_v24  ;;  %3294 = vmatmul.f32.gmra.mxu3 %v9067_v31  ;;  %3519 = vmatmul.f32.gmra.mxu0 %v9321_v34  ;;  %v11550_v24 = vld [vmem:[#allocation43_spill] sm:$0xff]  ;;  %v4510_v41 = vld [vmem:[#allocation6 + $0x440] sm:$0xff] }
 0x3e2   : > { %vm11551_vm4 = vnez %v11550_v24  ;;  %4525 = vmatpush.msra.mxu1 %v4510_v41  ;;  %4110 = vmatpush.msra.mxu3 %v4089_v35  ;;  %v4088_v13 = vld [vmem:[#allocation6 + $0x320] sm:$0xff]  ;;  %v4280_v41 = vld [vmem:[#allocation6 + $0x398] sm:$0xff] }
 0x3e3   : > { %v3021_v39 = vpop.f32.mrf.mxu1  ;;  %4303 = vmatpush.msra.mxu0 %v4282_v56  ;;  %v4086_v56 = vld [vmem:[#allocation6 + $0x310] sm:$0xff] }
 0x3e4   : > { %v3247_v46 = vpop.f32.mrf.mxu3  ;;  %4111 = vmatpush.msra.mxu3 %v4088_v13  ;;  %v4085_v13 = vld [vmem:[#allocation6 + $0x308] sm:$0xff]  ;;  %v9353_v34 = vld [vmem:[#allocation2 + $0xf1] sm:$0xff] }
 0x3e5   : > { %v3323_v7 = vadd.f32 %v3247_v46, %v9112_v21  ;;  %7042 = vmatmul.msk.f32.gmra.mxu2 %vm8269_vm6, %v9089_v30  ;;  %v9338_v46 = vld [vmem:[#allocation2 + $0xe9] sm:$0xff]  ;;  %4304 = vmatpush.msra.mxu0 %v4281_v44  ;;  %v4084_v44 = vld [vmem:[#allocation6 + $0x300] sm:$0xff] }
 0x3e6   : > { %7027 = vmatmul.msk.f32.gmra.mxu1 %vm11551_vm4, %v9327_v50  ;;  %v3475_v31 = vpop.f32.mrf.mxu0  ;;  %11554 = vst [vmem:[#allocation118_spill] sm:$0xff] %v9338_v46  ;;  %v11555_v30 = vld [vmem:[#allocation77_spill] sm:$0xff]  ;;  %4112 = vmatpush.msra.mxu3 %v4087_v55  ;;  %v4277_v55 = vld [vmem:[#allocation6 + $0x380] sm:$0xff] }
 0x3e7   : > { %v9336_v49 = vadd.f32 %v3472_v8, %v3323_v7  ;;  %vm11556_vm6 = vnez %v11555_v30  ;;  %v4279_v8 = vld [vmem:[#allocation6 + $0x390] sm:$0xff]  ;;  %4305 = vmatpush.msra.mxu0 %v4280_v41 }
 0x3e8   : > { %v3131_v21 = vpop.f32.mrf.mxu2  ;;  %4113 = vmatpush.msra.mxu3 %v4086_v56 }
 0x3e9   : > { %11553 = vst [vmem:[#allocation117_spill] sm:$0xff] %v9336_v49  ;;  %v9340_v24 = vadd.f32 %v3131_v21, %v3018_v37  ;;  %3297 = vmatmul.f32.gmra.mxu3 %v9081_v32  ;;  %7019 = vmatmul.msk.f32.gmra.mxu0 %vm11556_vm6, %v9338_v46  ;;  %v9346_v49 = vld [vmem:[#allocation2 + $0x77] sm:$0xff]  ;;  %v4278_v21 = vld [vmem:[#allocation6 + $0x388] sm:$0xff] }
 0x3ea   : > { %4306 = vmatpush.msra.mxu0 %v4279_v8  ;;  %4114 = vmatpush.msra.mxu3 %v4085_v13  ;;  %v9359_v8 = vld [vmem:[#allocation2 + $0x7f] sm:$0xff] }
 0x3eb   : > { %v3024_v35 = vpop.f32.mrf.mxu1 }
 0x3ec   : > { %v3250_v7 = vpop.f32.mrf.mxu3  ;;  %4307 = vmatpush.msra.mxu0 %v4278_v21  ;;  %4115 = vmatpush.msra.mxu3 %v4084_v44  ;;  %v9370_v44 = vld [vmem:[#allocation2 + $0xf9] sm:$0xff] }
 0x3ed   : > { %v3324_v37 = vadd.f32 %v3250_v7, %v9128_v53  ;;  %3921 = vmatmul.f32.gmra.mxu2 %v9110_v18  ;;  %v4854_v18 = vld [vmem:[#allocation6 + $0x78] sm:$0xff] }
 0x3ee   : > { %3699 = vmatmul.f32.gmra.mxu1 %v9346_v49  ;;  %v3478_v32 = vpop.f32.mrf.mxu0  ;;  %4308 = vmatpush.msra.mxu0 %v4277_v55 }
 0x3ef   : > { %v9351_v30 = vadd.f32 %v3475_v31, %v3324_v37  ;;  %4855 = vmatpush.msra.mxu2 %v4854_v18 }
 0x3f0   : > { %v3134_v46 = vpop.f32.mrf.mxu2 }
 0x3f1   : > { %11557 = vst [vmem:[#allocation119_spill] sm:$0xff] %v9351_v30  ;;  %v9355_v41 = vadd.f32 %v3134_v46, %v3021_v39  ;;  %3300 = vmatmul.f32.gmra.mxu3 %v9104_v38  ;;  %3525 = vmatmul.f32.gmra.mxu0 %v9353_v34  ;;  %v4509_v46 = vld [vmem:[#allocation6 + $0x438] sm:$0xff]  ;;  %v9378_v38 = vld [vmem:[#allocation2 + $0x87] sm:$0xff] }
 0x3f2   : > { %4526 = vmatpush.msra.mxu1 %v4509_v46  ;;  %v9385_v46 = vld [vmem:[#allocation2 + $0x101] sm:$0xff] }
 0x3f3   : > { %v3027_v53 = vpop.f32.mrf.mxu1 }
 0x3f4   : > { %v3253_v56 = vpop.f32.mrf.mxu3 }
 0x3f5   : > { %v3325_v31 = vadd.f32 %v3253_v56, %v9144_v22  ;;  %7043 = vmatmul.msk.f32.gmra.mxu2 %vm8296_vm8, %v9126_v40  ;;  %v11561_v22 = vld [vmem:[#allocation79_spill] sm:$0xff] }
 0x3f6   : > { %7028 = vmatmul.msk.f32.gmra.mxu1 %vm11452_vm1, %v9359_v8  ;;  %v3481_v37 = vpop.f32.mrf.mxu0  ;;  %vm11562_vm6 = vnez %v11561_v22 }
 0x3f7   : > { %v9368_v13 = vadd.f32 %v3478_v32, %v3325_v31 }
 0x3f8   : > { %v3137_v21 = vpop.f32.mrf.mxu2 }
 0x3f9   : > { %11560 = vst [vmem:[#allocation120_spill] sm:$0xff] %v9368_v13  ;;  %v9372_v55 = vadd.f32 %v3137_v21, %v3024_v35  ;;  %3303 = vmatmul.f32.gmra.mxu3 %v9118_v36  ;;  %7020 = vmatmul.msk.f32.gmra.mxu0 %vm11562_vm6, %v9370_v44  ;;  %v4853_v36 = vld [vmem:[#allocation6 + $0x70] sm:$0xff] }
 0x3fa   : > { %4856 = vmatpush.msra.mxu2 %v4853_v36  ;;  %v9402_v36 = vld [vmem:[#allocation2 + $0x109] sm:$0xff] }
 0x3fb   : > { %v3030_v18 = vpop.f32.mrf.mxu1 }
 0x3fc   : > { %v3256_v56 = vpop.f32.mrf.mxu3 }
 0x3fd   : > { %v3326_v40 = vadd.f32 %v3256_v56, %v9160_v52  ;;  %3927 = vmatmul.f32.gmra.mxu2 %v9142_v9  ;;  %v9391_v56 = vld [vmem:[#allocation2 + $0x8f] sm:$0xff] }
 0x3fe   : > { %3705 = vmatmul.f32.gmra.mxu1 %v9378_v38  ;;  %v3484_v32 = vpop.f32.mrf.mxu0 }
 0x3ff   : > { %v9383_v31 = vadd.f32 %v3481_v37, %v3326_v40  ;;  %v9410_v40 = vld [vmem:[#allocation2 + $0x97] sm:$0xff] }
 0x400   : > { %v3140_v35 = vpop.f32.mrf.mxu2 }
 0x401   : > { %11563 = vst [vmem:[#allocation121_spill] sm:$0xff] %v9383_v31  ;;  %v9387_v21 = vadd.f32 %v3140_v35, %v3027_v53  ;;  %3306 = vmatmul.f32.gmra.mxu3 %v9136_v60  ;;  %3531 = vmatmul.f32.gmra.mxu0 %v9385_v46  ;;  %v4508_v53 = vld [vmem:[#allocation6 + $0x430] sm:$0xff] }
 0x402   : > { %4527 = vmatpush.msra.mxu1 %v4508_v53 }
 0x403   : > { %v3033_v13 = vpop.f32.mrf.mxu1 }
 0x404   : > { %v3259_v52 = vpop.f32.mrf.mxu3 }
 0x405   : > { %v3327_v9 = vadd.f32 %v3259_v52, %v9170_v15  ;;  %7044 = vmatmul.msk.f32.gmra.mxu2 %vm8323_vm9, %v9158_v54  ;;  %v11567_v15 = vld [vmem:[#allocation82_spill] sm:$0xff] }
 0x406   : > { %7029 = vmatmul.msk.f32.gmra.mxu1 %vm11460_vm15, %v9391_v56  ;;  %v3487_v35 = vpop.f32.mrf.mxu0  ;;  %vm11568_vm8 = vnez %v11567_v15 }
 0x407   : > { %v9400_v60 = vadd.f32 %v3484_v32, %v3327_v9 }
 0x408   : > { %v3143_v31 = vpop.f32.mrf.mxu2 }
 0x409   : > { %11566 = vst [vmem:[#allocation122_spill] sm:$0xff] %v9400_v60  ;;  %v9404_v30 = vadd.f32 %v3143_v31, %v3030_v18  ;;  %3309 = vmatmul.f32.gmra.mxu3 %v9150_v0  ;;  %7021 = vmatmul.msk.f32.gmra.mxu0 %vm11568_vm8, %v9402_v36  ;;  %v4245_v31 = vld [vmem:[#allocation2 + $0x30] sm:$0xff]  ;;  %v4852_v0 = vld [vmem:[#allocation6 + $0x68] sm:$0xff] }
 0x40a   : > { %4857 = vmatpush.msra.mxu2 %v4852_v0  ;;  %v4246_v0 = vld [vmem:[#allocation2 + $0x38] sm:$0xff] }
 0x40b   : > { %v3036_v52 = vpop.f32.mrf.mxu1 }
 0x40c   : > { %v3262_v39 = vpop.f32.mrf.mxu3 }
 0x40d   : > { %v3328_v54 = vadd.f32 %v3262_v39, %v9183_v3  ;;  %3933 = vmatmul.f32.gmra.mxu2 %v9168_v23  ;;  %v9422_v39 = vld [vmem:[#allocation2 + $0x9f] sm:$0xff] }
 0x40e   : > { %3711 = vmatmul.f32.gmra.mxu1 %v9410_v40  ;;  %v3490_v32 = vpop.f32.mrf.mxu0 }
 0x40f   : > { %v9415_v9 = vadd.f32 %v3487_v35, %v3328_v54  ;;  %v11570_v35 = vld [vmem:[#allocation54_spill] sm:$0xff]  ;;  %v4507_v54 = vld [vmem:[#allocation6 + $0x428] sm:$0xff] }
 0x410   : > { %v3146_v18 = vpop.f32.mrf.mxu2  ;;  %vm11571_vm9 = vnez %v11570_v35  ;;  %4528 = vmatpush.msra.mxu1 %v4507_v54  ;;  %v4247_v54 = vld [vmem:[#allocation2 + $0x40] sm:$0xff] }
 0x411   : > { %11569 = vst [vmem:[#allocation123_spill] sm:$0xff] %v9415_v9  ;;  %v9417_v53 = vadd.f32 %v3146_v18, %v3033_v13  ;;  %7054 = vmatmul.msk.f32.vlgmr.msra.gmra.mxu3 %vm11411_vm5, %v9199_v58  ;;  %4309 = vmatmul.f32.vlgmr.msra.gmra.mxu0 %v4245_v31  ;;  %v11572_v13 = vld [vmem:[#allocation68_spill] sm:$0xff]  ;;  %vm11577_vm5 = vnez %v11521_v11 }
 0x412   : > { %v4440_v35 = vld [vmem:[#allocation2 + $0x41] sm:$0xff] }
 0x413   : > { %v3667_v60 = vpop.f32.mrf.mxu1 }
 0x414   : > { %v3265_v3 = vpop.f32.mrf.mxu3 }
 0x415   : > { %v3329_v23 = vadd.f32 %v3265_v3, %v9195_v6  ;;  %7045 = vmatmul.msk.f32.gmra.mxu2 %vm8352_vm10, %v9181_v25 }
 0x416   : > { %7030 = vmatmul.msk.f32.gmra.mxu1 %vm11571_vm9, %v9422_v39  ;;  %v3493_v18 = vpop.f32.mrf.mxu0 }
 0x417   : > { %v9431_v58 = vadd.f32 %v3490_v32, %v3329_v23  ;;  %v3763_v32 = vadd.f32 %v3667_v60, %v9179_v14  ;;  %v11575_v60 = vld [vmem:[#allocation57_spill] sm:$0xff]  ;;  %v4506_v14 = vld [vmem:[#allocation6 + $0x420] sm:$0xff] }
 0x418   : > { %v3149_v31 = vpop.f32.mrf.mxu2  ;;  %vm11576_vm10 = vnez %v11575_v60  ;;  %4529 = vmatpush.msra.mxu1 %v4506_v14  ;;  %v4249_v14 = vld [vmem:[#allocation2 + $0x50] sm:$0xff] }
 0x419   : > { %11573 = vst [vmem:[#allocation124_spill] sm:$0xff] %v9431_v58  ;;  %v9433_v9 = vadd.f32 %v3149_v31, %v3036_v52  ;;  %4119 = vmatmul.f32.gmra.mxu3 %v9218_v63  ;;  %4312 = vmatmul.f32.gmra.mxu0 %v4246_v0  ;;  %v4851_v63 = vld [vmem:[#allocation6 + $0x60] sm:$0xff]  ;;  %v4441_v60 = vld [vmem:[#allocation2 + $0x49] sm:$0xff] }
 0x41a   : > { %4858 = vmatpush.msra.mxu2 %v4851_v63 }
 0x41b   : > { %v3670_v6 = vpop.f32.mrf.mxu1 }
 0x41c   : > { %v3268_v3 = vpop.f32.mrf.mxu3 }
 0x41d   : > { %v3330_v15 = vadd.f32 %v3268_v3, %v9212_v16  ;;  %3939 = vmatmul.f32.gmra.mxu2 %v9193_v28  ;;  %v9449_v3 = vld [vmem:[#allocation2 + $0xaf] sm:$0xff] }
 0x41e   : > { %3717 = vmatmul.f32.gmra.mxu1 %v9436_v17  ;;  %v3496_v25 = vpop.f32.mrf.mxu0 }
 0x41f   : > { %v9442_v23 = vadd.f32 %v3493_v18, %v3330_v15 }
 0x420   : > { %v3892_v52 = vpop.f32.mrf.mxu2 }
 0x421   : > { %11574 = vst [vmem:[#allocation125_spill] sm:$0xff] %v9442_v23  ;;  %v9444_v31 = vadd.f32 %v3892_v52, %v3763_v32  ;;  %7055 = vmatmul.msk.f32.gmra.mxu3 %vm11420_vm11, %v9231_v2  ;;  %4315 = vmatmul.f32.gmra.mxu0 %v4247_v54  ;;  %v3764_v2 = vadd.f32 %v3670_v6, %v9191_v12  ;;  %v4248_v52 = vld [vmem:[#allocation2 + $0x48] sm:$0xff]  ;;  %v4254_v23 = vld [vmem:[#allocation2 + $0x78] sm:$0xff] }
 0x423   : > { %v3673_v16 = vpop.f32.mrf.mxu1 }
 0x424   : > { %v3271_v0 = vpop.f32.mrf.mxu3  ;;  %v3765_v6 = vadd.f32 %v3673_v16, %v9208_v4  ;;  %v11580_v4 = vld [vmem:[#allocation58_spill] sm:$0xff]  ;;  %v4505_v16 = vld [vmem:[#allocation6 + $0x418] sm:$0xff] }
 0x425   : > { %v3331_v28 = vadd.f32 %v3271_v0, %v9227_v29  ;;  %7046 = vmatmul.msk.f32.gmra.mxu2 %vm11577_vm5, %v9210_v43  ;;  %v9464_v0 = vld [vmem:[#allocation2 + $0xb7] sm:$0xff]  ;;  %vm11581_vm11 = vnez %v11580_v4  ;;  %4530 = vmatpush.msra.mxu1 %v4505_v16  ;;  %v11584_v16 = vld [vmem:[#allocation109_spill] sm:$0xff] }
 0x426   : > { %7031 = vmatmul.msk.f32.gmra.mxu1 %vm11576_vm10, %v9449_v3  ;;  %v3499_v15 = vpop.f32.mrf.mxu0  ;;  %v11637_v4 = vld [vmem:[#allocation62_spill] sm:$0xff] }
 0x427   : > { %v9459_v18 = vadd.f32 %v3496_v25, %v3331_v28 }
 0x428   : > { %v3895_v32 = vpop.f32.mrf.mxu2 }
 0x429   : > { %11578 = vst [vmem:[#allocation126_spill] sm:$0xff] %v9459_v18  ;;  %v9461_v54 = vadd.f32 %v3895_v32, %v3764_v2  ;;  %4125 = vmatmul.f32.gmra.mxu3 %v9250_v61  ;;  %4318 = vmatmul.f32.gmra.mxu0 %v4248_v52  ;;  %v4850_v61 = vld [vmem:[#allocation6 + $0x58] sm:$0xff] }
 0x42a   : > { %4859 = vmatpush.msra.mxu2 %v4850_v61  ;;  %v9477_v52 = vld [vmem:[#allocation2 + $0xbf] sm:$0xff]  ;;  %v9520_v18 = vld [vmem:[#allocation2 + $0xd7] sm:$0xff] }
 0x42b   : > { %v3676_v29 = vpop.f32.mrf.mxu1 }
 0x42c   : > { %v3274_v63 = vpop.f32.mrf.mxu3 }
 0x42d   : > { %v3332_v43 = vadd.f32 %v3274_v63, %v9244_v19  ;;  %3945 = vmatmul.f32.gmra.mxu2 %v9225_v57 }
 0x42e   : > { %3723 = vmatmul.f32.gmra.mxu1 %v9464_v0  ;;  %v3502_v12 = vpop.f32.mrf.mxu0 }
 0x42f   : > { %v9470_v25 = vadd.f32 %v3499_v15, %v3332_v43 }
 0x430   : > { %v3898_v28 = vpop.f32.mrf.mxu2 }
 0x431   : > { %11579 = vst [vmem:[#allocation127_spill] sm:$0xff] %v9470_v25  ;;  %v9472_v2 = vadd.f32 %v3898_v28, %v3765_v6  ;;  %7056 = vmatmul.msk.f32.gmra.mxu3 %vm11426_vm12, %v9263_v47  ;;  %4321 = vmatmul.f32.gmra.mxu0 %v4249_v14  ;;  %v11582_v47 = vld [vmem:[#allocation96_spill] sm:$0xff]  ;;  %v4250_v28 = vld [vmem:[#allocation2 + $0x58] sm:$0xff]  ;;  %v9505_v25 = vld [vmem:[#allocation2 + $0xcf] sm:$0xff] }
 0x432   : > { %v3766_v63 = vadd.f32 %v3676_v29, %v11582_v47 }
 0x433   : > { %v3679_v19 = vpop.f32.mrf.mxu1 }
 0x434   : > { %v3277_v32 = vpop.f32.mrf.mxu3 }
 0x435   : > { %v3333_v57 = vadd.f32 %v3277_v32, %v9259_v45  ;;  %7047 = vmatmul.msk.f32.gmra.mxu2 %vm11525_vm3, %v9242_v51  ;;  %v9492_v32 = vld [vmem:[#allocation2 + $0xc7] sm:$0xff] }
 0x436   : > { %7032 = vmatmul.msk.f32.gmra.mxu1 %vm11581_vm11, %v9477_v52  ;;  %v3505_v15 = vpop.f32.mrf.mxu0 }
 0x437   : > { %v9487_v43 = vadd.f32 %v3502_v12, %v3333_v57  ;;  %v11585_v12 = vld [vmem:[#allocation97_spill] sm:$0xff] }
 0x438   : > { %v3901_v6 = vpop.f32.mrf.mxu2  ;;  %v3767_v57 = vadd.f32 %v3679_v19, %v11585_v12  ;;  %v11588_v19 = vld [vmem:[#allocation59_spill] sm:$0xff] }
 0x439   : > { %11583 = vst [vmem:[#allocation96_spill] sm:$0xff] %v9487_v43  ;;  %v9489_v14 = vadd.f32 %v3901_v6, %v3766_v63  ;;  %4131 = vmatmul.f32.gmra.mxu3 %v9282_v62  ;;  %4324 = vmatmul.f32.gmra.mxu0 %v4250_v28  ;;  %v4251_v6 = vld [vmem:[#allocation2 + $0x60] sm:$0xff]  ;;  %v4849_v28 = vld [vmem:[#allocation6 + $0x50] sm:$0xff]  ;;  %vm11589_vm12 = vnez %v11588_v19  ;;  %v11642_v19 = vld [vmem:[#allocation63_spill] sm:$0xff] }
 0x43a   : > { %v11587_v62 = vld [vmem:[#allocation36_spill] sm:$0xff]  ;;  %4860 = vmatpush.msra.mxu2 %v4849_v28  ;;  %v4252_v28 = vld [vmem:[#allocation2 + $0x68] sm:$0xff] }
 0x43b   : > { %v3682_v45 = vpop.f32.mrf.mxu1 }
 0x43c   : > { %v3280_v61 = vpop.f32.mrf.mxu3 }
 0x43d   : > { %v3334_v51 = vadd.f32 %v3280_v61, %v9276_v48  ;;  %3951 = vmatmul.f32.gmra.mxu2 %v11584_v16 }
 0x43e   : > { %3729 = vmatmul.f32.gmra.mxu1 %v9492_v32  ;;  %v3508_v29 = vpop.f32.mrf.mxu0 }
 0x43f   : > { %v9498_v47 = vadd.f32 %v3505_v15, %v3334_v51  ;;  %v4504_v51 = vld [vmem:[#allocation6 + $0x410] sm:$0xff] }
 0x440   : > { %v3904_v63 = vpop.f32.mrf.mxu2  ;;  %4531 = vmatpush.msra.mxu1 %v4504_v51  ;;  %v11593_v51 = vld [vmem:[#allocation112_spill] sm:$0xff]  ;;  %v11715_v15 = vld [vmem:[#allocation126_spill] sm:$0xff] }
 0x441   : > { %11586 = vst [vmem:[#allocation109_spill] sm:$0xff] %v9498_v47  ;;  %v9500_v43 = vadd.f32 %v3904_v63, %v3767_v57  ;;  %7057 = vmatmul.msk.f32.gmra.mxu3 %vm11433_vm13, %v9295_v59  ;;  %4327 = vmatmul.f32.gmra.mxu0 %v4251_v6  ;;  %v11591_v59 = vld [vmem:[#allocation98_spill] sm:$0xff] }
 0x442   : > { %v3768_v57 = vadd.f32 %v3682_v45, %v11591_v59 }
 0x443   : > { %v3685_v48 = vpop.f32.mrf.mxu1 }
 0x444   : > { %v3283_v61 = vpop.f32.mrf.mxu3 }
 0x445   : > { %v3335_v16 = vadd.f32 %v3283_v61, %v9291_v33  ;;  %7048 = vmatmul.msk.f32.gmra.mxu2 %vm11530_vm7, %v9274_v42 }
 0x446   : > { %7033 = vmatmul.msk.f32.gmra.mxu1 %vm11589_vm12, %v9505_v25  ;;  %v3511_v12 = vpop.f32.mrf.mxu0 }
 0x447   : > { %v9515_v63 = vadd.f32 %v3508_v29, %v3335_v16  ;;  %v11594_v29 = vld [vmem:[#allocation110_spill] sm:$0xff] }
 0x448   : > { %v3907_v6 = vpop.f32.mrf.mxu2  ;;  %v3769_v16 = vadd.f32 %v3685_v48, %v11594_v29 }
 0x449   : > { %11592 = vst [vmem:[#allocation97_spill] sm:$0xff] %v9515_v63  ;;  %v9517_v47 = vadd.f32 %v3907_v6, %v3768_v57  ;;  %4137 = vmatmul.f32.gmra.mxu3 %v9314_v26  ;;  %4330 = vmatmul.f32.gmra.mxu0 %v4252_v28  ;;  %v4253_v6 = vld [vmem:[#allocation2 + $0x70] sm:$0xff]  ;;  %v4848_v28 = vld [vmem:[#allocation6 + $0x48] sm:$0xff] }
 0x44a   : > { %4861 = vmatpush.msra.mxu2 %v4848_v28  ;;  %v9552_v26 = vld [vmem:[#allocation2 + $0xe7] sm:$0xff] }
 0x44b   : > { %v3688_v33 = vpop.f32.mrf.mxu1 }
 0x44c   : > { %v3286_v61 = vpop.f32.mrf.mxu3 }
 0x44d   : > { %v3336_v42 = vadd.f32 %v3286_v61, %v9308_v1  ;;  %3957 = vmatmul.f32.gmra.mxu2 %v11593_v51  ;;  %v9535_v51 = vld [vmem:[#allocation2 + $0xdf] sm:$0xff] }
 0x44e   : > { %3735 = vmatmul.f32.gmra.mxu1 %v9520_v18  ;;  %v3514_v45 = vpop.f32.mrf.mxu0 }
 0x44f   : > { %v9526_v59 = vadd.f32 %v3511_v12, %v3336_v42  ;;  %v11597_v12 = vld [vmem:[#allocation22_spill] sm:$0xff] }
 0x450   : > { %v3910_v57 = vpop.f32.mrf.mxu2  ;;  %vm11598_vm13 = vnez %v11597_v12  ;;  %v11599_v42 = vld [vmem:[#allocation114_spill] sm:$0xff]  ;;  %v4270_v12 = vld [vmem:[#allocation2 + $0xf8] sm:$0xff] }
 0x451   : > { %11595 = vst [vmem:[#allocation98_spill] sm:$0xff] %v9526_v59  ;;  %v9528_v63 = vadd.f32 %v3910_v57, %v3769_v16  ;;  %7058 = vmatmul.msk.f32.gmra.mxu3 %vm11439_vm14, %v9327_v50  ;;  %4333 = vmatmul.f32.gmra.mxu0 %v4253_v6  ;;  %v4503_v16 = vld [vmem:[#allocation6 + $0x408] sm:$0xff]  ;;  %v11601_v57 = vld [vmem:[#allocation111_spill] sm:$0xff] }
 0x452   : > { %4532 = vmatpush.msra.mxu1 %v4503_v16  ;;  %v3770_v6 = vadd.f32 %v3688_v33, %v11601_v57  ;;  %v11603_v16 = vld [vmem:[#allocation116_spill] sm:$0xff] }
 0x453   : > { %v9533_v1 = vpop.f32.mrf.mxu1 }
 0x454   : > { %v3289_v61 = vpop.f32.mrf.mxu3 }
 0x455   : > { %v3337_v48 = vadd.f32 %v3289_v61, %v9323_v20  ;;  %7049 = vmatmul.msk.f32.gmra.mxu2 %vm11538_vm0, %v11599_v42 }
 0x456   : > { %7034 = vmatmul.msk.f32.gmra.mxu1 %vm11598_vm13, %v9535_v51  ;;  %v3517_v50 = vpop.f32.mrf.mxu0 }
 0x457   : > { %v9545_v59 = vadd.f32 %v3514_v45, %v3337_v48  ;;  %v4255_v48 = vld [vmem:[#allocation2 + $0x80] sm:$0xff] }
 0x458   : > { %v3913_v28 = vpop.f32.mrf.mxu2 }
 0x459   : > { %11602 = vst [vmem:[#allocation112_spill] sm:$0xff] %v9545_v59  ;;  %v9547_v58 = vadd.f32 %v3913_v28, %v3770_v6  ;;  %4143 = vmatmul.f32.gmra.mxu3 %v9346_v49  ;;  %4336 = vmatmul.f32.gmra.mxu0 %v4254_v23  ;;  %v4847_v49 = vld [vmem:[#allocation6 + $0x40] sm:$0xff]  ;;  %v9564_v28 = vld [vmem:[#allocation2 + $0xef] sm:$0xff] }
 0x45a   : > { %4862 = vmatpush.msra.mxu2 %v4847_v49 }
 0x45b   : > { %v9550_v20 = vpop.f32.mrf.mxu1 }
 0x45c   : > { %v3292_v61 = vpop.f32.mrf.mxu3 }
 0x45d   : > { %v3338_v42 = vadd.f32 %v3292_v61, %v9340_v24  ;;  %3963 = vmatmul.f32.gmra.mxu2 %v11603_v16  ;;  %v11606_v61 = vld [vmem:[#allocation28_spill] sm:$0xff] }
 0x45e   : > { %3741 = vmatmul.f32.gmra.mxu1 %v9552_v26  ;;  %v3520_v33 = vpop.f32.mrf.mxu0  ;;  %vm11607_vm14 = vnez %v11606_v61  ;;  %v4502_v16 = vld [vmem:[#allocation6 + $0x400] sm:$0xff]  ;;  %v5118_v61 = vld [vmem:[#allocation6 + $0xa8] sm:$0xff] }
 0x45f   : > { %v9557_v45 = vadd.f32 %v3517_v50, %v3338_v42  ;;  %v11608_v50 = vld [vmem:[#allocation118_spill] sm:$0xff]  ;;  %v11609_v42 = vld [vmem:[#allocation75_spill] sm:$0xff]  ;;  %4533 = vmatpush.msra.mxu1 %v4502_v16 }
 0x460   : > { %v9590_v16 = vld [vmem:[#allocation2 + $0xff] sm:$0xff] }
 0x461   : > { %11604 = vst [vmem:[#allocation110_spill] sm:$0xff] %v9557_v45  ;;  %7059 = vmatmul.msk.f32.gmra.mxu3 %vm11551_vm4, %v9359_v8  ;;  %4339 = vmatmul.f32.gmra.mxu0 %v4255_v48  ;;  %v4256_v45 = vld [vmem:[#allocation2 + $0x88] sm:$0xff] }
 0x463   : > { %v9562_v23 = vpop.f32.mrf.mxu1 }
 0x464   : > { %v3295_v6 = vpop.f32.mrf.mxu3 }
 0x465   : > { %v3339_v24 = vadd.f32 %v3295_v6, %v9355_v41  ;;  %7050 = vmatmul.msk.f32.gmra.mxu2 %vm11547_vm2, %v11608_v50  ;;  %v9578_v6 = vld [vmem:[#allocation2 + $0xf7] sm:$0xff] }
 0x466   : > { %7035 = vmatmul.msk.f32.gmra.mxu1 %vm11607_vm14, %v9564_v28  ;;  %v3523_v8 = vpop.f32.mrf.mxu0 }
 0x467   : > { %v9573_v48 = vadd.f32 %v3520_v33, %v3339_v24  ;;  %v4257_v33 = vld [vmem:[#allocation2 + $0x90] sm:$0xff] }
 0x469   : > { %11610 = vst [vmem:[#allocation114_spill] sm:$0xff] %v9573_v48  ;;  %4149 = vmatmul.f32.gmra.mxu3 %v9378_v38  ;;  %4342 = vmatmul.f32.gmra.mxu0 %v4256_v45  ;;  %v4846_v38 = vld [vmem:[#allocation6 + $0x38] sm:$0xff]  ;;  %v4263_v48 = vld [vmem:[#allocation2 + $0xc0] sm:$0xff] }
 0x46a   : > { %4863 = vmatpush.msra.mxu2 %v4846_v38 }
 0x46b   : > { %v9576_v49 = vpop.f32.mrf.mxu1 }
 0x46c   : > { %v3298_v41 = vpop.f32.mrf.mxu3 }
 0x46d   : > { %v3340_v59 = vadd.f32 %v3298_v41, %v9372_v55  ;;  %3969 = vmatmul.f32.gmra.mxu2 %v9353_v34  ;;  %v11613_v34 = vld [vmem:[#allocation33_spill] sm:$0xff]  ;;  %v4258_v41 = vld [vmem:[#allocation2 + $0x98] sm:$0xff] }
 0x46e   : > { %3747 = vmatmul.f32.gmra.mxu1 %v9578_v6  ;;  %v3526_v50 = vpop.f32.mrf.mxu0  ;;  %vm11614_vm4 = vnez %v11613_v34  ;;  %v4760_v34 = vld [vmem:[#allocation6 + $0x208] sm:$0xff] }
 0x46f   : > { %v9583_v57 = vadd.f32 %v3523_v8, %v3340_v59  ;;  %v11615_v59 = vld [vmem:[#allocation77_spill] sm:$0xff] }
 0x470   : > { %vm11616_vm2 = vnez %v11615_v59  ;;  %v5126_v59 = vld [vmem:[#allocation6 + $0xe8] sm:$0xff] }
 0x471   : > { %11611 = vst [vmem:[#allocation111_spill] sm:$0xff] %v9583_v57  ;;  %7060 = vmatmul.msk.f32.gmra.mxu3 %vm11452_vm1, %v9391_v56  ;;  %4345 = vmatmul.f32.gmra.mxu0 %v4257_v33  ;;  %v9604_v57 = vld [vmem:[#allocation2 + $0x107] sm:$0xff] }
 0x473   : > { %v9588_v45 = vpop.f32.mrf.mxu1 }
 0x474   : > { %11612 = vst [vmem:[#allocation116_spill] sm:$0xff] %v9588_v45  ;;  %v3301_v24 = vpop.f32.mrf.mxu3  ;;  %v4448_v45 = vld [vmem:[#allocation2 + $0x81] sm:$0xff] }
 0x475   : > { %v3341_v55 = vadd.f32 %v3301_v24, %v9387_v21  ;;  %7051 = vmatmul.msk.f32.gmra.mxu2 %vm11616_vm2, %v9370_v44 }
 0x476   : > { %7036 = vmatmul.msk.f32.gmra.mxu1 %vm11614_vm4, %v9590_v16  ;;  %v3529_v8 = vpop.f32.mrf.mxu0 }
 0x477   : > { %v9599_v56 = vadd.f32 %v3526_v50, %v3341_v55  ;;  %v4259_v50 = vld [vmem:[#allocation2 + $0xa0] sm:$0xff] }
 0x479   : > { %11617 = vst [vmem:[#allocation118_spill] sm:$0xff] %v9599_v56  ;;  %4155 = vmatmul.f32.gmra.mxu3 %v9410_v40  ;;  %4348 = vmatmul.f32.gmra.mxu0 %v4258_v41  ;;  %v4845_v40 = vld [vmem:[#allocation6 + $0x30] sm:$0xff] }
 0x47a   : > { %4864 = vmatpush.msra.mxu2 %v4845_v40  ;;  %v9616_v56 = vld [vmem:[#allocation2 + $0x10f] sm:$0xff]  ;;  %v9630_v40 = vld [vmem:[#allocation2 + $0x117] sm:$0xff] }
 0x47b   : > { %v9602_v33 = vpop.f32.mrf.mxu1 }
 0x47c   : > { %11618 = vst [vmem:[#allocation128_spill] sm:$0xff] %v9602_v33  ;;  %v3304_v38 = vpop.f32.mrf.mxu3  ;;  %v4446_v33 = vld [vmem:[#allocation2 + $0x71] sm:$0xff] }
 0x47d   : > { %v3342_v21 = vadd.f32 %v3304_v38, %v9404_v30  ;;  %3975 = vmatmul.f32.gmra.mxu2 %v9385_v46  ;;  %v11621_v46 = vld [vmem:[#allocation37_spill] sm:$0xff] }
 0x47e   : > { %3753 = vmatmul.f32.gmra.mxu1 %v9604_v57  ;;  %v3532_v24 = vpop.f32.mrf.mxu0  ;;  %vm11622_vm1 = vnez %v11621_v46  ;;  %v4260_v38 = vld [vmem:[#allocation2 + $0xa8] sm:$0xff] }
 0x47f   : > { %v9609_v44 = vadd.f32 %v3529_v8, %v3342_v21 }
 0x481   : > { %11619 = vst [vmem:[#allocation129_spill] sm:$0xff] %v9609_v44  ;;  %7061 = vmatmul.msk.f32.gmra.mxu3 %vm11460_vm15, %v9422_v39  ;;  %4351 = vmatmul.f32.gmra.mxu0 %v4259_v50 }
 0x483   : > { %v9614_v55 = vpop.f32.mrf.mxu1 }
 0x484   : > { %11620 = vst [vmem:[#allocation130_spill] sm:$0xff] %v9614_v55  ;;  %v3307_v41 = vpop.f32.mrf.mxu3 }
 0x485   : > { %v3343_v30 = vadd.f32 %v3307_v41, %v9417_v53  ;;  %7052 = vmatmul.msk.f32.gmra.mxu2 %vm11562_vm6, %v9402_v36  ;;  %v3825_v53 = vld [vmem:[#allocation2 + $0x111] sm:$0xff] }
 0x486   : > { %7037 = vmatmul.msk.f32.gmra.mxu1 %vm11622_vm1, %v9616_v56  ;;  %v3535_v8 = vpop.f32.mrf.mxu0 }
 0x487   : > { %v9625_v39 = vadd.f32 %v3532_v24, %v3343_v30  ;;  %v4261_v24 = vld [vmem:[#allocation2 + $0xb0] sm:$0xff] }
 0x489   : > { %11623 = vst [vmem:[#allocation131_spill] sm:$0xff] %v9625_v39  ;;  %4161 = vmatmul.f32.gmra.mxu3 %v9436_v17  ;;  %4354 = vmatmul.f32.gmra.mxu0 %v4260_v38  ;;  %v4844_v17 = vld [vmem:[#allocation6 + $0x28] sm:$0xff] }
 0x48a   : > { %4865 = vmatpush.msra.mxu2 %v4844_v17  ;;  %v11629_v17 = vld [vmem:[#allocation60_spill] sm:$0xff]  ;;  %v11633_v39 = vld [vmem:[#allocation61_spill] sm:$0xff] }
 0x48b   : > { %v9628_v21 = vpop.f32.mrf.mxu1 }
 0x48c   : > { %11624 = vst [vmem:[#allocation132_spill] sm:$0xff] %v9628_v21  ;;  %v3310_v50 = vpop.f32.mrf.mxu3  ;;  %v4444_v21 = vld [vmem:[#allocation2 + $0x61] sm:$0xff] }
 0x48d   : > { %v3344_v41 = vadd.f32 %v3310_v50, %v9433_v9  ;;  %3981 = vmatmul.f32.gmra.mxu2 %v3825_v53  ;;  %v3826_v9 = vld [vmem:[#allocation2 + $0x119] sm:$0xff]  ;;  %v4438_v50 = vld [vmem:[#allocation2 + $0x31] sm:$0xff] }
 0x48e   : > { %3759 = vmatmul.f32.gmra.mxu1 %v9630_v40  ;;  %v9634_v44 = vpop.f32.mrf.mxu0  ;;  %v4262_v53 = vld [vmem:[#allocation2 + $0xb8] sm:$0xff] }
 0x48f   : > { %v9636_v36 = vadd.f32 %v3535_v8, %v3344_v41 }
 0x491   : > { %11625 = vst [vmem:[#allocation133_spill] sm:$0xff] %v9636_v36  ;;  %7062 = vmatmul.msk.f32.gmra.mxu3 %vm11571_vm9, %v9449_v3  ;;  %4357 = vmatmul.f32.gmra.mxu0 %v4261_v24  ;;  %v4439_v24 = vld [vmem:[#allocation2 + $0x39] sm:$0xff]  ;;  %vm11630_vm9 = vnez %v11629_v17 }
 0x493   : > { %v9641_v30 = vpop.f32.mrf.mxu1 }
 0x494   : > { %11626 = vst [vmem:[#allocation134_spill] sm:$0xff] %v9641_v30  ;;  %v9643_v38 = vpop.f32.mrf.mxu3 }
 0x495   : > { %7053 = vmatmul.msk.f32.gmra.mxu2 %vm11568_vm8, %v3826_v9  ;;  %v4843_v9 = vld [vmem:[#allocation6 + $0x20] sm:$0xff] }
 0x496   : > { %4534 = vmatmul.f32.vlgmr.msra.gmra.mxu1 %v4438_v50  ;;  %v9647_v8 = vpop.f32.mrf.mxu0  ;;  %v9661_v50 = vpop.f32.mrf.mxu2  ;;  %4866 = vmatpush.msra.mxu2 %v4843_v9 }
 0x499   : > { %4167 = vmatmul.f32.gmra.mxu3 %v9464_v0  ;;  %4360 = vmatmul.f32.gmra.mxu0 %v4262_v53 }
 0x49b   : > { %v9650_v3 = vpop.f32.mrf.mxu1 }
 0x49c   : > { %11628 = vst [vmem:[#allocation135_spill] sm:$0xff] %v9650_v3  ;;  %v9652_v41 = vpop.f32.mrf.mxu3 }
 0x49e   : > { %7070 = vmatmul.msk.f32.gmra.mxu1 %vm11630_vm9, %v4439_v24  ;;  %v9656_v36 = vpop.f32.mrf.mxu0  ;;  %v4264_v24 = vld [vmem:[#allocation2 + $0xc8] sm:$0xff] }
 0x4a1   : > { %7063 = vmatmul.msk.f32.gmra.mxu3 %vm11576_vm10, %v9477_v52  ;;  %4363 = vmatmul.f32.gmra.mxu0 %v4263_v48  ;;  %v9672_v52 = vpop.f32.mrf.mxu2  ;;  %vm11634_vm10 = vnez %v11633_v39 }
 0x4a3   : > { %v9663_v0 = vpop.f32.mrf.mxu1 }
 0x4a4   : > { %11631 = vst [vmem:[#allocation136_spill] sm:$0xff] %v9663_v0  ;;  %v9665_v53 = vpop.f32.mrf.mxu3  ;;  %v4265_v0 = vld [vmem:[#allocation2 + $0xd0] sm:$0xff] }
 0x4a6   : > { %4540 = vmatmul.f32.gmra.mxu1 %v4440_v35  ;;  %v9667_v17 = vpop.f32.mrf.mxu0  ;;  %v4842_v35 = vld [vmem:[#allocation6 + $0x18] sm:$0xff] }
 0x4a7   : > { %4867 = vmatpush.msra.mxu2 %v4842_v35 }
 0x4a9   : > { %4173 = vmatmul.f32.gmra.mxu3 %v9492_v32  ;;  %4366 = vmatmul.f32.gmra.mxu0 %v4264_v24  ;;  %v9687_v30 = vpop.f32.mrf.mxu2 }
 0x4ab   : > { %v9670_v3 = vpop.f32.mrf.mxu1 }
 0x4ac   : > { %11632 = vst [vmem:[#allocation137_spill] sm:$0xff] %v9670_v3  ;;  %v9674_v48 = vpop.f32.mrf.mxu3  ;;  %v4442_v3 = vld [vmem:[#allocation2 + $0x51] sm:$0xff] }
 0x4ae   : > { %7071 = vmatmul.msk.f32.gmra.mxu1 %vm11634_vm10, %v4441_v60  ;;  %v9678_v9 = vpop.f32.mrf.mxu0  ;;  %v4266_v60 = vld [vmem:[#allocation2 + $0xd8] sm:$0xff] }
 0x4b1   : > { %7064 = vmatmul.msk.f32.gmra.mxu3 %vm11581_vm11, %v9505_v25  ;;  %4369 = vmatmul.f32.gmra.mxu0 %v4265_v0  ;;  %v4443_v0 = vld [vmem:[#allocation2 + $0x59] sm:$0xff]  ;;  %vm11638_vm11 = vnez %v11637_v4 }
 0x4b3   : > { %v9683_v32 = vpop.f32.mrf.mxu1 }
 0x4b4   : > { %11635 = vst [vmem:[#allocation138_spill] sm:$0xff] %v9683_v32  ;;  %v9685_v24 = vpop.f32.mrf.mxu3  ;;  %v9700_v32 = vpop.f32.mrf.mxu2 }
 0x4b6   : > { %4546 = vmatmul.f32.gmra.mxu1 %v4442_v3  ;;  %v9689_v39 = vpop.f32.mrf.mxu0  ;;  %v4267_v3 = vld [vmem:[#allocation2 + $0xe0] sm:$0xff] }
 0x4b9   : > { %4179 = vmatmul.f32.gmra.mxu3 %v9520_v18  ;;  %4372 = vmatmul.f32.gmra.mxu0 %v4266_v60  ;;  %v4841_v18 = vld [vmem:[#allocation6 + $0x10] sm:$0xff] }
 0x4ba   : > { %4868 = vmatpush.msra.mxu2 %v4841_v18 }
 0x4bb   : > { %v9692_v37 = vpop.f32.mrf.mxu1 }
 0x4bc   : > { %11636 = vst [vmem:[#allocation139_spill] sm:$0xff] %v9692_v37  ;;  %v9694_v25 = vpop.f32.mrf.mxu3  ;;  %v9712_v22 = vpop.f32.mrf.mxu2 }
 0x4bd   : > { %11640 = vst [vmem:[#allocation141_spill] sm:$0xff] %v9712_v22  ;;  %v5123_v22 = vld [vmem:[#allocation6 + $0xd0] sm:$0xff] }
 0x4be   : > { %7072 = vmatmul.msk.f32.gmra.mxu1 %vm11638_vm11, %v4443_v0  ;;  %v9698_v35 = vpop.f32.mrf.mxu0  ;;  %v4268_v0 = vld [vmem:[#allocation2 + $0xe8] sm:$0xff] }
 0x4c1   : > { %7065 = vmatmul.msk.f32.gmra.mxu3 %vm11589_vm12, %v9535_v51  ;;  %4375 = vmatmul.f32.gmra.mxu0 %v4267_v3  ;;  %v4445_v3 = vld [vmem:[#allocation2 + $0x69] sm:$0xff]  ;;  %vm11643_vm12 = vnez %v11642_v19 }
 0x4c3   : > { %v9705_v60 = vpop.f32.mrf.mxu1 }
 0x4c4   : > { %11639 = vst [vmem:[#allocation140_spill] sm:$0xff] %v9705_v60  ;;  %v9707_v37 = vpop.f32.mrf.mxu3  ;;  %v4269_v60 = vld [vmem:[#allocation2 + $0xf0] sm:$0xff] }
 0x4c6   : > { %4552 = vmatmul.f32.gmra.mxu1 %v4444_v21  ;;  %v9709_v4 = vpop.f32.mrf.mxu0 }
 0x4c9   : > { %4185 = vmatmul.f32.gmra.mxu3 %v9552_v26  ;;  %4378 = vmatmul.f32.gmra.mxu0 %v4268_v0  ;;  %v4840_v26 = vld [vmem:[#allocation6 + $0x8] sm:$0xff]  ;;  %v5128_v0 = vld [vmem:[#allocation6 + $0xf8] sm:$0xff] }
 0x4ca   : > { %4869 = vmatpush.msra.mxu2 %v4840_v26  ;;  %5129 = vmatpush.msrb.mxu0 %v5128_v0  ;;  %v4774_v26 = vld [vmem:[#allocation6 + $0x278] sm:$0xff] }
 0x4cb   : > { %v9714_v55 = vpop.f32.mrf.mxu1  ;;  %v4447_v0 = vld [vmem:[#allocation2 + $0x79] sm:$0xff]  ;;  %4968 = vmatpush.msrb.mxu3 %v4774_v26 }
 0x4cc   : > { %11641 = vst [vmem:[#allocation142_spill] sm:$0xff] %v9714_v55  ;;  %v9716_v51 = vpop.f32.mrf.mxu3  ;;  %v9727_v55 = vpop.f32.mrf.mxu2  ;;  %v5121_v26 = vld [vmem:[#allocation6 + $0xc0] sm:$0xff] }
 0x4cd   : > { %11645 = vst [vmem:[#allocation144_spill] sm:$0xff] %v9727_v55 }
 0x4ce   : > { %7073 = vmatmul.msk.f32.gmra.mxu1 %vm11643_vm12, %v4445_v3  ;;  %v9720_v18 = vpop.f32.mrf.mxu0  ;;  %v5127_v3 = vld [vmem:[#allocation6 + $0xf0] sm:$0xff] }
 0x4cf   : > { %5130 = vmatpush.msrb.mxu0 %v5127_v3  ;;  %v4773_v3 = vld [vmem:[#allocation6 + $0x270] sm:$0xff] }
 0x4d0   : > { %4969 = vmatpush.msrb.mxu3 %v4773_v3  ;;  %v4770_v3 = vld [vmem:[#allocation6 + $0x258] sm:$0xff] }
 0x4d1   : > { %7066 = vmatmul.msk.f32.gmra.mxu3 %vm11598_vm13, %v9564_v28  ;;  %4381 = vmatmul.f32.gmra.mxu0 %v4269_v60  ;;  %v5125_v28 = vld [vmem:[#allocation6 + $0xe0] sm:$0xff] }
 0x4d2   : > { %5131 = vmatpush.msrb.mxu0 %v5126_v59 }
 0x4d3   : > { %v9725_v21 = vpop.f32.mrf.mxu1 }
 0x4d4   : > { %11644 = vst [vmem:[#allocation143_spill] sm:$0xff] %v9725_v21  ;;  %v9729_v7 = vpop.f32.mrf.mxu3  ;;  %5132 = vmatpush.msrb.mxu0 %v5125_v28  ;;  %v5124_v21 = vld [vmem:[#allocation6 + $0xd8] sm:$0xff]  ;;  %v9740_v59 = vpop.f32.mrf.mxu2  ;;  %v5122_v28 = vld [vmem:[#allocation6 + $0xc8] sm:$0xff] }
 0x4d5   : > { %11649 = vst [vmem:[#allocation146_spill] sm:$0xff] %v9740_v59 }
 0x4d6   : > { %4558 = vmatmul.f32.gmra.mxu1 %v4446_v33  ;;  %v9731_v19 = vpop.f32.mrf.mxu0  ;;  %5133 = vmatpush.msrb.mxu0 %v5124_v21  ;;  %v11647_v33 = vld [vmem:[#allocation64_spill] sm:$0xff] }
 0x4d7   : > { %vm11648_vm13 = vnez %v11647_v33  ;;  %v4771_v21 = vld [vmem:[#allocation6 + $0x260] sm:$0xff] }
 0x4d8   : > { %5134 = vmatpush.msrb.mxu0 %v5123_v22  ;;  %v5120_v22 = vld [vmem:[#allocation6 + $0xb8] sm:$0xff] }
 0x4d9   : > { %4191 = vmatmul.f32.gmra.mxu3 %v9578_v6  ;;  %4384 = vmatmul.f32.gmra.mxu0 %v4270_v12  ;;  %v4772_v12 = vld [vmem:[#allocation6 + $0x268] sm:$0xff] }
 0x4da   : > { %4970 = vmatpush.msrb.mxu3 %v4772_v12  ;;  %5135 = vmatpush.msrb.mxu0 %v5122_v28  ;;  %v4769_v12 = vld [vmem:[#allocation6 + $0x250] sm:$0xff] }
 0x4db   : > { %v9734_v60 = vpop.f32.mrf.mxu1  ;;  %v5119_v28 = vld [vmem:[#allocation6 + $0xb0] sm:$0xff] }
 0x4dc   : > { %11646 = vst [vmem:[#allocation145_spill] sm:$0xff] %v9734_v60  ;;  %v9736_v55 = vpop.f32.mrf.mxu3  ;;  %v4271_v60 = vld [vmem:[#allocation2 + $0x100] sm:$0xff]  ;;  %4971 = vmatpush.msrb.mxu3 %v4771_v21  ;;  %5136 = vmatpush.msrb.mxu0 %v5121_v26  ;;  %v4272_v21 = vld [vmem:[#allocation2 + $0x108] sm:$0xff] }
 0x4dd   : > { %v4767_v26 = vld [vmem:[#allocation6 + $0x240] sm:$0xff] }
 0x4de   : > { %7074 = vmatmul.msk.f32.gmra.mxu1 %vm11648_vm13, %v4447_v0  ;;  %v9742_v6 = vpop.f32.mrf.mxu0  ;;  %v4839_v0 = vld [vmem:[#allocation6] sm:$0xff]  ;;  %4972 = vmatpush.msrb.mxu3 %v4770_v3 }
 0x4df   : > { %4870 = vmatpush.msra.mxu2 %v4839_v0  ;;  %5137 = vmatpush.msrb.mxu0 %v5120_v22  ;;  %v5117_v0 = vld [vmem:[#allocation6 + $0xa0] sm:$0xff]  ;;  %v5116_v22 = vld [vmem:[#allocation6 + $0x98] sm:$0xff] }
 0x4e0   : > { %4973 = vmatpush.msrb.mxu3 %v4769_v12 }
 0x4e1   : > { %7067 = vmatmul.msk.f32.gmra.mxu3 %vm11607_vm14, %v9590_v16  ;;  %4387 = vmatmul.f32.gmra.mxu0 %v4271_v60  ;;  %v4768_v60 = vld [vmem:[#allocation6 + $0x248] sm:$0xff] }
 0x4e2   : > { %5138 = vmatpush.msrb.mxu0 %v5119_v28  ;;  %4974 = vmatpush.msrb.mxu3 %v4768_v60  ;;  %v4449_v28 = vld [vmem:[#allocation2 + $0x89] sm:$0xff] }
 0x4e3   : > { %v9747_v33 = vpop.f32.mrf.mxu1  ;;  %v5115_v60 = vld [vmem:[#allocation6 + $0x90] sm:$0xff] }
 0x4e4   : > { %11650 = vst [vmem:[#allocation147_spill] sm:$0xff] %v9747_v33  ;;  %v9749_v59 = vpop.f32.mrf.mxu3  ;;  %v9753_v33 = vpop.f32.mrf.mxu2  ;;  %5139 = vmatpush.msrb.mxu0 %v5118_v61  ;;  %4975 = vmatpush.msrb.mxu3 %v4767_v26  ;;  %v4765_v61 = vld [vmem:[#allocation6 + $0x230] sm:$0xff] }
 0x4e5   : > { %11651 = vst [vmem:[#allocation148_spill] sm:$0xff] %v9753_v33  ;;  %v11653_v33 = vld [vmem:[#allocation65_spill] sm:$0xff]  ;;  %v4273_v26 = vld [vmem:[#allocation2 + $0x110] sm:$0xff] }
 0x4e6   : > { %4564 = vmatmul.f32.gmra.mxu1 %v4448_v45  ;;  %v9751_v16 = vpop.f32.mrf.mxu0  ;;  %5140 = vmatpush.msrb.mxu0 %v5117_v0  ;;  %v4766_v45 = vld [vmem:[#allocation6 + $0x238] sm:$0xff]  ;;  %vm11654_vm14 = vnez %v11653_v33  ;;  %v4763_v0 = vld [vmem:[#allocation6 + $0x220] sm:$0xff] }
 0x4e7   : > { %4976 = vmatpush.msrb.mxu3 %v4766_v45  ;;  %v5113_v45 = vld [vmem:[#allocation6 + $0x80] sm:$0xff] }
 0x4e8   : > { %5141 = vmatpush.msrb.mxu0 %v5116_v22  ;;  %v4775_v22 = vld [vmem:[#allocation2 + $0xf] sm:$0xff] }
 0x4e9   : > { %4197 = vmatmul.f32.gmra.mxu3 %v9604_v57  ;;  %4390 = vmatmul.f32.gmra.mxu0 %v4272_v21  ;;  %v4764_v21 = vld [vmem:[#allocation6 + $0x228] sm:$0xff] }
 0x4ea   : > { %4977 = vmatpush.msrb.mxu3 %v4765_v61  ;;  %5142 = vmatpush.msrb.mxu0 %v5115_v60  ;;  %v5578_v61 = vld [vmem:[#allocation6 + $0x1f8] sm:$0xff]  ;;  %v11658_v60 = vld [vmem:[#allocation21_spill] sm:$0xff] }
 0x4eb   : > { %v9756_v3 = vpop.f32.mrf.mxu1  ;;  %5579 = vmatpush.msrb.mxu2 %v5578_v61 }
 0x4ec   : > { %11652 = vst [vmem:[#allocation149_spill] sm:$0xff] %v9756_v3  ;;  %v9758_v12 = vpop.f32.mrf.mxu3  ;;  %v5114_v3 = vld [vmem:[#allocation6 + $0x88] sm:$0xff]  ;;  %4978 = vmatpush.msrb.mxu3 %v4764_v21  ;;  %v4762_v21 = vld [vmem:[#allocation6 + $0x218] sm:$0xff] }
 0x4ed   : > { %5143 = vmatpush.msrb.mxu0 %v5114_v3 }
 0x4ee   : > { %7075 = vmatmul.msk.f32.gmra.mxu1 %vm11654_vm14, %v4449_v28  ;;  %v9762_v57 = vpop.f32.mrf.mxu0  ;;  %v9767_v28 = vpop.f32.mrf.mxu2  ;;  %4979 = vmatpush.msrb.mxu3 %v4763_v0  ;;  %vm11659_vm14 = vnez %v11658_v60  ;;  %v5353_v0 = vld [vmem:[#allocation6 + $0x178] sm:$0xff] }
 0x4ef   : > { %11655 = vst [vmem:[#allocation150_spill] sm:$0xff] %v9762_v57  ;;  %5144 = vmatpush.msrb.mxu0 %v5113_v45  ;;  %7086 = vmatmul.msk.f32.vlgmr.msra.gmra.mxu2 %vm11659_vm14, %v4775_v22  ;;  %v4450_v57 = vld [vmem:[#allocation2 + $0x91] sm:$0xff]  ;;  %v4759_v45 = vld [vmem:[#allocation6 + $0x200] sm:$0xff] }
 0x4f0   : > { %11656 = vst [vmem:[#allocation151_spill] sm:$0xff] %v9767_v28  ;;  %4980 = vmatpush.msrb.mxu3 %v4762_v21  ;;  %v4274_v28 = vld [vmem:[#allocation2 + $0x118] sm:$0xff]  ;;  %5354 = vmatpush.msrb.mxu1 %v5353_v0  ;;  %v5577_v0 = vld [vmem:[#allocation6 + $0x1f0] sm:$0xff] }
 0x4f1   : > { %7068 = vmatmul.msk.f32.gmra.mxu3 %vm11614_vm4, %v9616_v56  ;;  %4393 = vmatmul.f32.gmra.mxu0 %v4273_v26  ;;  %v4761_v56 = vld [vmem:[#allocation6 + $0x210] sm:$0xff]  ;;  %v4451_v21 = vld [vmem:[#allocation2 + $0x99] sm:$0xff] }
 0x4f2   : > { %4981 = vmatpush.msrb.mxu3 %v4761_v56  ;;  %v4776_v22 = vld [vmem:[#allocation2 + $0x17] sm:$0xff]  ;;  %5580 = vmatpush.msrb.mxu2 %v5577_v0  ;;  %v4213_v0 = vadd.f32 %v9643_v38, %v9444_v31  ;;  %v4214_v31 = vadd.f32 %v9652_v41, %v9461_v54  ;;  %v9818_v38 = vld [vmem:[%s10996_s2] ss:$0 sm:$0xff] }
 0x4f3   : > { %v9769_v33 = vpop.f32.mrf.mxu1  ;;  %v11662_v56 = vld [vmem:[#allocation67_spill] sm:$0xff] }
 0x4f4   : > { %11657 = vst [vmem:[#allocation152_spill] sm:$0xff] %v9769_v33  ;;  %v9773_v3 = vpop.f32.mrf.mxu3  ;;  %4982 = vmatpush.msrb.mxu3 %v4760_v34  ;;  %vm11663_vm14 = vnez %v11662_v56  ;;  %v5352_v33 = vld [vmem:[#allocation6 + $0x170] sm:$0xff]  ;;  %v4051_v56 = vld [vmem:[#allocation2 + $0x127] sm:$0xff] }
 0x4f5   : > { %5355 = vmatpush.msrb.mxu1 %v5352_v33  ;;  %v4406_v33 = vadd.f32 %v9634_v44, %v4213_v0 }
 0x4f6   : > { %4570 = vmatmul.f32.gmra.mxu1 %v4450_v57  ;;  %v9775_v26 = vpop.f32.mrf.mxu0  ;;  %4983 = vmatpush.msrb.mxu3 %v4759_v45  ;;  %v9780_v61 = vpop.f32.mrf.mxu2 }
 0x4f7   : > { %4874 = vmatmul.f32.gmra.mxu2 %v4776_v22  ;;  %11661 = vst [vmem:[#allocation154_spill] sm:$0xff] %v9780_v61  ;;  %v4452_v22 = vld [vmem:[#allocation2 + $0xa1] sm:$0xff] }
 0x4f9   : > { %4203 = vmatmul.f32.gmra.mxu3 %v9630_v40  ;;  %4396 = vmatmul.f32.gmra.mxu0 %v4274_v28  ;;  %v4050_v40 = vld [vmem:[#allocation2 + $0x11f] sm:$0xff] }
 0x4fa   : > { %v7302_v28 = vld [vmem:[#allocation2] sm:$0xff] }
 0x4fb   : > { %v9778_v60 = vpop.f32.mrf.mxu1 }
 0x4fc   : > { %11660 = vst [vmem:[#allocation153_spill] sm:$0xff] %v9778_v60  ;;  %v9782_v57 = vpop.f32.mrf.mxu3 }
 0x4fe   : > { %7076 = vmatmul.msk.f32.gmra.mxu1 %vm11663_vm14, %v4451_v21  ;;  %v9786_v34 = vpop.f32.mrf.mxu0  ;;  %v9794_v61 = vpop.f32.mrf.mxu2 }
 0x4ff   : > { %11664 = vst [vmem:[#allocation155_spill] sm:$0xff] %v9786_v34 }
 0x500   : > { %11666 = vst [vmem:[#allocation157_spill] sm:$0xff] %v9794_v61 }
 0x501   : > { %7069 = vmatmul.msk.f32.gmra.mxu3 %vm11622_vm1, %v4050_v40  ;;  %4399 = vmatmul.f32.gmra.mxu0 %v7302_v28  ;;  %vm11670_vm1 = vnez %v11572_v13  ;;  %v5351_v13 = vld [vmem:[#allocation6 + $0x168] sm:$0xff] }
 0x502   : > { %5356 = vmatpush.msrb.mxu1 %v5351_v13 }
 0x503   : > { %v9790_v60 = vpop.f32.mrf.mxu1 }
 0x504   : > { %11665 = vst [vmem:[#allocation156_spill] sm:$0xff] %v9790_v60  ;;  %v9792_v45 = vpop.f32.mrf.mxu3  ;;  %v4453_v60 = vld [vmem:[#allocation2 + $0xa9] sm:$0xff] }
 0x506   : > { %4576 = vmatmul.f32.gmra.mxu1 %v4452_v22  ;;  %v9796_v21 = vpop.f32.mrf.mxu0  ;;  %v9808_v61 = vpop.f32.mrf.mxu2 }
 0x507   : > { %11667 = vst [vmem:[#allocation158_spill] sm:$0xff] %v9796_v21  ;;  %v5576_v21 = vld [vmem:[#allocation6 + $0x1e8] sm:$0xff] }
 0x508   : > { %11671 = vst [vmem:[#allocation161_spill] sm:$0xff] %v9808_v61  ;;  %5581 = vmatpush.msrb.mxu2 %v5576_v21  ;;  %v4407_v21 = vadd.f32 %v9647_v8, %v4214_v31  ;;  %v4455_v61 = vld [vmem:[#allocation2 + $0xb9] sm:$0xff] }
 0x509   : > { %4209 = vmatmul.f32.gmra.mxu3 %v4051_v56  ;;  %4402 = vmatmul.f32.gmra.mxu0 %v7302_v28 }
 0x50b   : > { %v9798_v40 = vpop.f32.mrf.mxu1 }
 0x50c   : > { %11668 = vst [vmem:[#allocation159_spill] sm:$0xff] %v9798_v40  ;;  %v9800_v46 = vpop.f32.mrf.mxu3 }
 0x50d   : > { %11669 = vst [vmem:[#allocation160_spill] sm:$0xff] %v9800_v46  ;;  %v4454_v46 = vld [vmem:[#allocation2 + $0xb1] sm:$0xff] }
 0x50e   : > { %7077 = vmatmul.msk.f32.gmra.mxu1 %vm11670_vm1, %v4453_v60  ;;  %v9806_v22 = vpop.f32.mrf.mxu0  ;;  %vm11672_vm1 = vnez %v11523_v10 }
 0x511   : > { %5145 = vmatmul.f32.vlgmr.msrb.gmra.mxu0 %v7302_v28 }
 0x513   : > { %v4535_v56 = vpop.f32.mrf.mxu1 }
 0x514   : > { %v4631_v34 = vadd.f32 %v4535_v56, %v4406_v33  ;;  %v9811_v40 = vpop.f32.mrf.mxu3  ;;  %v9824_v33 = vpop.f32.mrf.mxu2 }
 0x516   : > { %v4663_v60 = vadd.f32 %v9818_v38, %v4631_v34  ;;  %4582 = vmatmul.f32.gmra.mxu1 %v4454_v46  ;;  %v9821_v44 = vpop.f32.mrf.mxu0  ;;  %v4215_v46 = vadd.f32 %v9665_v53, %v9472_v2 }
 0x518   : > { %v4695_v0 = vmax.f32 %v4663_v60, 0.0  ;;  %v4408_v8 = vadd.f32 %v9656_v36, %v4215_v46 }
 0x519   : > { %5148 = vmatmul.f32.gmra.mxu0 %v7302_v28 }
 0x51a   : > { %4727 = vst [vmem:[#allocation2 + $0x20] sm:$0xff] %v4695_v0  ;;  %4984 = vmatmul.f32.vlgmr.msrb.gmra.mxu3 %v4695_v0 }
 0x51b   : > { %v4538_v54 = vpop.f32.mrf.mxu1 }
 0x51c   : > { %v4632_v41 = vadd.f32 %v4538_v54, %v4407_v21  ;;  %v9826_v56 = vpop.f32.mrf.mxu3  ;;  %v5575_v21 = vld [vmem:[#allocation6 + $0x1e0] sm:$0xff]  ;;  %v9838_v53 = vpop.f32.mrf.mxu2 }
 0x51d   : > { %5582 = vmatpush.msrb.mxu2 %v5575_v21 }
 0x51e   : > { %v4664_v34 = vadd.f32 %v9818_v38, %v4632_v41  ;;  %7078 = vmatmul.msk.f32.gmra.mxu1 %vm11577_vm5, %v4455_v61  ;;  %v9833_v13 = vpop.f32.mrf.mxu0  ;;  %v4456_v61 = vld [vmem:[#allocation2 + $0xc1] sm:$0xff]  ;;  %v4216_v41 = vadd.f32 %v9674_v48, %v9489_v14  ;;  %v4457_v14 = vld [vmem:[#allocation2 + $0xc9] sm:$0xff]  ;;  %v4217_v48 = vadd.f32 %v9685_v24, %v9500_v43  ;;  %v5574_v24 = vld [vmem:[#allocation6 + $0x1d8] sm:$0xff] }
 0x51f   : > { %5583 = vmatpush.msrb.mxu2 %v5574_v24  ;;  %v4219_v24 = vadd.f32 %v9707_v37, %v9528_v63  ;;  %v5573_v63 = vld [vmem:[#allocation6 + $0x1d0] sm:$0xff] }
 0x520   : > { %v4696_v28 = vmax.f32 %v4664_v34, 0.0  ;;  %v4409_v46 = vadd.f32 %v9667_v17, %v4216_v41 }
 0x521   : > { %v4777_v60 = vld [vmem:[#allocation2 + $0x1f] sm:$0xff]  ;;  %5151 = vmatmul.f32.gmra.mxu0 %v4695_v0  ;;  %5584 = vmatpush.msrb.mxu2 %v5573_v63 }
 0x522   : > { %7087 = vmatmul.msk.f32.gmra.mxu2 %vm11672_vm1, %v4777_v60  ;;  %4987 = vmatmul.f32.gmra.mxu3 %v4696_v28  ;;  %4728 = vst [vmem:[#allocation2 + $0x28] sm:$0xff] %v4696_v28  ;;  %v5350_v60 = vld [vmem:[#allocation6 + $0x160] sm:$0xff]  ;;  %vm11673_vm1 = vnez %v11527_v5 }
 0x523   : > { %v4541_v31 = vpop.f32.mrf.mxu1  ;;  %5357 = vmatpush.msrb.mxu1 %v5350_v60 }
 0x524   : > { %v4633_v2 = vadd.f32 %v4541_v31, %v4408_v8  ;;  %v9840_v54 = vpop.f32.mrf.mxu3 }
 0x526   : > { %v4665_v34 = vadd.f32 %v9818_v38, %v4633_v2  ;;  %4588 = vmatmul.f32.gmra.mxu1 %v4456_v61  ;;  %v9845_v10 = vpop.f32.mrf.mxu0  ;;  %v9855_v61 = vpop.f32.mrf.mxu2 }
 0x528   : > { %v4697_v36 = vmax.f32 %v4665_v34, 0.0 }
 0x529   : > { %v4778_v0 = vld [vmem:[#allocation2 + $0x27] sm:$0xff]  ;;  %5154 = vmatmul.f32.gmra.mxu0 %v4696_v28  ;;  %v4410_v28 = vadd.f32 %v9678_v9, %v4217_v48 }
 0x52a   : > { %4880 = vmatmul.f32.gmra.mxu2 %v4778_v0  ;;  %4990 = vmatmul.f32.gmra.mxu3 %v4697_v36  ;;  %4729 = vst [vmem:[#allocation2 + $0x30] sm:$0xff] %v4697_v36 }
 0x52b   : > { %v4544_v8 = vpop.f32.mrf.mxu1 }
 0x52c   : > { %v4634_v31 = vadd.f32 %v4544_v8, %v4409_v46  ;;  %v9848_v21 = vpop.f32.mrf.mxu3  ;;  %v4458_v46 = vld [vmem:[#allocation2 + $0xd1] sm:$0xff]  ;;  %v4218_v8 = vadd.f32 %v9694_v25, %v9517_v47  ;;  %v4459_v25 = vld [vmem:[#allocation2 + $0xd9] sm:$0xff] }
 0x52e   : > { %v4666_v2 = vadd.f32 %v9818_v38, %v4634_v31  ;;  %7079 = vmatmul.msk.f32.gmra.mxu1 %vm11525_vm3, %v4457_v14  ;;  %v9857_v34 = vpop.f32.mrf.mxu0  ;;  %v5349_v14 = vld [vmem:[#allocation6 + $0x158] sm:$0xff]  ;;  %v9869_v9 = vpop.f32.mrf.mxu2  ;;  %v4411_v48 = vadd.f32 %v9689_v39, %v4218_v8  ;;  %v4412_v39 = vadd.f32 %v9698_v35, %v4219_v24 }
 0x52f   : > { %5358 = vmatpush.msrb.mxu1 %v5349_v14 }
 0x530   : > { %v4698_v60 = vmax.f32 %v4666_v2, 0.0 }
 0x531   : > { %v4779_v17 = vld [vmem:[#allocation2 + $0x2f] sm:$0xff]  ;;  %5157 = vmatmul.f32.gmra.mxu0 %v4697_v36 }
 0x532   : > { %7088 = vmatmul.msk.f32.gmra.mxu2 %vm11673_vm1, %v4779_v17  ;;  %4993 = vmatmul.f32.gmra.mxu3 %v4698_v60  ;;  %4730 = vst [vmem:[#allocation2 + $0x38] sm:$0xff] %v4698_v60  ;;  %vm11674_vm1 = vnez %v11587_v62 }
 0x533   : > { %v4547_v43 = vpop.f32.mrf.mxu1 }
 0x534   : > { %v4635_v41 = vadd.f32 %v4547_v43, %v4410_v28  ;;  %v9862_v0 = vpop.f32.mrf.mxu3 }
 0x536   : > { %v4667_v31 = vadd.f32 %v9818_v38, %v4635_v41  ;;  %4594 = vmatmul.f32.gmra.mxu1 %v4458_v46  ;;  %v9867_v2 = vpop.f32.mrf.mxu0 }
 0x538   : > { %v4699_v17 = vmax.f32 %v4667_v31, 0.0 }
 0x539   : > { %v4780_v36 = vld [vmem:[#allocation2 + $0x37] sm:$0xff]  ;;  %5160 = vmatmul.f32.gmra.mxu0 %v4698_v60  ;;  %v9884_v60 = vpop.f32.mrf.mxu2 }
 0x53a   : > { %4886 = vmatmul.f32.gmra.mxu2 %v4780_v36  ;;  %4996 = vmatmul.f32.gmra.mxu3 %v4699_v17  ;;  %4731 = vst [vmem:[#allocation2 + $0x40] sm:$0xff] %v4699_v17 }
 0x53b   : > { %v4550_v28 = vpop.f32.mrf.mxu1 }
 0x53c   : > { %v4636_v43 = vadd.f32 %v4550_v28, %v4411_v48  ;;  %v9872_v47 = vpop.f32.mrf.mxu3  ;;  %v4460_v48 = vld [vmem:[#allocation2 + $0xe1] sm:$0xff]  ;;  %v4220_v28 = vadd.f32 %v9716_v51, %v9547_v58 }
 0x53e   : > { %v4668_v41 = vadd.f32 %v9818_v38, %v4636_v43  ;;  %7080 = vmatmul.msk.f32.gmra.mxu1 %vm11530_vm7, %v4459_v25  ;;  %v9879_v46 = vpop.f32.mrf.mxu0  ;;  %v5348_v25 = vld [vmem:[#allocation6 + $0x150] sm:$0xff] }
 0x53f   : > { %5359 = vmatpush.msrb.mxu1 %v5348_v25 }
 0x540   : > { %v4700_v31 = vmax.f32 %v4668_v41, 0.0 }
 0x541   : > { %v4781_v14 = vld [vmem:[#allocation2 + $0x3f] sm:$0xff]  ;;  %5163 = vmatmul.f32.gmra.mxu0 %v4699_v17  ;;  %v11675_v17 = vld [vmem:[#allocation113_spill] sm:$0xff]  ;;  %v9897_v63 = vpop.f32.mrf.mxu2 }
 0x542   : > { %7089 = vmatmul.msk.f32.gmra.mxu2 %vm11674_vm1, %v4781_v14  ;;  %4999 = vmatmul.f32.gmra.mxu3 %v4700_v31  ;;  %4732 = vst [vmem:[#allocation2 + $0x48] sm:$0xff] %v4700_v31  ;;  %v3771_v14 = vadd.f32 %v9533_v1, %v11675_v17 }
 0x543   : > { %v4553_v37 = vpop.f32.mrf.mxu1 }
 0x544   : > { %v4637_v8 = vadd.f32 %v4553_v37, %v4412_v39  ;;  %v9886_v36 = vpop.f32.mrf.mxu3  ;;  %v4413_v39 = vadd.f32 %v9709_v4, %v4220_v28  ;;  %v3996_v58 = vadd.f32 %v9661_v50, %v3771_v14  ;;  %v11676_v28 = vld [vmem:[#allocation115_spill] sm:$0xff]  ;;  %v5572_v14 = vld [vmem:[#allocation6 + $0x1c8] sm:$0xff] }
 0x545   : > { %v3772_v50 = vadd.f32 %v9550_v20, %v11676_v28  ;;  %5585 = vmatpush.msrb.mxu2 %v5572_v14 }
 0x546   : > { %v4669_v43 = vadd.f32 %v9818_v38, %v4637_v8  ;;  %4600 = vmatmul.f32.gmra.mxu1 %v4460_v48  ;;  %v9891_v41 = vpop.f32.mrf.mxu0  ;;  %v4461_v48 = vld [vmem:[#allocation2 + $0xe9] sm:$0xff] }
 0x548   : > { %v4701_v35 = vmax.f32 %v4669_v43, 0.0  ;;  %v4221_v43 = vadd.f32 %v9729_v7, %v3996_v58 }
 0x549   : > { %v4782_v24 = vld [vmem:[#allocation2 + $0x47] sm:$0xff]  ;;  %5166 = vmatmul.f32.gmra.mxu0 %v4700_v31 }
 0x54a   : > { %4892 = vmatmul.f32.gmra.mxu2 %v4782_v24  ;;  %5002 = vmatmul.f32.gmra.mxu3 %v4701_v35  ;;  %4733 = vst [vmem:[#allocation2 + $0x50] sm:$0xff] %v4701_v35  ;;  %v11677_v24 = vld [vmem:[#allocation40_spill] sm:$0xff]  ;;  %v4414_v17 = vadd.f32 %v9720_v18, %v4221_v43  ;;  %v11679_v43 = vld [vmem:[#allocation117_spill] sm:$0xff] }
 0x54b   : > { %v4556_v37 = vpop.f32.mrf.mxu1  ;;  %vm11678_vm1 = vnez %v11677_v24  ;;  %v11703_v24 = vld [vmem:[#allocation160_spill] sm:$0xff] }
 0x54c   : > { %v4638_v51 = vadd.f32 %v4556_v37, %v4413_v39  ;;  %v9899_v8 = vpop.f32.mrf.mxu3  ;;  %v3997_v39 = vadd.f32 %v9672_v52, %v3772_v50  ;;  %v3773_v52 = vadd.f32 %v9562_v23, %v11679_v43  ;;  %v5571_v43 = vld [vmem:[#allocation6 + $0x1c0] sm:$0xff] }
 0x54d   : > { %5586 = vmatpush.msrb.mxu2 %v5571_v43  ;;  %v11686_v43 = vld [vmem:[#allocation141_spill] sm:$0xff] }
 0x54e   : > { %v4670_v25 = vadd.f32 %v9818_v38, %v4638_v51  ;;  %7081 = vmatmul.msk.f32.gmra.mxu1 %vm11538_vm0, %v4461_v48  ;;  %v9905_v1 = vpop.f32.mrf.mxu0  ;;  %v4462_v51 = vld [vmem:[#allocation2 + $0xf1] sm:$0xff]  ;;  %v4222_v48 = vadd.f32 %v9736_v55, %v3997_v39  ;;  %v4463_v39 = vld [vmem:[#allocation2 + $0xf9] sm:$0xff] }
 0x550   : > { %v4702_v4 = vmax.f32 %v4670_v25, 0.0  ;;  %v5347_v25 = vld [vmem:[#allocation6 + $0x148] sm:$0xff]  ;;  %v4415_v50 = vadd.f32 %v9731_v19, %v4222_v48  ;;  %v11682_v48 = vld [vmem:[#allocation43_spill] sm:$0xff] }
 0x551   : > { %v4783_v31 = vld [vmem:[#allocation2 + $0x4f] sm:$0xff]  ;;  %5169 = vmatmul.f32.gmra.mxu0 %v4701_v35  ;;  %5360 = vmatpush.msrb.mxu1 %v5347_v25  ;;  %vm11683_vm0 = vnez %v11682_v48 }
 0x552   : > { %7090 = vmatmul.msk.f32.gmra.mxu2 %vm11678_vm1, %v4783_v31  ;;  %5005 = vmatmul.f32.gmra.mxu3 %v4702_v4  ;;  %4734 = vst [vmem:[#allocation2 + $0x58] sm:$0xff] %v4702_v4  ;;  %v9917_v31 = vpop.f32.mrf.mxu2  ;;  %vm11680_vm1 = vnez %v11609_v42  ;;  %v5339_v48 = vld [vmem:[#allocation6 + $0x108] sm:$0xff]  ;;  %v4466_v42 = vld [vmem:[#allocation2 + $0x111] sm:$0xff] }
 0x553   : > { %v4559_v7 = vpop.f32.mrf.mxu1 }
 0x554   : > { %v4639_v37 = vadd.f32 %v4559_v7, %v4414_v17  ;;  %v9913_v58 = vpop.f32.mrf.mxu3  ;;  %v3998_v17 = vadd.f32 %v9687_v30, %v3773_v52 }
 0x556   : > { %v4671_v20 = vadd.f32 %v9818_v38, %v4639_v37  ;;  %4606 = vmatmul.f32.gmra.mxu1 %v4462_v51  ;;  %v9919_v28 = vpop.f32.mrf.mxu0  ;;  %v4223_v37 = vadd.f32 %v9749_v59, %v3998_v17  ;;  %v4464_v17 = vld [vmem:[#allocation2 + $0x101] sm:$0xff] }
 0x558   : > { %v4703_v18 = vmax.f32 %v4671_v20, 0.0  ;;  %v4416_v59 = vadd.f32 %v9742_v6, %v4223_v37  ;;  %v5345_v6 = vld [vmem:[#allocation6 + $0x138] sm:$0xff]  ;;  %v5344_v37 = vld [vmem:[#allocation6 + $0x130] sm:$0xff] }
 0x559   : > { %v4784_v35 = vld [vmem:[#allocation2 + $0x57] sm:$0xff]  ;;  %5172 = vmatmul.f32.gmra.mxu0 %v4702_v4 }
 0x55a   : > { %4898 = vmatmul.f32.gmra.mxu2 %v4784_v35  ;;  %5008 = vmatmul.f32.gmra.mxu3 %v4703_v18  ;;  %4735 = vst [vmem:[#allocation2 + $0x60] sm:$0xff] %v4703_v18  ;;  %v9933_v25 = vpop.f32.mrf.mxu2  ;;  %v11681_v4 = vld [vmem:[#allocation119_spill] sm:$0xff] }
 0x55b   : > { %v4562_v55 = vpop.f32.mrf.mxu1  ;;  %v3774_v30 = vadd.f32 %v9576_v49, %v11681_v4  ;;  %v11685_v4 = vld [vmem:[#allocation116_spill] sm:$0xff] }
 0x55c   : > { %v4640_v7 = vadd.f32 %v4562_v55, %v4415_v50  ;;  %v9925_v14 = vpop.f32.mrf.mxu3 }
 0x55d   : > { %v3999_v52 = vadd.f32 %v9700_v32, %v3774_v30  ;;  %v11684_v32 = vld [vmem:[#allocation120_spill] sm:$0xff] }
 0x55e   : > { %v4672_v51 = vadd.f32 %v9818_v38, %v4640_v7  ;;  %7082 = vmatmul.msk.f32.gmra.mxu1 %vm11680_vm1, %v4463_v39  ;;  %v9931_v23 = vpop.f32.mrf.mxu0  ;;  %v5346_v39 = vld [vmem:[#allocation6 + $0x140] sm:$0xff]  ;;  %v3775_v30 = vadd.f32 %v11685_v4, %v11684_v32  ;;  %v5340_v4 = vld [vmem:[#allocation6 + $0x110] sm:$0xff] }
 0x55f   : > { %v4224_v7 = vadd.f32 %v9758_v12, %v3999_v52  ;;  %5361 = vmatpush.msrb.mxu1 %v5346_v39  ;;  %v4465_v39 = vld [vmem:[#allocation2 + $0x109] sm:$0xff] }
 0x560   : > { %v4704_v20 = vmax.f32 %v4672_v51, 0.0  ;;  %v4000_v52 = vadd.f32 %v11686_v43, %v3775_v30 }
 0x561   : > { %v4785_v19 = vld [vmem:[#allocation2 + $0x5f] sm:$0xff]  ;;  %5175 = vmatmul.f32.gmra.mxu0 %v4703_v18  ;;  %5362 = vmatpush.msrb.mxu1 %v5345_v6  ;;  %v4417_v12 = vadd.f32 %v9751_v16, %v4224_v7 }
 0x562   : > { %7091 = vmatmul.msk.f32.gmra.mxu2 %vm11683_vm0, %v4785_v19  ;;  %5011 = vmatmul.f32.gmra.mxu3 %v4704_v20  ;;  %4736 = vst [vmem:[#allocation2 + $0x68] sm:$0xff] %v4704_v20  ;;  %v4225_v6 = vadd.f32 %v9773_v3, %v4000_v52  ;;  %v5342_v16 = vld [vmem:[#allocation6 + $0x120] sm:$0xff]  ;;  %v11692_v3 = vld [vmem:[#allocation150_spill] sm:$0xff] }
 0x563   : > { %v4565_v35 = vpop.f32.mrf.mxu1  ;;  %5363 = vmatpush.msrb.mxu1 %v5344_v37 }
 0x564   : > { %v4641_v50 = vadd.f32 %v4565_v35, %v4416_v59  ;;  %v9941_v55 = vpop.f32.mrf.mxu3  ;;  %v9950_v59 = vpop.f32.mrf.mxu2  ;;  %v4418_v52 = vadd.f32 %v11692_v3, %v4225_v6  ;;  %v11694_v3 = vld [vmem:[#allocation122_spill] sm:$0xff] }
 0x566   : > { %v4673_v49 = vadd.f32 %v9818_v38, %v4641_v50  ;;  %4612 = vmatmul.f32.gmra.mxu1 %v4464_v17  ;;  %v9945_v51 = vpop.f32.mrf.mxu0  ;;  %v5343_v17 = vld [vmem:[#allocation6 + $0x128] sm:$0xff] }
 0x567   : > { %5364 = vmatpush.msrb.mxu1 %v5343_v17  ;;  %v11690_v17 = vld [vmem:[#allocation48_spill] sm:$0xff] }
 0x568   : > { %v4705_v18 = vmax.f32 %v4673_v49, 0.0  ;;  %vm11691_vm0 = vnez %v11690_v17 }
 0x569   : > { %v4786_v19 = vld [vmem:[#allocation2 + $0x67] sm:$0xff]  ;;  %5178 = vmatmul.f32.gmra.mxu0 %v4704_v20  ;;  %5365 = vmatpush.msrb.mxu1 %v5342_v16  ;;  %v5341_v20 = vld [vmem:[#allocation6 + $0x118] sm:$0xff] }
 0x56a   : > { %4904 = vmatmul.f32.gmra.mxu2 %v4786_v19  ;;  %5014 = vmatmul.f32.gmra.mxu3 %v4705_v18  ;;  %4737 = vst [vmem:[#allocation2 + $0x70] sm:$0xff] %v4705_v18  ;;  %v11693_v16 = vld [vmem:[#allocation144_spill] sm:$0xff] }
 0x56b   : > { %v4568_v35 = vpop.f32.mrf.mxu1  ;;  %5366 = vmatpush.msrb.mxu1 %v5341_v20 }
 0x56c   : > { %v4642_v50 = vadd.f32 %v4568_v35, %v4417_v12  ;;  %v9953_v49 = vpop.f32.mrf.mxu3  ;;  %v11688_v12 = vld [vmem:[#allocation121_spill] sm:$0xff]  ;;  %v11689_v35 = vld [vmem:[#allocation128_spill] sm:$0xff]  ;;  %v9967_v20 = vpop.f32.mrf.mxu2 }
 0x56d   : > { %v3776_v43 = vadd.f32 %v11689_v35, %v11688_v12  ;;  %5367 = vmatpush.msrb.mxu1 %v5340_v4  ;;  %v5338_v35 = vld [vmem:[#allocation6 + $0x100] sm:$0xff] }
 0x56e   : > { %v4674_v19 = vadd.f32 %v9818_v38, %v4642_v50  ;;  %7083 = vmatmul.msk.f32.gmra.mxu1 %vm11616_vm2, %v4465_v39  ;;  %v9959_v7 = vpop.f32.mrf.mxu0  ;;  %v5570_v39 = vld [vmem:[#allocation6 + $0x1b8] sm:$0xff] }
 0x56f   : > { %v4001_v32 = vadd.f32 %v11693_v16, %v3776_v43  ;;  %5587 = vmatpush.msrb.mxu2 %v5570_v39  ;;  %5368 = vmatpush.msrb.mxu1 %v5339_v48  ;;  %v4467_v16 = vld [vmem:[#allocation2 + $0x119] sm:$0xff] }
 0x570   : > { %v4706_v37 = vmax.f32 %v4674_v19, 0.0 }
 0x571   : > { %v4787_v30 = vld [vmem:[#allocation2 + $0x6f] sm:$0xff]  ;;  %5181 = vmatmul.f32.gmra.mxu0 %v4705_v18  ;;  %v4226_v12 = vadd.f32 %v9782_v57, %v4001_v32  ;;  %5369 = vmatpush.msrb.mxu1 %v5338_v35 }
 0x572   : > { %7092 = vmatmul.msk.f32.gmra.mxu2 %vm11691_vm0, %v4787_v30  ;;  %5017 = vmatmul.f32.gmra.mxu3 %v4706_v37  ;;  %4738 = vst [vmem:[#allocation2 + $0x78] sm:$0xff] %v4706_v37  ;;  %v11696_v32 = vld [vmem:[#allocation146_spill] sm:$0xff] }
 0x573   : > { %v4571_v50 = vpop.f32.mrf.mxu1  ;;  %v4419_v48 = vadd.f32 %v9775_v26, %v4226_v12  ;;  %v11699_v12 = vld [vmem:[#allocation132_spill] sm:$0xff] }
 0x574   : > { %v4643_v19 = vadd.f32 %v4571_v50, %v4418_v52  ;;  %v9971_v6 = vpop.f32.mrf.mxu3  ;;  %v11695_v52 = vld [vmem:[#allocation130_spill] sm:$0xff]  ;;  %v9983_v17 = vpop.f32.mrf.mxu2 }
 0x575   : > { %v3777_v50 = vadd.f32 %v11695_v52, %v11694_v3 }
 0x576   : > { %v4675_v30 = vadd.f32 %v9818_v38, %v4643_v19  ;;  %4618 = vmatmul.f32.gmra.mxu1 %v4466_v42  ;;  %v9973_v18 = vpop.f32.mrf.mxu0 }
 0x577   : > { %v4002_v42 = vadd.f32 %v11696_v32, %v3777_v50 }
 0x578   : > { %v4707_v4 = vmax.f32 %v4675_v30, 0.0 }
 0x579   : > { %v4788_v43 = vld [vmem:[#allocation2 + $0x77] sm:$0xff]  ;;  %5184 = vmatmul.f32.gmra.mxu0 %v4706_v37  ;;  %v4227_v19 = vadd.f32 %v9792_v45, %v4002_v42  ;;  %v4468_v42 = vld [vmem:[#allocation2 + $0x121] sm:$0xff] }
 0x57a   : > { %4910 = vmatmul.f32.gmra.mxu2 %v4788_v43  ;;  %5020 = vmatmul.f32.gmra.mxu3 %v4707_v4  ;;  %4739 = vst [vmem:[#allocation2 + $0x80] sm:$0xff] %v4707_v4  ;;  %v11698_v37 = vld [vmem:[#allocation123_spill] sm:$0xff] }
 0x57b   : > { %v4574_v57 = vpop.f32.mrf.mxu1  ;;  %v3778_v50 = vadd.f32 %v11699_v12, %v11698_v37  ;;  %v11701_v45 = vld [vmem:[#allocation155_spill] sm:$0xff] }
 0x57c   : > { %v4644_v39 = vadd.f32 %v4574_v57, %v4419_v48  ;;  %v9987_v52 = vpop.f32.mrf.mxu3  ;;  %v4420_v57 = vadd.f32 %v11701_v45, %v4227_v19  ;;  %v9999_v12 = vpop.f32.mrf.mxu2  ;;  %v11705_v19 = vld [vmem:[#allocation124_spill] sm:$0xff] }
 0x57e   : > { %v4676_v35 = vadd.f32 %v9818_v38, %v4644_v39  ;;  %7084 = vmatmul.msk.f32.gmra.mxu1 %vm11562_vm6, %v4467_v16  ;;  %v9985_v43 = vpop.f32.mrf.mxu0  ;;  %v5569_v39 = vld [vmem:[#allocation6 + $0x1b0] sm:$0xff]  ;;  %v11702_v16 = vld [vmem:[#allocation148_spill] sm:$0xff] }
 0x57f   : > { %v4003_v30 = vadd.f32 %v11702_v16, %v3778_v50  ;;  %5588 = vmatpush.msrb.mxu2 %v5569_v39  ;;  %v11707_v50 = vld [vmem:[#allocation158_spill] sm:$0xff] }
 0x580   : > { %v4708_v3 = vmax.f32 %v4676_v35, 0.0 }
 0x581   : > { %v4789_v26 = vld [vmem:[#allocation2 + $0x7f] sm:$0xff]  ;;  %5187 = vmatmul.f32.gmra.mxu0 %v4707_v4  ;;  %v4228_v29 = vadd.f32 %v11703_v24, %v4003_v30  ;;  %v11706_v4 = vld [vmem:[#allocation134_spill] sm:$0xff] }
 0x582   : > { %7093 = vmatmul.msk.f32.gmra.mxu2 %vm11460_vm15, %v4789_v26  ;;  %5023 = vmatmul.f32.gmra.mxu3 %v4708_v3  ;;  %4740 = vst [vmem:[#allocation2 + $0x88] sm:$0xff] %v4708_v3  ;;  %v3779_v45 = vadd.f32 %v11706_v4, %v11705_v19  ;;  %v4469_v30 = vld [vmem:[#allocation2 + $0x129] sm:$0xff] }
 0x583   : > { %v4577_v32 = vpop.f32.mrf.mxu1 }
 0x584   : > { %v4645_v35 = vadd.f32 %v4577_v32, %v4420_v57  ;;  %v4421_v57 = vadd.f32 %v11707_v50, %v4228_v29  ;;  %v10004_v32 = vpop.f32.mrf.mxu3  ;;  %v4872_v5 = vpop.f32.mrf.mxu2  ;;  %v11710_v29 = vld [vmem:[#allocation125_spill] sm:$0xff]  ;;  %v11711_v50 = vld [vmem:[#allocation135_spill] sm:$0xff] }
 0x585   : > { %v3780_v27 = vadd.f32 %v11711_v50, %v11710_v29 }
 0x586   : > { %v4677_v62 = vadd.f32 %v9818_v38, %v4645_v35  ;;  %4624 = vmatmul.f32.gmra.mxu1 %v4468_v42  ;;  %v9997_v37 = vpop.f32.mrf.mxu0  ;;  %v11708_v42 = vld [vmem:[#allocation151_spill] sm:$0xff] }
 0x587   : > { %11704 = vst [vmem:[#allocation113_spill] sm:$0xff] %v9997_v37  ;;  %v4004_v39 = vadd.f32 %v11708_v42, %v3779_v45  ;;  %v11714_v42 = vld [vmem:[#allocation154_spill] sm:$0xff] }
 0x588   : > { %v4709_v26 = vmax.f32 %v4677_v62, 0.0 }
 0x589   : > { %v4790_v48 = vld [vmem:[#allocation2 + $0x87] sm:$0xff]  ;;  %5190 = vmatmul.f32.gmra.mxu0 %v4708_v3  ;;  %v4229_v62 = vadd.f32 %v9811_v40, %v4004_v39  ;;  %v11712_v3 = vld [vmem:[#allocation54_spill] sm:$0xff] }
 0x58a   : > { %4916 = vmatmul.f32.gmra.mxu2 %v4790_v48  ;;  %5026 = vmatmul.f32.gmra.mxu3 %v4709_v26  ;;  %4741 = vst [vmem:[#allocation2 + $0x90] sm:$0xff] %v4709_v26  ;;  %vm11713_vm15 = vnez %v11712_v3 }
 0x58b   : > { %v4580_v24 = vpop.f32.mrf.mxu1  ;;  %v4422_v45 = vadd.f32 %v9806_v22, %v4229_v62  ;;  %v11716_v22 = vld [vmem:[#allocation136_spill] sm:$0xff] }
 0x58c   : > { %v4646_v16 = vadd.f32 %v4580_v24, %v4421_v57  ;;  %v5274_v57 = vld [vmem:[#allocation2 + $0x11] sm:$0xff]  ;;  %v5568_v24 = vld [vmem:[#allocation6 + $0x1a8] sm:$0xff] }
 0x58d   : > { %5589 = vmatpush.msrb.mxu2 %v5568_v24 }
 0x58e   : > { %v4678_v35 = vadd.f32 %v9818_v38, %v4646_v16  ;;  %7085 = vmatmul.msk.f32.gmra.mxu1 %vm11568_vm8, %v4469_v30  ;;  %v5146_v48 = vpop.f32.mrf.mxu0  ;;  %v4005_v30 = vadd.f32 %v11714_v42, %v3780_v27  ;;  %v10017_v16 = vpop.f32.mrf.mxu3 }
 0x590   : > { %v4710_v19 = vmax.f32 %v4678_v35, 0.0  ;;  %v4230_v35 = vadd.f32 %v9826_v56, %v4005_v30  ;;  %v5275_v30 = vld [vmem:[#allocation2 + $0x19] sm:$0xff] }
 0x591   : > { %v4791_v4 = vld [vmem:[#allocation2 + $0x8f] sm:$0xff]  ;;  %5193 = vmatmul.f32.gmra.mxu0 %v4709_v26  ;;  %v3781_v26 = vadd.f32 %v11716_v22, %v11715_v15 }
 0x592   : > { %7094 = vmatmul.msk.f32.gmra.mxu2 %vm11713_vm15, %v4791_v4  ;;  %5029 = vmatmul.f32.gmra.mxu3 %v4710_v19  ;;  %4742 = vst [vmem:[#allocation2 + $0x98] sm:$0xff] %v4710_v19  ;;  %v4423_v27 = vadd.f32 %v9821_v44, %v4230_v35  ;;  %v11720_v35 = vld [vmem:[#allocation137_spill] sm:$0xff] }
 0x593   : > { %v4583_v40 = vpop.f32.mrf.mxu1 }
 0x594   : > { %v4647_v39 = vadd.f32 %v4583_v40, %v4422_v45  ;;  %v4875_v45 = vpop.f32.mrf.mxu2  ;;  %v11717_v40 = vld [vmem:[#allocation157_spill] sm:$0xff] }
 0x595   : > { %v4006_v24 = vadd.f32 %v11717_v40, %v3781_v26  ;;  %v11721_v26 = vld [vmem:[#allocation57_spill] sm:$0xff] }
 0x596   : > { %v4679_v29 = vadd.f32 %v9818_v38, %v4647_v39  ;;  %5370 = vmatmul.f32.vlgmr.msrb.gmra.mxu1 %v5274_v57  ;;  %v5149_v4 = vpop.f32.mrf.mxu0  ;;  %vm11722_vm15 = vnez %v11721_v26 }
 0x597   : > { %v4231_v57 = vadd.f32 %v9840_v54, %v4006_v24 }
 0x598   : > { %v4711_v50 = vmax.f32 %v4679_v29, 0.0 }
 0x599   : > { %v4792_v3 = vld [vmem:[#allocation2 + $0x97] sm:$0xff]  ;;  %5196 = vmatmul.f32.gmra.mxu0 %v4710_v19  ;;  %v4424_v54 = vadd.f32 %v9833_v13, %v4231_v57 }
 0x59a   : > { %4922 = vmatmul.f32.gmra.mxu2 %v4792_v3  ;;  %5032 = vmatmul.f32.gmra.mxu3 %v4711_v50  ;;  %4743 = vst [vmem:[#allocation2 + $0xa0] sm:$0xff] %v4711_v50  ;;  %v11719_v19 = vld [vmem:[#allocation127_spill] sm:$0xff] }
 0x59b   : > { %v4586_v62 = vpop.f32.mrf.mxu1  ;;  %v3782_v37 = vadd.f32 %v11720_v35, %v11719_v19  ;;  %v11724_v19 = vld [vmem:[#allocation96_spill] sm:$0xff] }
 0x59c   : > { %v4648_v56 = vadd.f32 %v4586_v62, %v4423_v27  ;;  %v5567_v27 = vld [vmem:[#allocation6 + $0x1a0] sm:$0xff]  ;;  %v11723_v62 = vld [vmem:[#allocation161_spill] sm:$0xff] }
 0x59d   : > { %v4985_v42 = vpop.f32.mrf.mxu3  ;;  %v4007_v40 = vadd.f32 %v11723_v62, %v3782_v37  ;;  %5590 = vmatpush.msrb.mxu2 %v5567_v27  ;;  %v11725_v37 = vld [vmem:[#allocation138_spill] sm:$0xff] }
 0x59e   : > { %v4680_v39 = vadd.f32 %v9818_v38, %v4648_v56  ;;  %v4986_v29 = vadd.f32 %v4985_v42, %v4872_v5  ;;  %7102 = vmatmul.msk.f32.gmra.mxu1 %vm11630_vm9, %v5275_v30  ;;  %v5152_v15 = vpop.f32.mrf.mxu0  ;;  %v10037_v42 = vld [vmem:[#allocation2 + $0x21] sm:$0xff]  ;;  %v3783_v35 = vadd.f32 %v11725_v37, %v11724_v19  ;;  %v11729_v37 = vld [vmem:[#allocation58_spill] sm:$0xff] }
 0x59f   : > { %v4232_v30 = vadd.f32 %v9848_v21, %v4007_v40  ;;  %v10048_v40 = vld [vmem:[#allocation2 + $0x29] sm:$0xff] }
 0x5a0   : > { %v4712_v3 = vmax.f32 %v4680_v39, 0.0  ;;  %v10029_v22 = vadd.f32 %v5146_v48, %v4986_v29 }
 0x5a1   : > { %v4793_v44 = vld [vmem:[#allocation2 + $0x9f] sm:$0xff]  ;;  %5199 = vmatmul.f32.gmra.mxu0 %v4711_v50 }
 0x5a2   : > { %7095 = vmatmul.msk.f32.gmra.mxu2 %vm11722_vm15, %v4793_v44  ;;  %5035 = vmatmul.f32.gmra.mxu3 %v4712_v3  ;;  %4744 = vst [vmem:[#allocation2 + $0xa8] sm:$0xff] %v4712_v3  ;;  %vm11730_vm15 = vnez %v11729_v37 }
 0x5a3   : > { %v4589_v5 = vpop.f32.mrf.mxu1 }
 0x5a4   : > { %v4649_v24 = vadd.f32 %v4589_v5, %v4424_v54  ;;  %v4425_v54 = vadd.f32 %v9845_v10, %v4232_v30  ;;  %v4008_v5 = vadd.f32 %v9824_v33, %v3783_v35  ;;  %v11727_v33 = vld [vmem:[#allocation109_spill] sm:$0xff]  ;;  %v5566_v35 = vld [vmem:[#allocation6 + $0x198] sm:$0xff] }
 0x5a5   : > { %v4878_v48 = vpop.f32.mrf.mxu2  ;;  %v4988_v56 = vpop.f32.mrf.mxu3  ;;  %5591 = vmatpush.msrb.mxu2 %v5566_v35 }
 0x5a6   : > { %v4681_v39 = vadd.f32 %v9818_v38, %v4649_v24  ;;  %v4989_v29 = vadd.f32 %v4988_v56, %v4875_v45  ;;  %5376 = vmatmul.f32.gmra.mxu1 %v10037_v42  ;;  %v5155_v44 = vpop.f32.mrf.mxu0 }
 0x5a8   : > { %v4713_v13 = vmax.f32 %v4681_v39, 0.0  ;;  %v10042_v50 = vadd.f32 %v5149_v4, %v4989_v29  ;;  %v4233_v4 = vadd.f32 %v9862_v0, %v4008_v5 }
 0x5a9   : > { %v4794_v57 = vld [vmem:[#allocation2 + $0xa7] sm:$0xff]  ;;  %5202 = vmatmul.f32.gmra.mxu0 %v4712_v3 }
 0x5aa   : > { %4928 = vmatmul.f32.gmra.mxu2 %v4794_v57  ;;  %5038 = vmatmul.f32.gmra.mxu3 %v4713_v13  ;;  %4745 = vst [vmem:[#allocation2 + $0xb0] sm:$0xff] %v4713_v13  ;;  %v11728_v57 = vld [vmem:[#allocation139_spill] sm:$0xff]  ;;  %v4426_v0 = vadd.f32 %v9857_v34, %v4233_v4 }
 0x5ab   : > { %v4592_v21 = vpop.f32.mrf.mxu1  ;;  %v3784_v19 = vadd.f32 %v11728_v57, %v11727_v33  ;;  %v11731_v33 = vld [vmem:[#allocation97_spill] sm:$0xff] }
 0x5ac   : > { %v4650_v45 = vadd.f32 %v4592_v21, %v4425_v54 }
 0x5ad   : > { %v4881_v27 = vpop.f32.mrf.mxu2  ;;  %v4991_v62 = vpop.f32.mrf.mxu3  ;;  %v4009_v54 = vadd.f32 %v9838_v53, %v3784_v19  ;;  %v11732_v53 = vld [vmem:[#allocation140_spill] sm:$0xff] }
 0x5ae   : > { %v4682_v24 = vadd.f32 %v9818_v38, %v4650_v45  ;;  %v4992_v56 = vadd.f32 %v4991_v62, %v4878_v48  ;;  %7103 = vmatmul.msk.f32.gmra.mxu1 %vm11634_vm10, %v10048_v40  ;;  %v5158_v29 = vpop.f32.mrf.mxu0  ;;  %v10063_v45 = vld [vmem:[#allocation2 + $0x31] sm:$0xff]  ;;  %v3785_v57 = vadd.f32 %v11732_v53, %v11731_v33 }
 0x5af   : > { %v4234_v62 = vadd.f32 %v9872_v47, %v4009_v54  ;;  %v10074_v54 = vld [vmem:[#allocation2 + $0x39] sm:$0xff] }
 0x5b0   : > { %v4714_v10 = vmax.f32 %v4682_v24, 0.0  ;;  %v10055_v3 = vadd.f32 %v5152_v15, %v4992_v56  ;;  %v11736_v53 = vld [vmem:[#allocation59_spill] sm:$0xff] }
 0x5b1   : > { %v4795_v30 = vld [vmem:[#allocation2 + $0xaf] sm:$0xff]  ;;  %5205 = vmatmul.f32.gmra.mxu0 %v4713_v13  ;;  %v4427_v19 = vadd.f32 %v9867_v2, %v4234_v62 }
 0x5b2   : > { %7096 = vmatmul.msk.f32.gmra.mxu2 %vm11730_vm15, %v4795_v30  ;;  %5041 = vmatmul.f32.gmra.mxu3 %v4714_v10  ;;  %4746 = vst [vmem:[#allocation2 + $0xb8] sm:$0xff] %v4714_v10  ;;  %vm11737_vm15 = vnez %v11736_v53 }
 0x5b3   : > { %v4595_v48 = vpop.f32.mrf.mxu1 }
 0x5b4   : > { %v4651_v21 = vadd.f32 %v4595_v48, %v4426_v0  ;;  %v4010_v0 = vadd.f32 %v9855_v61, %v3785_v57  ;;  %v11734_v61 = vld [vmem:[#allocation98_spill] sm:$0xff] }
 0x5b5   : > { %v4884_v15 = vpop.f32.mrf.mxu2  ;;  %v4994_v5 = vpop.f32.mrf.mxu3  ;;  %v5565_v57 = vld [vmem:[#allocation6 + $0x190] sm:$0xff] }
 0x5b6   : > { %v4683_v24 = vadd.f32 %v9818_v38, %v4651_v21  ;;  %v4995_v56 = vadd.f32 %v4994_v5, %v4881_v27  ;;  %5382 = vmatmul.f32.gmra.mxu1 %v10063_v45  ;;  %v5161_v30 = vpop.f32.mrf.mxu0  ;;  %5592 = vmatpush.msrb.mxu2 %v5565_v57 }
 0x5b8   : > { %v4715_v34 = vmax.f32 %v4683_v24, 0.0  ;;  %v10068_v13 = vadd.f32 %v5155_v44, %v4995_v56  ;;  %v4235_v44 = vadd.f32 %v9886_v36, %v4010_v0 }
 0x5b9   : > { %v4796_v4 = vld [vmem:[#allocation2 + $0xb7] sm:$0xff]  ;;  %5208 = vmatmul.f32.gmra.mxu0 %v4714_v10 }
 0x5ba   : > { %4934 = vmatmul.f32.gmra.mxu2 %v4796_v4  ;;  %5044 = vmatmul.f32.gmra.mxu3 %v4715_v34  ;;  %4747 = vst [vmem:[#allocation2 + $0xc0] sm:$0xff] %v4715_v34  ;;  %v11735_v4 = vld [vmem:[#allocation142_spill] sm:$0xff]  ;;  %v4428_v36 = vadd.f32 %v9879_v46, %v4235_v44 }
 0x5bb   : > { %v4598_v47 = vpop.f32.mrf.mxu1  ;;  %v3786_v33 = vadd.f32 %v11735_v4, %v11734_v61  ;;  %v11738_v61 = vld [vmem:[#allocation112_spill] sm:$0xff] }
 0x5bc   : > { %v4652_v27 = vadd.f32 %v4598_v47, %v4427_v19 }
 0x5bd   : > { %v4887_v48 = vpop.f32.mrf.mxu2  ;;  %v4997_v35 = vpop.f32.mrf.mxu3  ;;  %v4011_v19 = vadd.f32 %v9869_v9, %v3786_v33  ;;  %v11739_v9 = vld [vmem:[#allocation143_spill] sm:$0xff] }
 0x5be   : > { %v4684_v21 = vadd.f32 %v9818_v38, %v4652_v27  ;;  %v4998_v5 = vadd.f32 %v4997_v35, %v4884_v15  ;;  %7104 = vmatmul.msk.f32.gmra.mxu1 %vm11638_vm11, %v10074_v54  ;;  %v5164_v56 = vpop.f32.mrf.mxu0  ;;  %v10089_v27 = vld [vmem:[#allocation2 + $0x41] sm:$0xff]  ;;  %v3787_v4 = vadd.f32 %v11739_v9, %v11738_v61  ;;  %v11743_v9 = vld [vmem:[#allocation22_spill] sm:$0xff] }
 0x5bf   : > { %v4236_v35 = vadd.f32 %v9899_v8, %v4011_v19  ;;  %v10100_v19 = vld [vmem:[#allocation2 + $0x49] sm:$0xff] }
 0x5c0   : > { %v4716_v2 = vmax.f32 %v4684_v21, 0.0  ;;  %v10081_v10 = vadd.f32 %v5158_v29, %v4998_v5 }
 0x5c1   : > { %v4797_v62 = vld [vmem:[#allocation2 + $0xbf] sm:$0xff]  ;;  %5211 = vmatmul.f32.gmra.mxu0 %v4715_v34  ;;  %v4429_v33 = vadd.f32 %v9891_v41, %v4236_v35 }
 0x5c2   : > { %7097 = vmatmul.msk.f32.gmra.mxu2 %vm11737_vm15, %v4797_v62  ;;  %5047 = vmatmul.f32.gmra.mxu3 %v4716_v2  ;;  %4748 = vst [vmem:[#allocation2 + $0xc8] sm:$0xff] %v4716_v2  ;;  %vm11744_vm15 = vnez %v11743_v9 }
 0x5c3   : > { %v4601_v15 = vpop.f32.mrf.mxu1 }
 0x5c4   : > { %v4653_v47 = vadd.f32 %v4601_v15, %v4428_v36  ;;  %v4012_v36 = vadd.f32 %v9884_v60, %v3787_v4  ;;  %v11741_v60 = vld [vmem:[#allocation110_spill] sm:$0xff]  ;;  %v5564_v4 = vld [vmem:[#allocation6 + $0x188] sm:$0xff] }
 0x5c5   : > { %v4890_v29 = vpop.f32.mrf.mxu2  ;;  %v5000_v0 = vpop.f32.mrf.mxu3  ;;  %5593 = vmatpush.msrb.mxu2 %v5564_v4 }
 0x5c6   : > { %v4685_v21 = vadd.f32 %v9818_v38, %v4653_v47  ;;  %v5001_v5 = vadd.f32 %v5000_v0, %v4887_v48  ;;  %5388 = vmatmul.f32.gmra.mxu1 %v10089_v27  ;;  %v5167_v62 = vpop.f32.mrf.mxu0 }
 0x5c8   : > { %v4717_v46 = vmax.f32 %v4685_v21, 0.0  ;;  %v10094_v34 = vadd.f32 %v5161_v30, %v5001_v5  ;;  %v4237_v30 = vadd.f32 %v9913_v58, %v4012_v36 }
 0x5c9   : > { %v4798_v44 = vld [vmem:[#allocation2 + $0xc7] sm:$0xff]  ;;  %5214 = vmatmul.f32.gmra.mxu0 %v4716_v2 }
 0x5ca   : > { %4940 = vmatmul.f32.gmra.mxu2 %v4798_v44  ;;  %5050 = vmatmul.f32.gmra.mxu3 %v4717_v46  ;;  %4749 = vst [vmem:[#allocation2 + $0xd0] sm:$0xff] %v4717_v46  ;;  %v11742_v44 = vld [vmem:[#allocation145_spill] sm:$0xff]  ;;  %v4430_v58 = vadd.f32 %v9905_v1, %v4237_v30  ;;  %v6027_v1 = vld [vmem:[#allocation6 + $0x370] sm:$0xff] }
 0x5cb   : > { %v4604_v8 = vpop.f32.mrf.mxu1  ;;  %v3788_v61 = vadd.f32 %v11742_v44, %v11741_v60  ;;  %v6026_v30 = vld [vmem:[#allocation6 + $0x368] sm:$0xff] }
 0x5cc   : > { %v4654_v48 = vadd.f32 %v4604_v8, %v4429_v33 }
 0x5cd   : > { %v4893_v15 = vpop.f32.mrf.mxu2  ;;  %v5003_v57 = vpop.f32.mrf.mxu3  ;;  %v4013_v33 = vadd.f32 %v9897_v63, %v3788_v61  ;;  %v6025_v61 = vld [vmem:[#allocation6 + $0x360] sm:$0xff] }
 0x5ce   : > { %v4686_v47 = vadd.f32 %v9818_v38, %v4654_v48  ;;  %v5004_v0 = vadd.f32 %v5003_v57, %v4890_v29  ;;  %7105 = vmatmul.msk.f32.gmra.mxu1 %vm11643_vm12, %v10100_v19  ;;  %v5170_v5 = vpop.f32.mrf.mxu0  ;;  %v10115_v57 = vld [vmem:[#allocation2 + $0x51] sm:$0xff] }
 0x5d0   : > { %v4718_v41 = vmax.f32 %v4686_v47, 0.0  ;;  %v10107_v2 = vadd.f32 %v5164_v56, %v5004_v0  ;;  %v6028_v56 = vld [vmem:[#allocation6 + $0x378] sm:$0xff]  ;;  %v4238_v47 = vadd.f32 %v9925_v14, %v4013_v33 }
 0x5d1   : > { %v4799_v35 = vld [vmem:[#allocation2 + $0xcf] sm:$0xff]  ;;  %5217 = vmatmul.f32.gmra.mxu0 %v4717_v46 }
 0x5d2   : > { %7098 = vmatmul.msk.f32.gmra.mxu2 %vm11744_vm15, %v4799_v35  ;;  %5053 = vmatmul.f32.gmra.mxu3 %v4718_v41  ;;  %4750 = vst [vmem:[#allocation2 + $0xd8] sm:$0xff] %v4718_v41  ;;  %v4431_v14 = vadd.f32 %v9919_v28, %v4238_v47 }
 0x5d3   : > { %v4607_v29 = vpop.f32.mrf.mxu1  ;;  %6029 = vmatpush.msra.mxu0 %v6028_v56  ;;  %v5803_v56 = vld [vmem:[#allocation6 + $0x2f8] sm:$0xff] }
 0x5d4   : > { %v4655_v8 = vadd.f32 %v4607_v29, %v4430_v58  ;;  %v11745_v58 = vld [vmem:[#allocation114_spill] sm:$0xff]  ;;  %v11746_v29 = vld [vmem:[#allocation147_spill] sm:$0xff]  ;;  %5804 = vmatpush.msra.mxu3 %v5803_v56 }
 0x5d5   : > { %v4896_v36 = vpop.f32.mrf.mxu2  ;;  %v5006_v48 = vpop.f32.mrf.mxu3  ;;  %6030 = vmatpush.msra.mxu0 %v6027_v1  ;;  %v3789_v4 = vadd.f32 %v11746_v29, %v11745_v58  ;;  %v5801_v58 = vld [vmem:[#allocation6 + $0x2e8] sm:$0xff]  ;;  %v5800_v29 = vld [vmem:[#allocation6 + $0x2e0] sm:$0xff] }
 0x5d6   : > { %v4687_v0 = vadd.f32 %v9818_v38, %v4655_v8  ;;  %v5007_v35 = vadd.f32 %v5006_v48, %v4893_v15  ;;  %5394 = vmatmul.f32.gmra.mxu1 %v10115_v57  ;;  %v10120_v46 = vpop.f32.mrf.mxu0 }
 0x5d7   : > { %6031 = vmatpush.msra.mxu0 %v6026_v30  ;;  %v4014_v33 = vadd.f32 %v9917_v31, %v3789_v4  ;;  %v5802_v31 = vld [vmem:[#allocation6 + $0x2f0] sm:$0xff] }
 0x5d8   : > { %v4719_v63 = vmax.f32 %v4687_v0, 0.0  ;;  %v10122_v60 = vadd.f32 %v5167_v62, %v5007_v35  ;;  %v6024_v62 = vld [vmem:[#allocation6 + $0x358] sm:$0xff]  ;;  %5805 = vmatpush.msra.mxu3 %v5802_v31 }
 0x5d9   : > { %v4800_v44 = vld [vmem:[#allocation2 + $0xd7] sm:$0xff]  ;;  %5220 = vmatmul.f32.gmra.mxu0 %v4718_v41  ;;  %v4239_v1 = vadd.f32 %v9941_v55, %v4014_v33  ;;  %v11750_v33 = vld [vmem:[#allocation28_spill] sm:$0xff] }
 0x5da   : > { %4946 = vmatmul.f32.gmra.mxu2 %v4800_v44  ;;  %5056 = vmatmul.f32.gmra.mxu3 %v4719_v63  ;;  %4751 = vst [vmem:[#allocation2 + $0xe0] sm:$0xff] %v4719_v63  ;;  %v10128_v35 = vld [vmem:[#allocation2 + $0x59] sm:$0xff]  ;;  %v6023_v41 = vld [vmem:[#allocation6 + $0x350] sm:$0xff]  ;;  %vm11751_vm15 = vnez %v11750_v33 }
 0x5db   : > { %v4610_v15 = vpop.f32.mrf.mxu1  ;;  %6032 = vmatpush.msra.mxu0 %v6025_v61  ;;  %5806 = vmatpush.msra.mxu3 %v5801_v58  ;;  %v10145_v58 = vld [vmem:[#allocation2 + $0x61] sm:$0xff]  ;;  %v11816_v33 = vld [vmem:[#allocation82_spill] sm:$0xff] }
 0x5dc   : > { %v4656_v8 = vadd.f32 %v4610_v15, %v4431_v14  ;;  %v11749_v14 = vld [vmem:[#allocation149_spill] sm:$0xff] }
 0x5dd   : > { %v4899_v48 = vpop.f32.mrf.mxu2  ;;  %v5009_v0 = vpop.f32.mrf.mxu3  ;;  %6033 = vmatpush.msra.mxu0 %v6024_v62  ;;  %5807 = vmatpush.msra.mxu3 %v5800_v29  ;;  %v6021_v62 = vld [vmem:[#allocation6 + $0x340] sm:$0xff] }
 0x5de   : > { %v4688_v30 = vadd.f32 %v9818_v38, %v4656_v8  ;;  %v5010_v44 = vadd.f32 %v5009_v0, %v4896_v36  ;;  %7106 = vmatmul.msk.f32.gmra.mxu1 %vm11648_vm13, %v10128_v35  ;;  %v10135_v47 = vpop.f32.mrf.mxu0  ;;  %v6022_v38 = vld [vmem:[#allocation6 + $0x348] sm:$0xff]  ;;  %v11748_v36 = vld [vmem:[#allocation111_spill] sm:$0xff]  ;;  %v4432_v8 = vadd.f32 %v9931_v23, %v4239_v1  ;;  %v5563_v0 = vld [vmem:[#allocation6 + $0x180] sm:$0xff] }
 0x5df   : > { %6034 = vmatpush.msra.mxu0 %v6023_v41  ;;  %v3790_v15 = vadd.f32 %v11749_v14, %v11748_v36  ;;  %5594 = vmatpush.msrb.mxu2 %v5563_v0  ;;  %v10151_v23 = vld [vmem:[%s10996_s2] ss:$0 sm:$0xff]  ;;  %v5798_v1 = vld [vmem:[#allocation6 + $0x2d0] sm:$0xff]  ;;  %v5797_v14 = vld [vmem:[#allocation6 + $0x2c8] sm:$0xff] }
 0x5e0   : > { %v4720_v61 = vmax.f32 %v4688_v30, 0.0  ;;  %v10137_v4 = vadd.f32 %v5170_v5, %v5010_v44  ;;  %v5799_v44 = vld [vmem:[#allocation6 + $0x2d8] sm:$0xff]  ;;  %v11752_v0 = vld [vmem:[#allocation118_spill] sm:$0xff] }
 0x5e1   : > { %v4801_v55 = vld [vmem:[#allocation2 + $0xdf] sm:$0xff]  ;;  %5223 = vmatmul.f32.gmra.mxu0 %v4719_v63  ;;  %v4015_v5 = vadd.f32 %v9933_v25, %v3790_v15  ;;  %5808 = vmatpush.msra.mxu3 %v5799_v44  ;;  %v6018_v44 = vld [vmem:[#allocation6 + $0x328] sm:$0xff] }
 0x5e2   : > { %7099 = vmatmul.msk.f32.gmra.mxu2 %vm11751_vm15, %v4801_v55  ;;  %5059 = vmatmul.f32.gmra.mxu3 %v4720_v61  ;;  %4752 = vst [vmem:[#allocation2 + $0xe8] sm:$0xff] %v4720_v61  ;;  %v6020_v55 = vld [vmem:[#allocation6 + $0x338] sm:$0xff]  ;;  %v5796_v15 = vld [vmem:[#allocation6 + $0x2c0] sm:$0xff] }
 0x5e3   : > { %v4613_v56 = vpop.f32.mrf.mxu1  ;;  %6035 = vmatpush.msra.mxu0 %v6022_v38  ;;  %v4240_v36 = vadd.f32 %v9953_v49, %v4015_v5  ;;  %5809 = vmatpush.msra.mxu3 %v5798_v1  ;;  %v11753_v5 = vld [vmem:[#allocation152_spill] sm:$0xff]  ;;  %v10164_v1 = vld [vmem:[#allocation2 + $0x69] sm:$0xff] }
 0x5e4   : > { %v4657_v30 = vadd.f32 %v4613_v56, %v4432_v8  ;;  %v6019_v56 = vld [vmem:[#allocation6 + $0x330] sm:$0xff] }
 0x5e5   : > { %v4902_v31 = vpop.f32.mrf.mxu2  ;;  %v5012_v41 = vpop.f32.mrf.mxu3  ;;  %6036 = vmatpush.msra.mxu0 %v6021_v62  ;;  %5810 = vmatpush.msra.mxu3 %v5797_v14  ;;  %v4433_v62 = vadd.f32 %v9945_v51, %v4240_v36  ;;  %v6017_v14 = vld [vmem:[#allocation6 + $0x320] sm:$0xff] }
 0x5e6   : > { %v4689_v63 = vadd.f32 %v10151_v23, %v4657_v30  ;;  %v5013_v25 = vadd.f32 %v5012_v41, %v4899_v48  ;;  %5400 = vmatmul.f32.gmra.mxu1 %v10145_v58  ;;  %v10155_v29 = vpop.f32.mrf.mxu0  ;;  %v3791_v48 = vadd.f32 %v11753_v5, %v11752_v0  ;;  %v5792_v5 = vld [vmem:[#allocation6 + $0x2a0] sm:$0xff] }
 0x5e7   : > { %6037 = vmatpush.msra.mxu0 %v6020_v55  ;;  %5811 = vmatpush.msra.mxu3 %v5796_v15 }
 0x5e8   : > { %v4721_v38 = vmax.f32 %v4689_v63, 0.0  ;;  %v10158_v49 = vadd.f32 %v10120_v46, %v5013_v25  ;;  %v4016_v41 = vadd.f32 %v9950_v59, %v3791_v48  ;;  %v5795_v46 = vld [vmem:[#allocation6 + $0x2b8] sm:$0xff]  ;;  %v5794_v59 = vld [vmem:[#allocation6 + $0x2b0] sm:$0xff] }
 0x5e9   : > { %v4802_v8 = vld [vmem:[#allocation2 + $0xe7] sm:$0xff]  ;;  %5226 = vmatmul.f32.gmra.mxu0 %v4720_v61  ;;  %5812 = vmatpush.msra.mxu3 %v5795_v46 }
 0x5ea   : > { %4952 = vmatmul.f32.gmra.mxu2 %v4802_v8  ;;  %5062 = vmatmul.f32.gmra.mxu3 %v4721_v38  ;;  %4753 = vst [vmem:[#allocation2 + $0xf0] sm:$0xff] %v4721_v38  ;;  %v4241_v8 = vadd.f32 %v9971_v6, %v4016_v41  ;;  %v11754_v61 = vld [vmem:[#allocation65_spill] sm:$0xff] }
 0x5eb   : > { %v4616_v30 = vpop.f32.mrf.mxu1  ;;  %6038 = vmatpush.msra.mxu0 %v6019_v56  ;;  %vm11755_vm15 = vnez %v11754_v61  ;;  %5813 = vmatpush.msra.mxu3 %v5794_v59  ;;  %v5793_v56 = vld [vmem:[#allocation6 + $0x2a8] sm:$0xff] }
 0x5ec   : > { %v4658_v55 = vadd.f32 %v4616_v30, %v4433_v62  ;;  %v6016_v62 = vld [vmem:[#allocation6 + $0x318] sm:$0xff]  ;;  %v11758_v30 = vld [vmem:[#allocation153_spill] sm:$0xff] }
 0x5ed   : > { %v4905_v63 = vpop.f32.mrf.mxu2  ;;  %v5015_v25 = vpop.f32.mrf.mxu3  ;;  %6039 = vmatpush.msra.mxu0 %v6018_v44  ;;  %5814 = vmatpush.msra.mxu3 %v5793_v56  ;;  %v4434_v44 = vadd.f32 %v9959_v7, %v4241_v8  ;;  %v5790_v8 = vld [vmem:[#allocation6 + $0x290] sm:$0xff] }
 0x5ee   : > { %v4690_v0 = vadd.f32 %v10151_v23, %v4658_v55  ;;  %v5016_v51 = vadd.f32 %v5015_v25, %v4902_v31  ;;  %7107 = vmatmul.msk.f32.gmra.mxu1 %vm11755_vm15, %v10164_v1  ;;  %v10171_v36 = vpop.f32.mrf.mxu0  ;;  %v11757_v31 = vld [vmem:[#allocation129_spill] sm:$0xff]  ;;  %v6015_v25 = vld [vmem:[#allocation6 + $0x310] sm:$0xff] }
 0x5ef   : > { %6040 = vmatpush.msra.mxu0 %v6017_v14  ;;  %v3792_v41 = vadd.f32 %v11758_v30, %v11757_v31  ;;  %5815 = vmatpush.msra.mxu3 %v5792_v5  ;;  %v6446_v14 = vld [vmem:[#allocation6 + $0x478] sm:$0xff] }
 0x5f0   : > { %v4722_v15 = vmax.f32 %v4690_v0, 0.0  ;;  %v10174_v48 = vadd.f32 %v10135_v47, %v5016_v51  ;;  %6447 = vmatpush.msra.mxu2 %v6446_v14  ;;  %v5791_v51 = vld [vmem:[#allocation6 + $0x298] sm:$0xff] }
 0x5f1   : > { %v4803_v6 = vld [vmem:[#allocation2 + $0xef] sm:$0xff]  ;;  %5229 = vmatmul.f32.gmra.mxu0 %v4721_v38  ;;  %v4017_v47 = vadd.f32 %v9967_v20, %v3792_v41  ;;  %5816 = vmatpush.msra.mxu3 %v5791_v51  ;;  %v6221_v20 = vld [vmem:[#allocation6 + $0x3f8] sm:$0xff] }
 0x5f2   : > { %11756 = vst [vmem:[#allocation115_spill] sm:$0xff] %v10174_v48  ;;  %7100 = vmatmul.msk.f32.gmra.mxu2 %vm11614_vm4, %v4803_v6  ;;  %5065 = vmatmul.f32.gmra.mxu3 %v4722_v15  ;;  %v10182_v31 = vld [vmem:[#allocation2 + $0x71] sm:$0xff]  ;;  %v6014_v6 = vld [vmem:[#allocation6 + $0x308] sm:$0xff] }
 0x5f3   : > { %4754 = vst [vmem:[#allocation2 + $0xf8] sm:$0xff] %v4722_v15  ;;  %v4619_v46 = vpop.f32.mrf.mxu1  ;;  %6041 = vmatpush.msra.mxu0 %v6016_v62  ;;  %v4242_v30 = vadd.f32 %v9987_v52, %v4017_v47  ;;  %5817 = vmatpush.msra.mxu3 %v5790_v8  ;;  %v5789_v41 = vld [vmem:[#allocation6 + $0x288] sm:$0xff]  ;;  %v6013_v52 = vld [vmem:[#allocation6 + $0x300] sm:$0xff]  ;;  %v11761_v47 = vld [vmem:[#allocation131_spill] sm:$0xff] }
 0x5f4   : > { %v4659_v0 = vadd.f32 %v4619_v46, %v4434_v44  ;;  %6222 = vmatpush.msra.mxu1 %v6221_v20  ;;  %v5788_v44 = vld [vmem:[#allocation6 + $0x280] sm:$0xff] }
 0x5f5   : > { %v4908_v59 = vpop.f32.mrf.mxu2  ;;  %v5018_v56 = vpop.f32.mrf.mxu3  ;;  %6042 = vmatpush.msra.mxu0 %v6015_v25  ;;  %5818 = vmatpush.msra.mxu3 %v5789_v41  ;;  %v4435_v25 = vadd.f32 %v9973_v18, %v4242_v30 }
 0x5f6   : > { %v4691_v7 = vadd.f32 %v10151_v23, %v4659_v0  ;;  %v5019_v38 = vadd.f32 %v5018_v56, %v4905_v63  ;;  %5406 = vmatmul.f32.gmra.mxu1 %v10182_v31  ;;  %v5185_v5 = vpop.f32.mrf.mxu0  ;;  %v11762_v63 = vld [vmem:[#allocation156_spill] sm:$0xff] }
 0x5f7   : > { %6043 = vmatpush.msra.mxu0 %v6014_v6  ;;  %v3793_v0 = vadd.f32 %v11762_v63, %v11761_v47  ;;  %5819 = vmatpush.msra.mxu3 %v5788_v44  ;;  %v11765_v44 = vld [vmem:[#allocation133_spill] sm:$0xff] }
 0x5f8   : > { %v4723_v62 = vmax.f32 %v4691_v7, 0.0  ;;  %v10188_v46 = vadd.f32 %v10155_v29, %v5019_v38  ;;  %v10194_v38 = vld [vmem:[#allocation2 + $0x79] sm:$0xff]  ;;  %v11767_v63 = vld [vmem:[#allocation37_spill] sm:$0xff] }
 0x5f9   : > { %5232 = vmatmul.f32.gmra.mxu0 %v4722_v15  ;;  %v4018_v56 = vadd.f32 %v9983_v17, %v3793_v0  ;;  %vm11768_vm4 = vnez %v11767_v63  ;;  %v6445_v0 = vld [vmem:[#allocation6 + $0x470] sm:$0xff]  ;;  %v10294_v63 = vld [vmem:[#allocation2 + $0xb9] sm:$0xff] }
 0x5fa   : > { %11760 = vst [vmem:[#allocation117_spill] sm:$0xff] %v10188_v46  ;;  %v4804_v14 = vld [vmem:[#allocation2 + $0xf7] sm:$0xff]  ;;  %5068 = vmatmul.f32.gmra.mxu3 %v4723_v62  ;;  %6044 = vmatpush.msra.mxu0 %v6013_v52 }
 0x5fb   : > { %4958 = vmatmul.f32.gmra.mxu2 %v4804_v14  ;;  %4755 = vst [vmem:[#allocation2 + $0x100] sm:$0xff] %v4723_v62  ;;  %v4622_v51 = vpop.f32.mrf.mxu1  ;;  %v4243_v8 = vadd.f32 %v10004_v32, %v4018_v56  ;;  %v11766_v52 = vld [vmem:[#allocation159_spill] sm:$0xff] }
 0x5fc   : > { %v4660_v6 = vadd.f32 %v4622_v51, %v4435_v25  ;;  %v3794_v47 = vadd.f32 %v11766_v52, %v11765_v44  ;;  %6448 = vmatpush.msra.mxu2 %v6445_v0 }
 0x5fd   : > { %v4911_v29 = vpop.f32.mrf.mxu2  ;;  %v5021_v7 = vpop.f32.mrf.mxu3  ;;  %v4436_v32 = vadd.f32 %v9985_v43, %v4243_v8  ;;  %v7305_v43 = vld [vmem:[#allocation2 + $0x110] sm:$0xff] }
 0x5fe   : > { %v4692_v20 = vadd.f32 %v10151_v23, %v4660_v6  ;;  %v5022_v41 = vadd.f32 %v5021_v7, %v4908_v59  ;;  %7108 = vmatmul.msk.f32.gmra.mxu1 %vm11663_vm14, %v10194_v38  ;;  %v5188_v18 = vpop.f32.mrf.mxu0  ;;  %v4019_v25 = vadd.f32 %v9999_v12, %v3794_v47  ;;  %v10210_v6 = vld [vmem:[#allocation2 + $0x81] sm:$0xff] }
 0x600   : > { %v4724_v15 = vmax.f32 %v4692_v20, 0.0  ;;  %v10202_v30 = vadd.f32 %v10171_v36, %v5022_v41  ;;  %v4244_v7 = vadd.f32 %v10017_v16, %v4019_v25 }
 0x601   : > { %5235 = vmatmul.f32.gmra.mxu0 %v4723_v62  ;;  %v11769_v62 = vld [vmem:[#allocation45_spill] sm:$0xff] }
 0x602   : > { %11764 = vst [vmem:[#allocation119_spill] sm:$0xff] %v10202_v30  ;;  %v4805_v17 = vld [vmem:[#allocation2 + $0xff] sm:$0xff]  ;;  %5071 = vmatmul.f32.gmra.mxu3 %v4724_v15  ;;  %v6686_v8 = vadd.f32 %v7305_v43, %v11769_v62 }
 0x603   : > { %7101 = vmatmul.msk.f32.gmra.mxu2 %vm11768_vm4, %v4805_v17  ;;  %4756 = vst [vmem:[#allocation2 + $0x108] sm:$0xff] %v4724_v15  ;;  %v4625_v59 = vpop.f32.mrf.mxu1  ;;  %v6220_v17 = vld [vmem:[#allocation6 + $0x3f0] sm:$0xff]  ;;  %v11775_v43 = vld [vmem:[#allocation47_spill] sm:$0xff] }
 0x604   : > { %v4661_v51 = vadd.f32 %v4625_v59, %v4436_v32  ;;  %6223 = vmatpush.msra.mxu1 %v6220_v17  ;;  %v11771_v32 = vld [vmem:[#allocation113_spill] sm:$0xff] }
 0x605   : > { %v4914_v36 = vpop.f32.mrf.mxu2  ;;  %v5024_v56 = vpop.f32.mrf.mxu3  ;;  %v4437_v16 = vadd.f32 %v11771_v32, %v4244_v7  ;;  %v5949_v32 = vld [vmem:[#allocation2 + $0x2f] sm:$0xff] }
 0x606   : > { %v4693_v20 = vadd.f32 %v10151_v23, %v4661_v51  ;;  %v5025_v41 = vadd.f32 %v5024_v56, %v4911_v29  ;;  %5412 = vmatmul.f32.gmra.mxu1 %v10210_v6  ;;  %v5191_v44 = vpop.f32.mrf.mxu0  ;;  %v10221_v56 = vld [vmem:[#allocation2 + $0x89] sm:$0xff] }
 0x608   : > { %v4725_v12 = vmax.f32 %v4693_v20, 0.0  ;;  %v10216_v52 = vadd.f32 %v5185_v5, %v5025_v41  ;;  %v11773_v5 = vld [vmem:[#allocation68_spill] sm:$0xff]  ;;  %v7306_v41 = vld [vmem:[#allocation2 + $0x118] sm:$0xff] }
 0x609   : > { %5238 = vmatmul.f32.gmra.mxu0 %v4724_v15  ;;  %vm11774_vm4 = vnez %v11773_v5  ;;  %v6687_v62 = vadd.f32 %v7306_v41, %v11775_v43  ;;  %v5499_v15 = vld [vmem:[#allocation2 + $0x1f] sm:$0xff]  ;;  %v5500_v43 = vld [vmem:[#allocation2 + $0x27] sm:$0xff] }
 0x60a   : > { %11770 = vst [vmem:[#allocation120_spill] sm:$0xff] %v10216_v52  ;;  %v4806_v47 = vld [vmem:[#allocation2 + $0x107] sm:$0xff]  ;;  %5074 = vmatmul.f32.gmra.mxu3 %v4725_v12  ;;  %v10219_v59 = vadd.f32 %v6686_v8, %v4725_v12 }
 0x60b   : > { %4964 = vmatmul.f32.gmra.mxu2 %v4806_v47  ;;  %4757 = vst [vmem:[#allocation2 + $0x110] sm:$0xff] %v4725_v12  ;;  %v4628_v29 = vpop.f32.mrf.mxu1  ;;  %v11777_v47 = vld [vmem:[#allocation21_spill] sm:$0xff] }
 0x60c   : > { %11772 = vst [vmem:[#allocation116_spill] sm:$0xff] %v10219_v59  ;;  %v4662_v0 = vadd.f32 %v4628_v29, %v4437_v16  ;;  %vm11778_vm8 = vnez %v11777_v47  ;;  %v6444_v16 = vld [vmem:[#allocation6 + $0x468] sm:$0xff] }
 0x60d   : > { %v4917_v25 = vpop.f32.mrf.mxu2  ;;  %v5027_v51 = vpop.f32.mrf.mxu3  ;;  %6449 = vmatpush.msra.mxu2 %v6444_v16  ;;  %v10246_v16 = vld [vmem:[#allocation2 + $0x99] sm:$0xff]  ;;  %v10262_v59 = vld [vmem:[#allocation2 + $0xa1] sm:$0xff] }
 0x60e   : > { %v4694_v17 = vadd.f32 %v10151_v23, %v4662_v0  ;;  %v5028_v20 = vadd.f32 %v5027_v51, %v4914_v36  ;;  %7109 = vmatmul.msk.f32.gmra.mxu1 %vm11774_vm4, %v10221_v56  ;;  %v5194_v7 = vpop.f32.mrf.mxu0 }
 0x610   : > { %v4726_v8 = vmax.f32 %v4694_v17, 0.0  ;;  %v10228_v12 = vadd.f32 %v5188_v18, %v5028_v20  ;;  %v10238_v18 = vld [vmem:[#allocation2 + $0x91] sm:$0xff]  ;;  %v6219_v17 = vld [vmem:[#allocation6 + $0x3e8] sm:$0xff] }
 0x611   : > { %7150 = vmatmul.msk.f32.vlgmr.msra.gmra.mxu0 %vm11778_vm8, %v5949_v32  ;;  %6224 = vmatpush.msra.mxu1 %v6219_v17 }
 0x612   : > { %11776 = vst [vmem:[#allocation141_spill] sm:$0xff] %v10228_v12  ;;  %5077 = vmatmul.f32.gmra.mxu3 %v4726_v8  ;;  %v10232_v23 = vadd.f32 %v6687_v62, %v4726_v8  ;;  %v5950_v62 = vld [vmem:[#allocation2 + $0x37] sm:$0xff] }
 0x613   : > { %4758 = vst [vmem:[#allocation2 + $0x118] sm:$0xff] %v4726_v8  ;;  %7118 = vmatmul.msk.f32.vlgmr.msrb.gmra.mxu2 %vm11778_vm8, %v5499_v15  ;;  %v10236_v36 = vpop.f32.mrf.mxu1 }
 0x614   : > { %11779 = vst [vmem:[#allocation121_spill] sm:$0xff] %v10232_v23 }
 0x615   : > { %v4920_v29 = vpop.f32.mrf.mxu2  ;;  %v5030_v0 = vpop.f32.mrf.mxu3 }
 0x616   : > { %v5031_v51 = vadd.f32 %v5030_v0, %v4917_v25  ;;  %5418 = vmatmul.f32.gmra.mxu1 %v10238_v18  ;;  %v5197_v20 = vpop.f32.mrf.mxu0 }
 0x618   : > { %v10241_v41 = vadd.f32 %v5191_v44, %v5031_v51  ;;  %v11783_v51 = vld [vmem:[#allocation27_spill] sm:$0xff] }
 0x619   : > { %6048 = vmatmul.f32.gmra.mxu0 %v5950_v62  ;;  %vm11784_vm8 = vnez %v11783_v51 }
 0x61a   : > { %11780 = vst [vmem:[#allocation128_spill] sm:$0xff] %v10241_v41  ;;  %5820 = vmatmul.f32.vlgmr.msra.gmra.mxu3 %v10037_v42  ;;  %v5951_v42 = vld [vmem:[#allocation2 + $0x3f] sm:$0xff]  ;;  %v10270_v41 = vld [vmem:[#allocation2 + $0xa9] sm:$0xff] }
 0x61b   : > { %5598 = vmatmul.f32.gmra.mxu2 %v5500_v43  ;;  %v10244_v8 = vpop.f32.mrf.mxu1 }
 0x61d   : > { %v4923_v15 = vpop.f32.mrf.mxu2  ;;  %v5033_v47 = vpop.f32.mrf.mxu3 }
 0x61e   : > { %v5034_v25 = vadd.f32 %v5033_v47, %v4920_v29  ;;  %7110 = vmatmul.msk.f32.gmra.mxu1 %vm11577_vm5, %v10246_v16  ;;  %v5200_v17 = vpop.f32.mrf.mxu0  ;;  %v6443_v29 = vld [vmem:[#allocation6 + $0x460] sm:$0xff] }
 0x61f   : > { %6450 = vmatpush.msra.mxu2 %v6443_v29 }
 0x620   : > { %v10251_v44 = vadd.f32 %v5194_v7, %v5034_v25 }
 0x621   : > { %7151 = vmatmul.msk.f32.gmra.mxu0 %vm11784_vm8, %v5951_v42 }
 0x622   : > { %11782 = vst [vmem:[#allocation150_spill] sm:$0xff] %v10251_v44  ;;  %7134 = vmatmul.msk.f32.gmra.mxu3 %vm11630_vm9, %v10048_v40  ;;  %v5952_v40 = vld [vmem:[#allocation2 + $0x47] sm:$0xff] }
 0x623   : > { %7119 = vmatmul.msk.f32.gmra.mxu2 %vm11784_vm8, %v5949_v32  ;;  %v10260_v43 = vpop.f32.mrf.mxu1  ;;  %v6218_v32 = vld [vmem:[#allocation6 + $0x3e0] sm:$0xff] }
 0x624   : > { %6225 = vmatpush.msra.mxu1 %v6218_v32 }
 0x625   : > { %v4926_v47 = vpop.f32.mrf.mxu2  ;;  %v5036_v23 = vpop.f32.mrf.mxu3 }
 0x626   : > { %v5037_v7 = vadd.f32 %v5036_v23, %v4923_v15  ;;  %5424 = vmatmul.f32.gmra.mxu1 %v10262_v59  ;;  %v5203_v25 = vpop.f32.mrf.mxu0  ;;  %v6387_v23 = vld [vmem:[#allocation2 + $0xd1] sm:$0xff] }
 0x628   : > { %v10265_v11 = vadd.f32 %v5197_v20, %v5037_v7  ;;  %v11788_v20 = vld [vmem:[#allocation32_spill] sm:$0xff] }
 0x629   : > { %6054 = vmatmul.f32.gmra.mxu0 %v5952_v40  ;;  %vm11789_vm8 = vnez %v11788_v20 }
 0x62a   : > { %11785 = vst [vmem:[#allocation144_spill] sm:$0xff] %v10265_v11  ;;  %5826 = vmatmul.f32.gmra.mxu3 %v10063_v45  ;;  %v5953_v45 = vld [vmem:[#allocation2 + $0x4f] sm:$0xff] }
 0x62b   : > { %5604 = vmatmul.f32.gmra.mxu2 %v5950_v62  ;;  %v10268_v51 = vpop.f32.mrf.mxu1  ;;  %v10286_v11 = vld [vmem:[#allocation2 + $0xb1] sm:$0xff] }
 0x62d   : > { %v4929_v29 = vpop.f32.mrf.mxu2  ;;  %v5039_v44 = vpop.f32.mrf.mxu3 }
 0x62e   : > { %v5040_v12 = vadd.f32 %v5039_v44, %v4926_v47  ;;  %7111 = vmatmul.msk.f32.gmra.mxu1 %vm11525_vm3, %v10270_v41  ;;  %v5206_v15 = vpop.f32.mrf.mxu0  ;;  %v6442_v44 = vld [vmem:[#allocation6 + $0x458] sm:$0xff] }
 0x62f   : > { %6451 = vmatpush.msra.mxu2 %v6442_v44 }
 0x630   : > { %v10275_v32 = vadd.f32 %v5200_v17, %v5040_v12  ;;  %v6217_v17 = vld [vmem:[#allocation6 + $0x3d8] sm:$0xff] }
 0x631   : > { %7152 = vmatmul.msk.f32.gmra.mxu0 %vm11789_vm8, %v5953_v45  ;;  %6226 = vmatpush.msra.mxu1 %v6217_v17 }
 0x632   : > { %11787 = vst [vmem:[#allocation122_spill] sm:$0xff] %v10275_v32  ;;  %7135 = vmatmul.msk.f32.gmra.mxu3 %vm11634_vm10, %v10074_v54  ;;  %v5954_v54 = vld [vmem:[#allocation2 + $0x57] sm:$0xff] }
 0x633   : > { %7120 = vmatmul.msk.f32.gmra.mxu2 %vm11789_vm8, %v5951_v42  ;;  %v10284_v62 = vpop.f32.mrf.mxu1 }
 0x635   : > { %v4932_v47 = vpop.f32.mrf.mxu2  ;;  %v5042_v7 = vpop.f32.mrf.mxu3 }
 0x636   : > { %v5043_v12 = vadd.f32 %v5042_v7, %v4929_v29  ;;  %5430 = vmatmul.f32.gmra.mxu1 %v10286_v11  ;;  %v5209_v42 = vpop.f32.mrf.mxu0  ;;  %v6389_v29 = vld [vmem:[#allocation2 + $0xe1] sm:$0xff] }
 0x638   : > { %v10289_v39 = vadd.f32 %v5203_v25, %v5043_v12  ;;  %v11793_v25 = vld [vmem:[#allocation36_spill] sm:$0xff] }
 0x639   : > { %6060 = vmatmul.f32.gmra.mxu0 %v5954_v54  ;;  %vm11794_vm8 = vnez %v11793_v25 }
 0x63a   : > { %11790 = vst [vmem:[#allocation130_spill] sm:$0xff] %v10289_v39  ;;  %5832 = vmatmul.f32.gmra.mxu3 %v10089_v27  ;;  %v5955_v27 = vld [vmem:[#allocation2 + $0x5f] sm:$0xff] }
 0x63b   : > { %5610 = vmatmul.f32.gmra.mxu2 %v5952_v40  ;;  %v10292_v20 = vpop.f32.mrf.mxu1  ;;  %v6441_v40 = vld [vmem:[#allocation6 + $0x450] sm:$0xff]  ;;  %v10310_v39 = vld [vmem:[#allocation2 + $0xc1] sm:$0xff] }
 0x63c   : > { %6452 = vmatpush.msra.mxu2 %v6441_v40  ;;  %v10316_v40 = vld [vmem:[#allocation2 + $0xc9] sm:$0xff] }
 0x63d   : > { %v4935_v44 = vpop.f32.mrf.mxu2  ;;  %v5045_v32 = vpop.f32.mrf.mxu3 }
 0x63e   : > { %v5046_v52 = vadd.f32 %v5045_v32, %v4932_v47  ;;  %7112 = vmatmul.msk.f32.gmra.mxu1 %vm11530_vm7, %v10294_v63  ;;  %v5212_v7 = vpop.f32.mrf.mxu0 }
 0x640   : > { %v10299_v17 = vadd.f32 %v5206_v15, %v5046_v52  ;;  %v6216_v15 = vld [vmem:[#allocation6 + $0x3d0] sm:$0xff] }
 0x641   : > { %7153 = vmatmul.msk.f32.gmra.mxu0 %vm11794_vm8, %v5955_v27  ;;  %6227 = vmatpush.msra.mxu1 %v6216_v15 }
 0x642   : > { %11792 = vst [vmem:[#allocation146_spill] sm:$0xff] %v10299_v17  ;;  %7136 = vmatmul.msk.f32.gmra.mxu3 %vm11638_vm11, %v10100_v19  ;;  %v5956_v19 = vld [vmem:[#allocation2 + $0x67] sm:$0xff] }
 0x643   : > { %7121 = vmatmul.msk.f32.gmra.mxu2 %vm11794_vm8, %v5953_v45  ;;  %v10308_v32 = vpop.f32.mrf.mxu1 }
 0x645   : > { %v4938_v47 = vpop.f32.mrf.mxu2  ;;  %v5048_v12 = vpop.f32.mrf.mxu3 }
 0x646   : > { %v5049_v52 = vadd.f32 %v5048_v12, %v4935_v44  ;;  %5436 = vmatmul.f32.gmra.mxu1 %v10310_v39  ;;  %v5215_v45 = vpop.f32.mrf.mxu0  ;;  %v11796_v44 = vld [vmem:[#allocation74_spill] sm:$0xff] }
 0x647   : > { %vm11797_vm8 = vnez %v11796_v44 }
 0x648   : > { %v10313_v24 = vadd.f32 %v5209_v42, %v5049_v52  ;;  %v11799_v42 = vld [vmem:[#allocation40_spill] sm:$0xff]  ;;  %v10332_v52 = vld [vmem:[#allocation2 + $0xd1] sm:$0xff] }
 0x649   : > { %6066 = vmatmul.f32.gmra.mxu0 %v5956_v19  ;;  %vm11800_vm11 = vnez %v11799_v42 }
 0x64a   : > { %11795 = vst [vmem:[#allocation123_spill] sm:$0xff] %v10313_v24  ;;  %5838 = vmatmul.f32.gmra.mxu3 %v10115_v57  ;;  %v5957_v57 = vld [vmem:[#allocation2 + $0x6f] sm:$0xff] }
 0x64b   : > { %5616 = vmatmul.f32.gmra.mxu2 %v5954_v54  ;;  %v10318_v30 = vpop.f32.mrf.mxu1  ;;  %v6440_v54 = vld [vmem:[#allocation6 + $0x448] sm:$0xff] }
 0x64c   : > { %6453 = vmatpush.msra.mxu2 %v6440_v54 }
 0x64d   : > { %v4941_v25 = vpop.f32.mrf.mxu2  ;;  %v5051_v17 = vpop.f32.mrf.mxu3 }
 0x64e   : > { %v5052_v55 = vadd.f32 %v5051_v17, %v4938_v47  ;;  %7113 = vmatmul.msk.f32.gmra.mxu1 %vm11797_vm8, %v10316_v40  ;;  %v5218_v12 = vpop.f32.mrf.mxu0 }
 0x650   : > { %v10323_v15 = vadd.f32 %v5212_v7, %v5052_v55  ;;  %v6215_v55 = vld [vmem:[#allocation6 + $0x3c8] sm:$0xff] }
 0x651   : > { %7154 = vmatmul.msk.f32.gmra.mxu0 %vm11800_vm11, %v5957_v57  ;;  %6228 = vmatpush.msra.mxu1 %v6215_v55 }
 0x652   : > { %11798 = vst [vmem:[#allocation132_spill] sm:$0xff] %v10323_v15  ;;  %7137 = vmatmul.msk.f32.gmra.mxu3 %vm11643_vm12, %v10128_v35  ;;  %v5958_v35 = vld [vmem:[#allocation2 + $0x77] sm:$0xff] }
 0x653   : > { %7122 = vmatmul.msk.f32.gmra.mxu2 %vm11800_vm11, %v5955_v27  ;;  %v10335_v7 = vpop.f32.mrf.mxu1  ;;  %v10340_v15 = vld [vmem:[#allocation2 + $0xd9] sm:$0xff] }
 0x655   : > { %v4944_v17 = vpop.f32.mrf.mxu2  ;;  %v5054_v47 = vpop.f32.mrf.mxu3 }
 0x656   : > { %v5055_v24 = vadd.f32 %v5054_v47, %v4941_v25  ;;  %5442 = vmatmul.f32.gmra.mxu1 %v10332_v52  ;;  %v5221_v27 = vpop.f32.mrf.mxu0  ;;  %v10364_v25 = vld [vmem:[#allocation2 + $0xe9] sm:$0xff] }
 0x658   : > { %v10337_v21 = vadd.f32 %v5215_v45, %v5055_v24  ;;  %v11804_v24 = vld [vmem:[#allocation43_spill] sm:$0xff]  ;;  %v6439_v45 = vld [vmem:[#allocation6 + $0x440] sm:$0xff] }
 0x659   : > { %6072 = vmatmul.f32.gmra.mxu0 %v5958_v35  ;;  %vm11805_vm11 = vnez %v11804_v24  ;;  %6454 = vmatpush.msra.mxu2 %v6439_v45  ;;  %v6211_v45 = vld [vmem:[#allocation6 + $0x3a8] sm:$0xff] }
 0x65a   : > { %11801 = vst [vmem:[#allocation155_spill] sm:$0xff] %v10337_v21  ;;  %5844 = vmatmul.f32.gmra.mxu3 %v10145_v58  ;;  %v5959_v58 = vld [vmem:[#allocation2 + $0x7f] sm:$0xff]  ;;  %v6212_v21 = vld [vmem:[#allocation6 + $0x3b0] sm:$0xff] }
 0x65b   : > { %5622 = vmatmul.f32.gmra.mxu2 %v5956_v19  ;;  %v10347_v48 = vpop.f32.mrf.mxu1 }
 0x65d   : > { %v4947_v42 = vpop.f32.mrf.mxu2  ;;  %v5057_v54 = vpop.f32.mrf.mxu3 }
 0x65e   : > { %v5058_v46 = vadd.f32 %v5057_v54, %v4944_v17  ;;  %7114 = vmatmul.msk.f32.gmra.mxu1 %vm11680_vm1, %v10340_v15  ;;  %v5224_v47 = vpop.f32.mrf.mxu0  ;;  %v10356_v54 = vld [vmem:[#allocation2 + $0xe1] sm:$0xff] }
 0x660   : > { %v10345_v55 = vadd.f32 %v5218_v12, %v5058_v46  ;;  %v6214_v12 = vld [vmem:[#allocation6 + $0x3c0] sm:$0xff] }
 0x661   : > { %7155 = vmatmul.msk.f32.gmra.mxu0 %vm11805_vm11, %v5959_v58  ;;  %6229 = vmatpush.msra.mxu1 %v6214_v12 }
 0x662   : > { %11803 = vst [vmem:[#allocation148_spill] sm:$0xff] %v10345_v55  ;;  %7138 = vmatmul.msk.f32.gmra.mxu3 %vm11648_vm13, %v10164_v1  ;;  %v6213_v55 = vld [vmem:[#allocation6 + $0x3b8] sm:$0xff]  ;;  %v5960_v1 = vld [vmem:[#allocation2 + $0x87] sm:$0xff] }
 0x663   : > { %7123 = vmatmul.msk.f32.gmra.mxu2 %vm11805_vm11, %v5957_v57  ;;  %6230 = vmatpush.msra.mxu1 %v6213_v55  ;;  %v10362_v24 = vpop.f32.mrf.mxu1  ;;  %v6208_v55 = vld [vmem:[#allocation6 + $0x390] sm:$0xff]  ;;  %vm11817_vm11 = vnez %v11816_v33 }
 0x665   : > { %v4950_v19 = vpop.f32.mrf.mxu2  ;;  %v5060_v17 = vpop.f32.mrf.mxu3  ;;  %6231 = vmatpush.msra.mxu1 %v6212_v21 }
 0x666   : > { %v5061_v46 = vadd.f32 %v5060_v17, %v4947_v42  ;;  %5448 = vmatmul.f32.gmra.mxu1 %v10356_v54  ;;  %v5227_v57 = vpop.f32.mrf.mxu0 }
 0x667   : > { %6232 = vmatpush.msra.mxu1 %v6211_v45  ;;  %v6438_v45 = vld [vmem:[#allocation6 + $0x438] sm:$0xff] }
 0x668   : > { %v10359_v28 = vadd.f32 %v5221_v27, %v5061_v46  ;;  %v6210_v27 = vld [vmem:[#allocation6 + $0x3a0] sm:$0xff]  ;;  %6455 = vmatpush.msra.mxu2 %v6438_v45 }
 0x669   : > { %6078 = vmatmul.f32.gmra.mxu0 %v5960_v1  ;;  %6233 = vmatpush.msra.mxu1 %v6210_v27 }
 0x66a   : > { %11806 = vst [vmem:[#allocation160_spill] sm:$0xff] %v10359_v28  ;;  %5850 = vmatmul.f32.gmra.mxu3 %v10182_v31  ;;  %v6209_v31 = vld [vmem:[#allocation6 + $0x398] sm:$0xff] }
 0x66b   : > { %5628 = vmatmul.f32.gmra.mxu2 %v5958_v35  ;;  %6234 = vmatpush.msra.mxu1 %v6209_v31  ;;  %v6206_v31 = vld [vmem:[#allocation6 + $0x380] sm:$0xff] }
 0x66d   : > { %v4953_v42 = vpop.f32.mrf.mxu2  ;;  %v5063_v17 = vpop.f32.mrf.mxu3  ;;  %6235 = vmatpush.msra.mxu1 %v6208_v55  ;;  %v5962_v55 = vld [vmem:[#allocation2 + $0x97] sm:$0xff] }
 0x66e   : > { %v5064_v12 = vadd.f32 %v5063_v17, %v4950_v19  ;;  %7115 = vmatmul.msk.f32.gmra.mxu1 %vm11616_vm2, %v10364_v25  ;;  %v5230_v35 = vpop.f32.mrf.mxu0  ;;  %v5961_v19 = vld [vmem:[#allocation2 + $0x8f] sm:$0xff] }
 0x66f   : > { %v6207_v17 = vld [vmem:[#allocation6 + $0x388] sm:$0xff] }
 0x670   : > { %v10369_v46 = vadd.f32 %v5224_v47, %v5064_v12  ;;  %v10378_v47 = vld [vmem:[#allocation2 + $0xf1] sm:$0xff]  ;;  %6236 = vmatpush.msra.mxu1 %v6207_v17  ;;  %v10380_v12 = vpop.f32.mrf.mxu1 }
 0x671   : > { %7156 = vmatmul.msk.f32.gmra.mxu0 %vm11691_vm0, %v5961_v19 }
 0x672   : > { %11808 = vst [vmem:[#allocation124_spill] sm:$0xff] %v10369_v46  ;;  %7139 = vmatmul.msk.f32.gmra.mxu3 %vm11755_vm15, %v10194_v38  ;;  %6237 = vmatpush.msra.mxu1 %v6206_v31  ;;  %v10386_v46 = vld [vmem:[#allocation2 + $0xf9] sm:$0xff] }
 0x673   : > { %7124 = vmatmul.msk.f32.gmra.mxu2 %vm11691_vm0, %v5959_v58 }
 0x675   : > { %v4956_v27 = vpop.f32.mrf.mxu2  ;;  %v5066_v28 = vpop.f32.mrf.mxu3 }
 0x676   : > { %v5067_v58 = vadd.f32 %v5066_v28, %v4953_v42  ;;  %5454 = vmatmul.f32.gmra.mxu1 %v10378_v47  ;;  %v5233_v38 = vpop.f32.mrf.mxu0 }
 0x678   : > { %v10383_v61 = vadd.f32 %v5227_v57, %v5067_v58  ;;  %v10391_v28 = vpop.f32.mrf.mxu1  ;;  %v11813_v57 = vld [vmem:[#allocation51_spill] sm:$0xff] }
 0x679   : > { %6084 = vmatmul.f32.gmra.mxu0 %v5962_v55  ;;  %vm11814_vm0 = vnez %v11813_v57 }
 0x67a   : > { %11810 = vst [vmem:[#allocation134_spill] sm:$0xff] %v10383_v61  ;;  %5856 = vmatmul.f32.gmra.mxu3 %v10210_v6  ;;  %v5963_v6 = vld [vmem:[#allocation2 + $0x9f] sm:$0xff] }
 0x67b   : > { %5634 = vmatmul.f32.gmra.mxu2 %v5960_v1  ;;  %v6437_v1 = vld [vmem:[#allocation6 + $0x430] sm:$0xff] }
 0x67c   : > { %6456 = vmatpush.msra.mxu2 %v6437_v1  ;;  %v10410_v1 = vld [vmem:[#allocation2 + $0x109] sm:$0xff] }
 0x67d   : > { %v5069_v45 = vpop.f32.mrf.mxu3 }
 0x67e   : > { %v4959_v21 = vpop.f32.mrf.mxu2  ;;  %v5070_v17 = vadd.f32 %v5069_v45, %v4956_v27  ;;  %7116 = vmatmul.msk.f32.gmra.mxu1 %vm11562_vm6, %v10386_v46  ;;  %v5236_v42 = vpop.f32.mrf.mxu0  ;;  %v10402_v45 = vld [vmem:[#allocation2 + $0x101] sm:$0xff] }
 0x680   : > { %v10393_v31 = vadd.f32 %v5230_v35, %v5070_v17 }
 0x681   : > { %7157 = vmatmul.msk.f32.gmra.mxu0 %vm11814_vm0, %v5963_v6 }
 0x682   : > { %11812 = vst [vmem:[#allocation158_spill] sm:$0xff] %v10393_v31  ;;  %7140 = vmatmul.msk.f32.gmra.mxu3 %vm11663_vm14, %v10221_v56  ;;  %v5964_v56 = vld [vmem:[#allocation2 + $0xa7] sm:$0xff] }
 0x683   : > { %7125 = vmatmul.msk.f32.gmra.mxu2 %vm11814_vm0, %v5961_v19  ;;  %v10407_v19 = vpop.f32.mrf.mxu1 }
 0x685   : > { %v5072_v58 = vpop.f32.mrf.mxu3 }
 0x686   : > { %v4962_v27 = vpop.f32.mrf.mxu2  ;;  %v5073_v61 = vadd.f32 %v5072_v58, %v4959_v21  ;;  %5460 = vmatmul.f32.gmra.mxu1 %v10402_v45  ;;  %v5239_v35 = vpop.f32.mrf.mxu0 }
 0x688   : > { %v10405_v17 = vadd.f32 %v5233_v38, %v5073_v61  ;;  %v11819_v61 = vld [vmem:[#allocation54_spill] sm:$0xff]  ;;  %v6436_v38 = vld [vmem:[#allocation6 + $0x428] sm:$0xff] }
 0x689   : > { %6090 = vmatmul.f32.gmra.mxu0 %v5964_v56  ;;  %vm11820_vm0 = vnez %v11819_v61  ;;  %6457 = vmatpush.msra.mxu2 %v6436_v38  ;;  %v5966_v61 = vld [vmem:[#allocation2 + $0xb7] sm:$0xff] }
 0x68a   : > { %11815 = vst [vmem:[#allocation151_spill] sm:$0xff] %v10405_v17  ;;  %5862 = vmatmul.f32.gmra.mxu3 %v10238_v18  ;;  %v5965_v18 = vld [vmem:[#allocation2 + $0xaf] sm:$0xff]  ;;  %v6175_v38 = vld [vmem:[#allocation2 + $0x38] sm:$0xff] }
 0x68b   : > { %5640 = vmatmul.f32.gmra.mxu2 %v5962_v55  ;;  %v10426_v55 = vpop.f32.mrf.mxu1 }
 0x68c   : > { %11821 = vst [vmem:[#allocation135_spill] sm:$0xff] %v10426_v55 }
 0x68d   : > { %v5075_v14 = vpop.f32.mrf.mxu3 }
 0x68e   : > { %v4965_v57 = vpop.f32.mrf.mxu2  ;;  %v5076_v31 = vadd.f32 %v5075_v14, %v4962_v27  ;;  %7117 = vmatmul.msk.f32.gmra.mxu1 %vm11817_vm11, %v10410_v1  ;;  %v6046_v21 = vpop.f32.mrf.mxu0  ;;  %v5467_v14 = vadd.f32 %v10236_v36, %v10029_v22  ;;  %v6174_v27 = vld [vmem:[#allocation2 + $0x30] sm:$0xff]  ;;  %v5468_v22 = vadd.f32 %v10244_v8, %v10042_v50  ;;  %v6435_v50 = vld [vmem:[#allocation6 + $0x420] sm:$0xff]  ;;  %v5469_v8 = vadd.f32 %v10260_v43, %v10055_v3 }
 0x68f   : > { %6458 = vmatpush.msra.mxu2 %v6435_v50  ;;  %v5470_v3 = vadd.f32 %v10268_v51, %v10068_v13  ;;  %v6434_v13 = vld [vmem:[#allocation6 + $0x418] sm:$0xff]  ;;  %v5471_v51 = vadd.f32 %v10284_v62, %v10081_v10 }
 0x690   : > { %v10415_v58 = vadd.f32 %v5236_v42, %v5076_v31 }
 0x691   : > { %7158 = vmatmul.msk.f32.gmra.mxu0 %vm11820_vm0, %v5965_v18  ;;  %6459 = vmatpush.msra.mxu2 %v6434_v13  ;;  %v6181_v13 = vld [vmem:[#allocation2 + $0x68] sm:$0xff] }
 0x692   : > { %11818 = vst [vmem:[#allocation125_spill] sm:$0xff] %v10415_v58  ;;  %7141 = vmatmul.msk.f32.gmra.mxu3 %vm11774_vm4, %v10246_v16 }
 0x693   : > { %7126 = vmatmul.msk.f32.gmra.mxu2 %vm11820_vm0, %v5963_v6  ;;  %v10433_v33 = vpop.f32.mrf.mxu1  ;;  %vm11822_vm0 = vnez %v11721_v26  ;;  %v5968_v26 = vld [vmem:[#allocation2 + $0xc7] sm:$0xff] }
 0x695   : > { %v5078_v42 = vpop.f32.mrf.mxu3 }
 0x696   : > { %v5596_v31 = vpop.f32.mrf.mxu2  ;;  %v5079_v58 = vadd.f32 %v5078_v42, %v4965_v57  ;;  %6238 = vmatmul.f32.vlgmr.msra.gmra.mxu1 %v6174_v27  ;;  %v6049_v16 = vpop.f32.mrf.mxu0  ;;  %v6177_v27 = vld [vmem:[#allocation2 + $0x48] sm:$0xff] }
 0x697   : > { %v5692_v6 = vadd.f32 %v5596_v31, %v5467_v14 }
 0x698   : > { %v10428_v17 = vadd.f32 %v5239_v35, %v5079_v58 }
 0x699   : > { %6096 = vmatmul.f32.gmra.mxu0 %v5966_v61 }
 0x69a   : > { %5868 = vmatmul.f32.gmra.mxu3 %v10262_v59  ;;  %v5967_v59 = vld [vmem:[#allocation2 + $0xbf] sm:$0xff] }
 0x69b   : > { %5646 = vmatmul.f32.gmra.mxu2 %v5964_v56 }
 0x69d   : > { %v5821_v5 = vpop.f32.mrf.mxu3 }
 0x69e   : > { %v5599_v36 = vpop.f32.mrf.mxu2  ;;  %v5917_v57 = vadd.f32 %v5821_v5, %v5692_v6  ;;  %6241 = vmatmul.f32.gmra.mxu1 %v6175_v38  ;;  %v6052_v35 = vpop.f32.mrf.mxu0 }
 0x69f   : > { %v5693_v55 = vadd.f32 %v5599_v36, %v5468_v22 }
 0x6a0   : > { %v10435_v14 = vadd.f32 %v6046_v21, %v5917_v57  ;;  %v6176_v21 = vld [vmem:[#allocation2 + $0x40] sm:$0xff]  ;;  %v6178_v57 = vld [vmem:[#allocation2 + $0x50] sm:$0xff] }
 0x6a1   : > { %7159 = vmatmul.msk.f32.gmra.mxu0 %vm11822_vm0, %v5967_v59 }
 0x6a2   : > { %7142 = vmatmul.msk.f32.gmra.mxu3 %vm11577_vm5, %v10270_v41 }
 0x6a3   : > { %7127 = vmatmul.msk.f32.gmra.mxu2 %vm11822_vm0, %v5965_v18  ;;  %v10446_v18 = vpop.f32.mrf.mxu1  ;;  %vm11823_vm0 = vnez %v11729_v37  ;;  %v5472_v37 = vadd.f32 %v10292_v20, %v10094_v34  ;;  %v6433_v34 = vld [vmem:[#allocation6 + $0x410] sm:$0xff]  ;;  %v5473_v20 = vadd.f32 %v10308_v32, %v10107_v2 }
 0x6a4   : > { %6460 = vmatpush.msra.mxu2 %v6433_v34  ;;  %v11829_v34 = vld [vmem:[#allocation115_spill] sm:$0xff] }
 0x6a5   : > { %v5824_v56 = vpop.f32.mrf.mxu3 }
 0x6a6   : > { %v5602_v5 = vpop.f32.mrf.mxu2  ;;  %v5918_v42 = vadd.f32 %v5824_v56, %v5693_v55  ;;  %6244 = vmatmul.f32.gmra.mxu1 %v6176_v21  ;;  %v6055_v6 = vpop.f32.mrf.mxu0  ;;  %v6179_v56 = vld [vmem:[#allocation2 + $0x58] sm:$0xff] }
 0x6a7   : > { %v5694_v58 = vadd.f32 %v5602_v5, %v5469_v8 }
 0x6a8   : > { %v10448_v31 = vadd.f32 %v6049_v16, %v5918_v42 }
 0x6a9   : > { %6102 = vmatmul.f32.gmra.mxu0 %v5968_v26 }
 0x6aa   : > { %5874 = vmatmul.f32.gmra.mxu3 %v10286_v11  ;;  %v5969_v11 = vld [vmem:[#allocation2 + $0xcf] sm:$0xff] }
 0x6ab   : > { %5652 = vmatmul.f32.gmra.mxu2 %v5966_v61  ;;  %v10455_v38 = vpop.f32.mrf.mxu1 }
 0x6ad   : > { %v5827_v43 = vpop.f32.mrf.mxu3 }
 0x6ae   : > { %v5605_v41 = vpop.f32.mrf.mxu2  ;;  %v5919_v36 = vadd.f32 %v5827_v43, %v5694_v58  ;;  %6247 = vmatmul.f32.gmra.mxu1 %v6177_v27  ;;  %v6180_v43 = vld [vmem:[#allocation2 + $0x60] sm:$0xff] }
 0x6af   : > { %v5695_v22 = vadd.f32 %v5605_v41, %v5470_v3 }
 0x6b0   : > { %v10453_v55 = vadd.f32 %v6052_v35, %v5919_v36 }
 0x6b1   : > { %7160 = vmatmul.msk.f32.gmra.mxu0 %vm11823_vm0, %v5969_v11 }
 0x6b2   : > { %7143 = vmatmul.msk.f32.gmra.mxu3 %vm11525_vm3, %v10294_v63  ;;  %v5970_v63 = vld [vmem:[#allocation2 + $0xd7] sm:$0xff] }
 0x6b3   : > { %7128 = vmatmul.msk.f32.gmra.mxu2 %vm11823_vm0, %v5967_v59  ;;  %v6058_v59 = vpop.f32.mrf.mxu0  ;;  %v10471_v5 = vpop.f32.mrf.mxu1  ;;  %vm11824_vm0 = vnez %v11736_v53  ;;  %v5972_v53 = vld [vmem:[#allocation2 + $0xe7] sm:$0xff] }
 0x6b5   : > { %v5830_v61 = vpop.f32.mrf.mxu3 }
 0x6b6   : > { %v5608_v16 = vpop.f32.mrf.mxu2  ;;  %v5920_v8 = vadd.f32 %v5830_v61, %v5695_v22  ;;  %6250 = vmatmul.f32.gmra.mxu1 %v6178_v57 }
 0x6b7   : > { %v5696_v50 = vadd.f32 %v5608_v16, %v5471_v51 }
 0x6b8   : > { %v10466_v35 = vadd.f32 %v6055_v6, %v5920_v8 }
 0x6b9   : > { %6108 = vmatmul.f32.gmra.mxu0 %v5970_v63 }
 0x6ba   : > { %5880 = vmatmul.f32.gmra.mxu3 %v10310_v39  ;;  %v5971_v39 = vld [vmem:[#allocation2 + $0xdf] sm:$0xff] }
 0x6bb   : > { %5658 = vmatmul.f32.gmra.mxu2 %v5968_v26  ;;  %v6061_v3 = vpop.f32.mrf.mxu0  ;;  %v10484_v27 = vpop.f32.mrf.mxu1 }
 0x6bd   : > { %v5833_v62 = vpop.f32.mrf.mxu3 }
 0x6be   : > { %v5611_v10 = vpop.f32.mrf.mxu2  ;;  %v5921_v58 = vadd.f32 %v5833_v62, %v5696_v50  ;;  %6253 = vmatmul.f32.gmra.mxu1 %v6179_v56  ;;  %v6183_v56 = vld [vmem:[#allocation2 + $0x78] sm:$0xff] }
 0x6bf   : > { %v5697_v21 = vadd.f32 %v5611_v10, %v5472_v37 }
 0x6c0   : > { %v10473_v42 = vadd.f32 %v6058_v59, %v5921_v58  ;;  %v6182_v59 = vld [vmem:[#allocation2 + $0x70] sm:$0xff]  ;;  %v11826_v58 = vld [vmem:[#allocation28_spill] sm:$0xff] }
 0x6c1   : > { %7161 = vmatmul.msk.f32.gmra.mxu0 %vm11824_vm0, %v5971_v39 }
 0x6c2   : > { %7144 = vmatmul.msk.f32.gmra.mxu3 %vm11530_vm7, %v10316_v40  ;;  %v5474_v40 = vadd.f32 %v10318_v30, %v10122_v60  ;;  %v6432_v60 = vld [vmem:[#allocation6 + $0x408] sm:$0xff]  ;;  %v5475_v30 = vadd.f32 %v10335_v7, %v10137_v4  ;;  %v5476_v4 = vadd.f32 %v10347_v48, %v10158_v49  ;;  %v5477_v49 = vadd.f32 %v10362_v24, %v11829_v34 }
 0x6c3   : > { %7129 = vmatmul.msk.f32.gmra.mxu2 %vm11824_vm0, %v5969_v11  ;;  %v6064_v2 = vpop.f32.mrf.mxu0  ;;  %v10491_v61 = vpop.f32.mrf.mxu1  ;;  %vm11825_vm0 = vnez %v11743_v9  ;;  %v5974_v9 = vld [vmem:[#allocation2 + $0xf7] sm:$0xff] }
 0x6c4   : > { %6461 = vmatpush.msra.mxu2 %v6432_v60  ;;  %v5978_v60 = vld [vmem:[#allocation2 + $0x117] sm:$0xff] }
 0x6c5   : > { %v5836_v41 = vpop.f32.mrf.mxu3 }
 0x6c6   : > { %v5614_v26 = vpop.f32.mrf.mxu2  ;;  %v5922_v22 = vadd.f32 %v5836_v41, %v5697_v21  ;;  %6256 = vmatmul.f32.gmra.mxu1 %v6180_v43  ;;  %v11830_v43 = vld [vmem:[#allocation117_spill] sm:$0xff] }
 0x6c7   : > { %v5698_v6 = vadd.f32 %v5614_v26, %v5473_v20  ;;  %v6184_v26 = vld [vmem:[#allocation2 + $0x80] sm:$0xff] }
 0x6c8   : > { %v10486_v36 = vadd.f32 %v6061_v3, %v5922_v22 }
 0x6c9   : > { %6114 = vmatmul.f32.gmra.mxu0 %v5972_v53 }
 0x6ca   : > { %5886 = vmatmul.f32.gmra.mxu3 %v10332_v52  ;;  %v5973_v52 = vld [vmem:[#allocation2 + $0xef] sm:$0xff] }
 0x6cb   : > { %5664 = vmatmul.f32.gmra.mxu2 %v5970_v63  ;;  %v6067_v10 = vpop.f32.mrf.mxu0 }
 0x6cd   : > { %v5839_v11 = vpop.f32.mrf.mxu3 }
 0x6ce   : > { %v5617_v32 = vpop.f32.mrf.mxu2  ;;  %v5923_v16 = vadd.f32 %v5839_v11, %v5698_v6  ;;  %6259 = vmatmul.f32.gmra.mxu1 %v6181_v13  ;;  %v5478_v6 = vadd.f32 %v10380_v12, %v11830_v43  ;;  %v11834_v11 = vld [vmem:[#allocation119_spill] sm:$0xff] }
 0x6cf   : > { %v5699_v51 = vadd.f32 %v5617_v32, %v5474_v40  ;;  %v5479_v12 = vadd.f32 %v10391_v28, %v11834_v11  ;;  %v10575_v43 = vld [vmem:[#allocation2 + $0x119] sm:$0xff] }
 0x6d0   : > { %v10493_v57 = vadd.f32 %v6064_v2, %v5923_v16  ;;  %v11831_v2 = vld [vmem:[#allocation33_spill] sm:$0xff] }
 0x6d1   : > { %7162 = vmatmul.msk.f32.gmra.mxu0 %vm11825_vm0, %v5973_v52 }
 0x6d2   : > { %7145 = vmatmul.msk.f32.gmra.mxu3 %vm11797_vm8, %v10340_v15  ;;  %v10508_v15 = vpop.f32.mrf.mxu1 }
 0x6d3   : > { %7130 = vmatmul.msk.f32.gmra.mxu2 %vm11825_vm0, %v5971_v39  ;;  %vm11827_vm0 = vnez %v11826_v58  ;;  %v5975_v39 = vld [vmem:[#allocation2 + $0xff] sm:$0xff] }
 0x6d5   : > { %v5842_v8 = vpop.f32.mrf.mxu3 }
 0x6d6   : > { %v5620_v50 = vpop.f32.mrf.mxu2  ;;  %v5924_v37 = vadd.f32 %v5842_v8, %v5699_v51  ;;  %6262 = vmatmul.f32.gmra.mxu1 %v6182_v59  ;;  %v6186_v51 = vld [vmem:[#allocation2 + $0x90] sm:$0xff]  ;;  %v6187_v8 = vld [vmem:[#allocation2 + $0x98] sm:$0xff] }
 0x6d7   : > { %v10504_v63 = vadd.f32 %v5620_v50, %v5475_v30 }
 0x6d8   : > { %v10506_v62 = vadd.f32 %v6067_v10, %v5924_v37  ;;  %v11836_v37 = vld [vmem:[#allocation37_spill] sm:$0xff] }
 0x6d9   : > { %6120 = vmatmul.f32.gmra.mxu0 %v5974_v9 }
 0x6da   : > { %5892 = vmatmul.f32.gmra.mxu3 %v10356_v54  ;;  %v6431_v54 = vld [vmem:[#allocation6 + $0x400] sm:$0xff]  ;;  %v10524_v48 = vpop.f32.mrf.mxu1 }
 0x6db   : > { %5670 = vmatmul.f32.gmra.mxu2 %v5972_v53  ;;  %v6185_v53 = vld [vmem:[#allocation2 + $0x88] sm:$0xff] }
 0x6dc   : > { %6462 = vmatpush.msra.mxu2 %v6431_v54  ;;  %v10566_v54 = vld [vmem:[#allocation2 + $0x111] sm:$0xff] }
 0x6de   : > { %v5623_v7 = vpop.f32.mrf.mxu2  ;;  %6265 = vmatmul.f32.gmra.mxu1 %v6183_v56  ;;  %v6188_v56 = vld [vmem:[#allocation2 + $0xa0] sm:$0xff] }
 0x6df   : > { %v10513_v21 = vadd.f32 %v5623_v7, %v5476_v4 }
 0x6e1   : > { %7163 = vmatmul.msk.f32.gmra.mxu0 %vm11827_vm0, %v5975_v39 }
 0x6e2   : > { %7146 = vmatmul.msk.f32.gmra.mxu3 %vm11680_vm1, %v10364_v25  ;;  %v5976_v25 = vld [vmem:[#allocation2 + $0x107] sm:$0xff]  ;;  %v10531_v40 = vpop.f32.mrf.mxu1 }
 0x6e3   : > { %7131 = vmatmul.msk.f32.gmra.mxu2 %vm11827_vm0, %v5973_v52  ;;  %vm11832_vm0 = vnez %v11831_v2 }
 0x6e6   : > { %v5626_v20 = vpop.f32.mrf.mxu2  ;;  %6268 = vmatmul.f32.gmra.mxu1 %v6184_v26  ;;  %v6189_v26 = vld [vmem:[#allocation2 + $0xa8] sm:$0xff] }
 0x6e7   : > { %v10526_v41 = vadd.f32 %v5626_v20, %v5477_v49 }
 0x6e9   : > { %6126 = vmatmul.f32.gmra.mxu0 %v5976_v25 }
 0x6ea   : > { %5898 = vmatmul.f32.gmra.mxu3 %v10378_v47  ;;  %v5977_v47 = vld [vmem:[#allocation2 + $0x10f] sm:$0xff]  ;;  %v10546_v52 = vpop.f32.mrf.mxu1 }
 0x6eb   : > { %5676 = vmatmul.f32.gmra.mxu2 %v5974_v9  ;;  %v11839_v9 = vld [vmem:[#allocation141_spill] sm:$0xff] }
 0x6ee   : > { %v5629_v22 = vpop.f32.mrf.mxu2  ;;  %6271 = vmatmul.f32.gmra.mxu1 %v6185_v53  ;;  %v11843_v53 = vld [vmem:[#allocation150_spill] sm:$0xff] }
 0x6ef   : > { %v10533_v24 = vadd.f32 %v5629_v22, %v5478_v6  ;;  %v6367_v6 = vld [vmem:[#allocation2 + $0x31] sm:$0xff]  ;;  %v5483_v2 = vadd.f32 %v10446_v18, %v11843_v53 }
 0x6f0   : > { %v11849_v53 = vld [vmem:[#allocation146_spill] sm:$0xff] }
 0x6f1   : > { %7164 = vmatmul.msk.f32.gmra.mxu0 %vm11832_vm0, %v5977_v47 }
 0x6f2   : > { %7147 = vmatmul.msk.f32.gmra.mxu3 %vm11616_vm2, %v10386_v46  ;;  %v11835_v46 = vld [vmem:[#allocation120_spill] sm:$0xff]  ;;  %v10553_v28 = vpop.f32.mrf.mxu1 }
 0x6f3   : > { %7132 = vmatmul.msk.f32.gmra.mxu2 %vm11832_vm0, %v5975_v39  ;;  %v5480_v30 = vadd.f32 %v10407_v19, %v11835_v46  ;;  %vm11837_vm0 = vnez %v11836_v37  ;;  %v11840_v19 = vld [vmem:[#allocation135_spill] sm:$0xff]  ;;  %v5980_v39 = vld [vmem:[#allocation2 + $0x127] sm:$0xff] }
 0x6f4   : > { %v5481_v4 = vadd.f32 %v11840_v19, %v11839_v9  ;;  %v6369_v37 = vld [vmem:[#allocation2 + $0x41] sm:$0xff] }
 0x6f6   : > { %v5632_v13 = vpop.f32.mrf.mxu2  ;;  %6274 = vmatmul.f32.gmra.mxu1 %v6186_v51 }
 0x6f7   : > { %v10544_v16 = vadd.f32 %v5632_v13, %v5479_v12  ;;  %v6368_v13 = vld [vmem:[#allocation2 + $0x39] sm:$0xff] }
 0x6f9   : > { %6132 = vmatmul.f32.gmra.mxu0 %v5978_v60 }
 0x6fa   : > { %5904 = vmatmul.f32.gmra.mxu3 %v10402_v45  ;;  %v5979_v45 = vld [vmem:[#allocation2 + $0x11f] sm:$0xff]  ;;  %v10571_v49 = vpop.f32.mrf.mxu1 }
 0x6fb   : > { %5682 = vmatmul.f32.gmra.mxu2 %v5976_v25 }
 0x6fe   : > { %v5635_v50 = vpop.f32.mrf.mxu2  ;;  %6277 = vmatmul.f32.gmra.mxu1 %v6187_v8 }
 0x6ff   : > { %v10551_v59 = vadd.f32 %v5635_v50, %v5480_v30  ;;  %v6191_v50 = vld [vmem:[#allocation2 + $0xb8] sm:$0xff] }
 0x701   : > { %7165 = vmatmul.msk.f32.gmra.mxu0 %vm11837_vm0, %v5979_v45  ;;  %v11846_v45 = vld [vmem:[#allocation122_spill] sm:$0xff] }
 0x702   : > { %7148 = vmatmul.msk.f32.gmra.mxu3 %vm11562_vm6, %v10410_v1  ;;  %v11841_v1 = vld [vmem:[#allocation128_spill] sm:$0xff]  ;;  %v10582_v11 = vpop.f32.mrf.mxu1  ;;  %v5485_v9 = vadd.f32 %v10471_v5, %v11846_v45  ;;  %v6371_v5 = vld [vmem:[#allocation2 + $0x51] sm:$0xff] }
 0x703   : > { %7133 = vmatmul.msk.f32.gmra.mxu2 %vm11837_vm0, %v5977_v47  ;;  %v5482_v34 = vadd.f32 %v10433_v33, %v11841_v1  ;;  %v6190_v33 = vld [vmem:[#allocation2 + $0xb0] sm:$0xff] }
 0x704   : > { %v11848_v1 = vld [vmem:[#allocation130_spill] sm:$0xff] }
 0x706   : > { %v5638_v7 = vpop.f32.mrf.mxu2  ;;  %6280 = vmatmul.f32.gmra.mxu1 %v6188_v56  ;;  %v6370_v56 = vld [vmem:[#allocation2 + $0x49] sm:$0xff] }
 0x707   : > { %v10564_v58 = vadd.f32 %v5638_v7, %v5481_v4  ;;  %v6192_v4 = vld [vmem:[#allocation2 + $0xc0] sm:$0xff] }
 0x709   : > { %6138 = vmatmul.f32.gmra.mxu0 %v5980_v39 }
 0x70a   : > { %5910 = vmatmul.f32.gmra.mxu3 %v10566_v54  ;;  %v10592_v18 = vpop.f32.mrf.mxu1 }
 0x70b   : > { %5688 = vmatmul.f32.gmra.mxu2 %v5978_v60  ;;  %v11845_v60 = vld [vmem:[#allocation144_spill] sm:$0xff] }
 0x70c   : > { %v5484_v46 = vadd.f32 %v10455_v38, %v11845_v60  ;;  %v6372_v60 = vld [vmem:[#allocation2 + $0x59] sm:$0xff] }
 0x70d   : > { %v6196_v38 = vld [vmem:[#allocation2 + $0xe0] sm:$0xff] }
 0x70e   : > { %v5641_v20 = vpop.f32.mrf.mxu2  ;;  %6283 = vmatmul.f32.gmra.mxu1 %v6189_v26  ;;  %v6193_v26 = vld [vmem:[#allocation2 + $0xc8] sm:$0xff] }
 0x70f   : > { %v10573_v25 = vadd.f32 %v5641_v20, %v5482_v34  ;;  %v5486_v34 = vadd.f32 %v10484_v27, %v11848_v1  ;;  %v11852_v27 = vld [vmem:[#allocation123_spill] sm:$0xff] }
 0x712   : > { %7149 = vmatmul.msk.f32.gmra.mxu3 %vm11817_vm11, %v10575_v43  ;;  %v10598_v39 = vpop.f32.mrf.mxu1 }
 0x713   : > { %6463 = vmatmul.f32.vlgmr.msra.gmra.mxu2 %v6367_v6 }
 0x716   : > { %v5644_v47 = vpop.f32.mrf.mxu2  ;;  %6286 = vmatmul.f32.gmra.mxu1 %v6190_v33 }
 0x717   : > { %v10584_v12 = vadd.f32 %v5644_v47, %v5483_v2  ;;  %v5487_v2 = vadd.f32 %v10491_v61, %v11849_v53  ;;  %v6373_v61 = vld [vmem:[#allocation2 + $0x61] sm:$0xff] }
 0x71a   : > { %v10608_v47 = vpop.f32.mrf.mxu1 }
 0x71b   : > { %7166 = vmatmul.msk.f32.gmra.mxu2 %vm11630_vm9, %v6368_v13  ;;  %v6194_v13 = vld [vmem:[#allocation2 + $0xd0] sm:$0xff] }
 0x71e   : > { %v5647_v30 = vpop.f32.mrf.mxu2  ;;  %6289 = vmatmul.f32.gmra.mxu1 %v6191_v50 }
 0x71f   : > { %v10590_v8 = vadd.f32 %v5647_v30, %v5484_v46  ;;  %v11850_v46 = vld [vmem:[#allocation62_spill] sm:$0xff]  ;;  %v5488_v30 = vadd.f32 %v10508_v15, %v11852_v27 }
 0x720   : > { %vm11851_vm9 = vnez %v11850_v46  ;;  %v6374_v15 = vld [vmem:[#allocation2 + $0x69] sm:$0xff] }
 0x722   : > { %v10616_v45 = vpop.f32.mrf.mxu1 }
 0x723   : > { %6469 = vmatmul.f32.gmra.mxu2 %v6369_v37  ;;  %v6195_v37 = vld [vmem:[#allocation2 + $0xd8] sm:$0xff] }
 0x726   : > { %v5650_v19 = vpop.f32.mrf.mxu2  ;;  %6292 = vmatmul.f32.gmra.mxu1 %v6192_v4 }
 0x727   : > { %v10596_v7 = vadd.f32 %v5650_v19, %v5485_v9  ;;  %v11853_v19 = vld [vmem:[#allocation132_spill] sm:$0xff] }
 0x728   : > { %v5489_v4 = vadd.f32 %v10524_v48, %v11853_v19  ;;  %v6375_v48 = vld [vmem:[#allocation2 + $0x71] sm:$0xff] }
 0x72b   : > { %7167 = vmatmul.msk.f32.gmra.mxu2 %vm11634_vm10, %v6370_v56 }
 0x72e   : > { %v5653_v20 = vpop.f32.mrf.mxu2  ;;  %6295 = vmatmul.f32.gmra.mxu1 %v6193_v26  ;;  %v11855_v26 = vld [vmem:[#allocation155_spill] sm:$0xff] }
 0x72f   : > { %v10604_v6 = vadd.f32 %v5653_v20, %v5486_v34  ;;  %v10624_v34 = vpop.f32.mrf.mxu1  ;;  %v11859_v20 = vld [vmem:[#allocation124_spill] sm:$0xff] }
 0x733   : > { %6475 = vmatmul.f32.gmra.mxu2 %v6371_v5  ;;  %v5490_v5 = vadd.f32 %v10531_v40, %v11855_v26  ;;  %v11858_v40 = vld [vmem:[#allocation160_spill] sm:$0xff]  ;;  %v5493_v26 = vadd.f32 %v10571_v49, %v11859_v20 }
 0x734   : > { %v5492_v19 = vadd.f32 %v10553_v28, %v11858_v40  ;;  %v6378_v28 = vld [vmem:[#allocation2 + $0x89] sm:$0xff]  ;;  %v6379_v40 = vld [vmem:[#allocation2 + $0x91] sm:$0xff] }
 0x736   : > { %v5656_v33 = vpop.f32.mrf.mxu2  ;;  %6298 = vmatmul.f32.gmra.mxu1 %v6194_v13 }
 0x737   : > { %v10610_v51 = vadd.f32 %v5656_v33, %v5487_v2  ;;  %v6197_v2 = vld [vmem:[#allocation2 + $0xe8] sm:$0xff]  ;;  %v10632_v13 = vpop.f32.mrf.mxu1 }
 0x73b   : > { %7168 = vmatmul.msk.f32.gmra.mxu2 %vm11851_vm9, %v6372_v60  ;;  %v11856_v60 = vld [vmem:[#allocation148_spill] sm:$0xff] }
 0x73c   : > { %v5491_v46 = vadd.f32 %v10546_v52, %v11856_v60  ;;  %v6377_v52 = vld [vmem:[#allocation2 + $0x81] sm:$0xff] }
 0x73e   : > { %v5659_v50 = vpop.f32.mrf.mxu2  ;;  %6301 = vmatmul.f32.gmra.mxu1 %v6195_v37  ;;  %v6376_v37 = vld [vmem:[#allocation2 + $0x79] sm:$0xff] }
 0x73f   : > { %v10618_v9 = vadd.f32 %v5659_v50, %v5488_v30  ;;  %v6198_v30 = vld [vmem:[#allocation2 + $0xf0] sm:$0xff] }
 0x743   : > { %6481 = vmatmul.f32.gmra.mxu2 %v6373_v61 }
 0x746   : > { %v5662_v56 = vpop.f32.mrf.mxu2  ;;  %6304 = vmatmul.f32.gmra.mxu1 %v6196_v38  ;;  %v6199_v38 = vld [vmem:[#allocation2 + $0xf8] sm:$0xff] }
 0x747   : > { %v10622_v1 = vadd.f32 %v5662_v56, %v5489_v4  ;;  %v10642_v4 = vpop.f32.mrf.mxu1 }
 0x74b   : > { %7169 = vmatmul.msk.f32.gmra.mxu2 %vm11643_vm12, %v6374_v15 }
 0x74e   : > { %v5665_v53 = vpop.f32.mrf.mxu2  ;;  %6307 = vmatmul.f32.gmra.mxu1 %v6197_v2 }
 0x74f   : > { %v10630_v33 = vadd.f32 %v5665_v53, %v5490_v5  ;;  %v6200_v53 = vld [vmem:[#allocation2 + $0x100] sm:$0xff]  ;;  %v10648_v2 = vpop.f32.mrf.mxu1 }
 0x753   : > { %6487 = vmatmul.f32.gmra.mxu2 %v6375_v48 }
 0x756   : > { %v5668_v27 = vpop.f32.mrf.mxu2  ;;  %6310 = vmatmul.f32.gmra.mxu1 %v6198_v30 }
 0x757   : > { %v10636_v50 = vadd.f32 %v5668_v27, %v5491_v46  ;;  %v11861_v46 = vld [vmem:[#allocation134_spill] sm:$0xff]  ;;  %v10658_v49 = vpop.f32.mrf.mxu1 }
 0x758   : > { %v5494_v27 = vadd.f32 %v10582_v11, %v11861_v46  ;;  %v6203_v46 = vld [vmem:[#allocation2 + $0x118] sm:$0xff] }
 0x75b   : > { %7170 = vmatmul.msk.f32.gmra.mxu2 %vm11648_vm13, %v6376_v37  ;;  %v6201_v37 = vld [vmem:[#allocation2 + $0x108] sm:$0xff] }
 0x75e   : > { %v5671_v56 = vpop.f32.mrf.mxu2  ;;  %6313 = vmatmul.f32.gmra.mxu1 %v6199_v38 }
 0x75f   : > { %v10644_v15 = vadd.f32 %v5671_v56, %v5492_v19  ;;  %v11862_v19 = vld [vmem:[#allocation158_spill] sm:$0xff] }
 0x760   : > { %v5495_v56 = vadd.f32 %v10592_v18, %v11862_v19  ;;  %v6381_v18 = vld [vmem:[#allocation2 + $0xa1] sm:$0xff] }
 0x763   : > { %6493 = vmatmul.f32.gmra.mxu2 %v6377_v52  ;;  %v6202_v52 = vld [vmem:[#allocation2 + $0x110] sm:$0xff] }
 0x766   : > { %v5674_v5 = vpop.f32.mrf.mxu2  ;;  %6316 = vmatmul.f32.gmra.mxu1 %v6200_v53  ;;  %v11864_v53 = vld [vmem:[#allocation151_spill] sm:$0xff] }
 0x767   : > { %v10650_v48 = vadd.f32 %v5674_v5, %v5493_v26  ;;  %v6380_v26 = vld [vmem:[#allocation2 + $0x99] sm:$0xff]  ;;  %v10664_v5 = vpop.f32.mrf.mxu1 }
 0x76b   : > { %7171 = vmatmul.msk.f32.gmra.mxu2 %vm11755_vm15, %v6378_v28  ;;  %v5496_v28 = vadd.f32 %v10598_v39, %v11864_v53  ;;  %v5498_v39 = vadd.f32 %v10616_v45, %v10428_v17  ;;  %v11867_v45 = vld [vmem:[#allocation15_spill] sm:$0xff] }
 0x76e   : > { %v5677_v30 = vpop.f32.mrf.mxu2  ;;  %6319 = vmatmul.f32.gmra.mxu1 %v6201_v37 }
 0x76f   : > { %v10656_v61 = vadd.f32 %v5677_v30, %v5494_v27  ;;  %v11865_v30 = vld [vmem:[#allocation125_spill] sm:$0xff] }
 0x770   : > { %v5497_v37 = vadd.f32 %v10608_v47, %v11865_v30  ;;  %v6383_v47 = vld [vmem:[#allocation2 + $0xb1] sm:$0xff]  ;;  %v10691_v30 = vld [vmem:[%s10996_s2] ss:$0 sm:$0xff] }
 0x773   : > { %6499 = vmatmul.f32.gmra.mxu2 %v6379_v40  ;;  %v10674_v40 = vpop.f32.mrf.mxu1 }
 0x776   : > { %v5680_v38 = vpop.f32.mrf.mxu2  ;;  %6322 = vmatmul.f32.gmra.mxu1 %v6202_v52  ;;  %v6382_v52 = vld [vmem:[#allocation2 + $0xa9] sm:$0xff] }
 0x777   : > { %v10662_v20 = vadd.f32 %v5680_v38, %v5495_v56  ;;  %v7307_v38 = vld [vmem:[#allocation2] sm:$0xff] }
 0x77b   : > { %7172 = vmatmul.msk.f32.gmra.mxu2 %vm11663_vm14, %v6380_v26  ;;  %v10682_v53 = vpop.f32.mrf.mxu1  ;;  %v7309_v26 = vld [vmem:[#allocation2 + $0x20] sm:$0xff] }
 0x77e   : > { %v5683_v60 = vpop.f32.mrf.mxu2  ;;  %6325 = vmatmul.f32.gmra.mxu1 %v6203_v46 }
 0x77f   : > { %v10670_v27 = vadd.f32 %v5683_v60, %v5496_v28  ;;  %v6335_v60 = vadd.f32 %v10624_v34, %v10435_v14  ;;  %v6336_v14 = vadd.f32 %v10632_v13, %v10448_v31  ;;  %v7310_v13 = vld [vmem:[#allocation2 + $0x28] sm:$0xff] }
 0x783   : > { %6505 = vmatmul.f32.gmra.mxu2 %v6381_v18 }
 0x786   : > { %v5686_v19 = vpop.f32.mrf.mxu2  ;;  %6328 = vmatmul.f32.gmra.mxu1 %v7307_v38 }
 0x787   : > { %v10676_v56 = vadd.f32 %v5686_v19, %v5497_v37  ;;  %v11868_v37 = vld [vmem:[#allocation99_spill] sm:$0xff] }
 0x788   : > { %v6656_v19 = vadd.f32 %v11868_v37, %v11867_v45  ;;  %v6385_v45 = vld [vmem:[#allocation2 + $0xc1] sm:$0xff]  ;;  %v10710_v37 = vpop.f32.mrf.mxu0 }
 0x78b   : > { %7173 = vmatmul.msk.f32.gmra.mxu2 %vm11774_vm4, %v6382_v52  ;;  %v6384_v52 = vld [vmem:[#allocation2 + $0xb9] sm:$0xff] }
 0x78e   : > { %v5689_v11 = vpop.f32.mrf.mxu2  ;;  %6331 = vmatmul.f32.gmra.mxu1 %v7307_v38 }
 0x78f   : > { %v10684_v28 = vadd.f32 %v5689_v11, %v5498_v39  ;;  %v6688_v39 = vadd.f32 %v7309_v26, %v6656_v19  ;;  %v10700_v11 = vpop.f32.mrf.mxu3 }
 0x793   : > { %6511 = vmatmul.f32.gmra.mxu2 %v6383_v47 }
 0x796   : > { %v6464_v46 = vpop.f32.mrf.mxu2 }
 0x797   : > { %v6560_v18 = vadd.f32 %v6464_v46, %v6335_v60  ;;  %v11869_v46 = vld [vmem:[#allocation17_spill] sm:$0xff] }
 0x799   : > { %v6592_v17 = vadd.f32 %v10691_v30, %v6560_v18  ;;  %v11870_v18 = vld [vmem:[#allocation100_spill] sm:$0xff] }
 0x79b   : > { %v6624_v38 = vmax.f32 %v6592_v17, 0.0  ;;  %7174 = vmatmul.msk.f32.gmra.mxu2 %vm11577_vm5, %v6384_v52  ;;  %v6657_v17 = vadd.f32 %v11870_v18, %v11869_v46  ;;  %v10712_v52 = vpop.f32.mrf.mxu1 }
 0x79d   : > { %v6720_v34 = vadd.f32 %v6688_v39, %v6624_v38  ;;  %v6689_v19 = vadd.f32 %v7310_v13, %v6657_v17  ;;  %v6337_v38 = vadd.f32 %v10642_v4, %v10453_v55  ;;  %v10724_v55 = vpop.f32.mrf.mxu0  ;;  %v6338_v4 = vadd.f32 %v10648_v2, %v10466_v35 }
 0x79e   : > { %v6467_v47 = vpop.f32.mrf.mxu2  ;;  %v6339_v35 = vadd.f32 %v10658_v49, %v10473_v42  ;;  %v6340_v49 = vadd.f32 %v10664_v5, %v10486_v36  ;;  %v6341_v36 = vadd.f32 %v10674_v40, %v10493_v57  ;;  %v6342_v40 = vadd.f32 %v10682_v53, %v10506_v62  ;;  %v7316_v62 = vld [vmem:[#allocation2 + $0x58] sm:$0xff] }
 0x79f   : > { %6752 = vst [vmem:[%s10704_s7] sm:$0xff] %v6720_v34  ;;  %v6561_v60 = vadd.f32 %v6467_v47, %v6336_v14  ;;  %v10717_v34 = vpop.f32.mrf.mxu3  ;;  %v11871_v47 = vld [vmem:[#allocation19_spill] sm:$0xff] }
 0x7a1   : > { %v6593_v0 = vadd.f32 %v10691_v30, %v6561_v60  ;;  %v11872_v60 = vld [vmem:[#allocation101_spill] sm:$0xff] }
 0x7a2   : > { %v6658_v46 = vadd.f32 %v11872_v60, %v11871_v47 }
 0x7a3   : > { %v6625_v31 = vmax.f32 %v6593_v0, 0.0  ;;  %6517 = vmatmul.f32.gmra.mxu2 %v6385_v45  ;;  %v6386_v0 = vld [vmem:[#allocation2 + $0xc9] sm:$0xff] }
 0x7a4   : > { %v7311_v45 = vld [vmem:[#allocation2 + $0x30] sm:$0xff] }
 0x7a5   : > { %v6721_v26 = vadd.f32 %v6689_v19, %v6625_v31  ;;  %v6690_v13 = vadd.f32 %v7311_v45, %v6658_v46  ;;  %v10728_v19 = vpop.f32.mrf.mxu1 }
 0x7a6   : > { %v6470_v39 = vpop.f32.mrf.mxu2 }
 0x7a7   : > { %6753 = vst [vmem:[%s10704_s7 + $0x8] sm:$0xff] %v6721_v26  ;;  %v6562_v14 = vadd.f32 %v6470_v39, %v6337_v38  ;;  %v11873_v39 = vld [vmem:[#allocation23_spill] sm:$0xff]  ;;  %v10734_v46 = vpop.f32.mrf.mxu3 }
 0x7a9   : > { %v6594_v18 = vadd.f32 %v10691_v30, %v6562_v14  ;;  %v11874_v14 = vld [vmem:[#allocation102_spill] sm:$0xff] }
 0x7aa   : > { %v6659_v47 = vadd.f32 %v11874_v14, %v11873_v39 }
 0x7ab   : > { %v6626_v17 = vmax.f32 %v6594_v18, 0.0  ;;  %7175 = vmatmul.msk.f32.gmra.mxu2 %vm11525_vm3, %v6386_v0  ;;  %v7312_v0 = vld [vmem:[#allocation2 + $0x38] sm:$0xff] }
 0x7ac   : > { %v6691_v45 = vadd.f32 %v7312_v0, %v6659_v47 }
 0x7ad   : > { %v6722_v31 = vadd.f32 %v6690_v13, %v6626_v17  ;;  %v10738_v13 = vpop.f32.mrf.mxu0 }
 0x7ae   : > { %v6473_v38 = vpop.f32.mrf.mxu2 }
 0x7af   : > { %6754 = vst [vmem:[%s10704_s7 + $0x10] sm:$0xff] %v6722_v31  ;;  %v6563_v26 = vadd.f32 %v6473_v38, %v6338_v4  ;;  %v10741_v31 = vpop.f32.mrf.mxu1  ;;  %v11875_v38 = vld [vmem:[#allocation25_spill] sm:$0xff]  ;;  %v10748_v42 = vpop.f32.mrf.mxu3 }
 0x7b1   : > { %v6595_v60 = vadd.f32 %v10691_v30, %v6563_v26  ;;  %v11876_v26 = vld [vmem:[#allocation72_spill] sm:$0xff] }
 0x7b2   : > { %v6660_v39 = vadd.f32 %v11876_v26, %v11875_v38 }
 0x7b3   : > { %v6627_v18 = vmax.f32 %v6595_v60, 0.0  ;;  %6523 = vmatmul.f32.gmra.mxu2 %v6387_v23  ;;  %v6388_v60 = vld [vmem:[#allocation2 + $0xd9] sm:$0xff] }
 0x7b4   : > { %v7313_v23 = vld [vmem:[#allocation2 + $0x40] sm:$0xff] }
 0x7b5   : > { %v6723_v2 = vadd.f32 %v6691_v45, %v6627_v18  ;;  %v6692_v0 = vadd.f32 %v7313_v23, %v6660_v39  ;;  %v10755_v38 = vpop.f32.mrf.mxu0 }
 0x7b6   : > { %v6476_v17 = vpop.f32.mrf.mxu2 }
 0x7b7   : > { %6755 = vst [vmem:[%s10704_s7 + $0x18] sm:$0xff] %v6723_v2  ;;  %v6564_v4 = vadd.f32 %v6476_v17, %v6339_v35  ;;  %v11877_v2 = vld [vmem:[#allocation29_spill] sm:$0xff]  ;;  %v11878_v17 = vld [vmem:[#allocation103_spill] sm:$0xff]  ;;  %v10758_v39 = vpop.f32.mrf.mxu1 }
 0x7b9   : > { %v6596_v14 = vadd.f32 %v10691_v30, %v6564_v4  ;;  %v6661_v4 = vadd.f32 %v11878_v17, %v11877_v2  ;;  %v6390_v17 = vld [vmem:[#allocation2 + $0xe9] sm:$0xff] }
 0x7bb   : > { %v6628_v47 = vmax.f32 %v6596_v14, 0.0  ;;  %7176 = vmatmul.msk.f32.gmra.mxu2 %vm11530_vm7, %v6388_v60  ;;  %v7314_v60 = vld [vmem:[#allocation2 + $0x48] sm:$0xff] }
 0x7bc   : > { %v6693_v23 = vadd.f32 %v7314_v60, %v6661_v4 }
 0x7bd   : > { %v6724_v18 = vadd.f32 %v6692_v0, %v6628_v47  ;;  %v10762_v47 = vpop.f32.mrf.mxu3 }
 0x7be   : > { %v6479_v45 = vpop.f32.mrf.mxu2 }
 0x7bf   : > { %6756 = vst [vmem:[%s10704_s7 + $0x20] sm:$0xff] %v6724_v18  ;;  %v6565_v35 = vadd.f32 %v6479_v45, %v6340_v49  ;;  %v11879_v18 = vld [vmem:[#allocation31_spill] sm:$0xff]  ;;  %v11880_v45 = vld [vmem:[#allocation105_spill] sm:$0xff]  ;;  %v10772_v57 = vpop.f32.mrf.mxu1 }
 0x7c1   : > { %v6597_v26 = vadd.f32 %v10691_v30, %v6565_v35  ;;  %v6662_v35 = vadd.f32 %v11880_v45, %v11879_v18  ;;  %v11882_v18 = vld [vmem:[#allocation106_spill] sm:$0xff] }
 0x7c3   : > { %v6629_v14 = vmax.f32 %v6597_v26, 0.0  ;;  %6529 = vmatmul.f32.gmra.mxu2 %v6389_v29  ;;  %v10768_v26 = vpop.f32.mrf.mxu0  ;;  %v7315_v29 = vld [vmem:[#allocation2 + $0x50] sm:$0xff] }
 0x7c4   : > { %v6694_v60 = vadd.f32 %v7315_v29, %v6662_v35  ;;  %v6391_v35 = vld [vmem:[#allocation2 + $0xf1] sm:$0xff] }
 0x7c5   : > { %v6725_v5 = vadd.f32 %v6693_v23, %v6629_v14 }
 0x7c6   : > { %v6482_v0 = vpop.f32.mrf.mxu2 }
 0x7c7   : > { %6757 = vst [vmem:[%s10704_s7 + $0x28] sm:$0xff] %v6725_v5  ;;  %v6566_v49 = vadd.f32 %v6482_v0, %v6341_v36  ;;  %v5925_v36 = vadd.f32 %v10700_v11, %v10504_v63  ;;  %v10779_v0 = vpop.f32.mrf.mxu3  ;;  %v10788_v29 = vpop.f32.mrf.mxu1 }
 0x7c9   : > { %v6598_v2 = vadd.f32 %v10691_v30, %v6566_v49  ;;  %v11881_v49 = vld [vmem:[#allocation34_spill] sm:$0xff] }
 0x7ca   : > { %v6663_v45 = vadd.f32 %v11882_v18, %v11881_v49  ;;  %v6392_v18 = vld [vmem:[#allocation2 + $0xf9] sm:$0xff] }
 0x7cb   : > { %v6630_v4 = vmax.f32 %v6598_v2, 0.0  ;;  %7177 = vmatmul.msk.f32.gmra.mxu2 %vm11797_vm8, %v6390_v17  ;;  %v6150_v2 = vadd.f32 %v10710_v37, %v5925_v36  ;;  %v11884_v37 = vld [vmem:[#allocation76_spill] sm:$0xff] }
 0x7cc   : > { %v6695_v53 = vadd.f32 %v7316_v62, %v6663_v45 }
 0x7cd   : > { %v6726_v14 = vadd.f32 %v6694_v60, %v6630_v4  ;;  %v10785_v4 = vpop.f32.mrf.mxu0  ;;  %v6343_v63 = vadd.f32 %v10712_v52, %v6150_v2 }
 0x7ce   : > { %v6485_v23 = vpop.f32.mrf.mxu2 }
 0x7cf   : > { %6758 = vst [vmem:[%s10704_s7 + $0x30] sm:$0xff] %v6726_v14  ;;  %v6567_v5 = vadd.f32 %v6485_v23, %v6342_v40  ;;  %v5926_v40 = vadd.f32 %v10717_v34, %v10513_v21  ;;  %v11883_v23 = vld [vmem:[#allocation35_spill] sm:$0xff]  ;;  %v10796_v49 = vpop.f32.mrf.mxu3 }
 0x7d0   : > { %v6664_v36 = vadd.f32 %v11884_v37, %v11883_v23  ;;  %v7318_v23 = vld [vmem:[#allocation2 + $0x68] sm:$0xff] }
 0x7d1   : > { %v6599_v44 = vadd.f32 %v10691_v30, %v6567_v5  ;;  %v6151_v52 = vadd.f32 %v10724_v55, %v5926_v40  ;;  %v11885_v55 = vld [vmem:[#allocation38_spill] sm:$0xff]  ;;  %v6393_v40 = vld [vmem:[#allocation2 + $0x101] sm:$0xff] }
 0x7d3   : > { %v6631_v17 = vmax.f32 %v6599_v44, 0.0  ;;  %6535 = vmatmul.f32.gmra.mxu2 %v6391_v35  ;;  %v7317_v44 = vld [vmem:[#allocation2 + $0x60] sm:$0xff]  ;;  %v6344_v21 = vadd.f32 %v10728_v19, %v6151_v52 }
 0x7d4   : > { %v6696_v35 = vadd.f32 %v7317_v44, %v6664_v36  ;;  %v11888_v44 = vld [vmem:[#allocation107_spill] sm:$0xff] }
 0x7d5   : > { %v6727_v11 = vadd.f32 %v6695_v53, %v6631_v17  ;;  %v5927_v17 = vadd.f32 %v10734_v46, %v10526_v41  ;;  %v10804_v62 = vpop.f32.mrf.mxu0 }
 0x7d6   : > { %v6488_v60 = vpop.f32.mrf.mxu2 }
 0x7d7   : > { %6759 = vst [vmem:[%s10704_s7 + $0x38] sm:$0xff] %v6727_v11  ;;  %v6568_v14 = vadd.f32 %v6488_v60, %v6343_v63  ;;  %v10807_v63 = vpop.f32.mrf.mxu1  ;;  %v11886_v11 = vld [vmem:[#allocation78_spill] sm:$0xff]  ;;  %v6152_v19 = vadd.f32 %v10738_v13, %v5927_v17  ;;  %v10813_v41 = vpop.f32.mrf.mxu3 }
 0x7d8   : > { %v6665_v60 = vadd.f32 %v11886_v11, %v11885_v55 }
 0x7d9   : > { %v6600_v5 = vadd.f32 %v10691_v30, %v6568_v14  ;;  %v6345_v46 = vadd.f32 %v10741_v31, %v6152_v19  ;;  %v11889_v19 = vld [vmem:[#allocation41_spill] sm:$0xff] }
 0x7da   : > { %v6697_v37 = vadd.f32 %v7318_v23, %v6665_v60 }
 0x7db   : > { %v6632_v45 = vmax.f32 %v6600_v5, 0.0  ;;  %7178 = vmatmul.msk.f32.gmra.mxu2 %vm11680_vm1, %v6392_v18  ;;  %v5928_v18 = vadd.f32 %v10748_v42, %v10533_v24 }
 0x7dd   : > { %v6728_v34 = vadd.f32 %v6696_v35, %v6632_v45  ;;  %v11887_v45 = vld [vmem:[#allocation39_spill] sm:$0xff]  ;;  %v10821_v13 = vpop.f32.mrf.mxu0  ;;  %v6153_v31 = vadd.f32 %v10755_v38, %v5928_v18  ;;  %v11890_v38 = vld [vmem:[#allocation80_spill] sm:$0xff] }
 0x7de   : > { %v6491_v2 = vpop.f32.mrf.mxu2  ;;  %v6666_v35 = vadd.f32 %v11888_v44, %v11887_v45 }
 0x7df   : > { %6760 = vst [vmem:[%s10704_s7 + $0x40] sm:$0xff] %v6728_v34  ;;  %v6569_v53 = vadd.f32 %v6491_v2, %v6344_v21  ;;  %v10824_v34 = vpop.f32.mrf.mxu1  ;;  %v6394_v2 = vld [vmem:[#allocation2 + $0x109] sm:$0xff]  ;;  %v6346_v24 = vadd.f32 %v10758_v39, %v6153_v31  ;;  %v10830_v11 = vpop.f32.mrf.mxu3 }
 0x7e1   : > { %v6601_v3 = vadd.f32 %v10691_v30, %v6569_v53  ;;  %v7319_v53 = vld [vmem:[#allocation2 + $0x70] sm:$0xff] }
 0x7e2   : > { %v6698_v55 = vadd.f32 %v7319_v53, %v6666_v35  ;;  %v11891_v35 = vld [vmem:[#allocation42_spill] sm:$0xff] }
 0x7e3   : > { %v6633_v14 = vmax.f32 %v6601_v3, 0.0  ;;  %6541 = vmatmul.f32.gmra.mxu2 %v6393_v40  ;;  %v5929_v3 = vadd.f32 %v10762_v47, %v10544_v16 }
 0x7e5   : > { %v6729_v36 = vadd.f32 %v6697_v37, %v6633_v14  ;;  %v6667_v14 = vadd.f32 %v11890_v38, %v11889_v19  ;;  %v10838_v37 = vpop.f32.mrf.mxu0  ;;  %v6154_v32 = vadd.f32 %v10768_v26, %v5929_v3  ;;  %v11892_v26 = vld [vmem:[#allocation81_spill] sm:$0xff]  ;;  %v11893_v3 = vld [vmem:[#allocation44_spill] sm:$0xff] }
 0x7e6   : > { %v6494_v5 = vpop.f32.mrf.mxu2 }
 0x7e7   : > { %6761 = vst [vmem:[%s10704_s7 + $0x48] sm:$0xff] %v6729_v36  ;;  %v6570_v52 = vadd.f32 %v6494_v5, %v6345_v46  ;;  %v7320_v46 = vld [vmem:[#allocation2 + $0x78] sm:$0xff]  ;;  %v10842_v5 = vpop.f32.mrf.mxu1  ;;  %v6347_v16 = vadd.f32 %v10772_v57, %v6154_v32  ;;  %v5872_v44 = vpop.f32.mrf.mxu3 }
 0x7e8   : > { %v6699_v36 = vadd.f32 %v7320_v46, %v6667_v14 }
 0x7e9   : > { %v6602_v21 = vadd.f32 %v10691_v30, %v6570_v52  ;;  %v5930_v52 = vadd.f32 %v10779_v0, %v10551_v59 }
 0x7eb   : > { %v6634_v17 = vmax.f32 %v6602_v21, 0.0  ;;  %7179 = vmatmul.msk.f32.gmra.mxu2 %vm11616_vm2, %v6394_v2  ;;  %v6668_v21 = vadd.f32 %v11892_v26, %v11891_v35 }
 0x7ed   : > { %v6730_v42 = vadd.f32 %v6698_v55, %v6634_v17  ;;  %v7321_v17 = vld [vmem:[#allocation2 + $0x80] sm:$0xff]  ;;  %v6097_v57 = vpop.f32.mrf.mxu0 }
 0x7ee   : > { %v6497_v60 = vpop.f32.mrf.mxu2  ;;  %v6700_v53 = vadd.f32 %v7321_v17, %v6668_v21 }
 0x7ef   : > { %6762 = vst [vmem:[%s10704_s7 + $0x50] sm:$0xff] %v6730_v42  ;;  %v6571_v40 = vadd.f32 %v6497_v60, %v6346_v24  ;;  %v6290_v55 = vpop.f32.mrf.mxu1  ;;  %v5931_v42 = vadd.f32 %v10796_v49, %v10564_v58  ;;  %v5875_v10 = vpop.f32.mrf.mxu3  ;;  %v5932_v49 = vadd.f32 %v10813_v41, %v10573_v25 }
 0x7f1   : > { %v6603_v23 = vadd.f32 %v10691_v30, %v6571_v40  ;;  %v11894_v40 = vld [vmem:[#allocation83_spill] sm:$0xff]  ;;  %v6157_v35 = vadd.f32 %v10821_v13, %v5932_v49 }
 0x7f2   : > { %v6669_v19 = vadd.f32 %v11894_v40, %v11893_v3 }
 0x7f3   : > { %v6635_v39 = vmax.f32 %v6603_v23, 0.0  ;;  %6547 = vmatmul.f32.gmra.mxu2 %v10566_v54  ;;  %v6155_v54 = vadd.f32 %v10785_v4, %v5930_v52  ;;  %v6397_v4 = vld [vmem:[#allocation2 + $0x121] sm:$0xff]  ;;  %v6350_v41 = vadd.f32 %v10824_v34, %v6157_v35 }
 0x7f4   : > { %v11896_v52 = vld [vmem:[#allocation108_spill] sm:$0xff] }
 0x7f5   : > { %v6731_v47 = vadd.f32 %v6699_v36, %v6635_v39  ;;  %v6348_v59 = vadd.f32 %v10788_v29, %v6155_v54  ;;  %v7322_v29 = vld [vmem:[#allocation2 + $0x88] sm:$0xff]  ;;  %v6100_v46 = vpop.f32.mrf.mxu0 }
 0x7f6   : > { %v6500_v18 = vpop.f32.mrf.mxu2  ;;  %v6701_v23 = vadd.f32 %v7322_v29, %v6669_v19 }
 0x7f7   : > { %6763 = vst [vmem:[%s10704_s7 + $0x58] sm:$0xff] %v6731_v47  ;;  %v6572_v45 = vadd.f32 %v6500_v18, %v6347_v16  ;;  %v6293_v16 = vpop.f32.mrf.mxu1  ;;  %v6398_v47 = vld [vmem:[#allocation2 + $0x129] sm:$0xff]  ;;  %v5878_v25 = vpop.f32.mrf.mxu3 }
 0x7f8   : > { %v11895_v18 = vld [vmem:[#allocation46_spill] sm:$0xff] }
 0x7f9   : > { %v6604_v2 = vadd.f32 %v10691_v30, %v6572_v45 }
 0x7fb   : > { %v6636_v31 = vmax.f32 %v6604_v2, 0.0  ;;  %7180 = vmatmul.msk.f32.gmra.mxu2 %vm11562_vm6, %v10575_v43  ;;  %v6156_v43 = vadd.f32 %v10804_v62, %v5931_v42  ;;  %v6670_v62 = vadd.f32 %v11896_v52, %v11895_v18  ;;  %v5935_v52 = vadd.f32 %v5875_v10, %v10596_v7 }
 0x7fc   : > { %v5936_v7 = vadd.f32 %v5878_v25, %v10604_v6 }
 0x7fd   : > { %v6732_v0 = vadd.f32 %v6700_v53, %v6636_v31  ;;  %v6349_v32 = vadd.f32 %v10807_v63, %v6156_v43  ;;  %v7323_v63 = vld [vmem:[#allocation2 + $0x90] sm:$0xff]  ;;  %v5933_v31 = vadd.f32 %v10830_v11, %v10584_v12  ;;  %v11897_v53 = vld [vmem:[#allocation49_spill] sm:$0xff]  ;;  %v5934_v11 = vadd.f32 %v5872_v44, %v10590_v8 }
 0x7fe   : > { %v6503_v24 = vpop.f32.mrf.mxu2  ;;  %v6702_v21 = vadd.f32 %v7323_v63, %v6670_v62  ;;  %v11899_v43 = vld [vmem:[#allocation50_spill] sm:$0xff]  ;;  %v11901_v62 = vld [vmem:[#allocation52_spill] sm:$0xff]  ;;  %v6160_v63 = vadd.f32 %v6100_v46, %v5935_v52 }
 0x7ff   : > { %6764 = vst [vmem:[%s10704_s7 + $0x60] sm:$0xff] %v6732_v0  ;;  %v6573_v60 = vadd.f32 %v6503_v24, %v6348_v59  ;;  %v11898_v59 = vld [vmem:[#allocation84_spill] sm:$0xff]  ;;  %v6103_v0 = vpop.f32.mrf.mxu0  ;;  %v6296_v42 = vpop.f32.mrf.mxu1  ;;  %v6158_v22 = vadd.f32 %v10838_v37, %v5933_v31  ;;  %v6159_v37 = vadd.f32 %v6097_v57, %v5934_v11 }
 0x800   : > { %v6671_v13 = vadd.f32 %v11898_v59, %v11897_v53  ;;  %v5881_v19 = vpop.f32.mrf.mxu3  ;;  %v11903_v53 = vld [vmem:[#allocation53_spill] sm:$0xff]  ;;  %v11904_v59 = vld [vmem:[#allocation87_spill] sm:$0xff]  ;;  %v6161_v46 = vadd.f32 %v6103_v0, %v5936_v7 }
 0x801   : > { %v6605_v38 = vadd.f32 %v10691_v30, %v6573_v60  ;;  %v6351_v3 = vadd.f32 %v10842_v5, %v6158_v22  ;;  %v6352_v5 = vadd.f32 %v6290_v55, %v6159_v37  ;;  %v7328_v37 = vld [vmem:[#allocation2 + $0xb8] sm:$0xff] }
 0x803   : > { %v6637_v14 = vmax.f32 %v6605_v38, 0.0  ;;  %6553 = vmatmul.f32.gmra.mxu2 %v6397_v4  ;;  %v7324_v4 = vld [vmem:[#allocation2 + $0x98] sm:$0xff] }
 0x804   : > { %v6703_v34 = vadd.f32 %v7324_v4, %v6671_v13  ;;  %v6674_v13 = vadd.f32 %v11904_v59, %v11903_v53  ;;  %v7327_v4 = vld [vmem:[#allocation2 + $0xb0] sm:$0xff]  ;;  %v7330_v59 = vld [vmem:[#allocation2 + $0xc8] sm:$0xff] }
 0x805   : > { %v6733_v39 = vadd.f32 %v6701_v23, %v6637_v14  ;;  %v11900_v14 = vld [vmem:[#allocation85_spill] sm:$0xff] }
 0x806   : > { %v6506_v58 = vpop.f32.mrf.mxu2  ;;  %v6672_v29 = vadd.f32 %v11900_v14, %v11899_v43  ;;  %v11906_v43 = vld [vmem:[#allocation88_spill] sm:$0xff] }
 0x807   : > { %6765 = vst [vmem:[%s10704_s7 + $0x68] sm:$0xff] %v6733_v39  ;;  %v6574_v36 = vadd.f32 %v6506_v58, %v6349_v32  ;;  %v6106_v32 = vpop.f32.mrf.mxu0  ;;  %v7325_v58 = vld [vmem:[#allocation2 + $0xa0] sm:$0xff] }
 0x808   : > { %v6704_v49 = vadd.f32 %v7325_v58, %v6672_v29  ;;  %v5884_v44 = vpop.f32.mrf.mxu3 }
 0x809   : > { %v6606_v45 = vadd.f32 %v10691_v30, %v6574_v36  ;;  %v6299_v36 = vpop.f32.mrf.mxu1 }
 0x80b   : > { %v6638_v26 = vmax.f32 %v6606_v45, 0.0  ;;  %7181 = vmatmul.msk.f32.gmra.mxu2 %vm11817_vm11, %v6398_v47  ;;  %v11902_v45 = vld [vmem:[#allocation86_spill] sm:$0xff] }
 0x80c   : > { %v6673_v35 = vadd.f32 %v11902_v45, %v11901_v62 }
 0x80d   : > { %v6734_v2 = vadd.f32 %v6702_v21, %v6638_v26  ;;  %v7326_v21 = vld [vmem:[#allocation2 + $0xa8] sm:$0xff] }
 0x80e   : > { %v6509_v54 = vpop.f32.mrf.mxu2 }
 0x80f   : > { %6766 = vst [vmem:[%s10704_s7 + $0x70] sm:$0xff] %v6734_v2  ;;  %v6575_v17 = vadd.f32 %v6509_v54, %v6350_v41  ;;  %v6705_v41 = vadd.f32 %v7326_v21, %v6673_v35  ;;  %v6109_v2 = vpop.f32.mrf.mxu0  ;;  %v6353_v54 = vadd.f32 %v6293_v16, %v6160_v63 }
 0x810   : > { %v5887_v22 = vpop.f32.mrf.mxu3 }
 0x811   : > { %v6607_v24 = vadd.f32 %v10691_v30, %v6575_v17  ;;  %v6302_v31 = vpop.f32.mrf.mxu1 }
 0x813   : > { %v6639_v60 = vmax.f32 %v6607_v24, 0.0 }
 0x815   : > { %v6735_v40 = vadd.f32 %v6703_v34, %v6639_v60  ;;  %v6706_v34 = vadd.f32 %v7327_v4, %v6674_v13 }
 0x816   : > { %v6512_v12 = vpop.f32.mrf.mxu2 }
 0x817   : > { %6767 = vst [vmem:[%s10704_s7 + $0x78] sm:$0xff] %v6735_v40  ;;  %v6576_v38 = vadd.f32 %v6512_v12, %v6351_v3  ;;  %v6354_v3 = vadd.f32 %v6296_v42, %v6161_v46  ;;  %v5937_v12 = vadd.f32 %v5881_v19, %v10610_v51  ;;  %v6112_v11 = vpop.f32.mrf.mxu0  ;;  %v5938_v51 = vadd.f32 %v5884_v44, %v10618_v9 }
 0x818   : > { %v5890_v58 = vpop.f32.mrf.mxu3  ;;  %v5939_v9 = vadd.f32 %v5887_v22, %v10622_v1 }
 0x819   : > { %v6608_v23 = vadd.f32 %v10691_v30, %v6576_v38  ;;  %v6305_v25 = vpop.f32.mrf.mxu1  ;;  %v11905_v38 = vld [vmem:[#allocation55_spill] sm:$0xff]  ;;  %v5940_v4 = vadd.f32 %v5890_v58, %v10630_v33 }
 0x81a   : > { %v6675_v14 = vadd.f32 %v11906_v43, %v11905_v38  ;;  %v6164_v53 = vadd.f32 %v6112_v11, %v5939_v9 }
 0x81b   : > { %v6640_v39 = vmax.f32 %v6608_v23, 0.0  ;;  %v6162_v23 = vadd.f32 %v6106_v32, %v5937_v12  ;;  %v6163_v32 = vadd.f32 %v6109_v2, %v5938_v51 }
 0x81d   : > { %v6736_v47 = vadd.f32 %v6704_v49, %v6640_v39  ;;  %v6707_v39 = vadd.f32 %v7328_v37, %v6675_v14  ;;  %v6355_v42 = vadd.f32 %v6299_v36, %v6162_v23  ;;  %v11913_v37 = vld [vmem:[#allocation14_spill] sm:$0xff] }
 0x81e   : > { %v6515_v18 = vpop.f32.mrf.mxu2 }
 0x81f   : > { %6768 = vst [vmem:[%s10704_s7 + $0x80] sm:$0xff] %v6736_v47  ;;  %v6577_v8 = vadd.f32 %v6515_v18, %v6352_v5  ;;  %v11907_v47 = vld [vmem:[#allocation56_spill] sm:$0xff]  ;;  %v11908_v18 = vld [vmem:[#allocation89_spill] sm:$0xff] }
 0x820   : > { %v6676_v52 = vadd.f32 %v11908_v18, %v11907_v47  ;;  %v5893_v21 = vpop.f32.mrf.mxu3 }
 0x821   : > { %v6609_v26 = vadd.f32 %v10691_v30, %v6577_v8  ;;  %v6115_v8 = vpop.f32.mrf.mxu0  ;;  %v6308_v45 = vpop.f32.mrf.mxu1  ;;  %v5941_v33 = vadd.f32 %v5893_v21, %v10636_v50 }
 0x822   : > { %v6165_v12 = vadd.f32 %v6115_v8, %v5940_v4 }
 0x823   : > { %v6641_v57 = vmax.f32 %v6609_v26, 0.0  ;;  %v7329_v26 = vld [vmem:[#allocation2 + $0xc0] sm:$0xff] }
 0x824   : > { %v6708_v63 = vadd.f32 %v7329_v26, %v6676_v52  ;;  %v6358_v14 = vadd.f32 %v6308_v45, %v6165_v12  ;;  %v11916_v26 = vld [vmem:[#allocation73_spill] sm:$0xff]  ;;  %v11920_v12 = vld [vmem:[#allocation104_spill] sm:$0xff] }
 0x825   : > { %v6737_v55 = vadd.f32 %v6705_v41, %v6641_v57  ;;  %v6356_v57 = vadd.f32 %v6302_v31, %v6163_v32  ;;  %v6357_v31 = vadd.f32 %v6305_v25, %v6164_v53  ;;  %v11918_v53 = vld [vmem:[#allocation93_spill] sm:$0xff] }
 0x826   : > { %v6518_v17 = vpop.f32.mrf.mxu2 }
 0x827   : > { %6769 = vst [vmem:[%s10704_s7 + $0x88] sm:$0xff] %v6737_v55  ;;  %v6578_v10 = vadd.f32 %v6518_v17, %v6353_v54  ;;  %v11909_v54 = vld [vmem:[#allocation12_spill] sm:$0xff]  ;;  %v11910_v55 = vld [vmem:[#allocation90_spill] sm:$0xff] }
 0x828   : > { %v6677_v17 = vadd.f32 %v11910_v55, %v11909_v54  ;;  %v5896_v22 = vpop.f32.mrf.mxu3 }
 0x829   : > { %v6610_v24 = vadd.f32 %v10691_v30, %v6578_v10  ;;  %v6118_v10 = vpop.f32.mrf.mxu0  ;;  %v5942_v45 = vadd.f32 %v5896_v22, %v10644_v15 }
 0x82a   : > { %v6709_v13 = vadd.f32 %v7330_v59, %v6677_v17 }
 0x82b   : > { %v6642_v60 = vmax.f32 %v6610_v24, 0.0  ;;  %v6311_v24 = vpop.f32.mrf.mxu1 }
 0x82d   : > { %v6738_v16 = vadd.f32 %v6706_v34, %v6642_v60  ;;  %v11911_v34 = vld [vmem:[#allocation13_spill] sm:$0xff] }
 0x82e   : > { %v6521_v40 = vpop.f32.mrf.mxu2 }
 0x82f   : > { %6770 = vst [vmem:[%s10704_s7 + $0x90] sm:$0xff] %v6738_v16  ;;  %v6579_v6 = vadd.f32 %v6521_v40, %v6354_v3  ;;  %v11912_v3 = vld [vmem:[#allocation91_spill] sm:$0xff] }
 0x830   : > { %v6678_v16 = vadd.f32 %v11912_v3, %v11911_v34 }
 0x831   : > { %v6611_v29 = vadd.f32 %v10691_v30, %v6579_v6  ;;  %v7331_v6 = vld [vmem:[#allocation2 + $0xd0] sm:$0xff]  ;;  %v6121_v43 = vpop.f32.mrf.mxu0 }
 0x832   : > { %v6710_v38 = vadd.f32 %v7331_v6, %v6678_v16 }
 0x833   : > { %v6643_v0 = vmax.f32 %v6611_v29, 0.0  ;;  %v6314_v29 = vpop.f32.mrf.mxu1 }
 0x835   : > { %v6739_v49 = vadd.f32 %v6707_v39, %v6643_v0  ;;  %v11914_v39 = vld [vmem:[#allocation92_spill] sm:$0xff] }
 0x836   : > { %v6524_v5 = vpop.f32.mrf.mxu2  ;;  %v6679_v58 = vadd.f32 %v11914_v39, %v11913_v37 }
 0x837   : > { %6771 = vst [vmem:[%s10704_s7 + $0x98] sm:$0xff] %v6739_v49  ;;  %v6580_v19 = vadd.f32 %v6524_v5, %v6355_v42  ;;  %v5899_v49 = vpop.f32.mrf.mxu3  ;;  %v6166_v5 = vadd.f32 %v6118_v10, %v5941_v33  ;;  %v11917_v10 = vld [vmem:[#allocation18_spill] sm:$0xff] }
 0x839   : > { %v6612_v62 = vadd.f32 %v10691_v30, %v6580_v19  ;;  %v7332_v19 = vld [vmem:[#allocation2 + $0xd8] sm:$0xff]  ;;  %v6359_v18 = vadd.f32 %v6311_v24, %v6166_v5 }
 0x83a   : > { %v6711_v47 = vadd.f32 %v7332_v19, %v6679_v58 }
 0x83b   : > { %v6644_v35 = vmax.f32 %v6612_v62, 0.0  ;;  %v6124_v62 = vpop.f32.mrf.mxu0  ;;  %v6317_v32 = vpop.f32.mrf.mxu1 }
 0x83d   : > { %v6740_v36 = vadd.f32 %v6708_v63, %v6644_v35  ;;  %v11915_v35 = vld [vmem:[#allocation16_spill] sm:$0xff] }
 0x83e   : > { %v6527_v41 = vpop.f32.mrf.mxu2  ;;  %v6680_v63 = vadd.f32 %v11916_v26, %v11915_v35  ;;  %v11923_v26 = vld [vmem:[#allocation26_spill] sm:$0xff] }
 0x83f   : > { %6772 = vst [vmem:[%s10704_s7 + $0xa0] sm:$0xff] %v6740_v36  ;;  %v6581_v44 = vadd.f32 %v6527_v41, %v6356_v57  ;;  %v6167_v36 = vadd.f32 %v6121_v43, %v5942_v45  ;;  %v7333_v41 = vld [vmem:[#allocation2 + $0xe0] sm:$0xff] }
 0x840   : > { %v6712_v9 = vadd.f32 %v7333_v41, %v6680_v63  ;;  %v11924_v63 = vld [vmem:[#allocation66_spill] sm:$0xff] }
 0x841   : > { %v6613_v7 = vadd.f32 %v10691_v30, %v6581_v44  ;;  %v5902_v44 = vpop.f32.mrf.mxu3  ;;  %v6360_v54 = vadd.f32 %v6314_v29, %v6167_v36 }
 0x843   : > { %v6645_v2 = vmax.f32 %v6613_v7, 0.0  ;;  %v5943_v7 = vadd.f32 %v5899_v49, %v10650_v48  ;;  %v6127_v59 = vpop.f32.mrf.mxu0  ;;  %v6320_v24 = vpop.f32.mrf.mxu1  ;;  %v5944_v48 = vadd.f32 %v5902_v44, %v10656_v61  ;;  %v11922_v49 = vld [vmem:[#allocation94_spill] sm:$0xff]  ;;  %v7337_v44 = vld [vmem:[#allocation2 + $0x100] sm:$0xff] }
 0x845   : > { %v6741_v46 = vadd.f32 %v6709_v13, %v6645_v2  ;;  %v6681_v2 = vadd.f32 %v11918_v53, %v11917_v10  ;;  %v6169_v43 = vadd.f32 %v6127_v59, %v5944_v48  ;;  %v11926_v59 = vld [vmem:[#allocation95_spill] sm:$0xff] }
 0x846   : > { %v6530_v60 = vpop.f32.mrf.mxu2 }
 0x847   : > { %6773 = vst [vmem:[%s10704_s7 + $0xa8] sm:$0xff] %v6741_v46  ;;  %v6582_v1 = vadd.f32 %v6530_v60, %v6357_v31  ;;  %v6168_v31 = vadd.f32 %v6124_v62, %v5943_v7  ;;  %v7334_v60 = vld [vmem:[#allocation2 + $0xe8] sm:$0xff]  ;;  %v6362_v33 = vadd.f32 %v6320_v24, %v6169_v43  ;;  %v11927_v43 = vld [vmem:[#allocation116_spill] sm:$0xff] }
 0x848   : > { %v6713_v4 = vadd.f32 %v7334_v60, %v6681_v2  ;;  %v11925_v2 = vld [vmem:[#allocation30_spill] sm:$0xff]  ;;  %v7338_v60 = vld [vmem:[#allocation2 + $0x108] sm:$0xff] }
 0x849   : > { %v6614_v40 = vadd.f32 %v10691_v30, %v6582_v1  ;;  %v6361_v1 = vadd.f32 %v6317_v32, %v6168_v31  ;;  %v5905_v34 = vpop.f32.mrf.mxu3 }
 0x84a   : > { %v5945_v39 = vadd.f32 %v5905_v34, %v10662_v20 }
 0x84b   : > { %v6646_v11 = vmax.f32 %v6614_v40, 0.0  ;;  %v11919_v40 = vld [vmem:[#allocation20_spill] sm:$0xff] }
 0x84d   : > { %v6742_v25 = vadd.f32 %v6710_v38, %v6646_v11  ;;  %v6682_v11 = vadd.f32 %v11920_v12, %v11919_v40  ;;  %v6130_v38 = vpop.f32.mrf.mxu0 }
 0x84e   : > { %v6533_v23 = vpop.f32.mrf.mxu2  ;;  %v6170_v19 = vadd.f32 %v6130_v38, %v5945_v39 }
 0x84f   : > { %6774 = vst [vmem:[%s10704_s7 + $0xb0] sm:$0xff] %v6742_v25  ;;  %v6583_v0 = vadd.f32 %v6533_v23, %v6358_v14  ;;  %v7335_v25 = vld [vmem:[#allocation2 + $0xf0] sm:$0xff]  ;;  %v6323_v23 = vpop.f32.mrf.mxu1 }
 0x850   : > { %v6714_v29 = vadd.f32 %v7335_v25, %v6682_v11  ;;  %v6363_v62 = vadd.f32 %v6323_v23, %v6170_v19 }
 0x851   : > { %v6615_v42 = vadd.f32 %v10691_v30, %v6583_v0  ;;  %v5908_v58 = vpop.f32.mrf.mxu3 }
 0x852   : > { %v5946_v20 = vadd.f32 %v5908_v58, %v10670_v27 }
 0x853   : > { %v6647_v51 = vmax.f32 %v6615_v42, 0.0  ;;  %v11921_v42 = vld [vmem:[#allocation24_spill] sm:$0xff] }
 0x854   : > { %v6683_v5 = vadd.f32 %v11922_v49, %v11921_v42 }
 0x855   : > { %v6743_v52 = vadd.f32 %v6711_v47, %v6647_v51 }
 0x856   : > { %v6536_v8 = vpop.f32.mrf.mxu2 }
 0x857   : > { %6775 = vst [vmem:[%s10704_s7 + $0xb8] sm:$0xff] %v6743_v52  ;;  %v6584_v50 = vadd.f32 %v6536_v8, %v6359_v18  ;;  %v7336_v18 = vld [vmem:[#allocation2 + $0xf8] sm:$0xff]  ;;  %v6133_v8 = vpop.f32.mrf.mxu0 }
 0x858   : > { %v6715_v52 = vadd.f32 %v7336_v18, %v6683_v5  ;;  %v6171_v41 = vadd.f32 %v6133_v8, %v5946_v20 }
 0x859   : > { %v6616_v57 = vadd.f32 %v10691_v30, %v6584_v50  ;;  %v6326_v50 = vpop.f32.mrf.mxu1 }
 0x85b   : > { %v6648_v21 = vmax.f32 %v6616_v57, 0.0  ;;  %v6684_v57 = vadd.f32 %v11924_v63, %v11923_v26 }
 0x85d   : > { %v6744_v55 = vadd.f32 %v6712_v9, %v6648_v21  ;;  %v5911_v21 = vpop.f32.mrf.mxu3 }
 0x85e   : > { %v6539_v17 = vpop.f32.mrf.mxu2 }
 0x85f   : > { %6776 = vst [vmem:[%s10704_s7 + $0xc0] sm:$0xff] %v6744_v55  ;;  %v6585_v15 = vadd.f32 %v6539_v17, %v6360_v54  ;;  %v6716_v54 = vadd.f32 %v7337_v44, %v6684_v57  ;;  %v6364_v55 = vadd.f32 %v6326_v50, %v6171_v41  ;;  %v6136_v10 = vpop.f32.mrf.mxu0 }
 0x861   : > { %v6617_v13 = vadd.f32 %v10691_v30, %v6585_v15  ;;  %v5947_v15 = vadd.f32 %v5911_v21, %v10676_v56  ;;  %v6329_v53 = vpop.f32.mrf.mxu1 }
 0x863   : > { %v6649_v46 = vmax.f32 %v6617_v13, 0.0  ;;  %v6685_v13 = vadd.f32 %v11926_v59, %v11925_v2  ;;  %v6172_v31 = vadd.f32 %v6136_v10, %v5947_v15 }
 0x865   : > { %v6745_v22 = vadd.f32 %v6713_v4, %v6649_v46  ;;  %v6717_v4 = vadd.f32 %v7338_v60, %v6685_v13 }
 0x866   : > { %v6542_v3 = vpop.f32.mrf.mxu2 }
 0x867   : > { %6777 = vst [vmem:[%s10704_s7 + $0xc8] sm:$0xff] %v6745_v22  ;;  %v6586_v16 = vadd.f32 %v6542_v3, %v6361_v1  ;;  %v5914_v1 = vpop.f32.mrf.mxu3  ;;  %v6365_v22 = vadd.f32 %v6329_v53, %v6172_v31 }
 0x868   : > { %v5948_v3 = vadd.f32 %v5914_v1, %v10684_v28 }
 0x869   : > { %v6618_v6 = vadd.f32 %v10691_v30, %v6586_v16  ;;  %v6139_v16 = vpop.f32.mrf.mxu0  ;;  %v6332_v12 = vpop.f32.mrf.mxu1 }
 0x86a   : > { %v6173_v11 = vadd.f32 %v6139_v16, %v5948_v3 }
 0x86b   : > { %v6650_v14 = vmax.f32 %v6618_v6, 0.0 }
 0x86c   : > { %v6366_v38 = vadd.f32 %v6332_v12, %v6173_v11 }
 0x86d   : > { %v6746_v0 = vadd.f32 %v6714_v29, %v6650_v14 }
 0x86e   : > { %v6545_v37 = vpop.f32.mrf.mxu2 }
 0x86f   : > { %6778 = vst [vmem:[%s10704_s7 + $0xd0] sm:$0xff] %v6746_v0  ;;  %v6587_v61 = vadd.f32 %v6545_v37, %v6362_v33  ;;  %v11928_v33 = vld [vmem:[#allocation121_spill] sm:$0xff] }
 0x871   : > { %v6619_v51 = vadd.f32 %v10691_v30, %v6587_v61 }
 0x873   : > { %v6651_v47 = vmax.f32 %v6619_v51, 0.0 }
 0x875   : > { %v6747_v45 = vadd.f32 %v6715_v52, %v6651_v47 }
 0x876   : > { %v6548_v32 = vpop.f32.mrf.mxu2 }
 0x877   : > { %6779 = vst [vmem:[%s10704_s7 + $0xd8] sm:$0xff] %v6747_v45  ;;  %v6588_v35 = vadd.f32 %v6548_v32, %v6363_v62 }
 0x879   : > { %v6620_v36 = vadd.f32 %v10691_v30, %v6588_v35 }
 0x87b   : > { %v6652_v9 = vmax.f32 %v6620_v36, 0.0 }
 0x87d   : > { %v6748_v17 = vadd.f32 %v6716_v54, %v6652_v9 }
 0x87e   : > { %v6551_v7 = vpop.f32.mrf.mxu2 }
 0x87f   : > { %6780 = vst [vmem:[%s10704_s7 + $0xe0] sm:$0xff] %v6748_v17  ;;  %v6589_v27 = vadd.f32 %v6551_v7, %v6364_v55 }
 0x881   : > { %v6621_v24 = vadd.f32 %v10691_v30, %v6589_v27 }
 0x883   : > { %v6653_v46 = vmax.f32 %v6621_v24, 0.0 }
 0x885   : > { %v6749_v34 = vadd.f32 %v6717_v4, %v6653_v46 }
 0x886   : > { %v6554_v56 = vpop.f32.mrf.mxu2 }
 0x887   : > { %6781 = vst [vmem:[%s10704_s7 + $0xe8] sm:$0xff] %v6749_v34  ;;  %v6590_v48 = vadd.f32 %v6554_v56, %v6365_v22 }
 0x889   : > { %v6622_v40 = vadd.f32 %v10691_v30, %v6590_v48 }
 0x88b   : > { %v6654_v6 = vmax.f32 %v6622_v40, 0.0 }
 0x88d   : > { %v6750_v14 = vadd.f32 %v11927_v43, %v6654_v6 }
 0x88e   : > { %v6557_v25 = vpop.f32.mrf.mxu2 }
 0x88f   : > { %6782 = vst [vmem:[%s10704_s7 + $0xf0] sm:$0xff] %v6750_v14  ;;  %v6591_v28 = vadd.f32 %v6557_v25, %v6366_v38 }
 0x891   : > { %v6623_v29 = vadd.f32 %v10691_v30, %v6591_v28 }
 0x893   : > { %v6655_v23 = vmax.f32 %v6623_v29, 0.0 }
 0x895   : > { %v6751_v0 = vadd.f32 %v11928_v33, %v6655_v23 }
 0x897   : > { %6783 = vst [vmem:[%s10704_s7 + $0xf8] sm:$0xff] %v6751_v0 }
 0x898   : > { %7426 = shalt.err (!%p7423_p10)
}
 0x899   : > { %s7475_s6 = smov 128   ;;  %s7476_s24 = smov 8  }
 0x89a   : > { %7243 = dma.vmem_to_hbm [thread:$0]  (%p7566_p3), %s6798_s20, 4096, %s6800_s25, %s6785_s16, %s7475_s6, %s7475_s6, %s7476_s24  }
 0x89b PF: > { %s6814_s29 = sand.u32 1, %s7457_s12   ;;  %p11929_p12 = scmp.ge.s32.totalorder %s7469_s15, 2 }
 0x89c   : > { %s6815_s30 = scalar_lea.sflag [#allocation5], %s6814_s29 }
 0x89d   : > { %p7254_p13 = pnand %p11929_p12, %p7532_p6 }
 0x89f   : > { %p7255_p0 = pneg %p7254_p13 }
 0x8a1   : > { %7452 = dma.done.wait (%p7255_p0), %s6815_s30, 4096  }
 0x8a2   : > { %7454 = vsyncadd (%p7255_p0), %s6815_s30, 4294963200  ;;  %p17_p5 = scmp.ge.s32.totalorder %s7550_s26, 4   ;;  %s11930_s12 = smov %s7461_s13 }
 0x8a3   : > { %s11931_s13 = smov %s7465_s14  ;;  %s11932_s14 = smov %s7562_s4 }
 0x8a4   : > { %s11933_s15 = smov %s7550_s26  ;;  %19 = sbr.rel (!%p17_p5) target bundleno = 6 (0x6), region = 89 }
 0x8a9   :  { %6821 = vsyncpa [#allocation4], 1 }
 0x8aa   :  { %6823 = vsyncpa [#allocation4 + $0x1], 1 }
 0x8ab   :  { %6824 = vsyncpa [#allocation7], 1 }
 0x8ac   :  { %6825 = vsyncpa [#allocation5], 1 }
 0x8ad   :  { %6827 = vsyncpa [#allocation5 + $0x1], 1 }

</bundles_post_ra>
